<compile_context>
chip_gen: v7x
topology: tpu7x:2x2x1
jax: 0.10.0
libtpu: 0.0.40
codegen_flags: <defaults>
</compile_context>

<pallas_src>
import numpy as np
import jax
import jax.numpy as jnp
from jax import lax
from jax.experimental import pallas as pl
from jax.experimental.pallas import tpu as pltpu

# ---- configuration (mirrors sample_pytorch_controller.json defaults) ----
INPUT_DIM = 8
OUTPUT_DIM = 8
CTRL_DIM = 32            # controller_size
MEM_N = 16               # memory_units
MEM_M = 16               # memory_unit_size
NUM_HEADS = 1            # read/write pairs -> heads are [r, w]
N_HEADS_TOTAL = 2 * NUM_HEADS
HEAD_P = 3 * MEM_M + 6   # per-head projection width in the original layout
IN_CAT = INPUT_DIM + NUM_HEADS * MEM_M
READ_DATA = CTRL_DIM + NUM_HEADS * MEM_M
PW = 4 * MEM_M + 12      # packed head-projection width (read erase/add dropped: unused)

# TODO(synk): the batched head addressing below assumes the single r/w head pair
# of the reference config (NUM_HEADS == 1). With more pairs, PyTorch lets earlier
# write heads change memory seen by later heads inside one step, which would
# require a sequential per-head loop instead.
assert NUM_HEADS == 1


def ntm_seq_kernel(x_ref, h0_ref, c0_ref, mem0_ref, hw0_ref, reads0_ref,
                   wx_ref, wrh_ref, bl_ref, wh_ref, bh_ref, wo_ref, bo_ref,
                   out_ref, h_ref, c_ref, mem_ref, hw_ref, reads_ref,
                   hist_ref):
    C, M, N = CTRL_DIM, MEM_M, MEM_N
    T = x_ref.shape[0]
    S0, P0, SH0 = 3 * M, 4 * M + 2, 4 * M + 6   # packed-column group offsets

    # Hoisted: x-contribution to the LSTM gates for every step (+ pre-summed bias).
    gx_all = jnp.dot(x_ref[...], wx_ref[...],
                     preferred_element_type=jnp.float32) + bl_ref[...]       # (T, 4C)

    # Weights stay live across the unrolled loop (tiny: ~10 vregs total).
    w_rh = wrh_ref[...]
    w_h = wh_ref[...]
    b_h = bh_ref[...]

    # hist row t = [reads_{t-1} | h_{t-1}] entering step t; rows 1..T feed the
    # single post-loop output projection (lane-contiguous slab -> no concats).
    hist_ref[0:1, 0:M] = reads0_ref[...]
    hist_ref[0:1, M:M + C] = h0_ref[...]

    c = c0_ref[...]
    mem = mem0_ref[...]
    hw = hw0_ref[...]
    h_new = h0_ref[...]
    read_vec = reads0_ref[...]

    # Fully unrolled time loop (T static & small): scheduler can overlap the
    # independent head-of-step work of t+1 with the tail of step t.
    for t in range(T):
        rh = hist_ref[t:t + 1, :]                                            # (1, M+C)

        # --- Controller LSTMCell: one fused matmul; gates packed [i|f|o|g] ---
        gates = jnp.dot(rh, w_rh,
                        preferred_element_type=jnp.float32) + gx_all[t:t + 1, :]
        sg = jax.nn.sigmoid(gates[:, 0:3 * C])
        i_g, f_g, o_g = sg[:, 0:C], sg[:, C:2 * C], sg[:, 2 * C:3 * C]
        g_g = jnp.tanh(gates[:, 3 * C:4 * C])
        c = f_g * c + i_g * g_g
        h_new = o_g * jnp.tanh(c)
        hist_ref[t + 1:t + 2, M:M + C] = h_new

        # --- all heads' 7 Linear layers in one matmul (function of cell state) ---
        proj = jnp.dot(c, w_h, preferred_element_type=jnp.float32) + b_h     # (1, PW)
        tnh = jnp.tanh(proj[:, 0:S0])                     # [key_r|key_w|add_w]
        sig = jax.nn.sigmoid(proj[:, S0:P0])              # [gate_r|gate_w|erase_w]
        sp = jnp.logaddexp(proj[:, P0:SH0], 0.0)          # [beta_r|beta_w|gamma_r|gamma_w]

        key_all = jnp.concatenate([tnh[:, 0:M], tnh[:, M:2 * M]], axis=0)    # (2, M)
        add_w = tnh[:, 2 * M:3 * M]                                          # (1, M)
        gate_all = jnp.concatenate([sig[:, 0:1], sig[:, 1:2]], axis=0)       # (2, 1)
        erase_w = sig[:, 2:2 + M]                                            # (1, M)
        beta_all = jnp.concatenate([sp[:, 0:1], sp[:, 1:2]], axis=0)         # (2, 1)
        gamma_all = 1.0 + jnp.concatenate([sp[:, 2:3], sp[:, 3:4]], axis=0)  # (2, 1)
        shift_all = jnp.concatenate([proj[:, SH0:SH0 + 3],
                                     proj[:, SH0 + 3:SH0 + 6]], axis=0)      # (2, 3)

        # --- content addressing, heads batched along sublanes ---
        mem_sq = jnp.sum(mem * mem, axis=1, keepdims=True)                   # (N, 1)
        mem_n = mem * lax.rsqrt(jnp.maximum(mem_sq, 1e-16))                  # row-normalized
        key_sq = jnp.sum(key_all * key_all, axis=1, keepdims=True)           # (2, 1)
        dots = lax.dot_general(key_all, mem_n, (((1,), (1,)), ((), ())),
                               preferred_element_type=jnp.float32)           # (2, N)
        sim = dots * lax.rsqrt(jnp.maximum(key_sq, 1e-16))
        scores = beta_all * sim
        scores = scores - jnp.max(scores, axis=1, keepdims=True)
        e = jnp.exp(scores)
        cw = e * pl.reciprocal(jnp.sum(e, axis=1, keepdims=True), approx=True)

        # --- gated interpolation with previous step's weights ---
        gated = gate_all * cw + (1.0 - gate_all) * hw                        # (2, N)

        # --- circular convolution shift (max_shift = 1) ---
        sl = shift_all - jnp.max(shift_all, axis=1, keepdims=True)
        se = jnp.exp(sl)
        sh = se * pl.reciprocal(jnp.sum(se, axis=1, keepdims=True), approx=True)
        # TODO(synk): pltpu.roll would move these rotations onto the XLU slot, but the
        # rotated lane dim is only 16 wide (sub-vreg), so keep the lowering-safe
        # slice+concat form.
        roll_p1 = jnp.concatenate([gated[:, N - 1:N], gated[:, :N - 1]], axis=1)  # w[i-1]
        roll_m1 = jnp.concatenate([gated[:, 1:N], gated[:, 0:1]], axis=1)         # w[i+1]
        shifted = sh[:, 0:1] * roll_p1 + sh[:, 1:2] * gated + sh[:, 2:3] * roll_m1

        # --- sharpen: w^gamma via exp(gamma*log(.)); exact normalization since it
        #     feeds recurrent state ---
        wp = jnp.exp(gamma_all * jnp.log(jnp.maximum(shifted, 1e-30)))
        hw = wp / (jnp.sum(wp, axis=1, keepdims=True) + 1e-16)               # (2, N)

        # --- read head (row 0): reads pre-write memory ---
        read_vec = jnp.dot(hw[0:1, :], mem,
                           preferred_element_type=jnp.float32)               # (1, M)
        hist_ref[t + 1:t + 2, 0:M] = read_vec

        # --- write head (row 1): one fused rank-1 (erase|add) outer product ---
        ea = jnp.concatenate([erase_w, add_w], axis=1)                       # (1, 2M)
        outer = lax.dot_general(hw[1:2, :], ea, (((0,), (0,)), ((), ())),
                                preferred_element_type=jnp.float32)          # (N, 2M)
        mem = mem * (1.0 - outer[:, 0:M]) + outer[:, M:2 * M]

    # --- external outputs for all T steps: ONE matmul + ONE sigmoid after the loop
    out_states = hist_ref[pl.ds(1, T), :]                                    # (T, M+C)
    out_ref[...] = jax.nn.sigmoid(
        jnp.dot(out_states, wo_ref[...], preferred_element_type=jnp.float32)
        + bo_ref[...])

    h_ref[...] = h_new
    c_ref[...] = c
    mem_ref[...] = mem
    hw_ref[...] = hw
    reads_ref[...] = read_vec


def pack_params(params):
    """Host-side one-time repacking into kernel-friendly fused slabs."""
    C, M = CTRL_DIM, MEM_M

    def reorder_gates(w):   # columns [i|f|g|o] -> [i|f|o|g]  (2 activations in-kernel)
        return jnp.concatenate([w[..., 0:2 * C], w[..., 3 * C:4 * C],
                                w[..., 2 * C:3 * C]], axis=-1)

    w_ih = reorder_gates(params["w_ih_t"])                    # (IN_CAT, 4C)
    w_hh = reorder_gates(params["w_hh_t"])                    # (C, 4C)
    b_lstm = reorder_gates(params["b_ih"] + params["b_hh"])   # (1, 4C)
    w_x = w_ih[:INPUT_DIM, :]                                 # x-part (precomputed per seq)
    w_rh = jnp.concatenate([w_ih[INPUT_DIM:, :], w_hh], axis=0)   # rows = [reads | h]

    KEY, BETA, GATE = slice(0, M), slice(M, M + 1), slice(M + 1, M + 2)
    SHIFT, GAMMA = slice(M + 2, M + 5), slice(M + 5, M + 6)
    ERASE, ADD = slice(M + 6, 2 * M + 6), slice(2 * M + 6, 3 * M + 6)

    def pack_head(a0, a1):   # field-major, activation-grouped columns; read head's
        # erase/add are dropped (unused by the reference module).
        return jnp.concatenate(
            [a0[:, KEY], a1[:, KEY], a1[:, ADD],                       # tanh group
             a0[:, GATE], a1[:, GATE], a1[:, ERASE],                   # sigmoid group
             a0[:, BETA], a1[:, BETA], a0[:, GAMMA], a1[:, GAMMA],     # softplus group
             a0[:, SHIFT], a1[:, SHIFT]], axis=1)                      # raw shift logits

    w_heads = pack_head(params["w_heads_t"][0], params["w_heads_t"][1])   # (C, PW)
    b_heads = pack_head(params["b_heads"][0:1], params["b_heads"][1:2])   # (1, PW)

    # output projection rows reordered to match the [reads | h] slab layout
    w_out = jnp.concatenate([params["w_out_t"][C:C + M, :],
                             params["w_out_t"][0:C, :]], axis=0)          # (M+C, OUT)
    return dict(w_x=w_x, w_rh=w_rh, b_lstm=b_lstm, w_heads=w_heads,
                b_heads=b_heads, w_out=w_out, b_out=params["b_out"])


def ntm_forward_seq(packed, state, x_seq):
    """Run T NTM steps for B independent sequences. Returns (outputs (B,T,OUT), new_state)."""
    B, T, _ = x_seq.shape
    C, M, N, H = CTRL_DIM, MEM_M, MEM_N, N_HEADS_TOTAL

    def bspec(*shp):   # batched array: one batch element per grid step
        return pl.BlockSpec((None,) + shp, lambda b: (b,) + (0,) * len(shp))

    def wspec(*shp):   # shared weights: constant block index -> stays VMEM-resident
        return pl.BlockSpec(shp, lambda b: (0,) * len(shp))

    in_specs = [
        bspec(T, INPUT_DIM),                # x
        bspec(1, C), bspec(1, C),           # h0, c0
        bspec(N, M),                        # memory
        bspec(H, N),                        # prev head weights
        bspec(1, M),                        # prev reads
        wspec(INPUT_DIM, 4 * C),            # w_x
        wspec(M + C, 4 * C),                # w_rh
        wspec(1, 4 * C),                    # b_lstm
        wspec(C, PW), wspec(1, PW),         # head projection
        wspec(M + C, OUTPUT_DIM), wspec(1, OUTPUT_DIM),   # output projection
    ]
    out_specs = (bspec(T, OUTPUT_DIM), bspec(1, C), bspec(1, C),
                 bspec(N, M), bspec(H, N), bspec(1, M))
    out_shape = (
        jax.ShapeDtypeStruct((B, T, OUTPUT_DIM), jnp.float32),
        jax.ShapeDtypeStruct((B, 1, C), jnp.float32),
        jax.ShapeDtypeStruct((B, 1, C), jnp.float32),
        jax.ShapeDtypeStruct((B, N, M), jnp.float32),
        jax.ShapeDtypeStruct((B, H, N), jnp.float32),
        jax.ShapeDtypeStruct((B, 1, M), jnp.float32),
    )
    outs = pl.pallas_call(
        ntm_seq_kernel,
        grid=(B,),
        in_specs=in_specs,
        out_specs=out_specs,
        out_shape=out_shape,
        scratch_shapes=[pltpu.VMEM((T + 1, M + C), jnp.float32)],   # [reads|h] history slab
        compiler_params=pltpu.CompilerParams(dimension_semantics=("parallel",)),
    )(x_seq, state["h"], state["c"], state["memory"],
      state["prev_head_weights"], state["prev_reads"],
      packed["w_x"], packed["w_rh"], packed["b_lstm"],
      packed["w_heads"], packed["b_heads"], packed["w_out"], packed["b_out"])
    out_seq, h, c, mem, hw, reads = outs
    new_state = dict(h=h, c=c, memory=mem, prev_head_weights=hw, prev_reads=reads)
    return out_seq, new_state


# ---------------- pure-JAX reference (ground truth, faithful to PyTorch) ----------------
def ntm_step_ref(params, state, x):
    hp = lax.Precision.HIGHEST
    C, M, N = CTRL_DIM, MEM_M, MEM_N
    xc = jnp.concatenate([x, state["prev_reads"]], axis=1)
    gates = (jnp.dot(xc, params["w_ih_t"], precision=hp) + params["b_ih"]
             + jnp.dot(state["h"], params["w_hh_t"], precision=hp) + params["b_hh"])
    i_g = jax.nn.sigmoid(gates[:, 0:C]); f_g = jax.nn.sigmoid(gates[:, C:2 * C])
    g_g = jnp.tanh(gates[:, 2 * C:3 * C]); o_g = jax.nn.sigmoid(gates[:, 3 * C:4 * C])
    c_new = f_g * state["c"] + i_g * g_g
    h_new = o_g * jnp.tanh(c_new)
    mem = state["memory"]
    reads, weights = [], []
    for hd in range(N_HEADS_TOTAL):
        proj = jnp.dot(c_new, params["w_heads_t"][hd], precision=hp) + params["b_heads"][hd:hd + 1]
        key = jnp.tanh(proj[:, 0:M]); beta = jax.nn.softplus(proj[:, M:M + 1])
        gate = jax.nn.sigmoid(proj[:, M + 1:M + 2])
        shift = jax.nn.softmax(proj[:, M + 2:M + 5], axis=1)
        gamma = 1.0 + jax.nn.softplus(proj[:, M + 5:M + 6])
        erase = jax.nn.sigmoid(proj[:, M + 6:2 * M + 6]); add = jnp.tanh(proj[:, 2 * M + 6:3 * M + 6])
        dots = jnp.dot(key, mem.T, precision=hp)
        kn = jnp.sqrt(jnp.sum(key * key, axis=1, keepdims=True))
        mn = jnp.sqrt(jnp.sum(mem * mem, axis=1))[None, :]
        sim = dots / jnp.maximum(kn * mn, 1e-8)
        cw = jax.nn.softmax(beta * sim, axis=1)
        gated = gate * cw + (1.0 - gate) * state["prev_head_weights"][hd:hd + 1]
        unrolled = jnp.concatenate([gated[:, N - 1:N], gated, gated[:, 0:1]], axis=1)
        shifted = (shift[:, 0:1] * unrolled[:, 0:N] + shift[:, 1:2] * unrolled[:, 1:N + 1]
                   + shift[:, 2:3] * unrolled[:, 2:N + 2])
        wp = jnp.power(shifted, gamma)
        wf = wp / (jnp.sum(wp, axis=1, keepdims=True) + 1e-16)
        weights.append(wf)
        if hd % 2 == 0:
            reads.append(jnp.dot(wf, mem, precision=hp))
        else:
            mem = mem * (1.0 - wf.T @ erase) + wf.T @ add
    reads_flat = jnp.concatenate(reads, axis=1)
    out_state = jnp.concatenate([h_new, reads_flat], axis=1)
    output = jax.nn.sigmoid(jnp.dot(out_state, params["w_out_t"], precision=hp) + params["b_out"])
    new_state = dict(h=h_new, c=c_new, memory=mem,
                     prev_head_weights=jnp.concatenate(weights, axis=0),
                     prev_reads=reads_flat)
    return output, new_state


def init_params_and_state(key, batch):
    ks = jax.random.split(key, 12)

    def rnd(k, shape, scale=0.1):
        return (scale * jax.random.normal(k, shape)).astype(jnp.float32)

    params = dict(
        w_ih_t=rnd(ks[0], (IN_CAT, 4 * CTRL_DIM)),
        w_hh_t=rnd(ks[1], (CTRL_DIM, 4 * CTRL_DIM)),
        b_ih=rnd(ks[2], (1, 4 * CTRL_DIM)),
        b_hh=rnd(ks[3], (1, 4 * CTRL_DIM)),
        w_heads_t=rnd(ks[4], (N_HEADS_TOTAL, CTRL_DIM, HEAD_P)),
        b_heads=rnd(ks[5], (N_HEADS_TOTAL, HEAD_P), scale=0.01),
        w_out_t=rnd(ks[6], (READ_DATA, OUTPUT_DIM)),
        b_out=rnd(ks[7], (1, OUTPUT_DIM)),
    )
    # initial state as in NTM.reset(): memory = 1e-6, prev_head_weights a softmax,
    # h/c/prev_reads small dense vectors (here randomized per batch element).
    phw = jax.nn.softmax(rnd(ks[10], (batch, N_HEADS_TOTAL, MEM_N)), axis=2)
    state = dict(
        h=rnd(ks[8], (batch, 1, CTRL_DIM)),
        c=rnd(ks[9], (batch, 1, CTRL_DIM)),
        memory=jnp.full((batch, MEM_N, MEM_M), 1e-6, dtype=jnp.float32),
        prev_head_weights=phw.astype(jnp.float32),
        prev_reads=rnd(ks[11], (batch, 1, NUM_HEADS * MEM_M)),
    )
    return params, state


if __name__ == "__main__":
    B, T = 4, 8
    key = jax.random.PRNGKey(0)
    pkey, xkey = jax.random.split(key)
    params, state = init_params_and_state(pkey, B)
    packed = pack_params(params)
    x_seq = jax.random.normal(xkey, (B, T, INPUT_DIM), dtype=jnp.float32)

    out_seq, new_state = ntm_forward_seq(packed, state, x_seq)
    jax.block_until_ready(out_seq)
    jax.block_until_ready(new_state["memory"])

    # reference: step the pure-JAX NTM T times for every sequence
    ref_out = np.zeros((B, T, OUTPUT_DIM), np.float32)
    ref_mem = np.zeros((B, MEM_N, MEM_M), np.float32)
    for b in range(B):
        st = dict(h=state["h"][b], c=state["c"][b], memory=state["memory"][b],
                  prev_head_weights=state["prev_head_weights"][b],
                  prev_reads=state["prev_reads"][b])
        for t in range(T):
            o, st = ntm_step_ref(params, st, x_seq[b, t:t + 1])
            ref_out[b, t] = np.asarray(o)[0]
        ref_mem[b] = np.asarray(st["memory"])

    np.testing.assert_allclose(np.asarray(out_seq), ref_out, rtol=2e-2, atol=2e-2)
    np.testing.assert_allclose(np.asarray(new_state["memory"]), ref_mem,
                               rtol=2e-2, atol=2e-2)
    print("KERNEL_OK")
</pallas_src>

<mosaic_0001>
module attributes {stable_mosaic.version = 11 : i64} {
  func.func @ntm_seq_kernel(%arg0: i32, %arg1: memref<1x8x8xf32, #tpu.memory_space<vmem>>, %arg2: memref<1x1x32xf32, #tpu.memory_space<vmem>>, %arg3: memref<1x1x32xf32, #tpu.memory_space<vmem>>, %arg4: memref<1x16x16xf32, #tpu.memory_space<vmem>>, %arg5: memref<1x2x16xf32, #tpu.memory_space<vmem>>, %arg6: memref<1x1x16xf32, #tpu.memory_space<vmem>>, %arg7: memref<8x128xf32, #tpu.memory_space<vmem>>, %arg8: memref<48x128xf32, #tpu.memory_space<vmem>>, %arg9: memref<1x128xf32, #tpu.memory_space<vmem>>, %arg10: memref<32x76xf32, #tpu.memory_space<vmem>>, %arg11: memref<1x76xf32, #tpu.memory_space<vmem>>, %arg12: memref<48x8xf32, #tpu.memory_space<vmem>>, %arg13: memref<1x8xf32, #tpu.memory_space<vmem>>, %arg14: memref<1x8x8xf32, #tpu.memory_space<vmem>>, %arg15: memref<1x1x32xf32, #tpu.memory_space<vmem>>, %arg16: memref<1x1x32xf32, #tpu.memory_space<vmem>>, %arg17: memref<1x16x16xf32, #tpu.memory_space<vmem>>, %arg18: memref<1x2x16xf32, #tpu.memory_space<vmem>>, %arg19: memref<1x1x16xf32, #tpu.memory_space<vmem>>, %arg20: memref<9x48xf32, #tpu.memory_space<vmem>>) attributes {dimension_semantics = [#tpu.dimension_semantics<parallel>], iteration_bounds = array<i64: 4>, scalar_prefetch = 0 : i64, scratch_operands = 1 : i64, tpu.core_type = #tpu.core_type<tc>, window_params = [{transform_indices = @transform_0, window_bounds = array<i64: 1, 8, 8>}, {transform_indices = @transform_1, window_bounds = array<i64: 1, 1, 32>}, {transform_indices = @transform_2, window_bounds = array<i64: 1, 1, 32>}, {transform_indices = @transform_3, window_bounds = array<i64: 1, 16, 16>}, {transform_indices = @transform_4, window_bounds = array<i64: 1, 2, 16>}, {transform_indices = @transform_5, window_bounds = array<i64: 1, 1, 16>}, {pipeline_mode = #tpu.pipeline_mode<synchronous>, transform_indices = @transform_6, window_bounds = array<i64: 8, 128>}, {pipeline_mode = #tpu.pipeline_mode<synchronous>, transform_indices = @transform_7, window_bounds = array<i64: 48, 128>}, {pipeline_mode = #tpu.pipeline_mode<synchronous>, transform_indices = @transform_8, window_bounds = array<i64: 1, 128>}, {pipeline_mode = #tpu.pipeline_mode<synchronous>, transform_indices = @transform_9, window_bounds = array<i64: 32, 76>}, {pipeline_mode = #tpu.pipeline_mode<synchronous>, transform_indices = @transform_10, window_bounds = array<i64: 1, 76>}, {pipeline_mode = #tpu.pipeline_mode<synchronous>, transform_indices = @transform_11, window_bounds = array<i64: 48, 8>}, {pipeline_mode = #tpu.pipeline_mode<synchronous>, transform_indices = @transform_12, window_bounds = array<i64: 1, 8>}, {transform_indices = @transform_13, window_bounds = array<i64: 1, 8, 8>}, {transform_indices = @transform_14, window_bounds = array<i64: 1, 1, 32>}, {transform_indices = @transform_15, window_bounds = array<i64: 1, 1, 32>}, {transform_indices = @transform_16, window_bounds = array<i64: 1, 16, 16>}, {transform_indices = @transform_17, window_bounds = array<i64: 1, 2, 16>}, {transform_indices = @transform_18, window_bounds = array<i64: 1, 1, 16>}]} {
    %c0 = arith.constant 0 : index
    %c0_0 = arith.constant 0 : index
    %c0_1 = arith.constant 0 : index
    %0 = vector.load %arg1[%c0, %c0_0, %c0_1] : memref<1x8x8xf32, #tpu.memory_space<vmem>>, vector<1x8x8xf32>
    %1 = vector.shape_cast %0 : vector<1x8x8xf32> to vector<8x8xf32>
    %c0_2 = arith.constant 0 : index
    %c0_3 = arith.constant 0 : index
    %2 = vector.load %arg7[%c0_2, %c0_3] : memref<8x128xf32, #tpu.memory_space<vmem>>, vector<8x128xf32>
    %cst = arith.constant dense<0.000000e+00> : vector<8x128xf32>
    %3 = tpu.matmul %1, %2, %cst {dimension_numbers = #tpu.dot_dimension_numbers<[1], [0], [0], [1], [0, 0, 1, 1], [], []>} : vector<8x8xf32>, vector<8x128xf32>, vector<8x128xf32> -> vector<8x128xf32>
    %c0_4 = arith.constant 0 : index
    %c0_5 = arith.constant 0 : index
    %4 = vector.load %arg9[%c0_4, %c0_5] : memref<1x128xf32, #tpu.memory_space<vmem>>, vector<1x128xf32>
    %5 = vector.broadcast %4 : vector<1x128xf32> to vector<8x128xf32>
    %6 = arith.addf %3, %5 : vector<8x128xf32>
    %c0_6 = arith.constant 0 : index
    %c0_7 = arith.constant 0 : index
    %7 = vector.load %arg8[%c0_6, %c0_7] : memref<48x128xf32, #tpu.memory_space<vmem>>, vector<48x128xf32>
    %c0_8 = arith.constant 0 : index
    %c0_9 = arith.constant 0 : index
    %8 = vector.load %arg10[%c0_8, %c0_9] : memref<32x76xf32, #tpu.memory_space<vmem>>, vector<32x76xf32>
    %c0_10 = arith.constant 0 : index
    %c0_11 = arith.constant 0 : index
    %9 = vector.load %arg11[%c0_10, %c0_11] : memref<1x76xf32, #tpu.memory_space<vmem>>, vector<1x76xf32>
    %c0_12 = arith.constant 0 : index
    %c0_13 = arith.constant 0 : index
    %c0_14 = arith.constant 0 : index
    %10 = vector.load %arg6[%c0_12, %c0_13, %c0_14] : memref<1x1x16xf32, #tpu.memory_space<vmem>>, vector<1x1x16xf32>
    %11 = vector.shape_cast %10 : vector<1x1x16xf32> to vector<1x16xf32>
    %c0_15 = arith.constant 0 : index
    %c0_16 = arith.constant 0 : index
    %12 = vector.load %arg20[%c0_15, %c0_16] : memref<9x48xf32, #tpu.memory_space<vmem>>, vector<1x16xf32>
    tpu.vector_store %arg20[%c0_15, %c0_16], %11 {strides = array<i32>} : memref<9x48xf32, #tpu.memory_space<vmem>>, vector<1x16xf32>,
    %c0_17 = arith.constant 0 : index
    %c0_18 = arith.constant 0 : index
    %c0_19 = arith.constant 0 : index
    %13 = vector.load %arg2[%c0_17, %c0_18, %c0_19] : memref<1x1x32xf32, #tpu.memory_space<vmem>>, vector<1x1x32xf32>
    %14 = vector.shape_cast %13 : vector<1x1x32xf32> to vector<1x32xf32>
    %c0_20 = arith.constant 0 : index
    %c16 = arith.constant 16 : index
    %15 = vector.load %arg20[%c0_20, %c16] : memref<9x48xf32, #tpu.memory_space<vmem>>, vector<1x32xf32>
    tpu.vector_store %arg20[%c0_20, %c16], %14 {strides = array<i32>} : memref<9x48xf32, #tpu.memory_space<vmem>>, vector<1x32xf32>,
    %c0_21 = arith.constant 0 : index
    %c0_22 = arith.constant 0 : index
    %c0_23 = arith.constant 0 : index
    %16 = vector.load %arg3[%c0_21, %c0_22, %c0_23] : memref<1x1x32xf32, #tpu.memory_space<vmem>>, vector<1x1x32xf32>
    %17 = vector.shape_cast %16 : vector<1x1x32xf32> to vector<1x32xf32>
    %c0_24 = arith.constant 0 : index
    %c0_25 = arith.constant 0 : index
    %c0_26 = arith.constant 0 : index
    %18 = vector.load %arg4[%c0_24, %c0_25, %c0_26] : memref<1x16x16xf32, #tpu.memory_space<vmem>>, vector<1x16x16xf32>
    %19 = vector.shape_cast %18 : vector<1x16x16xf32> to vector<16x16xf32>
    %c0_27 = arith.constant 0 : index
    %c0_28 = arith.constant 0 : index
    %c0_29 = arith.constant 0 : index
    %20 = vector.load %arg5[%c0_27, %c0_28, %c0_29] : memref<1x2x16xf32, #tpu.memory_space<vmem>>, vector<1x2x16xf32>
    %21 = vector.shape_cast %20 : vector<1x2x16xf32> to vector<2x16xf32>
    %c0_30 = arith.constant 0 : index
    %c0_31 = arith.constant 0 : index
    %22 = vector.load %arg20[%c0_30, %c0_31] : memref<9x48xf32, #tpu.memory_space<vmem>>, vector<1x48xf32>
    %cst_32 = arith.constant dense<0.000000e+00> : vector<1x128xf32>
    %23 = tpu.matmul %22, %7, %cst_32 {dimension_numbers = #tpu.dot_dimension_numbers<[1], [0], [0], [1], [0, 0, 1, 1], [], []>} : vector<1x48xf32>, vector<48x128xf32>, vector<1x128xf32> -> vector<1x128xf32>
    %24 = vector.extract_strided_slice %6 {offsets = [0, 0], sizes = [1, 128], strides = [1, 1]} : vector<8x128xf32> to vector<1x128xf32>
    %25 = arith.addf %23, %24 : vector<1x128xf32>
    %26 = vector.extract_strided_slice %25 {offsets = [0, 0], sizes = [1, 96], strides = [1, 1]} : vector<1x128xf32> to vector<1x96xf32>
    %27 = arith.negf %26 : vector<1x96xf32>
    %28 = math.exp %27 : vector<1x96xf32>
    %cst_33 = arith.constant 1.000000e+00 : f32
    %29 = vector.broadcast %cst_33 : f32 to vector<1x96xf32>
    %30 = arith.addf %29, %28 : vector<1x96xf32>
    %31 = arith.divf %29, %30 : vector<1x96xf32>
    %32 = vector.extract_strided_slice %31 {offsets = [0, 0], sizes = [1, 32], strides = [1, 1]} : vector<1x96xf32> to vector<1x32xf32>
    %33 = vector.extract_strided_slice %31 {offsets = [0, 32], sizes = [1, 32], strides = [1, 1]} : vector<1x96xf32> to vector<1x32xf32>
    %34 = vector.extract_strided_slice %31 {offsets = [0, 64], sizes = [1, 32], strides = [1, 1]} : vector<1x96xf32> to vector<1x32xf32>
    %35 = vector.extract_strided_slice %25 {offsets = [0, 96], sizes = [1, 32], strides = [1, 1]} : vector<1x128xf32> to vector<1x32xf32>
    %36 = math.tanh %35 : vector<1x32xf32>
    %37 = arith.mulf %33, %17 : vector<1x32xf32>
    %38 = arith.mulf %32, %36 : vector<1x32xf32>
    %39 = arith.addf %37, %38 : vector<1x32xf32>
    %40 = math.tanh %39 : vector<1x32xf32>
    %41 = arith.mulf %34, %40 : vector<1x32xf32>
    %c1 = arith.constant 1 : index
    %c16_34 = arith.constant 16 : index
    %42 = vector.load %arg20[%c1, %c16_34] : memref<9x48xf32, #tpu.memory_space<vmem>>, vector<1x32xf32>
    tpu.vector_store %arg20[%c1, %c16_34], %41 {strides = array<i32>} : memref<9x48xf32, #tpu.memory_space<vmem>>, vector<1x32xf32>,
    %cst_35 = arith.constant dense<0.000000e+00> : vector<1x76xf32>
    %43 = tpu.matmul %39, %8, %cst_35 {dimension_numbers = #tpu.dot_dimension_numbers<[1], [0], [0], [1], [0, 0, 1, 1], [], []>} : vector<1x32xf32>, vector<32x76xf32>, vector<1x76xf32> -> vector<1x76xf32>
    %44 = arith.addf %43, %9 : vector<1x76xf32>
    %45 = vector.extract_strided_slice %44 {offsets = [0, 0], sizes = [1, 48], strides = [1, 1]} : vector<1x76xf32> to vector<1x48xf32>
    %46 = math.tanh %45 : vector<1x48xf32>
    %47 = vector.extract_strided_slice %44 {offsets = [0, 48], sizes = [1, 18], strides = [1, 1]} : vector<1x76xf32> to vector<1x18xf32>
    %48 = arith.negf %47 : vector<1x18xf32>
    %49 = math.exp %48 : vector<1x18xf32>
    %cst_36 = arith.constant 1.000000e+00 : f32
    %50 = vector.broadcast %cst_36 : f32 to vector<1x18xf32>
    %51 = arith.addf %50, %49 : vector<1x18xf32>
    %52 = arith.divf %50, %51 : vector<1x18xf32>
    %53 = vector.extract_strided_slice %44 {offsets = [0, 66], sizes = [1, 4], strides = [1, 1]} : vector<1x76xf32> to vector<1x4xf32>
    %cst_37 = arith.constant 0.000000e+00 : f32
    %54 = vector.broadcast %cst_37 : f32 to vector<1x4xf32>
    %55 = arith.maximumf %53, %54 : vector<1x4xf32>
    %56 = vector.broadcast %cst_37 : f32 to vector<1x4xf32>
    %57 = arith.subf %53, %56 : vector<1x4xf32>
    %58 = arith.cmpf one, %57, %57 : vector<1x4xf32>
    %59 = vector.broadcast %cst_37 : f32 to vector<1x4xf32>
    %60 = arith.addf %53, %59 : vector<1x4xf32>
    %61 = math.absf %57 : vector<1x4xf32>
    %cst_38 = arith.constant 0.000000e+00 : f32
    %62 = vector.broadcast %cst_38 : f32 to vector<1x4xf32>
    %63 = arith.subf %62, %61 : vector<1x4xf32>
    %64 = math.exp %63 : vector<1x4xf32>
    %65 = math.log1p %64 : vector<1x4xf32>
    %66 = arith.addf %55, %65 : vector<1x4xf32>
    %67 = arith.select %58, %60, %66 : vector<1x4xi1>, vector<1x4xf32>
    %68 = vector.extract_strided_slice %46 {offsets = [0, 0], sizes = [1, 16], strides = [1, 1]} : vector<1x48xf32> to vector<1x16xf32>
    %69 = vector.extract_strided_slice %46 {offsets = [0, 16], sizes = [1, 16], strides = [1, 1]} : vector<1x48xf32> to vector<1x16xf32>
    %70 = tpu.concatenate %68, %69 in 0 : vector<1x16xf32>, vector<1x16xf32> -> vector<2x16xf32>
    %71 = vector.extract_strided_slice %46 {offsets = [0, 32], sizes = [1, 16], strides = [1, 1]} : vector<1x48xf32> to vector<1x16xf32>
    %72 = vector.extract_strided_slice %52 {offsets = [0, 0], sizes = [1, 1], strides = [1, 1]} : vector<1x18xf32> to vector<1x1xf32>
    %73 = vector.extract_strided_slice %52 {offsets = [0, 1], sizes = [1, 1], strides = [1, 1]} : vector<1x18xf32> to vector<1x1xf32>
    %74 = tpu.concatenate %72, %73 in 0 : vector<1x1xf32>, vector<1x1xf32> -> vector<2x1xf32>
    %75 = vector.extract_strided_slice %52 {offsets = [0, 2], sizes = [1, 16], strides = [1, 1]} : vector<1x18xf32> to vector<1x16xf32>
    %76 = vector.extract_strided_slice %67 {offsets = [0, 0], sizes = [1, 1], strides = [1, 1]} : vector<1x4xf32> to vector<1x1xf32>
    %77 = vector.extract_strided_slice %67 {offsets = [0, 1], sizes = [1, 1], strides = [1, 1]} : vector<1x4xf32> to vector<1x1xf32>
    %78 = tpu.concatenate %76, %77 in 0 : vector<1x1xf32>, vector<1x1xf32> -> vector<2x1xf32>
    %79 = vector.extract_strided_slice %67 {offsets = [0, 2], sizes = [1, 1], strides = [1, 1]} : vector<1x4xf32> to vector<1x1xf32>
    %80 = vector.extract_strided_slice %67 {offsets = [0, 3], sizes = [1, 1], strides = [1, 1]} : vector<1x4xf32> to vector<1x1xf32>
    %81 = tpu.concatenate %79, %80 in 0 : vector<1x1xf32>, vector<1x1xf32> -> vector<2x1xf32>
    %cst_39 = arith.constant 1.000000e+00 : f32
    %82 = vector.broadcast %cst_39 : f32 to vector<2x1xf32>
    %83 = arith.addf %82, %81 : vector<2x1xf32>
    %84 = vector.extract_strided_slice %44 {offsets = [0, 70], sizes = [1, 3], strides = [1, 1]} : vector<1x76xf32> to vector<1x3xf32>
    %85 = vector.extract_strided_slice %44 {offsets = [0, 73], sizes = [1, 3], strides = [1, 1]} : vector<1x76xf32> to vector<1x3xf32>
    %86 = tpu.concatenate %84, %85 in 0 : vector<1x3xf32>, vector<1x3xf32> -> vector<2x3xf32>
    %87 = arith.mulf %19, %19 : vector<16x16xf32>
    %cst_40 = arith.constant dense<0.000000e+00> : vector<16xf32>
    %88 = vector.multi_reduction <add>, %87, %cst_40 [1] : vector<16x16xf32> to vector<16xf32>
    %89 = vector.shape_cast %88 : vector<16xf32> to vector<16x1xf32>
    %cst_41 = arith.constant 1.000000e-16 : f32
    %90 = vector.broadcast %cst_41 : f32 to vector<16x1xf32>
    %91 = arith.maximumf %89, %90 : vector<16x1xf32>
    %92 = math.rsqrt %91 : vector<16x1xf32>
    %93 = vector.broadcast %92 : vector<16x1xf32> to vector<16x16xf32>
    %94 = arith.mulf %19, %93 : vector<16x16xf32>
    %95 = arith.mulf %70, %70 : vector<2x16xf32>
    %cst_42 = arith.constant dense<0.000000e+00> : vector<2xf32>
    %96 = vector.multi_reduction <add>, %95, %cst_42 [1] : vector<2x16xf32> to vector<2xf32>
    %97 = vector.shape_cast %96 : vector<2xf32> to vector<2x1xf32>
    %cst_43 = arith.constant dense<0.000000e+00> : vector<2x16xf32>
    %98 = tpu.matmul %70, %94, %cst_43 {dimension_numbers = #tpu.dot_dimension_numbers<[1], [1], [0], [0], [0, 0, 1, 0], [], []>} : vector<2x16xf32>, vector<16x16xf32>, vector<2x16xf32> -> vector<2x16xf32>
    %cst_44 = arith.constant 1.000000e-16 : f32
    %99 = vector.broadcast %cst_44 : f32 to vector<2x1xf32>
    %100 = arith.maximumf %97, %99 : vector<2x1xf32>
    %101 = math.rsqrt %100 : vector<2x1xf32>
    %102 = vector.broadcast %101 : vector<2x1xf32> to vector<2x16xf32>
    %103 = arith.mulf %98, %102 : vector<2x16xf32>
    %104 = vector.broadcast %78 : vector<2x1xf32> to vector<2x16xf32>
    %105 = arith.mulf %104, %103 : vector<2x16xf32>
    %cst_45 = arith.constant dense<0xFF800000> : vector<2xf32>
    %106 = vector.multi_reduction <maximumf>, %105, %cst_45 [1] : vector<2x16xf32> to vector<2xf32>
    %107 = vector.shape_cast %106 : vector<2xf32> to vector<2x1xf32>
    %108 = vector.broadcast %107 : vector<2x1xf32> to vector<2x16xf32>
    %109 = arith.subf %105, %108 : vector<2x16xf32>
    %110 = math.exp %109 : vector<2x16xf32>
    %cst_46 = arith.constant dense<0.000000e+00> : vector<2xf32>
    %111 = vector.multi_reduction <add>, %110, %cst_46 [1] : vector<2x16xf32> to vector<2xf32>
    %112 = vector.shape_cast %111 : vector<2xf32> to vector<2x1xf32>
    %113 = tpu.reciprocal %112 {approx = true} : vector<2x1xf32> -> vector<2x1xf32>
    %114 = vector.broadcast %113 : vector<2x1xf32> to vector<2x16xf32>
    %115 = arith.mulf %110, %114 : vector<2x16xf32>
    %116 = vector.broadcast %74 : vector<2x1xf32> to vector<2x16xf32>
    %117 = arith.mulf %116, %115 : vector<2x16xf32>
    %cst_47 = arith.constant 1.000000e+00 : f32
    %118 = vector.broadcast %cst_47 : f32 to vector<2x1xf32>
    %119 = arith.subf %118, %74 : vector<2x1xf32>
    %120 = vector.broadcast %119 : vector<2x1xf32> to vector<2x16xf32>
    %121 = arith.mulf %120, %21 : vector<2x16xf32>
    %122 = arith.addf %117, %121 : vector<2x16xf32>
    %cst_48 = arith.constant dense<0xFF800000> : vector<2xf32>
    %123 = vector.multi_reduction <maximumf>, %86, %cst_48 [1] : vector<2x3xf32> to vector<2xf32>
    %124 = vector.shape_cast %123 : vector<2xf32> to vector<2x1xf32>
    %125 = vector.broadcast %124 : vector<2x1xf32> to vector<2x3xf32>
    %126 = arith.subf %86, %125 : vector<2x3xf32>
    %127 = math.exp %126 : vector<2x3xf32>
    %cst_49 = arith.constant dense<0.000000e+00> : vector<2xf32>
    %128 = vector.multi_reduction <add>, %127, %cst_49 [1] : vector<2x3xf32> to vector<2xf32>
    %129 = vector.shape_cast %128 : vector<2xf32> to vector<2x1xf32>
    %130 = tpu.reciprocal %129 {approx = true} : vector<2x1xf32> -> vector<2x1xf32>
    %131 = vector.broadcast %130 : vector<2x1xf32> to vector<2x3xf32>
    %132 = arith.mulf %127, %131 : vector<2x3xf32>
    %133 = vector.extract_strided_slice %122 {offsets = [0, 15], sizes = [2, 1], strides = [1, 1]} : vector<2x16xf32> to vector<2x1xf32>
    %134 = vector.extract_strided_slice %122 {offsets = [0, 0], sizes = [2, 15], strides = [1, 1]} : vector<2x16xf32> to vector<2x15xf32>
    %135 = tpu.concatenate %133, %134 in 1 : vector<2x1xf32>, vector<2x15xf32> -> vector<2x16xf32>
    %136 = vector.extract_strided_slice %122 {offsets = [0, 1], sizes = [2, 15], strides = [1, 1]} : vector<2x16xf32> to vector<2x15xf32>
    %137 = vector.extract_strided_slice %122 {offsets = [0, 0], sizes = [2, 1], strides = [1, 1]} : vector<2x16xf32> to vector<2x1xf32>
    %138 = tpu.concatenate %136, %137 in 1 : vector<2x15xf32>, vector<2x1xf32> -> vector<2x16xf32>
    %139 = vector.extract_strided_slice %132 {offsets = [0, 0], sizes = [2, 1], strides = [1, 1]} : vector<2x3xf32> to vector<2x1xf32>
    %140 = vector.broadcast %139 : vector<2x1xf32> to vector<2x16xf32>
    %141 = arith.mulf %140, %135 : vector<2x16xf32>
    %142 = vector.extract_strided_slice %132 {offsets = [0, 1], sizes = [2, 1], strides = [1, 1]} : vector<2x3xf32> to vector<2x1xf32>
    %143 = vector.broadcast %142 : vector<2x1xf32> to vector<2x16xf32>
    %144 = arith.mulf %143, %122 : vector<2x16xf32>
    %145 = arith.addf %141, %144 : vector<2x16xf32>
    %146 = vector.extract_strided_slice %132 {offsets = [0, 2], sizes = [2, 1], strides = [1, 1]} : vector<2x3xf32> to vector<2x1xf32>
    %147 = vector.broadcast %146 : vector<2x1xf32> to vector<2x16xf32>
    %148 = arith.mulf %147, %138 : vector<2x16xf32>
    %149 = arith.addf %145, %148 : vector<2x16xf32>
    %cst_50 = arith.constant 1.000000e-30 : f32
    %150 = vector.broadcast %cst_50 : f32 to vector<2x16xf32>
    %151 = arith.maximumf %149, %150 : vector<2x16xf32>
    %152 = math.log %151 : vector<2x16xf32>
    %153 = vector.broadcast %83 : vector<2x1xf32> to vector<2x16xf32>
    %154 = arith.mulf %153, %152 : vector<2x16xf32>
    %155 = math.exp %154 : vector<2x16xf32>
    %cst_51 = arith.constant dense<0.000000e+00> : vector<2xf32>
    %156 = vector.multi_reduction <add>, %155, %cst_51 [1] : vector<2x16xf32> to vector<2xf32>
    %157 = vector.shape_cast %156 : vector<2xf32> to vector<2x1xf32>
    %cst_52 = arith.constant 1.000000e-16 : f32
    %158 = vector.broadcast %cst_52 : f32 to vector<2x1xf32>
    %159 = arith.addf %157, %158 : vector<2x1xf32>
    %160 = vector.broadcast %159 : vector<2x1xf32> to vector<2x16xf32>
    %161 = arith.divf %155, %160 : vector<2x16xf32>
    %162 = vector.extract_strided_slice %161 {offsets = [0, 0], sizes = [1, 16], strides = [1, 1]} : vector<2x16xf32> to vector<1x16xf32>
    %cst_53 = arith.constant dense<0.000000e+00> : vector<1x16xf32>
    %163 = tpu.matmul %162, %19, %cst_53 {dimension_numbers = #tpu.dot_dimension_numbers<[1], [0], [0], [1], [0, 0, 1, 1], [], []>} : vector<1x16xf32>, vector<16x16xf32>, vector<1x16xf32> -> vector<1x16xf32>
    %c1_54 = arith.constant 1 : index
    %c0_55 = arith.constant 0 : index
    %164 = vector.load %arg20[%c1_54, %c0_55] : memref<9x48xf32, #tpu.memory_space<vmem>>, vector<1x16xf32>
    tpu.vector_store %arg20[%c1_54, %c0_55], %163 {strides = array<i32>} : memref<9x48xf32, #tpu.memory_space<vmem>>, vector<1x16xf32>,
    %165 = tpu.concatenate %75, %71 in 1 : vector<1x16xf32>, vector<1x16xf32> -> vector<1x32xf32>
    %166 = vector.extract_strided_slice %161 {offsets = [1, 0], sizes = [1, 16], strides = [1, 1]} : vector<2x16xf32> to vector<1x16xf32>
    %cst_56 = arith.constant dense<0.000000e+00> : vector<16x32xf32>
    %167 = tpu.matmul %166, %165, %cst_56 {dimension_numbers = #tpu.dot_dimension_numbers<[0], [0], [1], [1], [0, 1, 1, 1], [], []>} : vector<1x16xf32>, vector<1x32xf32>, vector<16x32xf32> -> vector<16x32xf32>
    %168 = vector.extract_strided_slice %167 {offsets = [0, 0], sizes = [16, 16], strides = [1, 1]} : vector<16x32xf32> to vector<16x16xf32>
    %cst_57 = arith.constant 1.000000e+00 : f32
    %169 = vector.broadcast %cst_57 : f32 to vector<16x16xf32>
    %170 = arith.subf %169, %168 : vector<16x16xf32>
    %171 = arith.mulf %19, %170 : vector<16x16xf32>
    %172 = vector.extract_strided_slice %167 {offsets = [0, 16], sizes = [16, 16], strides = [1, 1]} : vector<16x32xf32> to vector<16x16xf32>
    %173 = arith.addf %171, %172 : vector<16x16xf32>
    %c1_58 = arith.constant 1 : index
    %c0_59 = arith.constant 0 : index
    %174 = vector.load %arg20[%c1_58, %c0_59] : memref<9x48xf32, #tpu.memory_space<vmem>>, vector<1x48xf32>
    %cst_60 = arith.constant dense<0.000000e+00> : vector<1x128xf32>
    %175 = tpu.matmul %174, %7, %cst_60 {dimension_numbers = #tpu.dot_dimension_numbers<[1], [0], [0], [1], [0, 0, 1, 1], [], []>} : vector<1x48xf32>, vector<48x128xf32>, vector<1x128xf32> -> vector<1x128xf32>
    %176 = vector.extract_strided_slice %6 {offsets = [1, 0], sizes = [1, 128], strides = [1, 1]} : vector<8x128xf32> to vector<1x128xf32>
    %177 = arith.addf %175, %176 : vector<1x128xf32>
    %178 = vector.extract_strided_slice %177 {offsets = [0, 0], sizes = [1, 96], strides = [1, 1]} : vector<1x128xf32> to vector<1x96xf32>
    %179 = arith.negf %178 : vector<1x96xf32>
    %180 = math.exp %179 : vector<1x96xf32>
    %cst_61 = arith.constant 1.000000e+00 : f32
    %181 = vector.broadcast %cst_61 : f32 to vector<1x96xf32>
    %182 = arith.addf %181, %180 : vector<1x96xf32>
    %183 = arith.divf %181, %182 : vector<1x96xf32>
    %184 = vector.extract_strided_slice %183 {offsets = [0, 0], sizes = [1, 32], strides = [1, 1]} : vector<1x96xf32> to vector<1x32xf32>
    %185 = vector.extract_strided_slice %183 {offsets = [0, 32], sizes = [1, 32], strides = [1, 1]} : vector<1x96xf32> to vector<1x32xf32>
    %186 = vector.extract_strided_slice %183 {offsets = [0, 64], sizes = [1, 32], strides = [1, 1]} : vector<1x96xf32> to vector<1x32xf32>
    %187 = vector.extract_strided_slice %177 {offsets = [0, 96], sizes = [1, 32], strides = [1, 1]} : vector<1x128xf32> to vector<1x32xf32>
    %188 = math.tanh %187 : vector<1x32xf32>
    %189 = arith.mulf %185, %39 : vector<1x32xf32>
    %190 = arith.mulf %184, %188 : vector<1x32xf32>
    %191 = arith.addf %189, %190 : vector<1x32xf32>
    %192 = math.tanh %191 : vector<1x32xf32>
    %193 = arith.mulf %186, %192 : vector<1x32xf32>
    %c2 = arith.constant 2 : index
    %c16_62 = arith.constant 16 : index
    %194 = vector.load %arg20[%c2, %c16_62] : memref<9x48xf32, #tpu.memory_space<vmem>>, vector<1x32xf32>
    tpu.vector_store %arg20[%c2, %c16_62], %193 {strides = array<i32>} : memref<9x48xf32, #tpu.memory_space<vmem>>, vector<1x32xf32>,
    %cst_63 = arith.constant dense<0.000000e+00> : vector<1x76xf32>
    %195 = tpu.matmul %191, %8, %cst_63 {dimension_numbers = #tpu.dot_dimension_numbers<[1], [0], [0], [1], [0, 0, 1, 1], [], []>} : vector<1x32xf32>, vector<32x76xf32>, vector<1x76xf32> -> vector<1x76xf32>
    %196 = arith.addf %195, %9 : vector<1x76xf32>
    %197 = vector.extract_strided_slice %196 {offsets = [0, 0], sizes = [1, 48], strides = [1, 1]} : vector<1x76xf32> to vector<1x48xf32>
    %198 = math.tanh %197 : vector<1x48xf32>
    %199 = vector.extract_strided_slice %196 {offsets = [0, 48], sizes = [1, 18], strides = [1, 1]} : vector<1x76xf32> to vector<1x18xf32>
    %200 = arith.negf %199 : vector<1x18xf32>
    %201 = math.exp %200 : vector<1x18xf32>
    %cst_64 = arith.constant 1.000000e+00 : f32
    %202 = vector.broadcast %cst_64 : f32 to vector<1x18xf32>
    %203 = arith.addf %202, %201 : vector<1x18xf32>
    %204 = arith.divf %202, %203 : vector<1x18xf32>
    %205 = vector.extract_strided_slice %196 {offsets = [0, 66], sizes = [1, 4], strides = [1, 1]} : vector<1x76xf32> to vector<1x4xf32>
    %cst_65 = arith.constant 0.000000e+00 : f32
    %206 = vector.broadcast %cst_65 : f32 to vector<1x4xf32>
    %207 = arith.maximumf %205, %206 : vector<1x4xf32>
    %208 = vector.broadcast %cst_65 : f32 to vector<1x4xf32>
    %209 = arith.subf %205, %208 : vector<1x4xf32>
    %210 = arith.cmpf one, %209, %209 : vector<1x4xf32>
    %211 = vector.broadcast %cst_65 : f32 to vector<1x4xf32>
    %212 = arith.addf %205, %211 : vector<1x4xf32>
    %213 = math.absf %209 : vector<1x4xf32>
    %cst_66 = arith.constant 0.000000e+00 : f32
    %214 = vector.broadcast %cst_66 : f32 to vector<1x4xf32>
    %215 = arith.subf %214, %213 : vector<1x4xf32>
    %216 = math.exp %215 : vector<1x4xf32>
    %217 = math.log1p %216 : vector<1x4xf32>
    %218 = arith.addf %207, %217 : vector<1x4xf32>
    %219 = arith.select %210, %212, %218 : vector<1x4xi1>, vector<1x4xf32>
    %220 = vector.extract_strided_slice %198 {offsets = [0, 0], sizes = [1, 16], strides = [1, 1]} : vector<1x48xf32> to vector<1x16xf32>
    %221 = vector.extract_strided_slice %198 {offsets = [0, 16], sizes = [1, 16], strides = [1, 1]} : vector<1x48xf32> to vector<1x16xf32>
    %222 = tpu.concatenate %220, %221 in 0 : vector<1x16xf32>, vector<1x16xf32> -> vector<2x16xf32>
    %223 = vector.extract_strided_slice %198 {offsets = [0, 32], sizes = [1, 16], strides = [1, 1]} : vector<1x48xf32> to vector<1x16xf32>
    %224 = vector.extract_strided_slice %204 {offsets = [0, 0], sizes = [1, 1], strides = [1, 1]} : vector<1x18xf32> to vector<1x1xf32>
    %225 = vector.extract_strided_slice %204 {offsets = [0, 1], sizes = [1, 1], strides = [1, 1]} : vector<1x18xf32> to vector<1x1xf32>
    %226 = tpu.concatenate %224, %225 in 0 : vector<1x1xf32>, vector<1x1xf32> -> vector<2x1xf32>
    %227 = vector.extract_strided_slice %204 {offsets = [0, 2], sizes = [1, 16], strides = [1, 1]} : vector<1x18xf32> to vector<1x16xf32>
    %228 = vector.extract_strided_slice %219 {offsets = [0, 0], sizes = [1, 1], strides = [1, 1]} : vector<1x4xf32> to vector<1x1xf32>
    %229 = vector.extract_strided_slice %219 {offsets = [0, 1], sizes = [1, 1], strides = [1, 1]} : vector<1x4xf32> to vector<1x1xf32>
    %230 = tpu.concatenate %228, %229 in 0 : vector<1x1xf32>, vector<1x1xf32> -> vector<2x1xf32>
    %231 = vector.extract_strided_slice %219 {offsets = [0, 2], sizes = [1, 1], strides = [1, 1]} : vector<1x4xf32> to vector<1x1xf32>
    %232 = vector.extract_strided_slice %219 {offsets = [0, 3], sizes = [1, 1], strides = [1, 1]} : vector<1x4xf32> to vector<1x1xf32>
    %233 = tpu.concatenate %231, %232 in 0 : vector<1x1xf32>, vector<1x1xf32> -> vector<2x1xf32>
    %cst_67 = arith.constant 1.000000e+00 : f32
    %234 = vector.broadcast %cst_67 : f32 to vector<2x1xf32>
    %235 = arith.addf %234, %233 : vector<2x1xf32>
    %236 = vector.extract_strided_slice %196 {offsets = [0, 70], sizes = [1, 3], strides = [1, 1]} : vector<1x76xf32> to vector<1x3xf32>
    %237 = vector.extract_strided_slice %196 {offsets = [0, 73], sizes = [1, 3], strides = [1, 1]} : vector<1x76xf32> to vector<1x3xf32>
    %238 = tpu.concatenate %236, %237 in 0 : vector<1x3xf32>, vector<1x3xf32> -> vector<2x3xf32>
    %239 = arith.mulf %173, %173 : vector<16x16xf32>
    %cst_68 = arith.constant dense<0.000000e+00> : vector<16xf32>
    %240 = vector.multi_reduction <add>, %239, %cst_68 [1] : vector<16x16xf32> to vector<16xf32>
    %241 = vector.shape_cast %240 : vector<16xf32> to vector<16x1xf32>
    %cst_69 = arith.constant 1.000000e-16 : f32
    %242 = vector.broadcast %cst_69 : f32 to vector<16x1xf32>
    %243 = arith.maximumf %241, %242 : vector<16x1xf32>
    %244 = math.rsqrt %243 : vector<16x1xf32>
    %245 = vector.broadcast %244 : vector<16x1xf32> to vector<16x16xf32>
    %246 = arith.mulf %173, %245 : vector<16x16xf32>
    %247 = arith.mulf %222, %222 : vector<2x16xf32>
    %cst_70 = arith.constant dense<0.000000e+00> : vector<2xf32>
    %248 = vector.multi_reduction <add>, %247, %cst_70 [1] : vector<2x16xf32> to vector<2xf32>
    %249 = vector.shape_cast %248 : vector<2xf32> to vector<2x1xf32>
    %cst_71 = arith.constant dense<0.000000e+00> : vector<2x16xf32>
    %250 = tpu.matmul %222, %246, %cst_71 {dimension_numbers = #tpu.dot_dimension_numbers<[1], [1], [0], [0], [0, 0, 1, 0], [], []>} : vector<2x16xf32>, vector<16x16xf32>, vector<2x16xf32> -> vector<2x16xf32>
    %cst_72 = arith.constant 1.000000e-16 : f32
    %251 = vector.broadcast %cst_72 : f32 to vector<2x1xf32>
    %252 = arith.maximumf %249, %251 : vector<2x1xf32>
    %253 = math.rsqrt %252 : vector<2x1xf32>
    %254 = vector.broadcast %253 : vector<2x1xf32> to vector<2x16xf32>
    %255 = arith.mulf %250, %254 : vector<2x16xf32>
    %256 = vector.broadcast %230 : vector<2x1xf32> to vector<2x16xf32>
    %257 = arith.mulf %256, %255 : vector<2x16xf32>
    %cst_73 = arith.constant dense<0xFF800000> : vector<2xf32>
    %258 = vector.multi_reduction <maximumf>, %257, %cst_73 [1] : vector<2x16xf32> to vector<2xf32>
    %259 = vector.shape_cast %258 : vector<2xf32> to vector<2x1xf32>
    %260 = vector.broadcast %259 : vector<2x1xf32> to vector<2x16xf32>
    %261 = arith.subf %257, %260 : vector<2x16xf32>
    %262 = math.exp %261 : vector<2x16xf32>
    %cst_74 = arith.constant dense<0.000000e+00> : vector<2xf32>
    %263 = vector.multi_reduction <add>, %262, %cst_74 [1] : vector<2x16xf32> to vector<2xf32>
    %264 = vector.shape_cast %263 : vector<2xf32> to vector<2x1xf32>
    %265 = tpu.reciprocal %264 {approx = true} : vector<2x1xf32> -> vector<2x1xf32>
    %266 = vector.broadcast %265 : vector<2x1xf32> to vector<2x16xf32>
    %267 = arith.mulf %262, %266 : vector<2x16xf32>
    %268 = vector.broadcast %226 : vector<2x1xf32> to vector<2x16xf32>
    %269 = arith.mulf %268, %267 : vector<2x16xf32>
    %cst_75 = arith.constant 1.000000e+00 : f32
    %270 = vector.broadcast %cst_75 : f32 to vector<2x1xf32>
    %271 = arith.subf %270, %226 : vector<2x1xf32>
    %272 = vector.broadcast %271 : vector<2x1xf32> to vector<2x16xf32>
    %273 = arith.mulf %272, %161 : vector<2x16xf32>
    %274 = arith.addf %269, %273 : vector<2x16xf32>
    %cst_76 = arith.constant dense<0xFF800000> : vector<2xf32>
    %275 = vector.multi_reduction <maximumf>, %238, %cst_76 [1] : vector<2x3xf32> to vector<2xf32>
    %276 = vector.shape_cast %275 : vector<2xf32> to vector<2x1xf32>
    %277 = vector.broadcast %276 : vector<2x1xf32> to vector<2x3xf32>
    %278 = arith.subf %238, %277 : vector<2x3xf32>
    %279 = math.exp %278 : vector<2x3xf32>
    %cst_77 = arith.constant dense<0.000000e+00> : vector<2xf32>
    %280 = vector.multi_reduction <add>, %279, %cst_77 [1] : vector<2x3xf32> to vector<2xf32>
    %281 = vector.shape_cast %280 : vector<2xf32> to vector<2x1xf32>
    %282 = tpu.reciprocal %281 {approx = true} : vector<2x1xf32> -> vector<2x1xf32>
    %283 = vector.broadcast %282 : vector<2x1xf32> to vector<2x3xf32>
    %284 = arith.mulf %279, %283 : vector<2x3xf32>
    %285 = vector.extract_strided_slice %274 {offsets = [0, 15], sizes = [2, 1], strides = [1, 1]} : vector<2x16xf32> to vector<2x1xf32>
    %286 = vector.extract_strided_slice %274 {offsets = [0, 0], sizes = [2, 15], strides = [1, 1]} : vector<2x16xf32> to vector<2x15xf32>
    %287 = tpu.concatenate %285, %286 in 1 : vector<2x1xf32>, vector<2x15xf32> -> vector<2x16xf32>
    %288 = vector.extract_strided_slice %274 {offsets = [0, 1], sizes = [2, 15], strides = [1, 1]} : vector<2x16xf32> to vector<2x15xf32>
    %289 = vector.extract_strided_slice %274 {offsets = [0, 0], sizes = [2, 1], strides = [1, 1]} : vector<2x16xf32> to vector<2x1xf32>
    %290 = tpu.concatenate %288, %289 in 1 : vector<2x15xf32>, vector<2x1xf32> -> vector<2x16xf32>
    %291 = vector.extract_strided_slice %284 {offsets = [0, 0], sizes = [2, 1], strides = [1, 1]} : vector<2x3xf32> to vector<2x1xf32>
    %292 = vector.broadcast %291 : vector<2x1xf32> to vector<2x16xf32>
    %293 = arith.mulf %292, %287 : vector<2x16xf32>
    %294 = vector.extract_strided_slice %284 {offsets = [0, 1], sizes = [2, 1], strides = [1, 1]} : vector<2x3xf32> to vector<2x1xf32>
    %295 = vector.broadcast %294 : vector<2x1xf32> to vector<2x16xf32>
    %296 = arith.mulf %295, %274 : vector<2x16xf32>
    %297 = arith.addf %293, %296 : vector<2x16xf32>
    %298 = vector.extract_strided_slice %284 {offsets = [0, 2], sizes = [2, 1], strides = [1, 1]} : vector<2x3xf32> to vector<2x1xf32>
    %299 = vector.broadcast %298 : vector<2x1xf32> to vector<2x16xf32>
    %300 = arith.mulf %299, %290 : vector<2x16xf32>
    %301 = arith.addf %297, %300 : vector<2x16xf32>
    %cst_78 = arith.constant 1.000000e-30 : f32
    %302 = vector.broadcast %cst_78 : f32 to vector<2x16xf32>
    %303 = arith.maximumf %301, %302 : vector<2x16xf32>
    %304 = math.log %303 : vector<2x16xf32>
    %305 = vector.broadcast %235 : vector<2x1xf32> to vector<2x16xf32>
    %306 = arith.mulf %305, %304 : vector<2x16xf32>
    %307 = math.exp %306 : vector<2x16xf32>
    %cst_79 = arith.constant dense<0.000000e+00> : vector<2xf32>
    %308 = vector.multi_reduction <add>, %307, %cst_79 [1] : vector<2x16xf32> to vector<2xf32>
    %309 = vector.shape_cast %308 : vector<2xf32> to vector<2x1xf32>
    %cst_80 = arith.constant 1.000000e-16 : f32
    %310 = vector.broadcast %cst_80 : f32 to vector<2x1xf32>
    %311 = arith.addf %309, %310 : vector<2x1xf32>
    %312 = vector.broadcast %311 : vector<2x1xf32> to vector<2x16xf32>
    %313 = arith.divf %307, %312 : vector<2x16xf32>
    %314 = vector.extract_strided_slice %313 {offsets = [0, 0], sizes = [1, 16], strides = [1, 1]} : vector<2x16xf32> to vector<1x16xf32>
    %cst_81 = arith.constant dense<0.000000e+00> : vector<1x16xf32>
    %315 = tpu.matmul %314, %173, %cst_81 {dimension_numbers = #tpu.dot_dimension_numbers<[1], [0], [0], [1], [0, 0, 1, 1], [], []>} : vector<1x16xf32>, vector<16x16xf32>, vector<1x16xf32> -> vector<1x16xf32>
    %c2_82 = arith.constant 2 : index
    %c0_83 = arith.constant 0 : index
    %316 = vector.load %arg20[%c2_82, %c0_83] : memref<9x48xf32, #tpu.memory_space<vmem>>, vector<1x16xf32>
    tpu.vector_store %arg20[%c2_82, %c0_83], %315 {strides = array<i32>} : memref<9x48xf32, #tpu.memory_space<vmem>>, vector<1x16xf32>,
    %317 = tpu.concatenate %227, %223 in 1 : vector<1x16xf32>, vector<1x16xf32> -> vector<1x32xf32>
    %318 = vector.extract_strided_slice %313 {offsets = [1, 0], sizes = [1, 16], strides = [1, 1]} : vector<2x16xf32> to vector<1x16xf32>
    %cst_84 = arith.constant dense<0.000000e+00> : vector<16x32xf32>
    %319 = tpu.matmul %318, %317, %cst_84 {dimension_numbers = #tpu.dot_dimension_numbers<[0], [0], [1], [1], [0, 1, 1, 1], [], []>} : vector<1x16xf32>, vector<1x32xf32>, vector<16x32xf32> -> vector<16x32xf32>
    %320 = vector.extract_strided_slice %319 {offsets = [0, 0], sizes = [16, 16], strides = [1, 1]} : vector<16x32xf32> to vector<16x16xf32>
    %cst_85 = arith.constant 1.000000e+00 : f32
    %321 = vector.broadcast %cst_85 : f32 to vector<16x16xf32>
    %322 = arith.subf %321, %320 : vector<16x16xf32>
    %323 = arith.mulf %173, %322 : vector<16x16xf32>
    %324 = vector.extract_strided_slice %319 {offsets = [0, 16], sizes = [16, 16], strides = [1, 1]} : vector<16x32xf32> to vector<16x16xf32>
    %325 = arith.addf %323, %324 : vector<16x16xf32>
    %c2_86 = arith.constant 2 : index
    %c0_87 = arith.constant 0 : index
    %326 = vector.load %arg20[%c2_86, %c0_87] : memref<9x48xf32, #tpu.memory_space<vmem>>, vector<1x48xf32>
    %cst_88 = arith.constant dense<0.000000e+00> : vector<1x128xf32>
    %327 = tpu.matmul %326, %7, %cst_88 {dimension_numbers = #tpu.dot_dimension_numbers<[1], [0], [0], [1], [0, 0, 1, 1], [], []>} : vector<1x48xf32>, vector<48x128xf32>, vector<1x128xf32> -> vector<1x128xf32>
    %328 = vector.extract_strided_slice %6 {offsets = [2, 0], sizes = [1, 128], strides = [1, 1]} : vector<8x128xf32> to vector<1x128xf32>
    %329 = arith.addf %327, %328 : vector<1x128xf32>
    %330 = vector.extract_strided_slice %329 {offsets = [0, 0], sizes = [1, 96], strides = [1, 1]} : vector<1x128xf32> to vector<1x96xf32>
    %331 = arith.negf %330 : vector<1x96xf32>
    %332 = math.exp %331 : vector<1x96xf32>
    %cst_89 = arith.constant 1.000000e+00 : f32
    %333 = vector.broadcast %cst_89 : f32 to vector<1x96xf32>
    %334 = arith.addf %333, %332 : vector<1x96xf32>
    %335 = arith.divf %333, %334 : vector<1x96xf32>
    %336 = vector.extract_strided_slice %335 {offsets = [0, 0], sizes = [1, 32], strides = [1, 1]} : vector<1x96xf32> to vector<1x32xf32>
    %337 = vector.extract_strided_slice %335 {offsets = [0, 32], sizes = [1, 32], strides = [1, 1]} : vector<1x96xf32> to vector<1x32xf32>
    %338 = vector.extract_strided_slice %335 {offsets = [0, 64], sizes = [1, 32], strides = [1, 1]} : vector<1x96xf32> to vector<1x32xf32>
    %339 = vector.extract_strided_slice %329 {offsets = [0, 96], sizes = [1, 32], strides = [1, 1]} : vector<1x128xf32> to vector<1x32xf32>
    %340 = math.tanh %339 : vector<1x32xf32>
    %341 = arith.mulf %337, %191 : vector<1x32xf32>
    %342 = arith.mulf %336, %340 : vector<1x32xf32>
    %343 = arith.addf %341, %342 : vector<1x32xf32>
    %344 = math.tanh %343 : vector<1x32xf32>
    %345 = arith.mulf %338, %344 : vector<1x32xf32>
    %c3 = arith.constant 3 : index
    %c16_90 = arith.constant 16 : index
    %346 = vector.load %arg20[%c3, %c16_90] : memref<9x48xf32, #tpu.memory_space<vmem>>, vector<1x32xf32>
    tpu.vector_store %arg20[%c3, %c16_90], %345 {strides = array<i32>} : memref<9x48xf32, #tpu.memory_space<vmem>>, vector<1x32xf32>,
    %cst_91 = arith.constant dense<0.000000e+00> : vector<1x76xf32>
    %347 = tpu.matmul %343, %8, %cst_91 {dimension_numbers = #tpu.dot_dimension_numbers<[1], [0], [0], [1], [0, 0, 1, 1], [], []>} : vector<1x32xf32>, vector<32x76xf32>, vector<1x76xf32> -> vector<1x76xf32>
    %348 = arith.addf %347, %9 : vector<1x76xf32>
    %349 = vector.extract_strided_slice %348 {offsets = [0, 0], sizes = [1, 48], strides = [1, 1]} : vector<1x76xf32> to vector<1x48xf32>
    %350 = math.tanh %349 : vector<1x48xf32>
    %351 = vector.extract_strided_slice %348 {offsets = [0, 48], sizes = [1, 18], strides = [1, 1]} : vector<1x76xf32> to vector<1x18xf32>
    %352 = arith.negf %351 : vector<1x18xf32>
    %353 = math.exp %352 : vector<1x18xf32>
    %cst_92 = arith.constant 1.000000e+00 : f32
    %354 = vector.broadcast %cst_92 : f32 to vector<1x18xf32>
    %355 = arith.addf %354, %353 : vector<1x18xf32>
    %356 = arith.divf %354, %355 : vector<1x18xf32>
    %357 = vector.extract_strided_slice %348 {offsets = [0, 66], sizes = [1, 4], strides = [1, 1]} : vector<1x76xf32> to vector<1x4xf32>
    %cst_93 = arith.constant 0.000000e+00 : f32
    %358 = vector.broadcast %cst_93 : f32 to vector<1x4xf32>
    %359 = arith.maximumf %357, %358 : vector<1x4xf32>
    %360 = vector.broadcast %cst_93 : f32 to vector<1x4xf32>
    %361 = arith.subf %357, %360 : vector<1x4xf32>
    %362 = arith.cmpf one, %361, %361 : vector<1x4xf32>
    %363 = vector.broadcast %cst_93 : f32 to vector<1x4xf32>
    %364 = arith.addf %357, %363 : vector<1x4xf32>
    %365 = math.absf %361 : vector<1x4xf32>
    %cst_94 = arith.constant 0.000000e+00 : f32
    %366 = vector.broadcast %cst_94 : f32 to vector<1x4xf32>
    %367 = arith.subf %366, %365 : vector<1x4xf32>
    %368 = math.exp %367 : vector<1x4xf32>
    %369 = math.log1p %368 : vector<1x4xf32>
    %370 = arith.addf %359, %369 : vector<1x4xf32>
    %371 = arith.select %362, %364, %370 : vector<1x4xi1>, vector<1x4xf32>
    %372 = vector.extract_strided_slice %350 {offsets = [0, 0], sizes = [1, 16], strides = [1, 1]} : vector<1x48xf32> to vector<1x16xf32>
    %373 = vector.extract_strided_slice %350 {offsets = [0, 16], sizes = [1, 16], strides = [1, 1]} : vector<1x48xf32> to vector<1x16xf32>
    %374 = tpu.concatenate %372, %373 in 0 : vector<1x16xf32>, vector<1x16xf32> -> vector<2x16xf32>
    %375 = vector.extract_strided_slice %350 {offsets = [0, 32], sizes = [1, 16], strides = [1, 1]} : vector<1x48xf32> to vector<1x16xf32>
    %376 = vector.extract_strided_slice %356 {offsets = [0, 0], sizes = [1, 1], strides = [1, 1]} : vector<1x18xf32> to vector<1x1xf32>
    %377 = vector.extract_strided_slice %356 {offsets = [0, 1], sizes = [1, 1], strides = [1, 1]} : vector<1x18xf32> to vector<1x1xf32>
    %378 = tpu.concatenate %376, %377 in 0 : vector<1x1xf32>, vector<1x1xf32> -> vector<2x1xf32>
    %379 = vector.extract_strided_slice %356 {offsets = [0, 2], sizes = [1, 16], strides = [1, 1]} : vector<1x18xf32> to vector<1x16xf32>
    %380 = vector.extract_strided_slice %371 {offsets = [0, 0], sizes = [1, 1], strides = [1, 1]} : vector<1x4xf32> to vector<1x1xf32>
    %381 = vector.extract_strided_slice %371 {offsets = [0, 1], sizes = [1, 1], strides = [1, 1]} : vector<1x4xf32> to vector<1x1xf32>
    %382 = tpu.concatenate %380, %381 in 0 : vector<1x1xf32>, vector<1x1xf32> -> vector<2x1xf32>
    %383 = vector.extract_strided_slice %371 {offsets = [0, 2], sizes = [1, 1], strides = [1, 1]} : vector<1x4xf32> to vector<1x1xf32>
    %384 = vector.extract_strided_slice %371 {offsets = [0, 3], sizes = [1, 1], strides = [1, 1]} : vector<1x4xf32> to vector<1x1xf32>
    %385 = tpu.concatenate %383, %384 in 0 : vector<1x1xf32>, vector<1x1xf32> -> vector<2x1xf32>
    %cst_95 = arith.constant 1.000000e+00 : f32
    %386 = vector.broadcast %cst_95 : f32 to vector<2x1xf32>
    %387 = arith.addf %386, %385 : vector<2x1xf32>
    %388 = vector.extract_strided_slice %348 {offsets = [0, 70], sizes = [1, 3], strides = [1, 1]} : vector<1x76xf32> to vector<1x3xf32>
    %389 = vector.extract_strided_slice %348 {offsets = [0, 73], sizes = [1, 3], strides = [1, 1]} : vector<1x76xf32> to vector<1x3xf32>
    %390 = tpu.concatenate %388, %389 in 0 : vector<1x3xf32>, vector<1x3xf32> -> vector<2x3xf32>
    %391 = arith.mulf %325, %325 : vector<16x16xf32>
    %cst_96 = arith.constant dense<0.000000e+00> : vector<16xf32>
    %392 = vector.multi_reduction <add>, %391, %cst_96 [1] : vector<16x16xf32> to vector<16xf32>
    %393 = vector.shape_cast %392 : vector<16xf32> to vector<16x1xf32>
    %cst_97 = arith.constant 1.000000e-16 : f32
    %394 = vector.broadcast %cst_97 : f32 to vector<16x1xf32>
    %395 = arith.maximumf %393, %394 : vector<16x1xf32>
    %396 = math.rsqrt %395 : vector<16x1xf32>
    %397 = vector.broadcast %396 : vector<16x1xf32> to vector<16x16xf32>
    %398 = arith.mulf %325, %397 : vector<16x16xf32>
    %399 = arith.mulf %374, %374 : vector<2x16xf32>
    %cst_98 = arith.constant dense<0.000000e+00> : vector<2xf32>
    %400 = vector.multi_reduction <add>, %399, %cst_98 [1] : vector<2x16xf32> to vector<2xf32>
    %401 = vector.shape_cast %400 : vector<2xf32> to vector<2x1xf32>
    %cst_99 = arith.constant dense<0.000000e+00> : vector<2x16xf32>
    %402 = tpu.matmul %374, %398, %cst_99 {dimension_numbers = #tpu.dot_dimension_numbers<[1], [1], [0], [0], [0, 0, 1, 0], [], []>} : vector<2x16xf32>, vector<16x16xf32>, vector<2x16xf32> -> vector<2x16xf32>
    %cst_100 = arith.constant 1.000000e-16 : f32
    %403 = vector.broadcast %cst_100 : f32 to vector<2x1xf32>
    %404 = arith.maximumf %401, %403 : vector<2x1xf32>
    %405 = math.rsqrt %404 : vector<2x1xf32>
    %406 = vector.broadcast %405 : vector<2x1xf32> to vector<2x16xf32>
    %407 = arith.mulf %402, %406 : vector<2x16xf32>
    %408 = vector.broadcast %382 : vector<2x1xf32> to vector<2x16xf32>
    %409 = arith.mulf %408, %407 : vector<2x16xf32>
    %cst_101 = arith.constant dense<0xFF800000> : vector<2xf32>
    %410 = vector.multi_reduction <maximumf>, %409, %cst_101 [1] : vector<2x16xf32> to vector<2xf32>
    %411 = vector.shape_cast %410 : vector<2xf32> to vector<2x1xf32>
    %412 = vector.broadcast %411 : vector<2x1xf32> to vector<2x16xf32>
    %413 = arith.subf %409, %412 : vector<2x16xf32>
    %414 = math.exp %413 : vector<2x16xf32>
    %cst_102 = arith.constant dense<0.000000e+00> : vector<2xf32>
    %415 = vector.multi_reduction <add>, %414, %cst_102 [1] : vector<2x16xf32> to vector<2xf32>
    %416 = vector.shape_cast %415 : vector<2xf32> to vector<2x1xf32>
    %417 = tpu.reciprocal %416 {approx = true} : vector<2x1xf32> -> vector<2x1xf32>
    %418 = vector.broadcast %417 : vector<2x1xf32> to vector<2x16xf32>
    %419 = arith.mulf %414, %418 : vector<2x16xf32>
    %420 = vector.broadcast %378 : vector<2x1xf32> to vector<2x16xf32>
    %421 = arith.mulf %420, %419 : vector<2x16xf32>
    %cst_103 = arith.constant 1.000000e+00 : f32
    %422 = vector.broadcast %cst_103 : f32 to vector<2x1xf32>
    %423 = arith.subf %422, %378 : vector<2x1xf32>
    %424 = vector.broadcast %423 : vector<2x1xf32> to vector<2x16xf32>
    %425 = arith.mulf %424, %313 : vector<2x16xf32>
    %426 = arith.addf %421, %425 : vector<2x16xf32>
    %cst_104 = arith.constant dense<0xFF800000> : vector<2xf32>
    %427 = vector.multi_reduction <maximumf>, %390, %cst_104 [1] : vector<2x3xf32> to vector<2xf32>
    %428 = vector.shape_cast %427 : vector<2xf32> to vector<2x1xf32>
    %429 = vector.broadcast %428 : vector<2x1xf32> to vector<2x3xf32>
    %430 = arith.subf %390, %429 : vector<2x3xf32>
    %431 = math.exp %430 : vector<2x3xf32>
    %cst_105 = arith.constant dense<0.000000e+00> : vector<2xf32>
    %432 = vector.multi_reduction <add>, %431, %cst_105 [1] : vector<2x3xf32> to vector<2xf32>
    %433 = vector.shape_cast %432 : vector<2xf32> to vector<2x1xf32>
    %434 = tpu.reciprocal %433 {approx = true} : vector<2x1xf32> -> vector<2x1xf32>
    %435 = vector.broadcast %434 : vector<2x1xf32> to vector<2x3xf32>
    %436 = arith.mulf %431, %435 : vector<2x3xf32>
    %437 = vector.extract_strided_slice %426 {offsets = [0, 15], sizes = [2, 1], strides = [1, 1]} : vector<2x16xf32> to vector<2x1xf32>
    %438 = vector.extract_strided_slice %426 {offsets = [0, 0], sizes = [2, 15], strides = [1, 1]} : vector<2x16xf32> to vector<2x15xf32>
    %439 = tpu.concatenate %437, %438 in 1 : vector<2x1xf32>, vector<2x15xf32> -> vector<2x16xf32>
    %440 = vector.extract_strided_slice %426 {offsets = [0, 1], sizes = [2, 15], strides = [1, 1]} : vector<2x16xf32> to vector<2x15xf32>
    %441 = vector.extract_strided_slice %426 {offsets = [0, 0], sizes = [2, 1], strides = [1, 1]} : vector<2x16xf32> to vector<2x1xf32>
    %442 = tpu.concatenate %440, %441 in 1 : vector<2x15xf32>, vector<2x1xf32> -> vector<2x16xf32>
    %443 = vector.extract_strided_slice %436 {offsets = [0, 0], sizes = [2, 1], strides = [1, 1]} : vector<2x3xf32> to vector<2x1xf32>
    %444 = vector.broadcast %443 : vector<2x1xf32> to vector<2x16xf32>
    %445 = arith.mulf %444, %439 : vector<2x16xf32>
    %446 = vector.extract_strided_slice %436 {offsets = [0, 1], sizes = [2, 1], strides = [1, 1]} : vector<2x3xf32> to vector<2x1xf32>
    %447 = vector.broadcast %446 : vector<2x1xf32> to vector<2x16xf32>
    %448 = arith.mulf %447, %426 : vector<2x16xf32>
    %449 = arith.addf %445, %448 : vector<2x16xf32>
    %450 = vector.extract_strided_slice %436 {offsets = [0, 2], sizes = [2, 1], strides = [1, 1]} : vector<2x3xf32> to vector<2x1xf32>
    %451 = vector.broadcast %450 : vector<2x1xf32> to vector<2x16xf32>
    %452 = arith.mulf %451, %442 : vector<2x16xf32>
    %453 = arith.addf %449, %452 : vector<2x16xf32>
    %cst_106 = arith.constant 1.000000e-30 : f32
    %454 = vector.broadcast %cst_106 : f32 to vector<2x16xf32>
    %455 = arith.maximumf %453, %454 : vector<2x16xf32>
    %456 = math.log %455 : vector<2x16xf32>
    %457 = vector.broadcast %387 : vector<2x1xf32> to vector<2x16xf32>
    %458 = arith.mulf %457, %456 : vector<2x16xf32>
    %459 = math.exp %458 : vector<2x16xf32>
    %cst_107 = arith.constant dense<0.000000e+00> : vector<2xf32>
    %460 = vector.multi_reduction <add>, %459, %cst_107 [1] : vector<2x16xf32> to vector<2xf32>
    %461 = vector.shape_cast %460 : vector<2xf32> to vector<2x1xf32>
    %cst_108 = arith.constant 1.000000e-16 : f32
    %462 = vector.broadcast %cst_108 : f32 to vector<2x1xf32>
    %463 = arith.addf %461, %462 : vector<2x1xf32>
    %464 = vector.broadcast %463 : vector<2x1xf32> to vector<2x16xf32>
    %465 = arith.divf %459, %464 : vector<2x16xf32>
    %466 = vector.extract_strided_slice %465 {offsets = [0, 0], sizes = [1, 16], strides = [1, 1]} : vector<2x16xf32> to vector<1x16xf32>
    %cst_109 = arith.constant dense<0.000000e+00> : vector<1x16xf32>
    %467 = tpu.matmul %466, %325, %cst_109 {dimension_numbers = #tpu.dot_dimension_numbers<[1], [0], [0], [1], [0, 0, 1, 1], [], []>} : vector<1x16xf32>, vector<16x16xf32>, vector<1x16xf32> -> vector<1x16xf32>
    %c3_110 = arith.constant 3 : index
    %c0_111 = arith.constant 0 : index
    %468 = vector.load %arg20[%c3_110, %c0_111] : memref<9x48xf32, #tpu.memory_space<vmem>>, vector<1x16xf32>
    tpu.vector_store %arg20[%c3_110, %c0_111], %467 {strides = array<i32>} : memref<9x48xf32, #tpu.memory_space<vmem>>, vector<1x16xf32>,
    %469 = tpu.concatenate %379, %375 in 1 : vector<1x16xf32>, vector<1x16xf32> -> vector<1x32xf32>
    %470 = vector.extract_strided_slice %465 {offsets = [1, 0], sizes = [1, 16], strides = [1, 1]} : vector<2x16xf32> to vector<1x16xf32>
    %cst_112 = arith.constant dense<0.000000e+00> : vector<16x32xf32>
    %471 = tpu.matmul %470, %469, %cst_112 {dimension_numbers = #tpu.dot_dimension_numbers<[0], [0], [1], [1], [0, 1, 1, 1], [], []>} : vector<1x16xf32>, vector<1x32xf32>, vector<16x32xf32> -> vector<16x32xf32>
    %472 = vector.extract_strided_slice %471 {offsets = [0, 0], sizes = [16, 16], strides = [1, 1]} : vector<16x32xf32> to vector<16x16xf32>
    %cst_113 = arith.constant 1.000000e+00 : f32
    %473 = vector.broadcast %cst_113 : f32 to vector<16x16xf32>
    %474 = arith.subf %473, %472 : vector<16x16xf32>
    %475 = arith.mulf %325, %474 : vector<16x16xf32>
    %476 = vector.extract_strided_slice %471 {offsets = [0, 16], sizes = [16, 16], strides = [1, 1]} : vector<16x32xf32> to vector<16x16xf32>
    %477 = arith.addf %475, %476 : vector<16x16xf32>
    %c3_114 = arith.constant 3 : index
    %c0_115 = arith.constant 0 : index
    %478 = vector.load %arg20[%c3_114, %c0_115] : memref<9x48xf32, #tpu.memory_space<vmem>>, vector<1x48xf32>
    %cst_116 = arith.constant dense<0.000000e+00> : vector<1x128xf32>
    %479 = tpu.matmul %478, %7, %cst_116 {dimension_numbers = #tpu.dot_dimension_numbers<[1], [0], [0], [1], [0, 0, 1, 1], [], []>} : vector<1x48xf32>, vector<48x128xf32>, vector<1x128xf32> -> vector<1x128xf32>
    %480 = vector.extract_strided_slice %6 {offsets = [3, 0], sizes = [1, 128], strides = [1, 1]} : vector<8x128xf32> to vector<1x128xf32>
    %481 = arith.addf %479, %480 : vector<1x128xf32>
    %482 = vector.extract_strided_slice %481 {offsets = [0, 0], sizes = [1, 96], strides = [1, 1]} : vector<1x128xf32> to vector<1x96xf32>
    %483 = arith.negf %482 : vector<1x96xf32>
    %484 = math.exp %483 : vector<1x96xf32>
    %cst_117 = arith.constant 1.000000e+00 : f32
    %485 = vector.broadcast %cst_117 : f32 to vector<1x96xf32>
    %486 = arith.addf %485, %484 : vector<1x96xf32>
    %487 = arith.divf %485, %486 : vector<1x96xf32>
    %488 = vector.extract_strided_slice %487 {offsets = [0, 0], sizes = [1, 32], strides = [1, 1]} : vector<1x96xf32> to vector<1x32xf32>
    %489 = vector.extract_strided_slice %487 {offsets = [0, 32], sizes = [1, 32], strides = [1, 1]} : vector<1x96xf32> to vector<1x32xf32>
    %490 = vector.extract_strided_slice %487 {offsets = [0, 64], sizes = [1, 32], strides = [1, 1]} : vector<1x96xf32> to vector<1x32xf32>
    %491 = vector.extract_strided_slice %481 {offsets = [0, 96], sizes = [1, 32], strides = [1, 1]} : vector<1x128xf32> to vector<1x32xf32>
    %492 = math.tanh %491 : vector<1x32xf32>
    %493 = arith.mulf %489, %343 : vector<1x32xf32>
    %494 = arith.mulf %488, %492 : vector<1x32xf32>
    %495 = arith.addf %493, %494 : vector<1x32xf32>
    %496 = math.tanh %495 : vector<1x32xf32>
    %497 = arith.mulf %490, %496 : vector<1x32xf32>
    %c4 = arith.constant 4 : index
    %c16_118 = arith.constant 16 : index
    %498 = vector.load %arg20[%c4, %c16_118] : memref<9x48xf32, #tpu.memory_space<vmem>>, vector<1x32xf32>
    tpu.vector_store %arg20[%c4, %c16_118], %497 {strides = array<i32>} : memref<9x48xf32, #tpu.memory_space<vmem>>, vector<1x32xf32>,
    %cst_119 = arith.constant dense<0.000000e+00> : vector<1x76xf32>
    %499 = tpu.matmul %495, %8, %cst_119 {dimension_numbers = #tpu.dot_dimension_numbers<[1], [0], [0], [1], [0, 0, 1, 1], [], []>} : vector<1x32xf32>, vector<32x76xf32>, vector<1x76xf32> -> vector<1x76xf32>
    %500 = arith.addf %499, %9 : vector<1x76xf32>
    %501 = vector.extract_strided_slice %500 {offsets = [0, 0], sizes = [1, 48], strides = [1, 1]} : vector<1x76xf32> to vector<1x48xf32>
    %502 = math.tanh %501 : vector<1x48xf32>
    %503 = vector.extract_strided_slice %500 {offsets = [0, 48], sizes = [1, 18], strides = [1, 1]} : vector<1x76xf32> to vector<1x18xf32>
    %504 = arith.negf %503 : vector<1x18xf32>
    %505 = math.exp %504 : vector<1x18xf32>
    %cst_120 = arith.constant 1.000000e+00 : f32
    %506 = vector.broadcast %cst_120 : f32 to vector<1x18xf32>
    %507 = arith.addf %506, %505 : vector<1x18xf32>
    %508 = arith.divf %506, %507 : vector<1x18xf32>
    %509 = vector.extract_strided_slice %500 {offsets = [0, 66], sizes = [1, 4], strides = [1, 1]} : vector<1x76xf32> to vector<1x4xf32>
    %cst_121 = arith.constant 0.000000e+00 : f32
    %510 = vector.broadcast %cst_121 : f32 to vector<1x4xf32>
    %511 = arith.maximumf %509, %510 : vector<1x4xf32>
    %512 = vector.broadcast %cst_121 : f32 to vector<1x4xf32>
    %513 = arith.subf %509, %512 : vector<1x4xf32>
    %514 = arith.cmpf one, %513, %513 : vector<1x4xf32>
    %515 = vector.broadcast %cst_121 : f32 to vector<1x4xf32>
    %516 = arith.addf %509, %515 : vector<1x4xf32>
    %517 = math.absf %513 : vector<1x4xf32>
    %cst_122 = arith.constant 0.000000e+00 : f32
    %518 = vector.broadcast %cst_122 : f32 to vector<1x4xf32>
    %519 = arith.subf %518, %517 : vector<1x4xf32>
    %520 = math.exp %519 : vector<1x4xf32>
    %521 = math.log1p %520 : vector<1x4xf32>
    %522 = arith.addf %511, %521 : vector<1x4xf32>
    %523 = arith.select %514, %516, %522 : vector<1x4xi1>, vector<1x4xf32>
    %524 = vector.extract_strided_slice %502 {offsets = [0, 0], sizes = [1, 16], strides = [1, 1]} : vector<1x48xf32> to vector<1x16xf32>
    %525 = vector.extract_strided_slice %502 {offsets = [0, 16], sizes = [1, 16], strides = [1, 1]} : vector<1x48xf32> to vector<1x16xf32>
    %526 = tpu.concatenate %524, %525 in 0 : vector<1x16xf32>, vector<1x16xf32> -> vector<2x16xf32>
    %527 = vector.extract_strided_slice %502 {offsets = [0, 32], sizes = [1, 16], strides = [1, 1]} : vector<1x48xf32> to vector<1x16xf32>
    %528 = vector.extract_strided_slice %508 {offsets = [0, 0], sizes = [1, 1], strides = [1, 1]} : vector<1x18xf32> to vector<1x1xf32>
    %529 = vector.extract_strided_slice %508 {offsets = [0, 1], sizes = [1, 1], strides = [1, 1]} : vector<1x18xf32> to vector<1x1xf32>
    %530 = tpu.concatenate %528, %529 in 0 : vector<1x1xf32>, vector<1x1xf32> -> vector<2x1xf32>
    %531 = vector.extract_strided_slice %508 {offsets = [0, 2], sizes = [1, 16], strides = [1, 1]} : vector<1x18xf32> to vector<1x16xf32>
    %532 = vector.extract_strided_slice %523 {offsets = [0, 0], sizes = [1, 1], strides = [1, 1]} : vector<1x4xf32> to vector<1x1xf32>
    %533 = vector.extract_strided_slice %523 {offsets = [0, 1], sizes = [1, 1], strides = [1, 1]} : vector<1x4xf32> to vector<1x1xf32>
    %534 = tpu.concatenate %532, %533 in 0 : vector<1x1xf32>, vector<1x1xf32> -> vector<2x1xf32>
    %535 = vector.extract_strided_slice %523 {offsets = [0, 2], sizes = [1, 1], strides = [1, 1]} : vector<1x4xf32> to vector<1x1xf32>
    %536 = vector.extract_strided_slice %523 {offsets = [0, 3], sizes = [1, 1], strides = [1, 1]} : vector<1x4xf32> to vector<1x1xf32>
    %537 = tpu.concatenate %535, %536 in 0 : vector<1x1xf32>, vector<1x1xf32> -> vector<2x1xf32>
    %cst_123 = arith.constant 1.000000e+00 : f32
    %538 = vector.broadcast %cst_123 : f32 to vector<2x1xf32>
    %539 = arith.addf %538, %537 : vector<2x1xf32>
    %540 = vector.extract_strided_slice %500 {offsets = [0, 70], sizes = [1, 3], strides = [1, 1]} : vector<1x76xf32> to vector<1x3xf32>
    %541 = vector.extract_strided_slice %500 {offsets = [0, 73], sizes = [1, 3], strides = [1, 1]} : vector<1x76xf32> to vector<1x3xf32>
    %542 = tpu.concatenate %540, %541 in 0 : vector<1x3xf32>, vector<1x3xf32> -> vector<2x3xf32>
    %543 = arith.mulf %477, %477 : vector<16x16xf32>
    %cst_124 = arith.constant dense<0.000000e+00> : vector<16xf32>
    %544 = vector.multi_reduction <add>, %543, %cst_124 [1] : vector<16x16xf32> to vector<16xf32>
    %545 = vector.shape_cast %544 : vector<16xf32> to vector<16x1xf32>
    %cst_125 = arith.constant 1.000000e-16 : f32
    %546 = vector.broadcast %cst_125 : f32 to vector<16x1xf32>
    %547 = arith.maximumf %545, %546 : vector<16x1xf32>
    %548 = math.rsqrt %547 : vector<16x1xf32>
    %549 = vector.broadcast %548 : vector<16x1xf32> to vector<16x16xf32>
    %550 = arith.mulf %477, %549 : vector<16x16xf32>
    %551 = arith.mulf %526, %526 : vector<2x16xf32>
    %cst_126 = arith.constant dense<0.000000e+00> : vector<2xf32>
    %552 = vector.multi_reduction <add>, %551, %cst_126 [1] : vector<2x16xf32> to vector<2xf32>
    %553 = vector.shape_cast %552 : vector<2xf32> to vector<2x1xf32>
    %cst_127 = arith.constant dense<0.000000e+00> : vector<2x16xf32>
    %554 = tpu.matmul %526, %550, %cst_127 {dimension_numbers = #tpu.dot_dimension_numbers<[1], [1], [0], [0], [0, 0, 1, 0], [], []>} : vector<2x16xf32>, vector<16x16xf32>, vector<2x16xf32> -> vector<2x16xf32>
    %cst_128 = arith.constant 1.000000e-16 : f32
    %555 = vector.broadcast %cst_128 : f32 to vector<2x1xf32>
    %556 = arith.maximumf %553, %555 : vector<2x1xf32>
    %557 = math.rsqrt %556 : vector<2x1xf32>
    %558 = vector.broadcast %557 : vector<2x1xf32> to vector<2x16xf32>
    %559 = arith.mulf %554, %558 : vector<2x16xf32>
    %560 = vector.broadcast %534 : vector<2x1xf32> to vector<2x16xf32>
    %561 = arith.mulf %560, %559 : vector<2x16xf32>
    %cst_129 = arith.constant dense<0xFF800000> : vector<2xf32>
    %562 = vector.multi_reduction <maximumf>, %561, %cst_129 [1] : vector<2x16xf32> to vector<2xf32>
    %563 = vector.shape_cast %562 : vector<2xf32> to vector<2x1xf32>
    %564 = vector.broadcast %563 : vector<2x1xf32> to vector<2x16xf32>
    %565 = arith.subf %561, %564 : vector<2x16xf32>
    %566 = math.exp %565 : vector<2x16xf32>
    %cst_130 = arith.constant dense<0.000000e+00> : vector<2xf32>
    %567 = vector.multi_reduction <add>, %566, %cst_130 [1] : vector<2x16xf32> to vector<2xf32>
    %568 = vector.shape_cast %567 : vector<2xf32> to vector<2x1xf32>
    %569 = tpu.reciprocal %568 {approx = true} : vector<2x1xf32> -> vector<2x1xf32>
    %570 = vector.broadcast %569 : vector<2x1xf32> to vector<2x16xf32>
    %571 = arith.mulf %566, %570 : vector<2x16xf32>
    %572 = vector.broadcast %530 : vector<2x1xf32> to vector<2x16xf32>
    %573 = arith.mulf %572, %571 : vector<2x16xf32>
    %cst_131 = arith.constant 1.000000e+00 : f32
    %574 = vector.broadcast %cst_131 : f32 to vector<2x1xf32>
    %575 = arith.subf %574, %530 : vector<2x1xf32>
    %576 = vector.broadcast %575 : vector<2x1xf32> to vector<2x16xf32>
    %577 = arith.mulf %576, %465 : vector<2x16xf32>
    %578 = arith.addf %573, %577 : vector<2x16xf32>
    %cst_132 = arith.constant dense<0xFF800000> : vector<2xf32>
    %579 = vector.multi_reduction <maximumf>, %542, %cst_132 [1] : vector<2x3xf32> to vector<2xf32>
    %580 = vector.shape_cast %579 : vector<2xf32> to vector<2x1xf32>
    %581 = vector.broadcast %580 : vector<2x1xf32> to vector<2x3xf32>
    %582 = arith.subf %542, %581 : vector<2x3xf32>
    %583 = math.exp %582 : vector<2x3xf32>
    %cst_133 = arith.constant dense<0.000000e+00> : vector<2xf32>
    %584 = vector.multi_reduction <add>, %583, %cst_133 [1] : vector<2x3xf32> to vector<2xf32>
    %585 = vector.shape_cast %584 : vector<2xf32> to vector<2x1xf32>
    %586 = tpu.reciprocal %585 {approx = true} : vector<2x1xf32> -> vector<2x1xf32>
    %587 = vector.broadcast %586 : vector<2x1xf32> to vector<2x3xf32>
    %588 = arith.mulf %583, %587 : vector<2x3xf32>
    %589 = vector.extract_strided_slice %578 {offsets = [0, 15], sizes = [2, 1], strides = [1, 1]} : vector<2x16xf32> to vector<2x1xf32>
    %590 = vector.extract_strided_slice %578 {offsets = [0, 0], sizes = [2, 15], strides = [1, 1]} : vector<2x16xf32> to vector<2x15xf32>
    %591 = tpu.concatenate %589, %590 in 1 : vector<2x1xf32>, vector<2x15xf32> -> vector<2x16xf32>
    %592 = vector.extract_strided_slice %578 {offsets = [0, 1], sizes = [2, 15], strides = [1, 1]} : vector<2x16xf32> to vector<2x15xf32>
    %593 = vector.extract_strided_slice %578 {offsets = [0, 0], sizes = [2, 1], strides = [1, 1]} : vector<2x16xf32> to vector<2x1xf32>
    %594 = tpu.concatenate %592, %593 in 1 : vector<2x15xf32>, vector<2x1xf32> -> vector<2x16xf32>
    %595 = vector.extract_strided_slice %588 {offsets = [0, 0], sizes = [2, 1], strides = [1, 1]} : vector<2x3xf32> to vector<2x1xf32>
    %596 = vector.broadcast %595 : vector<2x1xf32> to vector<2x16xf32>
    %597 = arith.mulf %596, %591 : vector<2x16xf32>
    %598 = vector.extract_strided_slice %588 {offsets = [0, 1], sizes = [2, 1], strides = [1, 1]} : vector<2x3xf32> to vector<2x1xf32>
    %599 = vector.broadcast %598 : vector<2x1xf32> to vector<2x16xf32>
    %600 = arith.mulf %599, %578 : vector<2x16xf32>
    %601 = arith.addf %597, %600 : vector<2x16xf32>
    %602 = vector.extract_strided_slice %588 {offsets = [0, 2], sizes = [2, 1], strides = [1, 1]} : vector<2x3xf32> to vector<2x1xf32>
    %603 = vector.broadcast %602 : vector<2x1xf32> to vector<2x16xf32>
    %604 = arith.mulf %603, %594 : vector<2x16xf32>
    %605 = arith.addf %601, %604 : vector<2x16xf32>
    %cst_134 = arith.constant 1.000000e-30 : f32
    %606 = vector.broadcast %cst_134 : f32 to vector<2x16xf32>
    %607 = arith.maximumf %605, %606 : vector<2x16xf32>
    %608 = math.log %607 : vector<2x16xf32>
    %609 = vector.broadcast %539 : vector<2x1xf32> to vector<2x16xf32>
    %610 = arith.mulf %609, %608 : vector<2x16xf32>
    %611 = math.exp %610 : vector<2x16xf32>
    %cst_135 = arith.constant dense<0.000000e+00> : vector<2xf32>
    %612 = vector.multi_reduction <add>, %611, %cst_135 [1] : vector<2x16xf32> to vector<2xf32>
    %613 = vector.shape_cast %612 : vector<2xf32> to vector<2x1xf32>
    %cst_136 = arith.constant 1.000000e-16 : f32
    %614 = vector.broadcast %cst_136 : f32 to vector<2x1xf32>
    %615 = arith.addf %613, %614 : vector<2x1xf32>
    %616 = vector.broadcast %615 : vector<2x1xf32> to vector<2x16xf32>
    %617 = arith.divf %611, %616 : vector<2x16xf32>
    %618 = vector.extract_strided_slice %617 {offsets = [0, 0], sizes = [1, 16], strides = [1, 1]} : vector<2x16xf32> to vector<1x16xf32>
    %cst_137 = arith.constant dense<0.000000e+00> : vector<1x16xf32>
    %619 = tpu.matmul %618, %477, %cst_137 {dimension_numbers = #tpu.dot_dimension_numbers<[1], [0], [0], [1], [0, 0, 1, 1], [], []>} : vector<1x16xf32>, vector<16x16xf32>, vector<1x16xf32> -> vector<1x16xf32>
    %c4_138 = arith.constant 4 : index
    %c0_139 = arith.constant 0 : index
    %620 = vector.load %arg20[%c4_138, %c0_139] : memref<9x48xf32, #tpu.memory_space<vmem>>, vector<1x16xf32>
    tpu.vector_store %arg20[%c4_138, %c0_139], %619 {strides = array<i32>} : memref<9x48xf32, #tpu.memory_space<vmem>>, vector<1x16xf32>,
    %621 = tpu.concatenate %531, %527 in 1 : vector<1x16xf32>, vector<1x16xf32> -> vector<1x32xf32>
    %622 = vector.extract_strided_slice %617 {offsets = [1, 0], sizes = [1, 16], strides = [1, 1]} : vector<2x16xf32> to vector<1x16xf32>
    %cst_140 = arith.constant dense<0.000000e+00> : vector<16x32xf32>
    %623 = tpu.matmul %622, %621, %cst_140 {dimension_numbers = #tpu.dot_dimension_numbers<[0], [0], [1], [1], [0, 1, 1, 1], [], []>} : vector<1x16xf32>, vector<1x32xf32>, vector<16x32xf32> -> vector<16x32xf32>
    %624 = vector.extract_strided_slice %623 {offsets = [0, 0], sizes = [16, 16], strides = [1, 1]} : vector<16x32xf32> to vector<16x16xf32>
    %cst_141 = arith.constant 1.000000e+00 : f32
    %625 = vector.broadcast %cst_141 : f32 to vector<16x16xf32>
    %626 = arith.subf %625, %624 : vector<16x16xf32>
    %627 = arith.mulf %477, %626 : vector<16x16xf32>
    %628 = vector.extract_strided_slice %623 {offsets = [0, 16], sizes = [16, 16], strides = [1, 1]} : vector<16x32xf32> to vector<16x16xf32>
    %629 = arith.addf %627, %628 : vector<16x16xf32>
    %c4_142 = arith.constant 4 : index
    %c0_143 = arith.constant 0 : index
    %630 = vector.load %arg20[%c4_142, %c0_143] : memref<9x48xf32, #tpu.memory_space<vmem>>, vector<1x48xf32>
    %cst_144 = arith.constant dense<0.000000e+00> : vector<1x128xf32>
    %631 = tpu.matmul %630, %7, %cst_144 {dimension_numbers = #tpu.dot_dimension_numbers<[1], [0], [0], [1], [0, 0, 1, 1], [], []>} : vector<1x48xf32>, vector<48x128xf32>, vector<1x128xf32> -> vector<1x128xf32>
    %632 = vector.extract_strided_slice %6 {offsets = [4, 0], sizes = [1, 128], strides = [1, 1]} : vector<8x128xf32> to vector<1x128xf32>
    %633 = arith.addf %631, %632 : vector<1x128xf32>
    %634 = vector.extract_strided_slice %633 {offsets = [0, 0], sizes = [1, 96], strides = [1, 1]} : vector<1x128xf32> to vector<1x96xf32>
    %635 = arith.negf %634 : vector<1x96xf32>
    %636 = math.exp %635 : vector<1x96xf32>
    %cst_145 = arith.constant 1.000000e+00 : f32
    %637 = vector.broadcast %cst_145 : f32 to vector<1x96xf32>
    %638 = arith.addf %637, %636 : vector<1x96xf32>
    %639 = arith.divf %637, %638 : vector<1x96xf32>
    %640 = vector.extract_strided_slice %639 {offsets = [0, 0], sizes = [1, 32], strides = [1, 1]} : vector<1x96xf32> to vector<1x32xf32>
    %641 = vector.extract_strided_slice %639 {offsets = [0, 32], sizes = [1, 32], strides = [1, 1]} : vector<1x96xf32> to vector<1x32xf32>
    %642 = vector.extract_strided_slice %639 {offsets = [0, 64], sizes = [1, 32], strides = [1, 1]} : vector<1x96xf32> to vector<1x32xf32>
    %643 = vector.extract_strided_slice %633 {offsets = [0, 96], sizes = [1, 32], strides = [1, 1]} : vector<1x128xf32> to vector<1x32xf32>
    %644 = math.tanh %643 : vector<1x32xf32>
    %645 = arith.mulf %641, %495 : vector<1x32xf32>
    %646 = arith.mulf %640, %644 : vector<1x32xf32>
    %647 = arith.addf %645, %646 : vector<1x32xf32>
    %648 = math.tanh %647 : vector<1x32xf32>
    %649 = arith.mulf %642, %648 : vector<1x32xf32>
    %c5 = arith.constant 5 : index
    %c16_146 = arith.constant 16 : index
    %650 = vector.load %arg20[%c5, %c16_146] : memref<9x48xf32, #tpu.memory_space<vmem>>, vector<1x32xf32>
    tpu.vector_store %arg20[%c5, %c16_146], %649 {strides = array<i32>} : memref<9x48xf32, #tpu.memory_space<vmem>>, vector<1x32xf32>,
    %cst_147 = arith.constant dense<0.000000e+00> : vector<1x76xf32>
    %651 = tpu.matmul %647, %8, %cst_147 {dimension_numbers = #tpu.dot_dimension_numbers<[1], [0], [0], [1], [0, 0, 1, 1], [], []>} : vector<1x32xf32>, vector<32x76xf32>, vector<1x76xf32> -> vector<1x76xf32>
    %652 = arith.addf %651, %9 : vector<1x76xf32>
    %653 = vector.extract_strided_slice %652 {offsets = [0, 0], sizes = [1, 48], strides = [1, 1]} : vector<1x76xf32> to vector<1x48xf32>
    %654 = math.tanh %653 : vector<1x48xf32>
    %655 = vector.extract_strided_slice %652 {offsets = [0, 48], sizes = [1, 18], strides = [1, 1]} : vector<1x76xf32> to vector<1x18xf32>
    %656 = arith.negf %655 : vector<1x18xf32>
    %657 = math.exp %656 : vector<1x18xf32>
    %cst_148 = arith.constant 1.000000e+00 : f32
    %658 = vector.broadcast %cst_148 : f32 to vector<1x18xf32>
    %659 = arith.addf %658, %657 : vector<1x18xf32>
    %660 = arith.divf %658, %659 : vector<1x18xf32>
    %661 = vector.extract_strided_slice %652 {offsets = [0, 66], sizes = [1, 4], strides = [1, 1]} : vector<1x76xf32> to vector<1x4xf32>
    %cst_149 = arith.constant 0.000000e+00 : f32
    %662 = vector.broadcast %cst_149 : f32 to vector<1x4xf32>
    %663 = arith.maximumf %661, %662 : vector<1x4xf32>
    %664 = vector.broadcast %cst_149 : f32 to vector<1x4xf32>
    %665 = arith.subf %661, %664 : vector<1x4xf32>
    %666 = arith.cmpf one, %665, %665 : vector<1x4xf32>
    %667 = vector.broadcast %cst_149 : f32 to vector<1x4xf32>
    %668 = arith.addf %661, %667 : vector<1x4xf32>
    %669 = math.absf %665 : vector<1x4xf32>
    %cst_150 = arith.constant 0.000000e+00 : f32
    %670 = vector.broadcast %cst_150 : f32 to vector<1x4xf32>
    %671 = arith.subf %670, %669 : vector<1x4xf32>
    %672 = math.exp %671 : vector<1x4xf32>
    %673 = math.log1p %672 : vector<1x4xf32>
    %674 = arith.addf %663, %673 : vector<1x4xf32>
    %675 = arith.select %666, %668, %674 : vector<1x4xi1>, vector<1x4xf32>
    %676 = vector.extract_strided_slice %654 {offsets = [0, 0], sizes = [1, 16], strides = [1, 1]} : vector<1x48xf32> to vector<1x16xf32>
    %677 = vector.extract_strided_slice %654 {offsets = [0, 16], sizes = [1, 16], strides = [1, 1]} : vector<1x48xf32> to vector<1x16xf32>
    %678 = tpu.concatenate %676, %677 in 0 : vector<1x16xf32>, vector<1x16xf32> -> vector<2x16xf32>
    %679 = vector.extract_strided_slice %654 {offsets = [0, 32], sizes = [1, 16], strides = [1, 1]} : vector<1x48xf32> to vector<1x16xf32>
    %680 = vector.extract_strided_slice %660 {offsets = [0, 0], sizes = [1, 1], strides = [1, 1]} : vector<1x18xf32> to vector<1x1xf32>
    %681 = vector.extract_strided_slice %660 {offsets = [0, 1], sizes = [1, 1], strides = [1, 1]} : vector<1x18xf32> to vector<1x1xf32>
    %682 = tpu.concatenate %680, %681 in 0 : vector<1x1xf32>, vector<1x1xf32> -> vector<2x1xf32>
    %683 = vector.extract_strided_slice %660 {offsets = [0, 2], sizes = [1, 16], strides = [1, 1]} : vector<1x18xf32> to vector<1x16xf32>
    %684 = vector.extract_strided_slice %675 {offsets = [0, 0], sizes = [1, 1], strides = [1, 1]} : vector<1x4xf32> to vector<1x1xf32>
    %685 = vector.extract_strided_slice %675 {offsets = [0, 1], sizes = [1, 1], strides = [1, 1]} : vector<1x4xf32> to vector<1x1xf32>
    %686 = tpu.concatenate %684, %685 in 0 : vector<1x1xf32>, vector<1x1xf32> -> vector<2x1xf32>
    %687 = vector.extract_strided_slice %675 {offsets = [0, 2], sizes = [1, 1], strides = [1, 1]} : vector<1x4xf32> to vector<1x1xf32>
    %688 = vector.extract_strided_slice %675 {offsets = [0, 3], sizes = [1, 1], strides = [1, 1]} : vector<1x4xf32> to vector<1x1xf32>
    %689 = tpu.concatenate %687, %688 in 0 : vector<1x1xf32>, vector<1x1xf32> -> vector<2x1xf32>
    %cst_151 = arith.constant 1.000000e+00 : f32
    %690 = vector.broadcast %cst_151 : f32 to vector<2x1xf32>
    %691 = arith.addf %690, %689 : vector<2x1xf32>
    %692 = vector.extract_strided_slice %652 {offsets = [0, 70], sizes = [1, 3], strides = [1, 1]} : vector<1x76xf32> to vector<1x3xf32>
    %693 = vector.extract_strided_slice %652 {offsets = [0, 73], sizes = [1, 3], strides = [1, 1]} : vector<1x76xf32> to vector<1x3xf32>
    %694 = tpu.concatenate %692, %693 in 0 : vector<1x3xf32>, vector<1x3xf32> -> vector<2x3xf32>
    %695 = arith.mulf %629, %629 : vector<16x16xf32>
    %cst_152 = arith.constant dense<0.000000e+00> : vector<16xf32>
    %696 = vector.multi_reduction <add>, %695, %cst_152 [1] : vector<16x16xf32> to vector<16xf32>
    %697 = vector.shape_cast %696 : vector<16xf32> to vector<16x1xf32>
    %cst_153 = arith.constant 1.000000e-16 : f32
    %698 = vector.broadcast %cst_153 : f32 to vector<16x1xf32>
    %699 = arith.maximumf %697, %698 : vector<16x1xf32>
    %700 = math.rsqrt %699 : vector<16x1xf32>
    %701 = vector.broadcast %700 : vector<16x1xf32> to vector<16x16xf32>
    %702 = arith.mulf %629, %701 : vector<16x16xf32>
    %703 = arith.mulf %678, %678 : vector<2x16xf32>
    %cst_154 = arith.constant dense<0.000000e+00> : vector<2xf32>
    %704 = vector.multi_reduction <add>, %703, %cst_154 [1] : vector<2x16xf32> to vector<2xf32>
    %705 = vector.shape_cast %704 : vector<2xf32> to vector<2x1xf32>
    %cst_155 = arith.constant dense<0.000000e+00> : vector<2x16xf32>
    %706 = tpu.matmul %678, %702, %cst_155 {dimension_numbers = #tpu.dot_dimension_numbers<[1], [1], [0], [0], [0, 0, 1, 0], [], []>} : vector<2x16xf32>, vector<16x16xf32>, vector<2x16xf32> -> vector<2x16xf32>
    %cst_156 = arith.constant 1.000000e-16 : f32
    %707 = vector.broadcast %cst_156 : f32 to vector<2x1xf32>
    %708 = arith.maximumf %705, %707 : vector<2x1xf32>
    %709 = math.rsqrt %708 : vector<2x1xf32>
    %710 = vector.broadcast %709 : vector<2x1xf32> to vector<2x16xf32>
    %711 = arith.mulf %706, %710 : vector<2x16xf32>
    %712 = vector.broadcast %686 : vector<2x1xf32> to vector<2x16xf32>
    %713 = arith.mulf %712, %711 : vector<2x16xf32>
    %cst_157 = arith.constant dense<0xFF800000> : vector<2xf32>
    %714 = vector.multi_reduction <maximumf>, %713, %cst_157 [1] : vector<2x16xf32> to vector<2xf32>
    %715 = vector.shape_cast %714 : vector<2xf32> to vector<2x1xf32>
    %716 = vector.broadcast %715 : vector<2x1xf32> to vector<2x16xf32>
    %717 = arith.subf %713, %716 : vector<2x16xf32>
    %718 = math.exp %717 : vector<2x16xf32>
    %cst_158 = arith.constant dense<0.000000e+00> : vector<2xf32>
    %719 = vector.multi_reduction <add>, %718, %cst_158 [1] : vector<2x16xf32> to vector<2xf32>
    %720 = vector.shape_cast %719 : vector<2xf32> to vector<2x1xf32>
    %721 = tpu.reciprocal %720 {approx = true} : vector<2x1xf32> -> vector<2x1xf32>
    %722 = vector.broadcast %721 : vector<2x1xf32> to vector<2x16xf32>
    %723 = arith.mulf %718, %722 : vector<2x16xf32>
    %724 = vector.broadcast %682 : vector<2x1xf32> to vector<2x16xf32>
    %725 = arith.mulf %724, %723 : vector<2x16xf32>
    %cst_159 = arith.constant 1.000000e+00 : f32
    %726 = vector.broadcast %cst_159 : f32 to vector<2x1xf32>
    %727 = arith.subf %726, %682 : vector<2x1xf32>
    %728 = vector.broadcast %727 : vector<2x1xf32> to vector<2x16xf32>
    %729 = arith.mulf %728, %617 : vector<2x16xf32>
    %730 = arith.addf %725, %729 : vector<2x16xf32>
    %cst_160 = arith.constant dense<0xFF800000> : vector<2xf32>
    %731 = vector.multi_reduction <maximumf>, %694, %cst_160 [1] : vector<2x3xf32> to vector<2xf32>
    %732 = vector.shape_cast %731 : vector<2xf32> to vector<2x1xf32>
    %733 = vector.broadcast %732 : vector<2x1xf32> to vector<2x3xf32>
    %734 = arith.subf %694, %733 : vector<2x3xf32>
    %735 = math.exp %734 : vector<2x3xf32>
    %cst_161 = arith.constant dense<0.000000e+00> : vector<2xf32>
    %736 = vector.multi_reduction <add>, %735, %cst_161 [1] : vector<2x3xf32> to vector<2xf32>
    %737 = vector.shape_cast %736 : vector<2xf32> to vector<2x1xf32>
    %738 = tpu.reciprocal %737 {approx = true} : vector<2x1xf32> -> vector<2x1xf32>
    %739 = vector.broadcast %738 : vector<2x1xf32> to vector<2x3xf32>
    %740 = arith.mulf %735, %739 : vector<2x3xf32>
    %741 = vector.extract_strided_slice %730 {offsets = [0, 15], sizes = [2, 1], strides = [1, 1]} : vector<2x16xf32> to vector<2x1xf32>
    %742 = vector.extract_strided_slice %730 {offsets = [0, 0], sizes = [2, 15], strides = [1, 1]} : vector<2x16xf32> to vector<2x15xf32>
    %743 = tpu.concatenate %741, %742 in 1 : vector<2x1xf32>, vector<2x15xf32> -> vector<2x16xf32>
    %744 = vector.extract_strided_slice %730 {offsets = [0, 1], sizes = [2, 15], strides = [1, 1]} : vector<2x16xf32> to vector<2x15xf32>
    %745 = vector.extract_strided_slice %730 {offsets = [0, 0], sizes = [2, 1], strides = [1, 1]} : vector<2x16xf32> to vector<2x1xf32>
    %746 = tpu.concatenate %744, %745 in 1 : vector<2x15xf32>, vector<2x1xf32> -> vector<2x16xf32>
    %747 = vector.extract_strided_slice %740 {offsets = [0, 0], sizes = [2, 1], strides = [1, 1]} : vector<2x3xf32> to vector<2x1xf32>
    %748 = vector.broadcast %747 : vector<2x1xf32> to vector<2x16xf32>
    %749 = arith.mulf %748, %743 : vector<2x16xf32>
    %750 = vector.extract_strided_slice %740 {offsets = [0, 1], sizes = [2, 1], strides = [1, 1]} : vector<2x3xf32> to vector<2x1xf32>
    %751 = vector.broadcast %750 : vector<2x1xf32> to vector<2x16xf32>
    %752 = arith.mulf %751, %730 : vector<2x16xf32>
    %753 = arith.addf %749, %752 : vector<2x16xf32>
    %754 = vector.extract_strided_slice %740 {offsets = [0, 2], sizes = [2, 1], strides = [1, 1]} : vector<2x3xf32> to vector<2x1xf32>
    %755 = vector.broadcast %754 : vector<2x1xf32> to vector<2x16xf32>
    %756 = arith.mulf %755, %746 : vector<2x16xf32>
    %757 = arith.addf %753, %756 : vector<2x16xf32>
    %cst_162 = arith.constant 1.000000e-30 : f32
    %758 = vector.broadcast %cst_162 : f32 to vector<2x16xf32>
    %759 = arith.maximumf %757, %758 : vector<2x16xf32>
    %760 = math.log %759 : vector<2x16xf32>
    %761 = vector.broadcast %691 : vector<2x1xf32> to vector<2x16xf32>
    %762 = arith.mulf %761, %760 : vector<2x16xf32>
    %763 = math.exp %762 : vector<2x16xf32>
    %cst_163 = arith.constant dense<0.000000e+00> : vector<2xf32>
    %764 = vector.multi_reduction <add>, %763, %cst_163 [1] : vector<2x16xf32> to vector<2xf32>
    %765 = vector.shape_cast %764 : vector<2xf32> to vector<2x1xf32>
    %cst_164 = arith.constant 1.000000e-16 : f32
    %766 = vector.broadcast %cst_164 : f32 to vector<2x1xf32>
    %767 = arith.addf %765, %766 : vector<2x1xf32>
    %768 = vector.broadcast %767 : vector<2x1xf32> to vector<2x16xf32>
    %769 = arith.divf %763, %768 : vector<2x16xf32>
    %770 = vector.extract_strided_slice %769 {offsets = [0, 0], sizes = [1, 16], strides = [1, 1]} : vector<2x16xf32> to vector<1x16xf32>
    %cst_165 = arith.constant dense<0.000000e+00> : vector<1x16xf32>
    %771 = tpu.matmul %770, %629, %cst_165 {dimension_numbers = #tpu.dot_dimension_numbers<[1], [0], [0], [1], [0, 0, 1, 1], [], []>} : vector<1x16xf32>, vector<16x16xf32>, vector<1x16xf32> -> vector<1x16xf32>
    %c5_166 = arith.constant 5 : index
    %c0_167 = arith.constant 0 : index
    %772 = vector.load %arg20[%c5_166, %c0_167] : memref<9x48xf32, #tpu.memory_space<vmem>>, vector<1x16xf32>
    tpu.vector_store %arg20[%c5_166, %c0_167], %771 {strides = array<i32>} : memref<9x48xf32, #tpu.memory_space<vmem>>, vector<1x16xf32>,
    %773 = tpu.concatenate %683, %679 in 1 : vector<1x16xf32>, vector<1x16xf32> -> vector<1x32xf32>
    %774 = vector.extract_strided_slice %769 {offsets = [1, 0], sizes = [1, 16], strides = [1, 1]} : vector<2x16xf32> to vector<1x16xf32>
    %cst_168 = arith.constant dense<0.000000e+00> : vector<16x32xf32>
    %775 = tpu.matmul %774, %773, %cst_168 {dimension_numbers = #tpu.dot_dimension_numbers<[0], [0], [1], [1], [0, 1, 1, 1], [], []>} : vector<1x16xf32>, vector<1x32xf32>, vector<16x32xf32> -> vector<16x32xf32>
    %776 = vector.extract_strided_slice %775 {offsets = [0, 0], sizes = [16, 16], strides = [1, 1]} : vector<16x32xf32> to vector<16x16xf32>
    %cst_169 = arith.constant 1.000000e+00 : f32
    %777 = vector.broadcast %cst_169 : f32 to vector<16x16xf32>
    %778 = arith.subf %777, %776 : vector<16x16xf32>
    %779 = arith.mulf %629, %778 : vector<16x16xf32>
    %780 = vector.extract_strided_slice %775 {offsets = [0, 16], sizes = [16, 16], strides = [1, 1]} : vector<16x32xf32> to vector<16x16xf32>
    %781 = arith.addf %779, %780 : vector<16x16xf32>
    %c5_170 = arith.constant 5 : index
    %c0_171 = arith.constant 0 : index
    %782 = vector.load %arg20[%c5_170, %c0_171] : memref<9x48xf32, #tpu.memory_space<vmem>>, vector<1x48xf32>
    %cst_172 = arith.constant dense<0.000000e+00> : vector<1x128xf32>
    %783 = tpu.matmul %782, %7, %cst_172 {dimension_numbers = #tpu.dot_dimension_numbers<[1], [0], [0], [1], [0, 0, 1, 1], [], []>} : vector<1x48xf32>, vector<48x128xf32>, vector<1x128xf32> -> vector<1x128xf32>
    %784 = vector.extract_strided_slice %6 {offsets = [5, 0], sizes = [1, 128], strides = [1, 1]} : vector<8x128xf32> to vector<1x128xf32>
    %785 = arith.addf %783, %784 : vector<1x128xf32>
    %786 = vector.extract_strided_slice %785 {offsets = [0, 0], sizes = [1, 96], strides = [1, 1]} : vector<1x128xf32> to vector<1x96xf32>
    %787 = arith.negf %786 : vector<1x96xf32>
    %788 = math.exp %787 : vector<1x96xf32>
    %cst_173 = arith.constant 1.000000e+00 : f32
    %789 = vector.broadcast %cst_173 : f32 to vector<1x96xf32>
    %790 = arith.addf %789, %788 : vector<1x96xf32>
    %791 = arith.divf %789, %790 : vector<1x96xf32>
    %792 = vector.extract_strided_slice %791 {offsets = [0, 0], sizes = [1, 32], strides = [1, 1]} : vector<1x96xf32> to vector<1x32xf32>
    %793 = vector.extract_strided_slice %791 {offsets = [0, 32], sizes = [1, 32], strides = [1, 1]} : vector<1x96xf32> to vector<1x32xf32>
    %794 = vector.extract_strided_slice %791 {offsets = [0, 64], sizes = [1, 32], strides = [1, 1]} : vector<1x96xf32> to vector<1x32xf32>
    %795 = vector.extract_strided_slice %785 {offsets = [0, 96], sizes = [1, 32], strides = [1, 1]} : vector<1x128xf32> to vector<1x32xf32>
    %796 = math.tanh %795 : vector<1x32xf32>
    %797 = arith.mulf %793, %647 : vector<1x32xf32>
    %798 = arith.mulf %792, %796 : vector<1x32xf32>
    %799 = arith.addf %797, %798 : vector<1x32xf32>
    %800 = math.tanh %799 : vector<1x32xf32>
    %801 = arith.mulf %794, %800 : vector<1x32xf32>
    %c6 = arith.constant 6 : index
    %c16_174 = arith.constant 16 : index
    %802 = vector.load %arg20[%c6, %c16_174] : memref<9x48xf32, #tpu.memory_space<vmem>>, vector<1x32xf32>
    tpu.vector_store %arg20[%c6, %c16_174], %801 {strides = array<i32>} : memref<9x48xf32, #tpu.memory_space<vmem>>, vector<1x32xf32>,
    %cst_175 = arith.constant dense<0.000000e+00> : vector<1x76xf32>
    %803 = tpu.matmul %799, %8, %cst_175 {dimension_numbers = #tpu.dot_dimension_numbers<[1], [0], [0], [1], [0, 0, 1, 1], [], []>} : vector<1x32xf32>, vector<32x76xf32>, vector<1x76xf32> -> vector<1x76xf32>
    %804 = arith.addf %803, %9 : vector<1x76xf32>
    %805 = vector.extract_strided_slice %804 {offsets = [0, 0], sizes = [1, 48], strides = [1, 1]} : vector<1x76xf32> to vector<1x48xf32>
    %806 = math.tanh %805 : vector<1x48xf32>
    %807 = vector.extract_strided_slice %804 {offsets = [0, 48], sizes = [1, 18], strides = [1, 1]} : vector<1x76xf32> to vector<1x18xf32>
    %808 = arith.negf %807 : vector<1x18xf32>
    %809 = math.exp %808 : vector<1x18xf32>
    %cst_176 = arith.constant 1.000000e+00 : f32
    %810 = vector.broadcast %cst_176 : f32 to vector<1x18xf32>
    %811 = arith.addf %810, %809 : vector<1x18xf32>
    %812 = arith.divf %810, %811 : vector<1x18xf32>
    %813 = vector.extract_strided_slice %804 {offsets = [0, 66], sizes = [1, 4], strides = [1, 1]} : vector<1x76xf32> to vector<1x4xf32>
    %cst_177 = arith.constant 0.000000e+00 : f32
    %814 = vector.broadcast %cst_177 : f32 to vector<1x4xf32>
    %815 = arith.maximumf %813, %814 : vector<1x4xf32>
    %816 = vector.broadcast %cst_177 : f32 to vector<1x4xf32>
    %817 = arith.subf %813, %816 : vector<1x4xf32>
    %818 = arith.cmpf one, %817, %817 : vector<1x4xf32>
    %819 = vector.broadcast %cst_177 : f32 to vector<1x4xf32>
    %820 = arith.addf %813, %819 : vector<1x4xf32>
    %821 = math.absf %817 : vector<1x4xf32>
    %cst_178 = arith.constant 0.000000e+00 : f32
    %822 = vector.broadcast %cst_178 : f32 to vector<1x4xf32>
    %823 = arith.subf %822, %821 : vector<1x4xf32>
    %824 = math.exp %823 : vector<1x4xf32>
    %825 = math.log1p %824 : vector<1x4xf32>
    %826 = arith.addf %815, %825 : vector<1x4xf32>
    %827 = arith.select %818, %820, %826 : vector<1x4xi1>, vector<1x4xf32>
    %828 = vector.extract_strided_slice %806 {offsets = [0, 0], sizes = [1, 16], strides = [1, 1]} : vector<1x48xf32> to vector<1x16xf32>
    %829 = vector.extract_strided_slice %806 {offsets = [0, 16], sizes = [1, 16], strides = [1, 1]} : vector<1x48xf32> to vector<1x16xf32>
    %830 = tpu.concatenate %828, %829 in 0 : vector<1x16xf32>, vector<1x16xf32> -> vector<2x16xf32>
    %831 = vector.extract_strided_slice %806 {offsets = [0, 32], sizes = [1, 16], strides = [1, 1]} : vector<1x48xf32> to vector<1x16xf32>
    %832 = vector.extract_strided_slice %812 {offsets = [0, 0], sizes = [1, 1], strides = [1, 1]} : vector<1x18xf32> to vector<1x1xf32>
    %833 = vector.extract_strided_slice %812 {offsets = [0, 1], sizes = [1, 1], strides = [1, 1]} : vector<1x18xf32> to vector<1x1xf32>
    %834 = tpu.concatenate %832, %833 in 0 : vector<1x1xf32>, vector<1x1xf32> -> vector<2x1xf32>
    %835 = vector.extract_strided_slice %812 {offsets = [0, 2], sizes = [1, 16], strides = [1, 1]} : vector<1x18xf32> to vector<1x16xf32>
    %836 = vector.extract_strided_slice %827 {offsets = [0, 0], sizes = [1, 1], strides = [1, 1]} : vector<1x4xf32> to vector<1x1xf32>
    %837 = vector.extract_strided_slice %827 {offsets = [0, 1], sizes = [1, 1], strides = [1, 1]} : vector<1x4xf32> to vector<1x1xf32>
    %838 = tpu.concatenate %836, %837 in 0 : vector<1x1xf32>, vector<1x1xf32> -> vector<2x1xf32>
    %839 = vector.extract_strided_slice %827 {offsets = [0, 2], sizes = [1, 1], strides = [1, 1]} : vector<1x4xf32> to vector<1x1xf32>
    %840 = vector.extract_strided_slice %827 {offsets = [0, 3], sizes = [1, 1], strides = [1, 1]} : vector<1x4xf32> to vector<1x1xf32>
    %841 = tpu.concatenate %839, %840 in 0 : vector<1x1xf32>, vector<1x1xf32> -> vector<2x1xf32>
    %cst_179 = arith.constant 1.000000e+00 : f32
    %842 = vector.broadcast %cst_179 : f32 to vector<2x1xf32>
    %843 = arith.addf %842, %841 : vector<2x1xf32>
    %844 = vector.extract_strided_slice %804 {offsets = [0, 70], sizes = [1, 3], strides = [1, 1]} : vector<1x76xf32> to vector<1x3xf32>
    %845 = vector.extract_strided_slice %804 {offsets = [0, 73], sizes = [1, 3], strides = [1, 1]} : vector<1x76xf32> to vector<1x3xf32>
    %846 = tpu.concatenate %844, %845 in 0 : vector<1x3xf32>, vector<1x3xf32> -> vector<2x3xf32>
    %847 = arith.mulf %781, %781 : vector<16x16xf32>
    %cst_180 = arith.constant dense<0.000000e+00> : vector<16xf32>
    %848 = vector.multi_reduction <add>, %847, %cst_180 [1] : vector<16x16xf32> to vector<16xf32>
    %849 = vector.shape_cast %848 : vector<16xf32> to vector<16x1xf32>
    %cst_181 = arith.constant 1.000000e-16 : f32
    %850 = vector.broadcast %cst_181 : f32 to vector<16x1xf32>
    %851 = arith.maximumf %849, %850 : vector<16x1xf32>
    %852 = math.rsqrt %851 : vector<16x1xf32>
    %853 = vector.broadcast %852 : vector<16x1xf32> to vector<16x16xf32>
    %854 = arith.mulf %781, %853 : vector<16x16xf32>
    %855 = arith.mulf %830, %830 : vector<2x16xf32>
    %cst_182 = arith.constant dense<0.000000e+00> : vector<2xf32>
    %856 = vector.multi_reduction <add>, %855, %cst_182 [1] : vector<2x16xf32> to vector<2xf32>
    %857 = vector.shape_cast %856 : vector<2xf32> to vector<2x1xf32>
    %cst_183 = arith.constant dense<0.000000e+00> : vector<2x16xf32>
    %858 = tpu.matmul %830, %854, %cst_183 {dimension_numbers = #tpu.dot_dimension_numbers<[1], [1], [0], [0], [0, 0, 1, 0], [], []>} : vector<2x16xf32>, vector<16x16xf32>, vector<2x16xf32> -> vector<2x16xf32>
    %cst_184 = arith.constant 1.000000e-16 : f32
    %859 = vector.broadcast %cst_184 : f32 to vector<2x1xf32>
    %860 = arith.maximumf %857, %859 : vector<2x1xf32>
    %861 = math.rsqrt %860 : vector<2x1xf32>
    %862 = vector.broadcast %861 : vector<2x1xf32> to vector<2x16xf32>
    %863 = arith.mulf %858, %862 : vector<2x16xf32>
    %864 = vector.broadcast %838 : vector<2x1xf32> to vector<2x16xf32>
    %865 = arith.mulf %864, %863 : vector<2x16xf32>
    %cst_185 = arith.constant dense<0xFF800000> : vector<2xf32>
    %866 = vector.multi_reduction <maximumf>, %865, %cst_185 [1] : vector<2x16xf32> to vector<2xf32>
    %867 = vector.shape_cast %866 : vector<2xf32> to vector<2x1xf32>
    %868 = vector.broadcast %867 : vector<2x1xf32> to vector<2x16xf32>
    %869 = arith.subf %865, %868 : vector<2x16xf32>
    %870 = math.exp %869 : vector<2x16xf32>
    %cst_186 = arith.constant dense<0.000000e+00> : vector<2xf32>
    %871 = vector.multi_reduction <add>, %870, %cst_186 [1] : vector<2x16xf32> to vector<2xf32>
    %872 = vector.shape_cast %871 : vector<2xf32> to vector<2x1xf32>
    %873 = tpu.reciprocal %872 {approx = true} : vector<2x1xf32> -> vector<2x1xf32>
    %874 = vector.broadcast %873 : vector<2x1xf32> to vector<2x16xf32>
    %875 = arith.mulf %870, %874 : vector<2x16xf32>
    %876 = vector.broadcast %834 : vector<2x1xf32> to vector<2x16xf32>
    %877 = arith.mulf %876, %875 : vector<2x16xf32>
    %cst_187 = arith.constant 1.000000e+00 : f32
    %878 = vector.broadcast %cst_187 : f32 to vector<2x1xf32>
    %879 = arith.subf %878, %834 : vector<2x1xf32>
    %880 = vector.broadcast %879 : vector<2x1xf32> to vector<2x16xf32>
    %881 = arith.mulf %880, %769 : vector<2x16xf32>
    %882 = arith.addf %877, %881 : vector<2x16xf32>
    %cst_188 = arith.constant dense<0xFF800000> : vector<2xf32>
    %883 = vector.multi_reduction <maximumf>, %846, %cst_188 [1] : vector<2x3xf32> to vector<2xf32>
    %884 = vector.shape_cast %883 : vector<2xf32> to vector<2x1xf32>
    %885 = vector.broadcast %884 : vector<2x1xf32> to vector<2x3xf32>
    %886 = arith.subf %846, %885 : vector<2x3xf32>
    %887 = math.exp %886 : vector<2x3xf32>
    %cst_189 = arith.constant dense<0.000000e+00> : vector<2xf32>
    %888 = vector.multi_reduction <add>, %887, %cst_189 [1] : vector<2x3xf32> to vector<2xf32>
    %889 = vector.shape_cast %888 : vector<2xf32> to vector<2x1xf32>
    %890 = tpu.reciprocal %889 {approx = true} : vector<2x1xf32> -> vector<2x1xf32>
    %891 = vector.broadcast %890 : vector<2x1xf32> to vector<2x3xf32>
    %892 = arith.mulf %887, %891 : vector<2x3xf32>
    %893 = vector.extract_strided_slice %882 {offsets = [0, 15], sizes = [2, 1], strides = [1, 1]} : vector<2x16xf32> to vector<2x1xf32>
    %894 = vector.extract_strided_slice %882 {offsets = [0, 0], sizes = [2, 15], strides = [1, 1]} : vector<2x16xf32> to vector<2x15xf32>
    %895 = tpu.concatenate %893, %894 in 1 : vector<2x1xf32>, vector<2x15xf32> -> vector<2x16xf32>
    %896 = vector.extract_strided_slice %882 {offsets = [0, 1], sizes = [2, 15], strides = [1, 1]} : vector<2x16xf32> to vector<2x15xf32>
    %897 = vector.extract_strided_slice %882 {offsets = [0, 0], sizes = [2, 1], strides = [1, 1]} : vector<2x16xf32> to vector<2x1xf32>
    %898 = tpu.concatenate %896, %897 in 1 : vector<2x15xf32>, vector<2x1xf32> -> vector<2x16xf32>
    %899 = vector.extract_strided_slice %892 {offsets = [0, 0], sizes = [2, 1], strides = [1, 1]} : vector<2x3xf32> to vector<2x1xf32>
    %900 = vector.broadcast %899 : vector<2x1xf32> to vector<2x16xf32>
    %901 = arith.mulf %900, %895 : vector<2x16xf32>
    %902 = vector.extract_strided_slice %892 {offsets = [0, 1], sizes = [2, 1], strides = [1, 1]} : vector<2x3xf32> to vector<2x1xf32>
    %903 = vector.broadcast %902 : vector<2x1xf32> to vector<2x16xf32>
    %904 = arith.mulf %903, %882 : vector<2x16xf32>
    %905 = arith.addf %901, %904 : vector<2x16xf32>
    %906 = vector.extract_strided_slice %892 {offsets = [0, 2], sizes = [2, 1], strides = [1, 1]} : vector<2x3xf32> to vector<2x1xf32>
    %907 = vector.broadcast %906 : vector<2x1xf32> to vector<2x16xf32>
    %908 = arith.mulf %907, %898 : vector<2x16xf32>
    %909 = arith.addf %905, %908 : vector<2x16xf32>
    %cst_190 = arith.constant 1.000000e-30 : f32
    %910 = vector.broadcast %cst_190 : f32 to vector<2x16xf32>
    %911 = arith.maximumf %909, %910 : vector<2x16xf32>
    %912 = math.log %911 : vector<2x16xf32>
    %913 = vector.broadcast %843 : vector<2x1xf32> to vector<2x16xf32>
    %914 = arith.mulf %913, %912 : vector<2x16xf32>
    %915 = math.exp %914 : vector<2x16xf32>
    %cst_191 = arith.constant dense<0.000000e+00> : vector<2xf32>
    %916 = vector.multi_reduction <add>, %915, %cst_191 [1] : vector<2x16xf32> to vector<2xf32>
    %917 = vector.shape_cast %916 : vector<2xf32> to vector<2x1xf32>
    %cst_192 = arith.constant 1.000000e-16 : f32
    %918 = vector.broadcast %cst_192 : f32 to vector<2x1xf32>
    %919 = arith.addf %917, %918 : vector<2x1xf32>
    %920 = vector.broadcast %919 : vector<2x1xf32> to vector<2x16xf32>
    %921 = arith.divf %915, %920 : vector<2x16xf32>
    %922 = vector.extract_strided_slice %921 {offsets = [0, 0], sizes = [1, 16], strides = [1, 1]} : vector<2x16xf32> to vector<1x16xf32>
    %cst_193 = arith.constant dense<0.000000e+00> : vector<1x16xf32>
    %923 = tpu.matmul %922, %781, %cst_193 {dimension_numbers = #tpu.dot_dimension_numbers<[1], [0], [0], [1], [0, 0, 1, 1], [], []>} : vector<1x16xf32>, vector<16x16xf32>, vector<1x16xf32> -> vector<1x16xf32>
    %c6_194 = arith.constant 6 : index
    %c0_195 = arith.constant 0 : index
    %924 = vector.load %arg20[%c6_194, %c0_195] : memref<9x48xf32, #tpu.memory_space<vmem>>, vector<1x16xf32>
    tpu.vector_store %arg20[%c6_194, %c0_195], %923 {strides = array<i32>} : memref<9x48xf32, #tpu.memory_space<vmem>>, vector<1x16xf32>,
    %925 = tpu.concatenate %835, %831 in 1 : vector<1x16xf32>, vector<1x16xf32> -> vector<1x32xf32>
    %926 = vector.extract_strided_slice %921 {offsets = [1, 0], sizes = [1, 16], strides = [1, 1]} : vector<2x16xf32> to vector<1x16xf32>
    %cst_196 = arith.constant dense<0.000000e+00> : vector<16x32xf32>
    %927 = tpu.matmul %926, %925, %cst_196 {dimension_numbers = #tpu.dot_dimension_numbers<[0], [0], [1], [1], [0, 1, 1, 1], [], []>} : vector<1x16xf32>, vector<1x32xf32>, vector<16x32xf32> -> vector<16x32xf32>
    %928 = vector.extract_strided_slice %927 {offsets = [0, 0], sizes = [16, 16], strides = [1, 1]} : vector<16x32xf32> to vector<16x16xf32>
    %cst_197 = arith.constant 1.000000e+00 : f32
    %929 = vector.broadcast %cst_197 : f32 to vector<16x16xf32>
    %930 = arith.subf %929, %928 : vector<16x16xf32>
    %931 = arith.mulf %781, %930 : vector<16x16xf32>
    %932 = vector.extract_strided_slice %927 {offsets = [0, 16], sizes = [16, 16], strides = [1, 1]} : vector<16x32xf32> to vector<16x16xf32>
    %933 = arith.addf %931, %932 : vector<16x16xf32>
    %c6_198 = arith.constant 6 : index
    %c0_199 = arith.constant 0 : index
    %934 = vector.load %arg20[%c6_198, %c0_199] : memref<9x48xf32, #tpu.memory_space<vmem>>, vector<1x48xf32>
    %cst_200 = arith.constant dense<0.000000e+00> : vector<1x128xf32>
    %935 = tpu.matmul %934, %7, %cst_200 {dimension_numbers = #tpu.dot_dimension_numbers<[1], [0], [0], [1], [0, 0, 1, 1], [], []>} : vector<1x48xf32>, vector<48x128xf32>, vector<1x128xf32> -> vector<1x128xf32>
    %936 = vector.extract_strided_slice %6 {offsets = [6, 0], sizes = [1, 128], strides = [1, 1]} : vector<8x128xf32> to vector<1x128xf32>
    %937 = arith.addf %935, %936 : vector<1x128xf32>
    %938 = vector.extract_strided_slice %937 {offsets = [0, 0], sizes = [1, 96], strides = [1, 1]} : vector<1x128xf32> to vector<1x96xf32>
    %939 = arith.negf %938 : vector<1x96xf32>
    %940 = math.exp %939 : vector<1x96xf32>
    %cst_201 = arith.constant 1.000000e+00 : f32
    %941 = vector.broadcast %cst_201 : f32 to vector<1x96xf32>
    %942 = arith.addf %941, %940 : vector<1x96xf32>
    %943 = arith.divf %941, %942 : vector<1x96xf32>
    %944 = vector.extract_strided_slice %943 {offsets = [0, 0], sizes = [1, 32], strides = [1, 1]} : vector<1x96xf32> to vector<1x32xf32>
    %945 = vector.extract_strided_slice %943 {offsets = [0, 32], sizes = [1, 32], strides = [1, 1]} : vector<1x96xf32> to vector<1x32xf32>
    %946 = vector.extract_strided_slice %943 {offsets = [0, 64], sizes = [1, 32], strides = [1, 1]} : vector<1x96xf32> to vector<1x32xf32>
    %947 = vector.extract_strided_slice %937 {offsets = [0, 96], sizes = [1, 32], strides = [1, 1]} : vector<1x128xf32> to vector<1x32xf32>
    %948 = math.tanh %947 : vector<1x32xf32>
    %949 = arith.mulf %945, %799 : vector<1x32xf32>
    %950 = arith.mulf %944, %948 : vector<1x32xf32>
    %951 = arith.addf %949, %950 : vector<1x32xf32>
    %952 = math.tanh %951 : vector<1x32xf32>
    %953 = arith.mulf %946, %952 : vector<1x32xf32>
    %c7 = arith.constant 7 : index
    %c16_202 = arith.constant 16 : index
    %954 = vector.load %arg20[%c7, %c16_202] : memref<9x48xf32, #tpu.memory_space<vmem>>, vector<1x32xf32>
    tpu.vector_store %arg20[%c7, %c16_202], %953 {strides = array<i32>} : memref<9x48xf32, #tpu.memory_space<vmem>>, vector<1x32xf32>,
    %cst_203 = arith.constant dense<0.000000e+00> : vector<1x76xf32>
    %955 = tpu.matmul %951, %8, %cst_203 {dimension_numbers = #tpu.dot_dimension_numbers<[1], [0], [0], [1], [0, 0, 1, 1], [], []>} : vector<1x32xf32>, vector<32x76xf32>, vector<1x76xf32> -> vector<1x76xf32>
    %956 = arith.addf %955, %9 : vector<1x76xf32>
    %957 = vector.extract_strided_slice %956 {offsets = [0, 0], sizes = [1, 48], strides = [1, 1]} : vector<1x76xf32> to vector<1x48xf32>
    %958 = math.tanh %957 : vector<1x48xf32>
    %959 = vector.extract_strided_slice %956 {offsets = [0, 48], sizes = [1, 18], strides = [1, 1]} : vector<1x76xf32> to vector<1x18xf32>
    %960 = arith.negf %959 : vector<1x18xf32>
    %961 = math.exp %960 : vector<1x18xf32>
    %cst_204 = arith.constant 1.000000e+00 : f32
    %962 = vector.broadcast %cst_204 : f32 to vector<1x18xf32>
    %963 = arith.addf %962, %961 : vector<1x18xf32>
    %964 = arith.divf %962, %963 : vector<1x18xf32>
    %965 = vector.extract_strided_slice %956 {offsets = [0, 66], sizes = [1, 4], strides = [1, 1]} : vector<1x76xf32> to vector<1x4xf32>
    %cst_205 = arith.constant 0.000000e+00 : f32
    %966 = vector.broadcast %cst_205 : f32 to vector<1x4xf32>
    %967 = arith.maximumf %965, %966 : vector<1x4xf32>
    %968 = vector.broadcast %cst_205 : f32 to vector<1x4xf32>
    %969 = arith.subf %965, %968 : vector<1x4xf32>
    %970 = arith.cmpf one, %969, %969 : vector<1x4xf32>
    %971 = vector.broadcast %cst_205 : f32 to vector<1x4xf32>
    %972 = arith.addf %965, %971 : vector<1x4xf32>
    %973 = math.absf %969 : vector<1x4xf32>
    %cst_206 = arith.constant 0.000000e+00 : f32
    %974 = vector.broadcast %cst_206 : f32 to vector<1x4xf32>
    %975 = arith.subf %974, %973 : vector<1x4xf32>
    %976 = math.exp %975 : vector<1x4xf32>
    %977 = math.log1p %976 : vector<1x4xf32>
    %978 = arith.addf %967, %977 : vector<1x4xf32>
    %979 = arith.select %970, %972, %978 : vector<1x4xi1>, vector<1x4xf32>
    %980 = vector.extract_strided_slice %958 {offsets = [0, 0], sizes = [1, 16], strides = [1, 1]} : vector<1x48xf32> to vector<1x16xf32>
    %981 = vector.extract_strided_slice %958 {offsets = [0, 16], sizes = [1, 16], strides = [1, 1]} : vector<1x48xf32> to vector<1x16xf32>
    %982 = tpu.concatenate %980, %981 in 0 : vector<1x16xf32>, vector<1x16xf32> -> vector<2x16xf32>
    %983 = vector.extract_strided_slice %958 {offsets = [0, 32], sizes = [1, 16], strides = [1, 1]} : vector<1x48xf32> to vector<1x16xf32>
    %984 = vector.extract_strided_slice %964 {offsets = [0, 0], sizes = [1, 1], strides = [1, 1]} : vector<1x18xf32> to vector<1x1xf32>
    %985 = vector.extract_strided_slice %964 {offsets = [0, 1], sizes = [1, 1], strides = [1, 1]} : vector<1x18xf32> to vector<1x1xf32>
    %986 = tpu.concatenate %984, %985 in 0 : vector<1x1xf32>, vector<1x1xf32> -> vector<2x1xf32>
    %987 = vector.extract_strided_slice %964 {offsets = [0, 2], sizes = [1, 16], strides = [1, 1]} : vector<1x18xf32> to vector<1x16xf32>
    %988 = vector.extract_strided_slice %979 {offsets = [0, 0], sizes = [1, 1], strides = [1, 1]} : vector<1x4xf32> to vector<1x1xf32>
    %989 = vector.extract_strided_slice %979 {offsets = [0, 1], sizes = [1, 1], strides = [1, 1]} : vector<1x4xf32> to vector<1x1xf32>
    %990 = tpu.concatenate %988, %989 in 0 : vector<1x1xf32>, vector<1x1xf32> -> vector<2x1xf32>
    %991 = vector.extract_strided_slice %979 {offsets = [0, 2], sizes = [1, 1], strides = [1, 1]} : vector<1x4xf32> to vector<1x1xf32>
    %992 = vector.extract_strided_slice %979 {offsets = [0, 3], sizes = [1, 1], strides = [1, 1]} : vector<1x4xf32> to vector<1x1xf32>
    %993 = tpu.concatenate %991, %992 in 0 : vector<1x1xf32>, vector<1x1xf32> -> vector<2x1xf32>
    %cst_207 = arith.constant 1.000000e+00 : f32
    %994 = vector.broadcast %cst_207 : f32 to vector<2x1xf32>
    %995 = arith.addf %994, %993 : vector<2x1xf32>
    %996 = vector.extract_strided_slice %956 {offsets = [0, 70], sizes = [1, 3], strides = [1, 1]} : vector<1x76xf32> to vector<1x3xf32>
    %997 = vector.extract_strided_slice %956 {offsets = [0, 73], sizes = [1, 3], strides = [1, 1]} : vector<1x76xf32> to vector<1x3xf32>
    %998 = tpu.concatenate %996, %997 in 0 : vector<1x3xf32>, vector<1x3xf32> -> vector<2x3xf32>
    %999 = arith.mulf %933, %933 : vector<16x16xf32>
    %cst_208 = arith.constant dense<0.000000e+00> : vector<16xf32>
    %1000 = vector.multi_reduction <add>, %999, %cst_208 [1] : vector<16x16xf32> to vector<16xf32>
    %1001 = vector.shape_cast %1000 : vector<16xf32> to vector<16x1xf32>
    %cst_209 = arith.constant 1.000000e-16 : f32
    %1002 = vector.broadcast %cst_209 : f32 to vector<16x1xf32>
    %1003 = arith.maximumf %1001, %1002 : vector<16x1xf32>
    %1004 = math.rsqrt %1003 : vector<16x1xf32>
    %1005 = vector.broadcast %1004 : vector<16x1xf32> to vector<16x16xf32>
    %1006 = arith.mulf %933, %1005 : vector<16x16xf32>
    %1007 = arith.mulf %982, %982 : vector<2x16xf32>
    %cst_210 = arith.constant dense<0.000000e+00> : vector<2xf32>
    %1008 = vector.multi_reduction <add>, %1007, %cst_210 [1] : vector<2x16xf32> to vector<2xf32>
    %1009 = vector.shape_cast %1008 : vector<2xf32> to vector<2x1xf32>
    %cst_211 = arith.constant dense<0.000000e+00> : vector<2x16xf32>
    %1010 = tpu.matmul %982, %1006, %cst_211 {dimension_numbers = #tpu.dot_dimension_numbers<[1], [1], [0], [0], [0, 0, 1, 0], [], []>} : vector<2x16xf32>, vector<16x16xf32>, vector<2x16xf32> -> vector<2x16xf32>
    %cst_212 = arith.constant 1.000000e-16 : f32
    %1011 = vector.broadcast %cst_212 : f32 to vector<2x1xf32>
    %1012 = arith.maximumf %1009, %1011 : vector<2x1xf32>
    %1013 = math.rsqrt %1012 : vector<2x1xf32>
    %1014 = vector.broadcast %1013 : vector<2x1xf32> to vector<2x16xf32>
    %1015 = arith.mulf %1010, %1014 : vector<2x16xf32>
    %1016 = vector.broadcast %990 : vector<2x1xf32> to vector<2x16xf32>
    %1017 = arith.mulf %1016, %1015 : vector<2x16xf32>
    %cst_213 = arith.constant dense<0xFF800000> : vector<2xf32>
    %1018 = vector.multi_reduction <maximumf>, %1017, %cst_213 [1] : vector<2x16xf32> to vector<2xf32>
    %1019 = vector.shape_cast %1018 : vector<2xf32> to vector<2x1xf32>
    %1020 = vector.broadcast %1019 : vector<2x1xf32> to vector<2x16xf32>
    %1021 = arith.subf %1017, %1020 : vector<2x16xf32>
    %1022 = math.exp %1021 : vector<2x16xf32>
    %cst_214 = arith.constant dense<0.000000e+00> : vector<2xf32>
    %1023 = vector.multi_reduction <add>, %1022, %cst_214 [1] : vector<2x16xf32> to vector<2xf32>
    %1024 = vector.shape_cast %1023 : vector<2xf32> to vector<2x1xf32>
    %1025 = tpu.reciprocal %1024 {approx = true} : vector<2x1xf32> -> vector<2x1xf32>
    %1026 = vector.broadcast %1025 : vector<2x1xf32> to vector<2x16xf32>
    %1027 = arith.mulf %1022, %1026 : vector<2x16xf32>
    %1028 = vector.broadcast %986 : vector<2x1xf32> to vector<2x16xf32>
    %1029 = arith.mulf %1028, %1027 : vector<2x16xf32>
    %cst_215 = arith.constant 1.000000e+00 : f32
    %1030 = vector.broadcast %cst_215 : f32 to vector<2x1xf32>
    %1031 = arith.subf %1030, %986 : vector<2x1xf32>
    %1032 = vector.broadcast %1031 : vector<2x1xf32> to vector<2x16xf32>
    %1033 = arith.mulf %1032, %921 : vector<2x16xf32>
    %1034 = arith.addf %1029, %1033 : vector<2x16xf32>
    %cst_216 = arith.constant dense<0xFF800000> : vector<2xf32>
    %1035 = vector.multi_reduction <maximumf>, %998, %cst_216 [1] : vector<2x3xf32> to vector<2xf32>
    %1036 = vector.shape_cast %1035 : vector<2xf32> to vector<2x1xf32>
    %1037 = vector.broadcast %1036 : vector<2x1xf32> to vector<2x3xf32>
    %1038 = arith.subf %998, %1037 : vector<2x3xf32>
    %1039 = math.exp %1038 : vector<2x3xf32>
    %cst_217 = arith.constant dense<0.000000e+00> : vector<2xf32>
    %1040 = vector.multi_reduction <add>, %1039, %cst_217 [1] : vector<2x3xf32> to vector<2xf32>
    %1041 = vector.shape_cast %1040 : vector<2xf32> to vector<2x1xf32>
    %1042 = tpu.reciprocal %1041 {approx = true} : vector<2x1xf32> -> vector<2x1xf32>
    %1043 = vector.broadcast %1042 : vector<2x1xf32> to vector<2x3xf32>
    %1044 = arith.mulf %1039, %1043 : vector<2x3xf32>
    %1045 = vector.extract_strided_slice %1034 {offsets = [0, 15], sizes = [2, 1], strides = [1, 1]} : vector<2x16xf32> to vector<2x1xf32>
    %1046 = vector.extract_strided_slice %1034 {offsets = [0, 0], sizes = [2, 15], strides = [1, 1]} : vector<2x16xf32> to vector<2x15xf32>
    %1047 = tpu.concatenate %1045, %1046 in 1 : vector<2x1xf32>, vector<2x15xf32> -> vector<2x16xf32>
    %1048 = vector.extract_strided_slice %1034 {offsets = [0, 1], sizes = [2, 15], strides = [1, 1]} : vector<2x16xf32> to vector<2x15xf32>
    %1049 = vector.extract_strided_slice %1034 {offsets = [0, 0], sizes = [2, 1], strides = [1, 1]} : vector<2x16xf32> to vector<2x1xf32>
    %1050 = tpu.concatenate %1048, %1049 in 1 : vector<2x15xf32>, vector<2x1xf32> -> vector<2x16xf32>
    %1051 = vector.extract_strided_slice %1044 {offsets = [0, 0], sizes = [2, 1], strides = [1, 1]} : vector<2x3xf32> to vector<2x1xf32>
    %1052 = vector.broadcast %1051 : vector<2x1xf32> to vector<2x16xf32>
    %1053 = arith.mulf %1052, %1047 : vector<2x16xf32>
    %1054 = vector.extract_strided_slice %1044 {offsets = [0, 1], sizes = [2, 1], strides = [1, 1]} : vector<2x3xf32> to vector<2x1xf32>
    %1055 = vector.broadcast %1054 : vector<2x1xf32> to vector<2x16xf32>
    %1056 = arith.mulf %1055, %1034 : vector<2x16xf32>
    %1057 = arith.addf %1053, %1056 : vector<2x16xf32>
    %1058 = vector.extract_strided_slice %1044 {offsets = [0, 2], sizes = [2, 1], strides = [1, 1]} : vector<2x3xf32> to vector<2x1xf32>
    %1059 = vector.broadcast %1058 : vector<2x1xf32> to vector<2x16xf32>
    %1060 = arith.mulf %1059, %1050 : vector<2x16xf32>
    %1061 = arith.addf %1057, %1060 : vector<2x16xf32>
    %cst_218 = arith.constant 1.000000e-30 : f32
    %1062 = vector.broadcast %cst_218 : f32 to vector<2x16xf32>
    %1063 = arith.maximumf %1061, %1062 : vector<2x16xf32>
    %1064 = math.log %1063 : vector<2x16xf32>
    %1065 = vector.broadcast %995 : vector<2x1xf32> to vector<2x16xf32>
    %1066 = arith.mulf %1065, %1064 : vector<2x16xf32>
    %1067 = math.exp %1066 : vector<2x16xf32>
    %cst_219 = arith.constant dense<0.000000e+00> : vector<2xf32>
    %1068 = vector.multi_reduction <add>, %1067, %cst_219 [1] : vector<2x16xf32> to vector<2xf32>
    %1069 = vector.shape_cast %1068 : vector<2xf32> to vector<2x1xf32>
    %cst_220 = arith.constant 1.000000e-16 : f32
    %1070 = vector.broadcast %cst_220 : f32 to vector<2x1xf32>
    %1071 = arith.addf %1069, %1070 : vector<2x1xf32>
    %1072 = vector.broadcast %1071 : vector<2x1xf32> to vector<2x16xf32>
    %1073 = arith.divf %1067, %1072 : vector<2x16xf32>
    %1074 = vector.extract_strided_slice %1073 {offsets = [0, 0], sizes = [1, 16], strides = [1, 1]} : vector<2x16xf32> to vector<1x16xf32>
    %cst_221 = arith.constant dense<0.000000e+00> : vector<1x16xf32>
    %1075 = tpu.matmul %1074, %933, %cst_221 {dimension_numbers = #tpu.dot_dimension_numbers<[1], [0], [0], [1], [0, 0, 1, 1], [], []>} : vector<1x16xf32>, vector<16x16xf32>, vector<1x16xf32> -> vector<1x16xf32>
    %c7_222 = arith.constant 7 : index
    %c0_223 = arith.constant 0 : index
    %1076 = vector.load %arg20[%c7_222, %c0_223] : memref<9x48xf32, #tpu.memory_space<vmem>>, vector<1x16xf32>
    tpu.vector_store %arg20[%c7_222, %c0_223], %1075 {strides = array<i32>} : memref<9x48xf32, #tpu.memory_space<vmem>>, vector<1x16xf32>,
    %1077 = tpu.concatenate %987, %983 in 1 : vector<1x16xf32>, vector<1x16xf32> -> vector<1x32xf32>
    %1078 = vector.extract_strided_slice %1073 {offsets = [1, 0], sizes = [1, 16], strides = [1, 1]} : vector<2x16xf32> to vector<1x16xf32>
    %cst_224 = arith.constant dense<0.000000e+00> : vector<16x32xf32>
    %1079 = tpu.matmul %1078, %1077, %cst_224 {dimension_numbers = #tpu.dot_dimension_numbers<[0], [0], [1], [1], [0, 1, 1, 1], [], []>} : vector<1x16xf32>, vector<1x32xf32>, vector<16x32xf32> -> vector<16x32xf32>
    %1080 = vector.extract_strided_slice %1079 {offsets = [0, 0], sizes = [16, 16], strides = [1, 1]} : vector<16x32xf32> to vector<16x16xf32>
    %cst_225 = arith.constant 1.000000e+00 : f32
    %1081 = vector.broadcast %cst_225 : f32 to vector<16x16xf32>
    %1082 = arith.subf %1081, %1080 : vector<16x16xf32>
    %1083 = arith.mulf %933, %1082 : vector<16x16xf32>
    %1084 = vector.extract_strided_slice %1079 {offsets = [0, 16], sizes = [16, 16], strides = [1, 1]} : vector<16x32xf32> to vector<16x16xf32>
    %1085 = arith.addf %1083, %1084 : vector<16x16xf32>
    %c7_226 = arith.constant 7 : index
    %c0_227 = arith.constant 0 : index
    %1086 = vector.load %arg20[%c7_226, %c0_227] : memref<9x48xf32, #tpu.memory_space<vmem>>, vector<1x48xf32>
    %cst_228 = arith.constant dense<0.000000e+00> : vector<1x128xf32>
    %1087 = tpu.matmul %1086, %7, %cst_228 {dimension_numbers = #tpu.dot_dimension_numbers<[1], [0], [0], [1], [0, 0, 1, 1], [], []>} : vector<1x48xf32>, vector<48x128xf32>, vector<1x128xf32> -> vector<1x128xf32>
    %1088 = vector.extract_strided_slice %6 {offsets = [7, 0], sizes = [1, 128], strides = [1, 1]} : vector<8x128xf32> to vector<1x128xf32>
    %1089 = arith.addf %1087, %1088 : vector<1x128xf32>
    %1090 = vector.extract_strided_slice %1089 {offsets = [0, 0], sizes = [1, 96], strides = [1, 1]} : vector<1x128xf32> to vector<1x96xf32>
    %1091 = arith.negf %1090 : vector<1x96xf32>
    %1092 = math.exp %1091 : vector<1x96xf32>
    %cst_229 = arith.constant 1.000000e+00 : f32
    %1093 = vector.broadcast %cst_229 : f32 to vector<1x96xf32>
    %1094 = arith.addf %1093, %1092 : vector<1x96xf32>
    %1095 = arith.divf %1093, %1094 : vector<1x96xf32>
    %1096 = vector.extract_strided_slice %1095 {offsets = [0, 0], sizes = [1, 32], strides = [1, 1]} : vector<1x96xf32> to vector<1x32xf32>
    %1097 = vector.extract_strided_slice %1095 {offsets = [0, 32], sizes = [1, 32], strides = [1, 1]} : vector<1x96xf32> to vector<1x32xf32>
    %1098 = vector.extract_strided_slice %1095 {offsets = [0, 64], sizes = [1, 32], strides = [1, 1]} : vector<1x96xf32> to vector<1x32xf32>
    %1099 = vector.extract_strided_slice %1089 {offsets = [0, 96], sizes = [1, 32], strides = [1, 1]} : vector<1x128xf32> to vector<1x32xf32>
    %1100 = math.tanh %1099 : vector<1x32xf32>
    %1101 = arith.mulf %1097, %951 : vector<1x32xf32>
    %1102 = arith.mulf %1096, %1100 : vector<1x32xf32>
    %1103 = arith.addf %1101, %1102 : vector<1x32xf32>
    %1104 = math.tanh %1103 : vector<1x32xf32>
    %1105 = arith.mulf %1098, %1104 : vector<1x32xf32>
    %c8 = arith.constant 8 : index
    %c16_230 = arith.constant 16 : index
    %1106 = vector.load %arg20[%c8, %c16_230] : memref<9x48xf32, #tpu.memory_space<vmem>>, vector<1x32xf32>
    tpu.vector_store %arg20[%c8, %c16_230], %1105 {strides = array<i32>} : memref<9x48xf32, #tpu.memory_space<vmem>>, vector<1x32xf32>,
    %cst_231 = arith.constant dense<0.000000e+00> : vector<1x76xf32>
    %1107 = tpu.matmul %1103, %8, %cst_231 {dimension_numbers = #tpu.dot_dimension_numbers<[1], [0], [0], [1], [0, 0, 1, 1], [], []>} : vector<1x32xf32>, vector<32x76xf32>, vector<1x76xf32> -> vector<1x76xf32>
    %1108 = arith.addf %1107, %9 : vector<1x76xf32>
    %1109 = vector.extract_strided_slice %1108 {offsets = [0, 0], sizes = [1, 48], strides = [1, 1]} : vector<1x76xf32> to vector<1x48xf32>
    %1110 = math.tanh %1109 : vector<1x48xf32>
    %1111 = vector.extract_strided_slice %1108 {offsets = [0, 48], sizes = [1, 18], strides = [1, 1]} : vector<1x76xf32> to vector<1x18xf32>
    %1112 = arith.negf %1111 : vector<1x18xf32>
    %1113 = math.exp %1112 : vector<1x18xf32>
    %cst_232 = arith.constant 1.000000e+00 : f32
    %1114 = vector.broadcast %cst_232 : f32 to vector<1x18xf32>
    %1115 = arith.addf %1114, %1113 : vector<1x18xf32>
    %1116 = arith.divf %1114, %1115 : vector<1x18xf32>
    %1117 = vector.extract_strided_slice %1108 {offsets = [0, 66], sizes = [1, 4], strides = [1, 1]} : vector<1x76xf32> to vector<1x4xf32>
    %cst_233 = arith.constant 0.000000e+00 : f32
    %1118 = vector.broadcast %cst_233 : f32 to vector<1x4xf32>
    %1119 = arith.maximumf %1117, %1118 : vector<1x4xf32>
    %1120 = vector.broadcast %cst_233 : f32 to vector<1x4xf32>
    %1121 = arith.subf %1117, %1120 : vector<1x4xf32>
    %1122 = arith.cmpf one, %1121, %1121 : vector<1x4xf32>
    %1123 = vector.broadcast %cst_233 : f32 to vector<1x4xf32>
    %1124 = arith.addf %1117, %1123 : vector<1x4xf32>
    %1125 = math.absf %1121 : vector<1x4xf32>
    %cst_234 = arith.constant 0.000000e+00 : f32
    %1126 = vector.broadcast %cst_234 : f32 to vector<1x4xf32>
    %1127 = arith.subf %1126, %1125 : vector<1x4xf32>
    %1128 = math.exp %1127 : vector<1x4xf32>
    %1129 = math.log1p %1128 : vector<1x4xf32>
    %1130 = arith.addf %1119, %1129 : vector<1x4xf32>
    %1131 = arith.select %1122, %1124, %1130 : vector<1x4xi1>, vector<1x4xf32>
    %1132 = vector.extract_strided_slice %1110 {offsets = [0, 0], sizes = [1, 16], strides = [1, 1]} : vector<1x48xf32> to vector<1x16xf32>
    %1133 = vector.extract_strided_slice %1110 {offsets = [0, 16], sizes = [1, 16], strides = [1, 1]} : vector<1x48xf32> to vector<1x16xf32>
    %1134 = tpu.concatenate %1132, %1133 in 0 : vector<1x16xf32>, vector<1x16xf32> -> vector<2x16xf32>
    %1135 = vector.extract_strided_slice %1110 {offsets = [0, 32], sizes = [1, 16], strides = [1, 1]} : vector<1x48xf32> to vector<1x16xf32>
    %1136 = vector.extract_strided_slice %1116 {offsets = [0, 0], sizes = [1, 1], strides = [1, 1]} : vector<1x18xf32> to vector<1x1xf32>
    %1137 = vector.extract_strided_slice %1116 {offsets = [0, 1], sizes = [1, 1], strides = [1, 1]} : vector<1x18xf32> to vector<1x1xf32>
    %1138 = tpu.concatenate %1136, %1137 in 0 : vector<1x1xf32>, vector<1x1xf32> -> vector<2x1xf32>
    %1139 = vector.extract_strided_slice %1116 {offsets = [0, 2], sizes = [1, 16], strides = [1, 1]} : vector<1x18xf32> to vector<1x16xf32>
    %1140 = vector.extract_strided_slice %1131 {offsets = [0, 0], sizes = [1, 1], strides = [1, 1]} : vector<1x4xf32> to vector<1x1xf32>
    %1141 = vector.extract_strided_slice %1131 {offsets = [0, 1], sizes = [1, 1], strides = [1, 1]} : vector<1x4xf32> to vector<1x1xf32>
    %1142 = tpu.concatenate %1140, %1141 in 0 : vector<1x1xf32>, vector<1x1xf32> -> vector<2x1xf32>
    %1143 = vector.extract_strided_slice %1131 {offsets = [0, 2], sizes = [1, 1], strides = [1, 1]} : vector<1x4xf32> to vector<1x1xf32>
    %1144 = vector.extract_strided_slice %1131 {offsets = [0, 3], sizes = [1, 1], strides = [1, 1]} : vector<1x4xf32> to vector<1x1xf32>
    %1145 = tpu.concatenate %1143, %1144 in 0 : vector<1x1xf32>, vector<1x1xf32> -> vector<2x1xf32>
    %cst_235 = arith.constant 1.000000e+00 : f32
    %1146 = vector.broadcast %cst_235 : f32 to vector<2x1xf32>
    %1147 = arith.addf %1146, %1145 : vector<2x1xf32>
    %1148 = vector.extract_strided_slice %1108 {offsets = [0, 70], sizes = [1, 3], strides = [1, 1]} : vector<1x76xf32> to vector<1x3xf32>
    %1149 = vector.extract_strided_slice %1108 {offsets = [0, 73], sizes = [1, 3], strides = [1, 1]} : vector<1x76xf32> to vector<1x3xf32>
    %1150 = tpu.concatenate %1148, %1149 in 0 : vector<1x3xf32>, vector<1x3xf32> -> vector<2x3xf32>
    %1151 = arith.mulf %1085, %1085 : vector<16x16xf32>
    %cst_236 = arith.constant dense<0.000000e+00> : vector<16xf32>
    %1152 = vector.multi_reduction <add>, %1151, %cst_236 [1] : vector<16x16xf32> to vector<16xf32>
    %1153 = vector.shape_cast %1152 : vector<16xf32> to vector<16x1xf32>
    %cst_237 = arith.constant 1.000000e-16 : f32
    %1154 = vector.broadcast %cst_237 : f32 to vector<16x1xf32>
    %1155 = arith.maximumf %1153, %1154 : vector<16x1xf32>
    %1156 = math.rsqrt %1155 : vector<16x1xf32>
    %1157 = vector.broadcast %1156 : vector<16x1xf32> to vector<16x16xf32>
    %1158 = arith.mulf %1085, %1157 : vector<16x16xf32>
    %1159 = arith.mulf %1134, %1134 : vector<2x16xf32>
    %cst_238 = arith.constant dense<0.000000e+00> : vector<2xf32>
    %1160 = vector.multi_reduction <add>, %1159, %cst_238 [1] : vector<2x16xf32> to vector<2xf32>
    %1161 = vector.shape_cast %1160 : vector<2xf32> to vector<2x1xf32>
    %cst_239 = arith.constant dense<0.000000e+00> : vector<2x16xf32>
    %1162 = tpu.matmul %1134, %1158, %cst_239 {dimension_numbers = #tpu.dot_dimension_numbers<[1], [1], [0], [0], [0, 0, 1, 0], [], []>} : vector<2x16xf32>, vector<16x16xf32>, vector<2x16xf32> -> vector<2x16xf32>
    %cst_240 = arith.constant 1.000000e-16 : f32
    %1163 = vector.broadcast %cst_240 : f32 to vector<2x1xf32>
    %1164 = arith.maximumf %1161, %1163 : vector<2x1xf32>
    %1165 = math.rsqrt %1164 : vector<2x1xf32>
    %1166 = vector.broadcast %1165 : vector<2x1xf32> to vector<2x16xf32>
    %1167 = arith.mulf %1162, %1166 : vector<2x16xf32>
    %1168 = vector.broadcast %1142 : vector<2x1xf32> to vector<2x16xf32>
    %1169 = arith.mulf %1168, %1167 : vector<2x16xf32>
    %cst_241 = arith.constant dense<0xFF800000> : vector<2xf32>
    %1170 = vector.multi_reduction <maximumf>, %1169, %cst_241 [1] : vector<2x16xf32> to vector<2xf32>
    %1171 = vector.shape_cast %1170 : vector<2xf32> to vector<2x1xf32>
    %1172 = vector.broadcast %1171 : vector<2x1xf32> to vector<2x16xf32>
    %1173 = arith.subf %1169, %1172 : vector<2x16xf32>
    %1174 = math.exp %1173 : vector<2x16xf32>
    %cst_242 = arith.constant dense<0.000000e+00> : vector<2xf32>
    %1175 = vector.multi_reduction <add>, %1174, %cst_242 [1] : vector<2x16xf32> to vector<2xf32>
    %1176 = vector.shape_cast %1175 : vector<2xf32> to vector<2x1xf32>
    %1177 = tpu.reciprocal %1176 {approx = true} : vector<2x1xf32> -> vector<2x1xf32>
    %1178 = vector.broadcast %1177 : vector<2x1xf32> to vector<2x16xf32>
    %1179 = arith.mulf %1174, %1178 : vector<2x16xf32>
    %1180 = vector.broadcast %1138 : vector<2x1xf32> to vector<2x16xf32>
    %1181 = arith.mulf %1180, %1179 : vector<2x16xf32>
    %cst_243 = arith.constant 1.000000e+00 : f32
    %1182 = vector.broadcast %cst_243 : f32 to vector<2x1xf32>
    %1183 = arith.subf %1182, %1138 : vector<2x1xf32>
    %1184 = vector.broadcast %1183 : vector<2x1xf32> to vector<2x16xf32>
    %1185 = arith.mulf %1184, %1073 : vector<2x16xf32>
    %1186 = arith.addf %1181, %1185 : vector<2x16xf32>
    %cst_244 = arith.constant dense<0xFF800000> : vector<2xf32>
    %1187 = vector.multi_reduction <maximumf>, %1150, %cst_244 [1] : vector<2x3xf32> to vector<2xf32>
    %1188 = vector.shape_cast %1187 : vector<2xf32> to vector<2x1xf32>
    %1189 = vector.broadcast %1188 : vector<2x1xf32> to vector<2x3xf32>
    %1190 = arith.subf %1150, %1189 : vector<2x3xf32>
    %1191 = math.exp %1190 : vector<2x3xf32>
    %cst_245 = arith.constant dense<0.000000e+00> : vector<2xf32>
    %1192 = vector.multi_reduction <add>, %1191, %cst_245 [1] : vector<2x3xf32> to vector<2xf32>
    %1193 = vector.shape_cast %1192 : vector<2xf32> to vector<2x1xf32>
    %1194 = tpu.reciprocal %1193 {approx = true} : vector<2x1xf32> -> vector<2x1xf32>
    %1195 = vector.broadcast %1194 : vector<2x1xf32> to vector<2x3xf32>
    %1196 = arith.mulf %1191, %1195 : vector<2x3xf32>
    %1197 = vector.extract_strided_slice %1186 {offsets = [0, 15], sizes = [2, 1], strides = [1, 1]} : vector<2x16xf32> to vector<2x1xf32>
    %1198 = vector.extract_strided_slice %1186 {offsets = [0, 0], sizes = [2, 15], strides = [1, 1]} : vector<2x16xf32> to vector<2x15xf32>
    %1199 = tpu.concatenate %1197, %1198 in 1 : vector<2x1xf32>, vector<2x15xf32> -> vector<2x16xf32>
    %1200 = vector.extract_strided_slice %1186 {offsets = [0, 1], sizes = [2, 15], strides = [1, 1]} : vector<2x16xf32> to vector<2x15xf32>
    %1201 = vector.extract_strided_slice %1186 {offsets = [0, 0], sizes = [2, 1], strides = [1, 1]} : vector<2x16xf32> to vector<2x1xf32>
    %1202 = tpu.concatenate %1200, %1201 in 1 : vector<2x15xf32>, vector<2x1xf32> -> vector<2x16xf32>
    %1203 = vector.extract_strided_slice %1196 {offsets = [0, 0], sizes = [2, 1], strides = [1, 1]} : vector<2x3xf32> to vector<2x1xf32>
    %1204 = vector.broadcast %1203 : vector<2x1xf32> to vector<2x16xf32>
    %1205 = arith.mulf %1204, %1199 : vector<2x16xf32>
    %1206 = vector.extract_strided_slice %1196 {offsets = [0, 1], sizes = [2, 1], strides = [1, 1]} : vector<2x3xf32> to vector<2x1xf32>
    %1207 = vector.broadcast %1206 : vector<2x1xf32> to vector<2x16xf32>
    %1208 = arith.mulf %1207, %1186 : vector<2x16xf32>
    %1209 = arith.addf %1205, %1208 : vector<2x16xf32>
    %1210 = vector.extract_strided_slice %1196 {offsets = [0, 2], sizes = [2, 1], strides = [1, 1]} : vector<2x3xf32> to vector<2x1xf32>
    %1211 = vector.broadcast %1210 : vector<2x1xf32> to vector<2x16xf32>
    %1212 = arith.mulf %1211, %1202 : vector<2x16xf32>
    %1213 = arith.addf %1209, %1212 : vector<2x16xf32>
    %cst_246 = arith.constant 1.000000e-30 : f32
    %1214 = vector.broadcast %cst_246 : f32 to vector<2x16xf32>
    %1215 = arith.maximumf %1213, %1214 : vector<2x16xf32>
    %1216 = math.log %1215 : vector<2x16xf32>
    %1217 = vector.broadcast %1147 : vector<2x1xf32> to vector<2x16xf32>
    %1218 = arith.mulf %1217, %1216 : vector<2x16xf32>
    %1219 = math.exp %1218 : vector<2x16xf32>
    %cst_247 = arith.constant dense<0.000000e+00> : vector<2xf32>
    %1220 = vector.multi_reduction <add>, %1219, %cst_247 [1] : vector<2x16xf32> to vector<2xf32>
    %1221 = vector.shape_cast %1220 : vector<2xf32> to vector<2x1xf32>
    %cst_248 = arith.constant 1.000000e-16 : f32
    %1222 = vector.broadcast %cst_248 : f32 to vector<2x1xf32>
    %1223 = arith.addf %1221, %1222 : vector<2x1xf32>
    %1224 = vector.broadcast %1223 : vector<2x1xf32> to vector<2x16xf32>
    %1225 = arith.divf %1219, %1224 : vector<2x16xf32>
    %1226 = vector.extract_strided_slice %1225 {offsets = [0, 0], sizes = [1, 16], strides = [1, 1]} : vector<2x16xf32> to vector<1x16xf32>
    %cst_249 = arith.constant dense<0.000000e+00> : vector<1x16xf32>
    %1227 = tpu.matmul %1226, %1085, %cst_249 {dimension_numbers = #tpu.dot_dimension_numbers<[1], [0], [0], [1], [0, 0, 1, 1], [], []>} : vector<1x16xf32>, vector<16x16xf32>, vector<1x16xf32> -> vector<1x16xf32>
    %c8_250 = arith.constant 8 : index
    %c0_251 = arith.constant 0 : index
    %1228 = vector.load %arg20[%c8_250, %c0_251] : memref<9x48xf32, #tpu.memory_space<vmem>>, vector<1x16xf32>
    tpu.vector_store %arg20[%c8_250, %c0_251], %1227 {strides = array<i32>} : memref<9x48xf32, #tpu.memory_space<vmem>>, vector<1x16xf32>,
    %1229 = tpu.concatenate %1139, %1135 in 1 : vector<1x16xf32>, vector<1x16xf32> -> vector<1x32xf32>
    %1230 = vector.extract_strided_slice %1225 {offsets = [1, 0], sizes = [1, 16], strides = [1, 1]} : vector<2x16xf32> to vector<1x16xf32>
    %cst_252 = arith.constant dense<0.000000e+00> : vector<16x32xf32>
    %1231 = tpu.matmul %1230, %1229, %cst_252 {dimension_numbers = #tpu.dot_dimension_numbers<[0], [0], [1], [1], [0, 1, 1, 1], [], []>} : vector<1x16xf32>, vector<1x32xf32>, vector<16x32xf32> -> vector<16x32xf32>
    %1232 = vector.extract_strided_slice %1231 {offsets = [0, 0], sizes = [16, 16], strides = [1, 1]} : vector<16x32xf32> to vector<16x16xf32>
    %cst_253 = arith.constant 1.000000e+00 : f32
    %1233 = vector.broadcast %cst_253 : f32 to vector<16x16xf32>
    %1234 = arith.subf %1233, %1232 : vector<16x16xf32>
    %1235 = arith.mulf %1085, %1234 : vector<16x16xf32>
    %1236 = vector.extract_strided_slice %1231 {offsets = [0, 16], sizes = [16, 16], strides = [1, 1]} : vector<16x32xf32> to vector<16x16xf32>
    %1237 = arith.addf %1235, %1236 : vector<16x16xf32>
    %c1_254 = arith.constant 1 : index
    %c0_255 = arith.constant 0 : index
    %1238 = vector.load %arg20[%c1_254, %c0_255] : memref<9x48xf32, #tpu.memory_space<vmem>>, vector<8x48xf32>
    %c0_256 = arith.constant 0 : index
    %c0_257 = arith.constant 0 : index
    %1239 = vector.load %arg12[%c0_256, %c0_257] : memref<48x8xf32, #tpu.memory_space<vmem>>, vector<48x8xf32>
    %cst_258 = arith.constant dense<0.000000e+00> : vector<8x8xf32>
    %1240 = tpu.matmul %1238, %1239, %cst_258 {dimension_numbers = #tpu.dot_dimension_numbers<[1], [0], [0], [1], [0, 0, 1, 1], [], []>} : vector<8x48xf32>, vector<48x8xf32>, vector<8x8xf32> -> vector<8x8xf32>
    %c0_259 = arith.constant 0 : index
    %c0_260 = arith.constant 0 : index
    %1241 = vector.load %arg13[%c0_259, %c0_260] : memref<1x8xf32, #tpu.memory_space<vmem>>, vector<1x8xf32>
    %1242 = vector.broadcast %1241 : vector<1x8xf32> to vector<8x8xf32>
    %1243 = arith.addf %1240, %1242 : vector<8x8xf32>
    %1244 = arith.negf %1243 : vector<8x8xf32>
    %1245 = math.exp %1244 : vector<8x8xf32>
    %cst_261 = arith.constant 1.000000e+00 : f32
    %1246 = vector.broadcast %cst_261 : f32 to vector<8x8xf32>
    %1247 = arith.addf %1246, %1245 : vector<8x8xf32>
    %1248 = arith.divf %1246, %1247 : vector<8x8xf32>
    %c0_262 = arith.constant 0 : index
    %c0_263 = arith.constant 0 : index
    %c0_264 = arith.constant 0 : index
    %1249 = vector.load %arg14[%c0_262, %c0_263, %c0_264] : memref<1x8x8xf32, #tpu.memory_space<vmem>>, vector<1x8x8xf32>
    %1250 = vector.shape_cast %1249 : vector<1x8x8xf32> to vector<8x8xf32>
    %1251 = vector.shape_cast %1248 : vector<8x8xf32> to vector<1x8x8xf32>
    tpu.vector_store %arg14[%c0_262, %c0_263, %c0_264], %1251 {strides = array<i32>} : memref<1x8x8xf32, #tpu.memory_space<vmem>>, vector<1x8x8xf32>,
    %c0_265 = arith.constant 0 : index
    %c0_266 = arith.constant 0 : index
    %c0_267 = arith.constant 0 : index
    %1252 = vector.load %arg15[%c0_265, %c0_266, %c0_267] : memref<1x1x32xf32, #tpu.memory_space<vmem>>, vector<1x1x32xf32>
    %1253 = vector.shape_cast %1252 : vector<1x1x32xf32> to vector<1x32xf32>
    %1254 = vector.shape_cast %1105 : vector<1x32xf32> to vector<1x1x32xf32>
    tpu.vector_store %arg15[%c0_265, %c0_266, %c0_267], %1254 {strides = array<i32>} : memref<1x1x32xf32, #tpu.memory_space<vmem>>, vector<1x1x32xf32>,
    %c0_268 = arith.constant 0 : index
    %c0_269 = arith.constant 0 : index
    %c0_270 = arith.constant 0 : index
    %1255 = vector.load %arg16[%c0_268, %c0_269, %c0_270] : memref<1x1x32xf32, #tpu.memory_space<vmem>>, vector<1x1x32xf32>
    %1256 = vector.shape_cast %1255 : vector<1x1x32xf32> to vector<1x32xf32>
    %1257 = vector.shape_cast %1103 : vector<1x32xf32> to vector<1x1x32xf32>
    tpu.vector_store %arg16[%c0_268, %c0_269, %c0_270], %1257 {strides = array<i32>} : memref<1x1x32xf32, #tpu.memory_space<vmem>>, vector<1x1x32xf32>,
    %c0_271 = arith.constant 0 : index
    %c0_272 = arith.constant 0 : index
    %c0_273 = arith.constant 0 : index
    %1258 = vector.load %arg17[%c0_271, %c0_272, %c0_273] : memref<1x16x16xf32, #tpu.memory_space<vmem>>, vector<1x16x16xf32>
    %1259 = vector.shape_cast %1258 : vector<1x16x16xf32> to vector<16x16xf32>
    %1260 = vector.shape_cast %1237 : vector<16x16xf32> to vector<1x16x16xf32>
    tpu.vector_store %arg17[%c0_271, %c0_272, %c0_273], %1260 {strides = array<i32>} : memref<1x16x16xf32, #tpu.memory_space<vmem>>, vector<1x16x16xf32>,
    %c0_274 = arith.constant 0 : index
    %c0_275 = arith.constant 0 : index
    %c0_276 = arith.constant 0 : index
    %1261 = vector.load %arg18[%c0_274, %c0_275, %c0_276] : memref<1x2x16xf32, #tpu.memory_space<vmem>>, vector<1x2x16xf32>
    %1262 = vector.shape_cast %1261 : vector<1x2x16xf32> to vector<2x16xf32>
    %1263 = vector.shape_cast %1225 : vector<2x16xf32> to vector<1x2x16xf32>
    tpu.vector_store %arg18[%c0_274, %c0_275, %c0_276], %1263 {strides = array<i32>} : memref<1x2x16xf32, #tpu.memory_space<vmem>>, vector<1x2x16xf32>,
    %c0_277 = arith.constant 0 : index
    %c0_278 = arith.constant 0 : index
    %c0_279 = arith.constant 0 : index
    %1264 = vector.load %arg19[%c0_277, %c0_278, %c0_279] : memref<1x1x16xf32, #tpu.memory_space<vmem>>, vector<1x1x16xf32>
    %1265 = vector.shape_cast %1264 : vector<1x1x16xf32> to vector<1x16xf32>
    %1266 = vector.shape_cast %1227 : vector<1x16xf32> to vector<1x1x16xf32>
    tpu.vector_store %arg19[%c0_277, %c0_278, %c0_279], %1266 {strides = array<i32>} : memref<1x1x16xf32, #tpu.memory_space<vmem>>, vector<1x1x16xf32>,
    return
  }
  func.func @transform_0(%arg0: i32) -> (i32, i32, i32) {
    %c0_i32 = arith.constant 0 : i32
    %c0_i32_0 = arith.constant 0 : i32
    %c0_i32_1 = arith.constant 0 : i32
    return %arg0, %c0_i32, %c0_i32_0 : i32, i32, i32
  }
  func.func @transform_1(%arg0: i32) -> (i32, i32, i32) {
    %c0_i32 = arith.constant 0 : i32
    %c0_i32_0 = arith.constant 0 : i32
    %c0_i32_1 = arith.constant 0 : i32
    return %arg0, %c0_i32, %c0_i32_0 : i32, i32, i32
  }
  func.func @transform_2(%arg0: i32) -> (i32, i32, i32) {
    %c0_i32 = arith.constant 0 : i32
    %c0_i32_0 = arith.constant 0 : i32
    %c0_i32_1 = arith.constant 0 : i32
    return %arg0, %c0_i32, %c0_i32_0 : i32, i32, i32
  }
  func.func @transform_3(%arg0: i32) -> (i32, i32, i32) {
    %c0_i32 = arith.constant 0 : i32
    %c0_i32_0 = arith.constant 0 : i32
    %c0_i32_1 = arith.constant 0 : i32
    return %arg0, %c0_i32, %c0_i32_0 : i32, i32, i32
  }
  func.func @transform_4(%arg0: i32) -> (i32, i32, i32) {
    %c0_i32 = arith.constant 0 : i32
    %c0_i32_0 = arith.constant 0 : i32
    %c0_i32_1 = arith.constant 0 : i32
    return %arg0, %c0_i32, %c0_i32_0 : i32, i32, i32
  }
  func.func @transform_5(%arg0: i32) -> (i32, i32, i32) {
    %c0_i32 = arith.constant 0 : i32
    %c0_i32_0 = arith.constant 0 : i32
    %c0_i32_1 = arith.constant 0 : i32
    return %arg0, %c0_i32, %c0_i32_0 : i32, i32, i32
  }
  func.func @transform_6(%arg0: i32) -> (i32, i32) {
    %c0_i32 = arith.constant 0 : i32
    %c0_i32_0 = arith.constant 0 : i32
    %c0_i32_1 = arith.constant 0 : i32
    return %c0_i32, %c0_i32_0 : i32, i32
  }
  func.func @transform_7(%arg0: i32) -> (i32, i32) {
    %c0_i32 = arith.constant 0 : i32
    %c0_i32_0 = arith.constant 0 : i32
    %c0_i32_1 = arith.constant 0 : i32
    return %c0_i32, %c0_i32_0 : i32, i32
  }
  func.func @transform_8(%arg0: i32) -> (i32, i32) {
    %c0_i32 = arith.constant 0 : i32
    %c0_i32_0 = arith.constant 0 : i32
    %c0_i32_1 = arith.constant 0 : i32
    return %c0_i32, %c0_i32_0 : i32, i32
  }
  func.func @transform_9(%arg0: i32) -> (i32, i32) {
    %c0_i32 = arith.constant 0 : i32
    %c0_i32_0 = arith.constant 0 : i32
    %c0_i32_1 = arith.constant 0 : i32
    return %c0_i32, %c0_i32_0 : i32, i32
  }
  func.func @transform_10(%arg0: i32) -> (i32, i32) {
    %c0_i32 = arith.constant 0 : i32
    %c0_i32_0 = arith.constant 0 : i32
    %c0_i32_1 = arith.constant 0 : i32
    return %c0_i32, %c0_i32_0 : i32, i32
  }
  func.func @transform_11(%arg0: i32) -> (i32, i32) {
    %c0_i32 = arith.constant 0 : i32
    %c0_i32_0 = arith.constant 0 : i32
    %c0_i32_1 = arith.constant 0 : i32
    return %c0_i32, %c0_i32_0 : i32, i32
  }
  func.func @transform_12(%arg0: i32) -> (i32, i32) {
    %c0_i32 = arith.constant 0 : i32
    %c0_i32_0 = arith.constant 0 : i32
    %c0_i32_1 = arith.constant 0 : i32
    return %c0_i32, %c0_i32_0 : i32, i32
  }
  func.func @transform_13(%arg0: i32) -> (i32, i32, i32) {
    %c0_i32 = arith.constant 0 : i32
    %c0_i32_0 = arith.constant 0 : i32
    %c0_i32_1 = arith.constant 0 : i32
    return %arg0, %c0_i32, %c0_i32_0 : i32, i32, i32
  }
  func.func @transform_14(%arg0: i32) -> (i32, i32, i32) {
    %c0_i32 = arith.constant 0 : i32
    %c0_i32_0 = arith.constant 0 : i32
    %c0_i32_1 = arith.constant 0 : i32
    return %arg0, %c0_i32, %c0_i32_0 : i32, i32, i32
  }
  func.func @transform_15(%arg0: i32) -> (i32, i32, i32) {
    %c0_i32 = arith.constant 0 : i32
    %c0_i32_0 = arith.constant 0 : i32
    %c0_i32_1 = arith.constant 0 : i32
    return %arg0, %c0_i32, %c0_i32_0 : i32, i32, i32
  }
  func.func @transform_16(%arg0: i32) -> (i32, i32, i32) {
    %c0_i32 = arith.constant 0 : i32
    %c0_i32_0 = arith.constant 0 : i32
    %c0_i32_1 = arith.constant 0 : i32
    return %arg0, %c0_i32, %c0_i32_0 : i32, i32, i32
  }
  func.func @transform_17(%arg0: i32) -> (i32, i32, i32) {
    %c0_i32 = arith.constant 0 : i32
    %c0_i32_0 = arith.constant 0 : i32
    %c0_i32_1 = arith.constant 0 : i32
    return %arg0, %c0_i32, %c0_i32_0 : i32, i32, i32
  }
  func.func @transform_18(%arg0: i32) -> (i32, i32, i32) {
    %c0_i32 = arith.constant 0 : i32
    %c0_i32_0 = arith.constant 0 : i32
    %c0_i32_1 = arith.constant 0 : i32
    return %arg0, %c0_i32, %c0_i32_0 : i32, i32, i32
  }
}

</mosaic_0001>

<bundles_post_ra>
// kernel: tpu_custom_call.1
= control target key start
LH: loop header
LB: loop body
LE: loop exit
PB: predicated region body
PF: predicated region fallthrough
CT: control target
= control target key end

     0   :  { %s10258_s0 = inlined_call_operand.hbm [shape: f32[4,8,8], index: 0, kind: input, shape index: {}]   ;;  %s10259_s1 = inlined_call_operand.hbm [shape: f32[4,1,32], index: 1, kind: input, shape index: {}]   ;;  %s10260_s2 = inlined_call_operand.hbm [shape: f32[4,1,32], index: 2, kind: input, shape index: {}]   ;;  %s10261_s3 = inlined_call_operand.vmem [shape: f32[4,16,16], index: 3, kind: input, shape index: {}]   ;;  %s10262_s4 = inlined_call_operand.hbm [shape: f32[4,2,16], index: 4, kind: input, shape index: {}]   ;;  %s10263_s5 = inlined_call_operand.hbm [shape: f32[4,1,16], index: 5, kind: input, shape index: {}]   ;;  %s10264_s6 = inlined_call_operand.hbm [shape: f32[8,128], index: 6, kind: input, shape index: {}]   ;;  %s10265_s7 = inlined_call_operand.hbm [shape: f32[48,128], index: 7, kind: input, shape index: {}]   ;;  %s10266_s8 = inlined_call_operand.vmem [shape: f32[1,128], index: 8, kind: input, shape index: {}]   ;;  %s10267_s9 = inlined_call_operand.hbm [shape: f32[32,76], index: 9, kind: input, shape index: {}]   ;;  %s10268_s10 = inlined_call_operand.vmem [shape: f32[1,76], index: 10, kind: input, shape index: {}]   ;;  %s10269_s11 = inlined_call_operand.vmem [shape: f32[48,8], index: 11, kind: input, shape index: {}]   ;;  %s10270_s12 = inlined_call_operand.vmem [shape: f32[1,8], index: 12, kind: input, shape index: {}]   ;;  %s10271_s13 = inlined_call_operand.hbm [shape: f32[4,8,8], index: 13, kind: output, shape index: {0}]   ;;  %s10272_s14 = inlined_call_operand.hbm [shape: f32[4,1,32], index: 14, kind: output, shape index: {1}]   ;;  %s10273_s15 = inlined_call_operand.hbm [shape: f32[4,1,32], index: 15, kind: output, shape index: {2}]   ;;  %s10274_s16 = inlined_call_operand.hbm [shape: f32[4,16,16], index: 16, kind: output, shape index: {3}]   ;;  %s10275_s17 = inlined_call_operand.hbm [shape: f32[4,2,16], index: 17, kind: output, shape index: {4}]   ;;  %s10276_s18 = inlined_call_operand.hbm [shape: f32[4,1,16], index: 18, kind: output, shape index: {5}]  }
   0x1   :  { %10312 = sst [smem:[#allocation41_spill]] %s10258_s0 }
   0x2   :  { %10313 = sst [smem:[#allocation42_spill]] %s10259_s1 }
   0x3   :  { %10314 = sst [smem:[#allocation43_spill]] %s10260_s2 }
   0x4   :  { %10315 = sst [smem:[#allocation44_spill]] %s10261_s3 }
   0x5   :  { %10316 = sst [smem:[#allocation45_spill]] %s10262_s4 }
   0x6   :  { %10317 = sst [smem:[#allocation46_spill]] %s10263_s5 }
   0x7   :  { %10318 = sst [smem:[#allocation47_spill]] %s10264_s6 }
   0x8   :  { %10319 = sst [smem:[#allocation48_spill]] %s10265_s7 }
   0x9   :  { %10320 = sst [smem:[#allocation49_spill]] %s10266_s8 }
   0xa   :  { %10321 = sst [smem:[#allocation50_spill]] %s10267_s9 }
   0xb   :  { %10322 = sst [smem:[#allocation51_spill]] %s10268_s10 }
   0xc   :  { %10323 = sst [smem:[#allocation52_spill]] %s10269_s11 }
   0xd   :  { %10324 = sst [smem:[#allocation53_spill]] %s10270_s12 }
   0xe   :  { %10325 = sst [smem:[#allocation54_spill]] %s10271_s13 }
   0xf   :  { %10326 = sst [smem:[#allocation55_spill]] %s10272_s14 }
  0x10   :  { %10327 = sst [smem:[#allocation56_spill]] %s10273_s15 }
  0x11   :  { %10328 = sst [smem:[#allocation57_spill]] %s10274_s16 }
  0x12   :  { %10329 = sst [smem:[#allocation58_spill]] %s10275_s17 }
  0x13   :  { %10330 = sst [smem:[#allocation59_spill]] %s10276_s18 }
  0x14   :  { %24 = vsyncpa [#allocation4], 0 }
  0x15   :  { %26 = vsyncpa [#allocation4 + $0x1], 0 }
  0x16   :  { %27 = vsyncpa [#allocation7], 0 }
  0x17   :  { %29 = vsyncpa [#allocation7 + $0x1], 0 }
  0x18   :  { %30 = vsyncpa [#allocation10], 0 }
  0x19   :  { %32 = vsyncpa [#allocation10 + $0x1], 0 }
  0x1a   :  { %33 = vsyncpa [#allocation13], 0 }
  0x1b   :  { %34 = vsyncpa [#allocation16], 0 }
  0x1c   :  { %35 = vsyncpa [#allocation5], 0 }
  0x1d   :  { %37 = vsyncpa [#allocation5 + $0x1], 0 }
  0x1e   :  { %38 = vsyncpa [#allocation19], 0 }
  0x1f   :  { %40 = vsyncpa [#allocation19 + $0x1], 0 }
  0x20   :  { %41 = vsyncpa [#allocation22], 0 }
  0x21   :  { %43 = vsyncpa [#allocation22 + $0x1], 0 }
  0x22   :  { %44 = vsyncpa [#allocation25], 0 }
  0x23   :  { %46 = vsyncpa [#allocation25 + $0x1], 0  ;;  %s8597_s27 = smov 0   ;;  %s8599_s28 = smov 0  }
  0x24   :  { %s8601_s29 = smov 0   ;;  %s8603_s30 = smov 0  }
  0x25 LB: > { %10331 = sst [smem:[#allocation35_spill]] %s8448_s27  ;;  %s8618_s0 = sadd.s32 4294967295, %s8460_s30   ;;  %s8460_s30 = sphi %s8603_s30, %s10391_s30   ;;  %s8456_s29 = sphi %s8601_s29, %s10393_s29   ;;  %s8452_s28 = sphi %s8599_s28, %s10395_s28   ;;  %s8448_s27 = sphi %s8597_s27, %s10394_s27  }
  0x26   : > { %10332 = sst [smem:[#allocation36_spill]] %s8456_s29  ;;  %s10280_s19 = sadd.s32 4294967294, %s8460_s30  }
  0x27   : > { %s8622_s1 = sadd.s32 1, %s8460_s30   ;;  %s59_s20 = sadd.s32 1, %s8456_s29 }
  0x28   : > { %10333 = sst [smem:[#allocation37_spill]] %s8622_s1  ;;  %s56_s21 = ssub.s32 %s8460_s30, %s8622_s1 }
  0x29   : > { %p66_p0 = scmp.ne.s32.totalorder %s8456_s29, %s8452_s28  ;;  %p57_p1 = scmp.eq.s32.totalorder %s56_s21, 0 }
  0x2a   : > { %p67_p2 = scmp.eq.s32.totalorder %s8460_s30, 0  ;;  %p72_p3 = scmp.ne.s32.totalorder %s8452_s28, %s8448_s27 }
  0x2b   : > { %p10290_p4 = scmp.eq.s32.totalorder %s8618_s0, 0  ;;  %p373_p7 = scmp.eq.s32.totalorder %s8618_s0, 3 }
  0x2c   : > { %s8634_s22 = scalar_select %p57_p1, %s8456_s29, %s59_s20  }
  0x2d   : > { %p8636_p5 = por %p67_p2, %p66_p0  ;;  %p8642_p6 = por %p10290_p4, %p72_p3 }
  0x2e   : > { %10334 = sst [smem:[#allocation38_spill]] %s8634_s22  ;;  %p379_p8 = scmp.eq.s32.totalorder %s10280_s19, 3 }
  0x2f   : > { %s10336_s23 = scalar_select %p8642_p6, 1, 0 }
  0x30   : > { %p6608_p9 = scmp.ge.s32.totalorder %s8460_s30, 1  ;;  %p516_p10 = scmp.lt.s32.totalorder %s8460_s30, 5 }
  0x31   : > { %p8651_p11 = por %p373_p7, %p66_p0  ;;  %p8655_p12 = por %p379_p8, %p72_p3 }
  0x32   : > { %p8659_p13 = pnand %p6608_p9, %p516_p10  ;;  %s8462_s20 = smov [#allocation12]  }
  0x33   : > { %s10337_s24 = scalar_select %p8651_p11, 1, 0 }
  0x34   : > { %s10339_s25 = scalar_select %p8655_p12, 1, 0 }
  0x35   : > { %10338 = sst [smem:[#allocation39_spill]] %s10337_s24  ;;  %p7516_p1 = pneg %p8659_p13 }
  0x36   : > { %10340 = sst [smem:[#allocation40_spill]] %s10339_s25  ;;  %s529_s21 = sshll.u32 %s8462_s20, 4  ;;  %s530_s21 = int_to_ptr.vmem [resolvable:$true] %s529_s21 }
  0x37   : > { %s10341_s26 = scalar_select %p8659_p13, 1, 0 }
  0x38   : > { %p7564_p2 = scmp.lt.s32.totalorder %s8460_s30, 4  ;;  %p8668_p0 = pnand %p7516_p1, %p10290_p4 }
  0x39   : > { %s8673_s22 = sand.u32 1, %s8456_s29   ;;  %s10344_s6 = sld [smem:[#allocation47_spill]] }
  0x3a   : > { %s10342_s19 = scalar_select %p8668_p0, 1, 0 }
  0x3b   : > { %p8677_p3 = pnand %p7564_p2, %p8636_p5  ;;  %p8690_p8 = pneg %p8668_p0 }
  0x3d   : > { %s10343_s1 = scalar_select %p8677_p3, 1, 0 }
  0x3e   : > { %s10345_s13 = scalar_select %p8690_p8, 1, 0 }
  0x3f   : > { %s7992_s20 = scalar_lea.hbm %s10344_s6, 128 }
  0x40   : > { %p7993_p7 = scmp.ne.s32.totalorder %s10344_s6, %s7992_s20  ;;  %p7999_p10 = scmp.lt.u32.totalorder %s7992_s20, %s10344_s6 }
  0x42   : > { %p7995_p5 = pnand %p8690_p8, %p7993_p7 }
  0x44   : > { %p7996_p9 = pneg %p7995_p5 }
  0x46   : > { %p8001_p1 = pnand %p7999_p10, %p7996_p9 }
  0x48   : > { %8004 = shalt.err (!%p8001_p1)
}
  0x49   : > { %s8005_s17 = scalar_lea.vmem %s530_s21, 128  ;;  %p8013_p11 = scmp.lt.s32.totalorder %s530_s21, %s530_s21 }
  0x4a   : > { %p8006_p2 = scmp.ne.s32.totalorder %s530_s21, %s8005_s17  ;;  %p8014_p6 = scmp.lt.s32.totalorder %s8005_s17, %s8005_s17 }
  0x4c   : > { %p8008_p4 = pnand %p8006_p2, %p8690_p8  ;;  %p8015_p13 = por %p8014_p6, %p8013_p11 }
  0x4e   : > { %p8009_p12 = pneg %p8008_p4 }
  0x50   : > { %p8016_p3 = pnand %p8015_p13, %p8009_p12 }
  0x52   : > { %8019 = shalt.err (!%p8016_p3)
}
  0x53   : > { %7519 = dma.hbm_to_vmem [thread:$0]  (!%p8668_p0), %s10344_s6, 128, %s530_s21, [#allocation13]  }
  0x54   : > { %s8707_s27 = sshll.u32 %s8460_s30, 4  ;;  %s599_s29 = scalar_lea.vmem [#allocation6], %s8673_s22 }
  0x55   : > { %s606_s20 = sshll.u32 %s599_s29, 4  ;;  %s10346_s25 = sld [smem:[#allocation42_spill]]  ;;  %s8716_s20 = int_to_ptr.vmem [resolvable:$true] %s606_s20 }
  0x56   : > { %s10347_s15 = sand.u32 1, %s8460_s30   ;;  %p10348_p6 = scmp.ne.s32.totalorder %s10343_s1, 0 }
  0x57   : > { %s8720_s16 = scalar_lea.sflag [#allocation7], %s10347_s15 }
  0x58   : > { %p8726_p11 = pneg %p10348_p6 }
  0x5a   : > { %s10349_s6 = scalar_select %p8726_p11, 1, 0 }
  0x5b   : > { %s8714_s14 = scalar_lea.hbm %s10346_s25, %s8707_s27  ;;  %s8025_s17 = scalar_lea.hbm %s10346_s25, 64 }
  0x5c   : > { %s8020_s21 = scalar_lea.hbm %s8714_s14, 16  ;;  %p8026_p3 = scmp.lt.u32.totalorder %s8714_s14, %s10346_s25 }
  0x5d   : > { %p8021_p4 = scmp.ne.s32.totalorder %s8714_s14, %s8020_s21  ;;  %p8027_p7 = scmp.lt.u32.totalorder %s8025_s17, %s8020_s21 }
  0x5e   : > { %p8029_p9 = scmp.lt.u32.totalorder %s8020_s21, %s8714_s14 }
  0x5f   : > { %p8023_p12 = pnand %p8726_p11, %p8021_p4  ;;  %p8028_p5 = por %p8027_p7, %p8026_p3 }
  0x61   : > { %p8024_p13 = pneg %p8023_p12  ;;  %p8030_p10 = por %p8029_p9, %p8028_p5 }
  0x63   : > { %p8031_p1 = pnand %p8030_p10, %p8024_p13 }
  0x65   : > { %8034 = shalt.err (!%p8031_p1)
}
  0x66   : > { %s8035_s15 = scalar_lea.vmem %s8716_s20, 16  ;;  %s8463_s29 = smov [#allocation6]  }
  0x67   : > { %p8036_p2 = scmp.ne.s32.totalorder %s8716_s20, %s8035_s15  ;;  %s8040_s2 = sshll.u32 %s8463_s29, 4  ;;  %s8041_s2 = int_to_ptr.vmem [resolvable:$false] %s8040_s2 }
  0x68   : > { %s8042_s12 = scalar_lea.vmem %s8041_s2, 32  ;;  %p8043_p0 = scmp.lt.s32.totalorder %s8716_s20, %s8041_s2 }
  0x69   : > { %p8038_p4 = pnand %p8036_p2, %p8726_p11  ;;  %p8044_p8 = scmp.lt.s32.totalorder %s8042_s12, %s8035_s15 }
  0x6b   : > { %p8039_p12 = pneg %p8038_p4  ;;  %p8045_p3 = por %p8044_p8, %p8043_p0 }
  0x6d   : > { %p8046_p7 = pnand %p8045_p3, %p8039_p12 }
  0x6f   : > { %8049 = shalt.err (!%p8046_p7)
}
  0x70   : > { %7532 = dma.hbm_to_vmem [thread:$0]  (!%p10348_p6), %s8714_s14, 16, %s8716_s20, %s8720_s16  }
  0x71   : > { %s6617_s18 = sshll.u32 %s8673_s22, 1  ;;  %s6618_s21 = sshll.u32 %s8460_s30, 5 }
  0x72   : > { %s10350_s4 = sld [smem:[#allocation45_spill]]  ;;  %s642_s15 = scalar_lea.vmem [#allocation9], %s6617_s18 }
  0x73   : > { %s649_s12 = sshll.u32 %s642_s15, 4  ;;  %s10351_s25 = sand.u32 1, %s8460_s30   ;;  %s650_s12 = int_to_ptr.vmem [resolvable:$true] %s649_s12 }
  0x74   : > { %s8759_s24 = scalar_lea.sflag [#allocation10], %s10351_s25 }
  0x78   : > { %s8755_s2 = scalar_lea.hbm %s10350_s4, %s6618_s21  ;;  %s8055_s21 = scalar_lea.hbm %s10350_s4, 128 }
  0x79   : > { %s8050_s11 = scalar_lea.hbm %s8755_s2, 32  ;;  %p8056_p5 = scmp.lt.u32.totalorder %s8755_s2, %s10350_s4 }
  0x7a   : > { %p8051_p0 = scmp.ne.s32.totalorder %s8755_s2, %s8050_s11  ;;  %p8057_p9 = scmp.lt.u32.totalorder %s8055_s21, %s8050_s11 }
  0x7b   : > { %p8059_p1 = scmp.lt.u32.totalorder %s8050_s11, %s8755_s2 }
  0x7c   : > { %p8053_p8 = pnand %p8051_p0, %p8726_p11  ;;  %p8058_p10 = por %p8057_p9, %p8056_p5 }
  0x7e   : > { %p8054_p13 = pneg %p8053_p8  ;;  %p8060_p2 = por %p8059_p1, %p8058_p10 }
  0x80   : > { %p8061_p4 = pnand %p8060_p2, %p8054_p13 }
  0x82   : > { %8064 = shalt.err (!%p8061_p4)
}
  0x83   : > { %s8065_s25 = scalar_lea.vmem %s650_s12, 32  ;;  %s8464_s18 = smov [#allocation9]  }
  0x84   : > { %p8066_p12 = scmp.ne.s32.totalorder %s650_s12, %s8065_s25  ;;  %s8070_s15 = sshll.u32 %s8464_s18, 4  ;;  %s8071_s15 = int_to_ptr.vmem [resolvable:$false] %s8070_s15 }
  0x85   : > { %s8072_s14 = scalar_lea.vmem %s8071_s15, 64  ;;  %p8073_p0 = scmp.lt.s32.totalorder %s650_s12, %s8071_s15 }
  0x86   : > { %p8068_p3 = pnand %p8066_p12, %p8726_p11  ;;  %p8074_p8 = scmp.lt.s32.totalorder %s8072_s14, %s8065_s25 }
  0x88   : > { %p8069_p7 = pneg %p8068_p3  ;;  %p8075_p6 = por %p8074_p8, %p8073_p0 }
  0x8a   : > { %p8076_p5 = pnand %p8075_p6, %p8069_p7 }
  0x8c   : > { %8079 = shalt.err (!%p8076_p5)
}
  0x8d   : > { %p10352_p9 = scmp.ne.s32.totalorder %s10343_s1, 0  ;;  %s8465_s11 = smov [#allocation14]  }
  0x8e   : > { %s539_s20 = sshll.u32 %s8465_s11, 4  ;;  %s10353_s7 = sld [smem:[#allocation48_spill]]  ;;  %s540_s20 = int_to_ptr.vmem [resolvable:$true] %s539_s20 }
  0x8f   : > { %7538 = dma.hbm_to_vmem [thread:$0]  (!%p10352_p9), %s8755_s2, 32, %s650_s12, %s8759_s24  }
  0x90   : > { %p10354_p10 = scmp.ne.s32.totalorder %s10345_s13, 0 }
  0x94   : > { %s8080_s29 = scalar_lea.hbm %s10353_s7, 768 }
  0x95   : > { %p8081_p13 = scmp.ne.s32.totalorder %s10353_s7, %s8080_s29  ;;  %p8087_p2 = scmp.lt.u32.totalorder %s8080_s29, %s10353_s7 }
  0x97   : > { %p8083_p6 = pnand %p8081_p13, %p10354_p10 }
  0x99   : > { %p8084_p1 = pneg %p8083_p6 }
  0x9b   : > { %p8089_p4 = pnand %p8087_p2, %p8084_p1 }
  0x9d   : > { %8092 = shalt.err (!%p8089_p4)
}
  0x9e   : > { %s8093_s2 = scalar_lea.vmem %s540_s20, 768  ;;  %p8101_p0 = scmp.lt.s32.totalorder %s540_s20, %s540_s20 }
  0x9f   : > { %p8094_p12 = scmp.ne.s32.totalorder %s540_s20, %s8093_s2  ;;  %p8102_p8 = scmp.lt.s32.totalorder %s8093_s2, %s8093_s2 }
  0xa1   : > { %p8096_p3 = pnand %p8094_p12, %p10354_p10  ;;  %p8103_p5 = por %p8102_p8, %p8101_p0 }
  0xa3   : > { %p8097_p7 = pneg %p8096_p3 }
  0xa5   : > { %p8104_p9 = pnand %p8103_p5, %p8097_p7 }
  0xa7   : > { %8107 = shalt.err (!%p8104_p9)
}
  0xa8   : > { %s8466_s4 = smov 128   ;;  %s8467_s12 = smov 8  }
  0xa9   : > { %p10355_p13 = scmp.ne.s32.totalorder %s10342_s19, 0  ;;  %s8468_s21 = smov [#allocation15]  }
  0xaa   : > { %s555_s17 = sshll.u32 %s8468_s21, 4  ;;  %s6613_s29 = sshll.u32 %s8673_s22, 3  ;;  %s556_s17 = int_to_ptr.vmem [resolvable:$true] %s555_s17 }
  0xab   : > { %7522 = dma.hbm_to_vmem [thread:$0]  (!%p10355_p13), %s10353_s7, 768, %s540_s20, [#allocation13], %s8466_s4, %s8466_s4, %s8467_s12  }
  0xac   : > { %s10356_s9 = sld [smem:[#allocation50_spill]] }
  0xb2   : > { %s8108_s15 = scalar_lea.hbm %s10356_s9, 512 }
  0xb3   : > { %p8109_p9 = scmp.ne.s32.totalorder %s10356_s9, %s8108_s15  ;;  %p8115_p2 = scmp.lt.u32.totalorder %s8108_s15, %s10356_s9 }
  0xb5   : > { %p8111_p6 = pnand %p8109_p9, %p10354_p10 }
  0xb7   : > { %p8112_p1 = pneg %p8111_p6 }
  0xb9   : > { %p8117_p4 = pnand %p8115_p2, %p8112_p1 }
  0xbb   : > { %8120 = shalt.err (!%p8117_p4)
}
  0xbc   : > { %s8121_s20 = scalar_lea.vmem %s556_s17, 512  ;;  %p8129_p0 = scmp.lt.s32.totalorder %s556_s17, %s556_s17 }
  0xbd   : > { %p8122_p12 = scmp.ne.s32.totalorder %s556_s17, %s8121_s20  ;;  %p8130_p8 = scmp.lt.s32.totalorder %s8121_s20, %s8121_s20 }
  0xbf   : > { %p8124_p3 = pnand %p8122_p12, %p10354_p10  ;;  %p8131_p5 = por %p8130_p8, %p8129_p0 }
  0xc1   : > { %p8125_p7 = pneg %p8124_p3 }
  0xc3   : > { %p8132_p11 = pnand %p8131_p5, %p8125_p7 }
  0xc5   : > { %8135 = shalt.err (!%p8132_p11)
}
  0xc6   : > { %7525 = dma.hbm_to_vmem [thread:$0]  (!%p10355_p13), %s10356_s9, 512, %s556_s17, [#allocation16], %s8466_s4, %s8466_s4, %s8467_s12  }
  0xc7   : > { %s6614_s3 = sshll.u32 %s8460_s30, 7  ;;  %s582_s8 = scalar_lea.vmem [#allocation3], %s6613_s29 }
  0xc8   : > { %s589_s11 = sshll.u32 %s582_s8, 4  ;;  %s10357_s18 = sld [smem:[#allocation41_spill]]  ;;  %s590_s11 = int_to_ptr.vmem [resolvable:$true] %s589_s11 }
  0xc9   : > { %s579_s19 = scalar_lea.sflag [#allocation4], %s8673_s22  ;;  %p10358_p10 = scmp.ne.s32.totalorder %s10349_s6, 0 }
  0xce   : > { %s8820_s25 = scalar_lea.hbm %s10357_s18, %s6614_s3  ;;  %s8141_s17 = scalar_lea.hbm %s10357_s18, 512 }
  0xcf   : > { %s8136_s15 = scalar_lea.hbm %s8820_s25, 128  ;;  %p8142_p13 = scmp.lt.u32.totalorder %s8820_s25, %s10357_s18 }
  0xd0   : > { %p8137_p11 = scmp.ne.s32.totalorder %s8820_s25, %s8136_s15  ;;  %p8143_p1 = scmp.lt.u32.totalorder %s8141_s17, %s8136_s15 }
  0xd1   : > { %p8145_p4 = scmp.lt.u32.totalorder %s8136_s15, %s8820_s25 }
  0xd2   : > { %p8139_p9 = pnand %p8137_p11, %p10358_p10  ;;  %p8144_p2 = por %p8143_p1, %p8142_p13 }
  0xd4   : > { %p8140_p6 = pneg %p8139_p9  ;;  %p8146_p12 = por %p8145_p4, %p8144_p2 }
  0xd6   : > { %p8147_p3 = pnand %p8146_p12, %p8140_p6 }
  0xd8   : > { %8150 = shalt.err (!%p8147_p3)
}
  0xd9   : > { %s8151_s20 = scalar_lea.vmem %s590_s11, 128  ;;  %s8469_s10 = smov [#allocation3]  }
  0xda   : > { %p8152_p7 = scmp.ne.s32.totalorder %s590_s11, %s8151_s20  ;;  %s8156_s14 = sshll.u32 %s8469_s10, 4  ;;  %s8157_s14 = int_to_ptr.vmem [resolvable:$false] %s8156_s14 }
  0xdb   : > { %s8158_s3 = scalar_lea.vmem %s8157_s14, 256  ;;  %p8159_p5 = scmp.lt.s32.totalorder %s590_s11, %s8157_s14 }
  0xdc   : > { %p8154_p0 = pnand %p8152_p7, %p10358_p10  ;;  %p8160_p11 = scmp.lt.s32.totalorder %s8158_s3, %s8151_s20 }
  0xde   : > { %p8155_p8 = pneg %p8154_p0  ;;  %p8161_p9 = por %p8160_p11, %p8159_p5 }
  0xe0   : > { %p8162_p1 = pnand %p8161_p9, %p8155_p8 }
  0xe2   : > { %8165 = shalt.err (!%p8162_p1)
}
  0xe3   : > { %p10359_p13 = scmp.ne.s32.totalorder %s10343_s1, 0  ;;  %s10360_s21 = sld [smem:[#allocation43_spill]] }
  0xe4   : > { %s616_s4 = scalar_lea.vmem [#allocation8], %s8673_s22  ;;  %s10361_s5 = sld [smem:[#allocation46_spill]] }
  0xe5   : > { %7529 = dma.hbm_to_vmem [thread:$0]  (!%p10359_p13), %s8820_s25, 128, %s590_s11, %s579_s19  }
  0xe6   : > { %s623_s12 = sshll.u32 %s616_s4, 4  ;;  %s624_s12 = int_to_ptr.vmem [resolvable:$true] %s623_s12 }
  0xe9   : > { %s8844_s15 = scalar_lea.hbm %s10360_s21, %s8707_s27  ;;  %s8171_s19 = scalar_lea.hbm %s10360_s21, 64 }
  0xea   : > { %s8851_s2 = scalar_lea.hbm %s10361_s5, %s8707_s27  ;;  %s8166_s20 = scalar_lea.hbm %s8844_s15, 16 }
  0xeb   : > { %p8167_p6 = scmp.ne.s32.totalorder %s8844_s15, %s8166_s20  ;;  %p8172_p12 = scmp.lt.u32.totalorder %s8844_s15, %s10360_s21 }
  0xec   : > { %p8173_p3 = scmp.lt.u32.totalorder %s8171_s19, %s8166_s20  ;;  %p8175_p0 = scmp.lt.u32.totalorder %s8166_s20, %s8844_s15 }
  0xed   : > { %p8169_p2 = pnand %p8167_p6, %p10358_p10 }
  0xee   : > { %p8174_p7 = por %p8173_p3, %p8172_p12 }
  0xef   : > { %p8170_p4 = pneg %p8169_p2 }
  0xf0   : > { %p8176_p8 = por %p8175_p0, %p8174_p7 }
  0xf2   : > { %p8177_p5 = pnand %p8176_p8, %p8170_p4 }
  0xf4   : > { %8180 = shalt.err (!%p8177_p5)
}
  0xf5   : > { %s8181_s27 = scalar_lea.vmem %s624_s12, 16  ;;  %s8470_s3 = smov [#allocation8]  }
  0xf6   : > { %p8182_p11 = scmp.ne.s32.totalorder %s624_s12, %s8181_s27  ;;  %s8186_s8 = sshll.u32 %s8470_s3, 4  ;;  %s8187_s8 = int_to_ptr.vmem [resolvable:$false] %s8186_s8 }
  0xf7   : > { %s8188_s13 = scalar_lea.vmem %s8187_s8, 32  ;;  %p8189_p6 = scmp.lt.s32.totalorder %s624_s12, %s8187_s8 }
  0xf8   : > { %p8184_p9 = pnand %p8182_p11, %p10358_p10  ;;  %p8190_p2 = scmp.lt.s32.totalorder %s8188_s13, %s8181_s27 }
  0xfa   : > { %p8185_p1 = pneg %p8184_p9  ;;  %p8191_p13 = por %p8190_p2, %p8189_p6 }
  0xfc   : > { %p8192_p3 = pnand %p8191_p13, %p8185_p1 }
  0xfe   : > { %8195 = shalt.err (!%p8192_p3)
}
  0xff   : > { %p10362_p12 = scmp.ne.s32.totalorder %s10343_s1, 0  ;;  %s659_s4 = scalar_lea.vmem [#allocation11], %s8673_s22 }
 0x100   : > { %s666_s17 = sshll.u32 %s659_s4, 4  ;;  %s8196_s29 = scalar_lea.hbm %s8851_s2, 16  ;;  %s667_s17 = int_to_ptr.vmem [resolvable:$true] %s666_s17 }
 0x101   : > { %7535 = dma.hbm_to_vmem [thread:$0]  (!%p10362_p12), %s8844_s15, 16, %s624_s12, %s8720_s16  }
 0x102   : > { %p8197_p4 = scmp.ne.s32.totalorder %s8851_s2, %s8196_s29  ;;  %s8201_s25 = scalar_lea.hbm %s10361_s5, 64 }
 0x103   : > { %p8202_p0 = scmp.lt.u32.totalorder %s8851_s2, %s10361_s5  ;;  %p8203_p8 = scmp.lt.u32.totalorder %s8201_s25, %s8196_s29 }
 0x104   : > { %p8199_p7 = pnand %p8197_p4, %p10358_p10  ;;  %p8205_p11 = scmp.lt.u32.totalorder %s8196_s29, %s8851_s2 }
 0x105   : > { %p8204_p5 = por %p8203_p8, %p8202_p0 }
 0x106   : > { %p8200_p13 = pneg %p8199_p7 }
 0x107   : > { %p8206_p9 = por %p8205_p11, %p8204_p5 }
 0x109   : > { %p8207_p1 = pnand %p8206_p9, %p8200_p13 }
 0x10b   : > { %8210 = shalt.err (!%p8207_p1)
}
 0x10c   : > { %s8211_s22 = scalar_lea.vmem %s667_s17, 16  ;;  %s8471_s16 = smov [#allocation11]  }
 0x10d   : > { %p8212_p6 = scmp.ne.s32.totalorder %s667_s17, %s8211_s22  ;;  %s8216_s15 = sshll.u32 %s8471_s16, 4  ;;  %s8217_s15 = int_to_ptr.vmem [resolvable:$false] %s8216_s15 }
 0x10e   : > { %s8218_s12 = scalar_lea.vmem %s8217_s15, 32  ;;  %p8219_p4 = scmp.lt.s32.totalorder %s667_s17, %s8217_s15 }
 0x10f   : > { %p8214_p2 = pnand %p8212_p6, %p10358_p10  ;;  %p8220_p7 = scmp.lt.s32.totalorder %s8218_s12, %s8211_s22 }
 0x111   : > { %p8215_p3 = pneg %p8214_p2  ;;  %p8221_p12 = por %p8220_p7, %p8219_p4 }
 0x113   : > { %p8222_p0 = pnand %p8221_p12, %p8215_p3 }
 0x115   : > { %8225 = shalt.err (!%p8222_p0)
}
 0x116   : > { %p10363_p8 = scmp.ne.s32.totalorder %s10343_s1, 0  ;;  %p10364_p13 = scmp.ne.s32.totalorder %s10341_s26, 0 }
 0x117   : > { %s8893_s6 = sand.u32 (!%p10364_p13), 1, %s8452_s28   ;;  %p10365_p10 = scmp.ne.s32.totalorder (!%p10364_p13), %s10336_s23, 0 }
 0x118   : > { %7541 = dma.hbm_to_vmem [thread:$0]  (!%p10363_p8), %s8851_s2, 16, %s667_s17, %s8759_s24  }
 0x119   : > { %675 = sbr.rel (%p10364_p13) target bundleno = 16726 (0x4156), region = 72  ;;  %s6621_s14 = sshll.u32 (!%p10364_p13), %s8893_s6, 3 }
 0x11a   : > { %s678_s27 = scalar_lea.sflag (!%p10364_p13), [#allocation4], %s8893_s6  ;;  %s8899_s3 = scalar_lea.vmem (!%p10364_p13), [#allocation3], %s6621_s14 }
 0x120   : > { %8411 = dma.done.wait (%p10365_p10), %s678_s27, 128  }
 0x121   : > { %8413 = vsyncadd (%p10365_p10), %s678_s27, 4294967168  ;;  %s8906_s1 = sand.u32 1, %s8618_s0   ;;  %s689_s26 = scalar_lea.vmem [#allocation6], %s8893_s6 }
 0x122   : > { %s687_s24 = scalar_lea.sflag [#allocation7], %s8906_s1 }
 0x123   : > { %8415 = dma.done.wait (%p10365_p10), %s687_s24, 32  }
 0x124   : > { %8417 = vsyncadd (%p10365_p10), %s687_s24, 4294967264  ;;  %s6622_s2 = sshll.u32 %s8893_s6, 1  ;;  %s697_s8 = scalar_lea.vmem [#allocation8], %s8893_s6 }
 0x125   : > { %s703_s13 = scalar_lea.sflag [#allocation10], %s8906_s1  ;;  %s8919_s4 = scalar_lea.vmem [#allocation9], %s6622_s2 }
 0x126   : > { %8419 = dma.done.wait (%p10365_p10), %s703_s13, 48  }
 0x127   : > { %8421 = vsyncadd (%p10365_p10), %s703_s13, 4294967248  ;;  %s714_s17 = scalar_lea.vmem [#allocation11], %s8893_s6  ;;  %p10366_p12 = scmp.eq.s32.totalorder %s8618_s0, 0 }
 0x129   : > { %8423 = dma.done.wait (%p10366_p12), [#allocation13], 896   ;;  %p10367_p5 = pmov %p10366_p12 }
 0x12b   : > { %8425 = vsyncadd (%p10367_p5), [#allocation13], 4294966400  ;;  %p10368_p11 = pmov %p10367_p5 }
 0x12c   : > { %p10369_p9 = pmov %p10367_p5 }
 0x12d   : > { %8427 = dma.done.wait (%p10368_p11), [#allocation16], 512  }
 0x12e   : > { %8429 = vsyncadd (%p10369_p9), [#allocation16], 4294966784  ;;  %v8472_v0 = vmov 0.0|0.0   ;;  %v8473_v1 = vmov 0.0   ;;  %vm8474_vm0 = vmmov 0   ;;  %vm923_vm1 = vcmask 122880  }
 0x12f   : > { %7297 = vmatprep.subr.bf16.mxu1 %v8472_v0  ;;  %6917 = vmatprep.subr.mxu0 %v8473_v1  ;;  %v6633_v2 = vld [vmem:[%s689_s26] ss:$0 sm:$0xff]  ;;  %v911_v3 = vld [vmem:[#allocation14] sm:$0xff]  ;;  %s8475_s23 = smov 16   ;;  %v913_v7 = vld [vmem:[#allocation14 + $0x10] sm:$0xff]  ;;  %vm837_vm2 = vcmask 64512  }
 0x130   : > { %6919 = vmatprep.mubr.msk.f32.mxu0 %vm8474_vm0, %v8473_v1  ;;  %6934 = vmatprep.mubr.msk.f32.mxu1 %vm8474_vm0, %v8473_v1  ;;  %v912_v4 = vld [vmem:[#allocation14 + $0x8] sm:$0xff]  ;;  %v914_v8 = vld [vmem:[#allocation14 + $0x18] sm:$0xff]  ;;  %v915_v13 = vld [vmem:[#allocation14 + $0x20] sm:$0xff]  ;;  %s8476_s29 = smov 32   ;;  %vm934_vm3 = vcmask 385152   ;;  %vm941_vm4 = vcmask 392192  }
 0x131   : > { %931 = vrot.lane.b32.xlu0 %v6633_v2, %s8475_s23  ;;  %v8940_v5 = vpack.c.bf16 %v912_v4, %v911_v3  ;;  %v922_v6 = vld [vmem:[%s714_s17] sm:$0x1]  ;;  %v829_v9 = vld [vmem:[#allocation12] sm:$0xff]  ;;  %v8945_v11 = vpack.c.bf16 %v914_v8, %v913_v7  ;;  %s10370_s25 = sld [smem:[#allocation49_spill]]  ;;  %v917_v29 = vld [vmem:[#allocation15] sm:$0xff]  ;;  %p823_p1 = scmp.lt.s32.totalorder %s8618_s0, 3 }
 0x132   : > { %924 = vst.msk [vmem:[#allocation2] sm:$0x1] %vm923_vm1, %v922_v6  ;;  %v828_v10 = vld [vmem:[%s8899_s3] sm:$0xff]  ;;  %6918 = vmatpush3.msra.mxu0 %v829_v9  ;;  %v6636_v12 = vld [vmem:[%s697_s8] ss:$0 sm:$0xff]  ;;  %s10371_s15 = sld [smem:[#allocation44_spill]] }
 0x133   : > { %7299 = vmatpush3.bf16.msra.mxu1 %v8940_v5  ;;  %6920 = vmatmul.mubr.msk.f32.vlgmr.msra.gmra.mrb[0].mxu0 %vm837_vm2, %v828_v10  ;;  %v916_v14 = vld [vmem:[#allocation14 + $0x28] sm:$0xff]  ;;  %v918_v30 = vld [vmem:[#allocation15 + $0x8] sm:$0xff]  ;;  %v919_v31 = vld [vmem:[#allocation15 + $0x10] sm:$0xff]  ;;  %s824_s19 = scalar_select %p823_p1, %s8618_s0, 3  ;;  %vm1181_vm5 = vcmask 130048   ;;  %vm1055_vm6 = vcmask 261120  }
 0x134   : > { %7300 = vmatprep.subr.bf16.mxu1 %v8472_v0  ;;  %1027 = vrot.lane.b32.xlu1 %v6636_v12, %s8476_s29  ;;  %v8956_v15 = vpack.c.bf16 %v916_v14, %v915_v13  ;;  %v8969_v32 = vpack.c.bf16 %v918_v30, %v917_v29  ;;  %v920_v33 = vld [vmem:[#allocation15 + $0x18] sm:$0xff]  ;;  %s8477_s27 = smov 96   ;;  %vm9008_vm7 = vmpackc.low %vm1181_vm5, %vm1181_vm5  ;;  %s10374_s26 = sld [smem:[#allocation51_spill]]  ;;  %v8479_v10 = vmov 66   ;;  %vm1158_vm10 = vcmask 1040384  }
 0x135   : > { %7306 = vmatprep.subr.bf16.mxu0 %v8472_v0  ;;  %6945 = vmatprep.mubr.msk.f32.mxu0 %vm8474_vm0, %v8473_v1  ;;  %v8972_v34 = vpack.c.bf16 %v920_v33, %v919_v31  ;;  %s6738_s10 = sshll.u32 %s824_s19, 4  ;;  %s8478_s8 = smov 112   ;;  %vm1195_vm11 = vcmask 123904   ;;  %vm1312_vm12 = vcmask 591408   ;;  %vm1323_vm13 = vcmask 17408  }
 0x136   : > { %7308 = vmatpush3.bf16.msra.mxu0 %v8969_v32  ;;  %7630 = vset.pattern.permute.xlu1 %v8479_v10  ;;  %s8480_s13 = smov 127   ;;  %s8481_s17 = smov 125   ;;  %vm1336_vm14 = vcmask 7168   ;;  %vm1344_vm15 = vcmask 121856  }
 0x137   : > { %7302 = vmatpush3.bf16.msra.mxu1 %v8945_v11  ;;  %v6631_v20 = vld [vmem:[%s10370_s25] ss:$0 sm:$0xff]  ;;  %7309 = vmatprep.subr.bf16.mxu0 %v8472_v0  ;;  %s8482_s23 = smov 58   ;;  %s8488_s20 = smov 15  }
 0x138   : > { %7303 = vmatprep.subr.bf16.mxu1 %v8472_v0  ;;  %s827_s12 = scalar_lea.vmem %s10371_s15, %s6738_s10  ;;  %s8489_s11 = smov 113  }
 0x139   : > { %v8986_v39 = vld [vmem:[%s827_s12] sm:$0xff]  ;;  %v8996_v45 = vld [vmem:[%s827_s12 + $0x8] sm:$0xff]  ;;  %s8491_s25 = smov 80   ;;  %s8492_s19 = smov 78  }
 0x13a   : > { %7311 = vmatpush3.bf16.msra.mxu0 %v8972_v34  ;;  %v1179_v40 = vmul.f32 %v8986_v39, %v8986_v39  ;;  %v1180_v46 = vmul.f32 %v8996_v45, %v8996_v45  ;;  %v9018_v59 = vld [vmem:[%s10374_s26] sm:$0x1]  ;;  %s802_s12 = scalar_lea.vmem [#allocation20], %s8893_s6  ;;  %s10375_s24 = sld [smem:[#allocation52_spill]] }
 0x13b   : > { %7305 = vmatpush3.bf16.msra.mxu1 %v8956_v15  ;;  %7312 = vmatprep.subr.bf16.mxu0 %v8472_v0  ;;  %s822_s22 = scalar_lea.vmem [#allocation24], %s8893_s6  ;;  %s10376_s16 = sld [smem:[#allocation39_spill]] }
 0x13c   : > { %v1182_v42 = vsel %vm1181_vm5, %v1179_v40, 0.0  ;;  %v1185_v47 = vsel %vm1181_vm5, %v1180_v46, 0.0  ;;  %s10013_s15 = sshll.u32 %s8618_s0, 4 }
 0x141   : > { %p10378_p2 = scmp.ne.s32.totalorder %s10376_s16, 0 }
 0x1a3   : > { %v932_v16 = vpop.permute.xlu0 %931 }
 0x1a4   : > { %935 = vst.msk [vmem:[#allocation2] sm:$0x1] %vm934_vm3, %v932_v16 }
 0x1a6   : > { %v1028_v38 = vpop.permute.xlu1 %1027 }
 0x1ab   : > { %v940_v17 = vld [vmem:[#allocation2] sm:$0x1] }
 0x1ac   : > { %6935 = vmatmul.mubr.msk.f32.vlgmr.msra.gmra.mrb[0].mxu1 %vm941_vm4, %v940_v17 }
 0x206   : > { %v907_v18 = vpop.f32.mrb[0].mxu0 }
 0x207   : > { %v6921_v19 = vpop.f32.mrb[1].mxu0  ;;  %v8965_v21 = vadd.f32 %v6631_v20, %v907_v18 }
 0x27f   : > { %v1011_v22 = vpop.f32.mrb[0].mxu1 }
 0x280   : > { %v1012_v23 = vadd.f32 %v1011_v22, %v8965_v21  ;;  %v6936_v24 = vpop.f32.mrb[1].mxu1 }
 0x282   : > { %7682 = vtanh.f32 %v1012_v23  ;;  %v6635_v26 = vmul.f32 -1.442695, %v1012_v23 }
 0x284   : > { %7684 = vpow2.f32 %v6635_v26 }
 0x28c   : > { %v7683_v25 = vpop.eup %7682 }
 0x28d   : > { %1032 = vrot.lane.b32.xlu0 %v7683_v25, %s8476_s29 }
 0x28e   : > { %v7685_v27 = vpop.eup %7684 }
 0x28f   : > { %v1018_v28 = vadd.f32 1.0, %v7685_v27 }
 0x291   : > { %7686 = vrcp.f32 %v1018_v28 }
 0x29b   : > { %v8976_v35 = vpop.eup %7686 }
 0x29c   : > { %v1030_v41 = vmul.f32 %v8976_v35, %v1028_v38 }
 0x2ff   : > { %v1033_v36 = vpop.permute.xlu0 %1032 }
 0x300   : > { %v1035_v37 = vmul.f32 %v8976_v35, %v1033_v36 }
 0x302   : > { %1037 = vrot.lane.b32.xlu1 %v1035_v37, %s8476_s29 }
 0x326   : > { %1183 = vadd.xlane.f32.xlu1 %v1182_v42 }
 0x374   : > { %v1038_v43 = vpop.permute.xlu1 %1037 }
 0x375   : > { %v8992_v44 = vadd.f32 %v1038_v43, %v1030_v41 }
 0x377   : > { %1053 = vrot.lane.b32.xlu0 %v8992_v44, %s8477_s27 }
 0x396   : > { %1186 = vadd.xlane.f32.xlu0 %v1185_v47 }
 0x3b3   : > { %v1184_v49 = vpop.xlane.xlu1 %1183 }
 0x3b4   : > { %v1188_v51 = vmax.f32 %v1184_v49, 1e-16 }
 0x3b6   : > { %7688 = vrsqrt.f32 %v1188_v51 }
 0x3c0   : > { %v7689_v53 = vpop.eup %7688 }
 0x3c1   : > { %v1192_v55 = vmul.f32 %v7689_v53, %v8986_v39 }
 0x3e9   : > { %v1054_v48 = vpop.permute.xlu0 %1053 }
 0x3ea   : > { %6946 = vmatmul.mubr.msk.f32.vlgmr.msra.gmra.mrb[2].mxu0 %vm1055_vm6, %v1054_v48 }
 0x3eb   : > { %6952 = vmatprep.mubr.msk.f32.mxu0 %vm8474_vm0, %v8473_v1 }
 0x423   : > { %v1187_v50 = vpop.xlane.xlu0 %1186 }
 0x424   : > { %v1189_v52 = vmax.f32 %v1187_v50, 1e-16 }
 0x426   : > { %7690 = vrsqrt.f32 %v1189_v52 }
 0x430   : > { %v7691_v54 = vpop.eup %7690 }
 0x431   : > { %v1193_v56 = vmul.f32 %v7691_v54, %v8996_v45 }
 0x433   : > { %v7313_v58 = vpack.c.bf16 %v1193_v56, %v1192_v55 }
 0x435   : > { %7315 = vmatpush3.bf16.xpose.msk.msra.mxu0 %vm9008_vm7, %v7313_v58 }
 0x436   : > { %7316 = vmatprep.subr.bf16.mxu0 %v8472_v0 }
 0x4bd   : > { %v1124_v60 = vpop.f32.mrb[2].mxu0 }
 0x4be   : > { %v1125_v61 = vadd.f32 %v1124_v60, %v9018_v59  ;;  %v6947_v62 = vpop.f32.mrb[3].mxu0  ;;  %v8483_v60 = vmov 48  }
 0x4bf   : > { %7631 = vset.pattern.permute.xlu0 %v8483_v60 }
 0x4c0   : > { %v1138_v63 = vand.u32 2147483647, %v1125_v61  ;;  %7692 = vtanh.f32 %v1125_v61  ;;  %v1135_v18 = vmax.f32 %v1125_v61, 0.0  ;;  %vm1136_vm9 = vcmp.ne.f32.partialorder %v1125_v61, %v1125_v61 }
 0x4c1   : > { %v1174_v24 = vrot.slane %v1125_v61, 7  ;;  %v6638_v31 = vmul.f32 -1.442695, %v1125_v61 }
 0x4c2   : > { %v1139_v2 = vsub.f32 0.0, %v1138_v63 }
 0x4c4   : > { %v1140_v3 = vmul.f32 1.442695, %v1139_v2 }
 0x4c6   : > { %7694 = vpow2.f32 %v1140_v3 }
 0x4ca   : > { %v9021_v4 = vpop.eup %7692 }
 0x4cb   : > { %v1154_v6 = vrot.slane %v9021_v4, 7 }
 0x4cd   : > { %1155 = vrot.lane.b32.xlu0 %v1154_v6, %s8478_s8 }
 0x4d0   : > { %v7695_v7 = vpop.eup %7694 }
 0x4d1   : > { %v1142_v8 = vadd.f32 1.0, %v7695_v7  ;;  %v1145_v9 = vmul.f32 -0.5, %v7695_v7  ;;  %v1148_v13 = vand.u32 2147483647, %v7695_v7 }
 0x4d3   : > { %7696 = vlog2.f32 %v1142_v8  ;;  %v1146_v12 = vadd.f32 1.0, %v1145_v9  ;;  %vm1149_vm8 = vcmp.lt.f32.partialorder %v1148_v13, 0.0004427343  ;;  %v8484_v13 = vmov 70  }
 0x4d4   : > { %7698 = vpow2.f32 %v6638_v31  ;;  %v8487_v31 = vmov 68  }
 0x4d5   : > { %v1147_v17 = vmul.f32 %v7695_v7, %v1146_v12 }
 0x4dd   : > { %v7697_v14 = vpop.eup %7696 }
 0x4de   : > { %v1144_v16 = vmul.f32 0.6931472, %v7697_v14  ;;  %v7699_v36 = vpop.eup %7698 }
 0x4df   : > { %v1132_v38 = vadd.f32 1.0, %v7699_v36 }
 0x4e0   : > { %v1150_v19 = vsel %vm1149_vm8, %v1147_v17, %v1144_v16 }
 0x4e1   : > { %v1151_v20 = vadd.f32 %v1150_v19, %v1135_v18  ;;  %7700 = vrcp.f32 %v1132_v38  ;;  %v8485_v19 = vmov 71  }
 0x4e3   : > { %v1152_v22 = vsel %vm1136_vm9, %v1125_v61, %v1151_v20 }
 0x4e4   : > { %v1167_v23 = vrot.slane %v1152_v22, 7 }
 0x4e6   : > { %1168 = vrot.lane.b32.xlu1 %v1167_v23, %s8480_s13 }
 0x4ea   : > { %1175 = vrot.lane.b32.xlu1 %v1174_v24, %s8481_s17 }
 0x4eb   : > { %v9040_v41 = vpop.eup %7700 }
 0x4ec   : > { %v1161_v42 = vrot.slane %v9040_v41, 7 }
 0x53f   : > { %v1156_v25 = vpop.permute.xlu0 %1155 }
 0x540   : > { %v1159_v26 = vsel %vm1158_vm10, %v9021_v4, %v1156_v25  ;;  %v8486_v25 = vmov 72  }
 0x541   : > { %6953 = vmatmul.mubr.msk.f32.vlgmr.msra.gmra.mrb[4].mxu0 %vm1181_vm5, %v1159_v26  ;;  %v1194_v27 = vmul.f32 %v1159_v26, %v1159_v26 }
 0x542   : > { %6959 = vmatprep.mubr.msk.f32.mxu0 %vm8474_vm0, %v8473_v1 }
 0x543   : > { %v1196_v28 = vsel %vm1195_vm11, %v1194_v27, 0.0 }
 0x544   : > { %1197 = vadd.xlane.f32.xlu0 %v1196_v28 }
 0x558   : > { %v1169_v29 = vpop.permute.xlu1 %1168 }
 0x559   : > { %v9035_v30 = vsel %vm1158_vm10, %v1152_v22, %v1169_v29  ;;  %v939_v22 = vld [vmem:[%s8919_s4] sm:$0x3]  ;;  %s8490_s4 = smov 1  }
 0x55a   : > { %1283 = vperm.xlu1 %7630, %v9035_v30  }
 0x55c   : > { %v1176_v33 = vpop.permute.xlu1 %1175 }
 0x55d   : > { %v1178_v37 = vsel %vm1158_vm10, %v1125_v61, %v1176_v33  ;;  %v1172_v33 = vadd.f32 1.0, %v9035_v30 }
 0x55e   : > { %v1313_v40 = vsel %vm1312_vm12, %v1178_v37, -inf  ;;  %7632 = vset.pattern.permute.xlu1 %v8483_v60 }
 0x57e   : > { %1314 = vmax.xlane.f32.xlu1 %v1313_v40 }
 0x58f   : > { %1162 = vrot.lane.b32.xlu1 %v1161_v42, %s8480_s13 }
 0x5d1   : > { %v1198_v43 = vpop.xlane.xlu0 %1197 }
 0x5d2   : > { %v1278_v46 = vmax.f32 %v1198_v43, 1e-16 }
 0x5d4   : > { %7702 = vrsqrt.f32 %v1278_v46 }
 0x5d9   : > { %v1284_v51 = vpop.permute.xlu1 %1283 }
 0x5de   : > { %v7703_v47 = vpop.eup %7702 }
 0x60b   : > { %v1315_v54 = vpop.xlane.xlu1 %1314 }
 0x60c   : > { %v1316_v55 = vsub.f32 %v1178_v37, %v1315_v54 }
 0x60e   : > { %v1317_v56 = vmul.f32 1.442695, %v1316_v55 }
 0x60f   : > { %v1163_v8 = vpop.permute.xlu1 %1162 }
 0x610   : > { %7704 = vpow2.f32 %v1317_v56  ;;  %v1165_v9 = vsel %vm1158_vm10, %v9040_v41, %v1163_v8 }
 0x611   : > { %v1304_v12 = vsub.f32 1.0, %v1165_v9 }
 0x614   : > { %v1274_v48 = vpop.f32.mrb[4].mxu0 }
 0x615   : > { %v1280_v49 = vmul.f32 %v7703_v47, %v1274_v48  ;;  %v6954_v50 = vpop.f32.mrb[5].mxu0 }
 0x617   : > { %v1286_v52 = vmul.f32 %v1284_v51, %v1280_v49 }
 0x619   : > { %v1287_v53 = vsel %vm1195_vm11, %v1286_v52, -inf }
 0x61a   : > { %1288 = vmax.xlane.f32.xlu0 %v1287_v53  ;;  %v7705_v58 = vpop.eup %7704 }
 0x630   : > { %1320 = vrot.lane.b32.xlu0 %v7705_v58, %s8482_s23 }
 0x6a7   : > { %v1289_v61 = vpop.xlane.xlu0 %1288 }
 0x6a8   : > { %v1290_v62 = vsub.f32 %v1286_v52, %v1289_v61 }
 0x6aa   : > { %v1291_v63 = vmul.f32 1.442695, %v1290_v62 }
 0x6ab   : > { %v1321_v2 = vpop.permute.xlu0 %1320 }
 0x6ac   : > { %7706 = vpow2.f32 %v1291_v63  ;;  %v1324_v3 = vsel %vm1323_vm13, %v1321_v2, 0.0 }
 0x6ad   : > { %1325 = vadd.xlane.f32.xlu0 %v1324_v3 }
 0x6b6   : > { %v7707_v6 = vpop.eup %7706 }
 0x6b7   : > { %v1293_v7 = vsel %vm1195_vm11, %v7707_v6, 0.0 }
 0x6b8   : > { %1294 = vadd.xlane.f32.xlu1 %v1293_v7  ;;  %v7317_v7 = vpack.c.bf16 %v8996_v45, %v8986_v39 }
 0x6ba   : > { %7318 = vmatpush3.bf16.msra.mxu0 %v7317_v7 }
 0x6bb   : > { %7319 = vmatprep.subr.bf16.mxu0 %v8472_v0 }
 0x6c3   : > { %1300 = vperm.xlu0 %7631, %v1165_v9  }
 0x6c9   : > { %1307 = vperm.xlu1 %7632, %v1304_v12  }
 0x6cd   : > { %7633 = vset.pattern.permute.xlu1 %v8484_v13 }
 0x73a   : > { %v1326_v14 = vpop.xlane.xlu0 %1325 }
 0x73b   : > { %7708 = vrcp.f32 %v1326_v14 }
 0x742   : > { %v1301_v26 = vpop.permute.xlu0 %1300 }
 0x745   : > { %v7709_v16 = vpop.eup %7708  ;;  %v1295_v17 = vpop.xlane.xlu1 %1294 }
 0x746   : > { %7710 = vrcp.f32 %v1295_v17  ;;  %v1328_v18 = vmul.f32 %v7709_v16, %v7705_v58 }
 0x747   : > { %7712 = vtanh.f32 %v8992_v44 }
 0x748   : > { %1348 = vperm.xlu1 %7633, %v1328_v18  }
 0x749   : > { %v1308_v23 = vpop.permute.xlu1 %1307 }
 0x74a   : > { %v1310_v28 = vmul.f32 %v1308_v23, %v939_v22 }
 0x74c   : > { %7634 = vset.pattern.permute.xlu1 %v8485_v19 }
 0x74d   : > { %1353 = vperm.xlu1 %7634, %v1328_v18  }
 0x750   : > { %v7711_v20 = vpop.eup %7710 }
 0x751   : > { %v1297_v24 = vmul.f32 %v7711_v20, %v7707_v6  ;;  %7635 = vset.pattern.permute.xlu1 %v8486_v25  ;;  %v7713_v36 = vpop.eup %7712  ;;  %v1596_v20 = vrot.slane %v8965_v21, 1 }
 0x752   : > { %1359 = vperm.xlu1 %7635, %v1328_v18  }
 0x753   : > { %v1303_v27 = vmul.f32 %v1301_v26, %v1297_v24 }
 0x755   : > { %v1311_v29 = vadd.f32 %v1310_v28, %v1303_v27 }
 0x756   : > { %7636 = vset.pattern.permute.xlu1 %v8487_v31 }
 0x757   : > { %1341 = vrot.lane.b32.xlu0 %v1311_v29, %s8488_s20  ;;  %1330 = vrot.lane.b32.xlu1 %v1311_v29, %s8489_s11 }
 0x75b   : > { %1333 = vrot.lane.b32.xlu1 %v1311_v29, %s8490_s4 }
 0x75f   : > { %1338 = vrot.lane.b32.xlu1 %v1311_v29, %s8480_s13 }
 0x763   : > { %1369 = vperm.xlu1 %7636, %v1172_v33  }
 0x767   : > { %1043 = vrot.lane.b32.xlu1 %v7713_v36, %s8476_s29 }
 0x7c7   : > { %v1349_v37 = vpop.permute.xlu1 %1348 }
 0x7c9   : > { %v1342_v48 = vpop.permute.xlu0 %1341 }
 0x7cc   : > { %v1354_v38 = vpop.permute.xlu1 %1353 }
 0x7cd   : > { %v1356_v49 = vmul.f32 %v1354_v38, %v1311_v29 }
 0x7d1   : > { %v1360_v40 = vpop.permute.xlu1 %1359 }
 0x7d5   : > { %v1331_v42 = vpop.permute.xlu1 %1330 }
 0x7d9   : > { %v1334_v43 = vpop.permute.xlu1 %1333 }
 0x7da   : > { %v1337_v46 = vsel %vm1336_vm14, %v1331_v42, %v1334_v43 }
 0x7db   : > { %v1351_v47 = vmul.f32 %v1349_v37, %v1337_v46 }
 0x7dd   : > { %v1339_v50 = vpop.permute.xlu1 %1338  ;;  %v1357_v30 = vadd.f32 %v1356_v49, %v1351_v47 }
 0x7de   : > { %v1345_v51 = vsel %vm1344_vm15, %v1339_v50, %v1342_v48 }
 0x7df   : > { %v1362_v52 = vmul.f32 %v1360_v40, %v1345_v51 }
 0x7e1   : > { %v1363_v53 = vadd.f32 %v1362_v52, %v1357_v30 }
 0x7e2   : > { %v1370_v54 = vpop.permute.xlu1 %1369 }
 0x7e3   : > { %v1364_v55 = vmax.f32 %v1363_v53, 1e-30 }
 0x7e5   : > { %7714 = vlog2.f32 %v1364_v55 }
 0x7e6   : > { %v1044_v56 = vpop.permute.xlu1 %1043 }
 0x7e7   : > { %v1046_v58 = vmul.f32 %v8976_v35, %v1044_v56 }
 0x7e9   : > { %1048 = vrot.lane.b32.xlu1 %v1046_v58, %s8491_s25 }
 0x7ef   : > { %v7715_v61 = vpop.eup %7714 }
 0x7f0   : > { %v1366_v62 = vmul.f32 0.6931472, %v7715_v61 }
 0x7f2   : > { %v1372_v63 = vmul.f32 %v1370_v54, %v1366_v62 }
 0x7f4   : > { %v1373_v2 = vmul.f32 1.442695, %v1372_v63 }
 0x7f6   : > { %7716 = vpow2.f32 %v1373_v2 }
 0x800   : > { %v7717_v3 = vpop.eup %7716 }
 0x801   : > { %v1375_v6 = vsel %vm1195_vm11, %v7717_v3, 0.0 }
 0x802   : > { %1376 = vadd.xlane.f32.xlu0 %v1375_v6 }
 0x85b   : > { %v1049_v8 = vpop.permute.xlu1 %1048 }
 0x85c   : > { %1051 = vst.msk [vmem:[#allocation2 + $0x1] sm:$0x1] %vm934_vm3, %v1049_v8 }
 0x88f   : > { %v1377_v35 = vpop.xlane.xlu0 %1376 }
 0x890   : > { %v1378_v9 = vadd.f32 1e-16, %v1377_v35 }
 0x892   : > { %7718 = vrcp.f32 %v1378_v9 }
 0x89c   : > { %v7719_v12 = vpop.eup %7718 }
 0x89d   : > { %v9073_v14 = vmul.f32 %v7719_v12, %v7717_v3 }
 0x89f   : > { %6960 = vmatmul.mubr.msk.f32.vlgmr.msra.gmra.mrb[6].mxu0 %vm1181_vm5, %v9073_v14  ;;  %v1462_v27 = vrot.slane %v9073_v14, 1 }
 0x8a0   : > { %7321 = vmatpush3.bf16.msra.mxu0 %v8940_v5  ;;  %6979 = vmatprep.mubr.msk.f32.mxu0 %vm8474_vm0, %v8473_v1 }
 0x8a1   : > { %7322 = vmatprep.subr.bf16.mxu0 %v8472_v0 }
 0x8a4   : > { %7324 = vmatpush3.bf16.msra.mxu0 %v8945_v11 }
 0x8a5   : > { %7325 = vmatprep.subr.bf16.mxu0 %v8472_v0 }
 0x8a8   : > { %7327 = vmatpush3.bf16.msra.mxu0 %v8956_v15 }
 0x8a9   : > { %7338 = vmatprep.subr.bf16.mxu0 %v8472_v0 }
 0x972   : > { %v1450_v16 = vpop.f32.mrb[6].mxu0 }
 0x973   : > { %1454 = vst.msk [vmem:[#allocation2 + $0x1] sm:$0x1] %vm923_vm1, %v1450_v16  ;;  %v6961_v17 = vpop.f32.mrb[7].mxu0 }
 0x97a   : > { %v1594_v18 = vld [vmem:[#allocation2 + $0x1] sm:$0x1] }
 0x97b   : > { %6980 = vmatmul.mubr.msk.f32.vlgmr.msra.gmra.mrb[8].mxu0 %vm941_vm4, %v1594_v18 }
 0x97c   : > { %7004 = vmatprep.mubr.msk.f32.mxu0 %vm8474_vm0, %v8473_v1 }
 0xa4e   : > { %v1667_v22 = vpop.f32.mrb[8].mxu0 }
 0xa4f   : > { %v1668_v23 = vadd.f32 %v1667_v22, %v1596_v20  ;;  %v6981_v24 = vpop.f32.mrb[9].mxu0 }
 0xa51   : > { %7720 = vtanh.f32 %v1668_v23  ;;  %v6647_v28 = vmul.f32 -1.442695, %v1668_v23 }
 0xa53   : > { %7722 = vpow2.f32 %v6647_v28 }
 0xa5b   : > { %v7721_v26 = vpop.eup %7720 }
 0xa5c   : > { %1680 = vrot.lane.b32.xlu1 %v7721_v26, %s8476_s29 }
 0xa5d   : > { %v7723_v29 = vpop.eup %7722 }
 0xa5e   : > { %v1674_v33 = vadd.f32 1.0, %v7723_v29 }
 0xa60   : > { %1455 = vrot.lane.b32.xlu1 %v9040_v41, %s8492_s19  ;;  %7724 = vrcp.f32 %v1674_v33 }
 0xa64   : > { %1458 = vrot.lane.b32.xlu1 %v9021_v4, %s8478_s8 }
 0xa6a   : > { %v9097_v36 = vpop.eup %7724 }
 0xa6b   : > { %v1678_v46 = vmul.f32 %v9097_v36, %v8992_v44 }
 0xa8d   : > { %1464 = vxpose.xlu1.b32.start.end [1/1] (short) (narrow) %v1462_v27, 16 }
 0xaab   : > { %7637 = vset.pattern.permute.xlu1 %v8479_v10 }
 0xace   : > { %v1681_v37 = vpop.permute.xlu1 %1680 }
 0xacf   : > { %v1683_v38 = vmul.f32 %v9097_v36, %v1681_v37 }
 0xad1   : > { %1685 = vrot.lane.b32.xlu0 %v1683_v38, %s8476_s29 }
 0xad2   : > { %v1456_v41 = vpop.permute.xlu1 %1455 }
 0xad6   : > { %v1459_v40 = vpop.permute.xlu1 %1458 }
 0xad7   : > { %v1461_v4 = vsel %vm1181_vm5, %v1456_v41, %v1459_v40 }
 0xad8   : > { %6962 = vmatprep.subr.msk.mxu1 %vm1158_vm10, %v1461_v4 }
 0xad9   : > { %6963 = vmatpush3.msk.msra.mxu1 %vm1158_vm10, %v1461_v4 }
 0xada   : > { %7328 = vmatprep.subr.bf16.mxu1 %v8472_v0 }
 0xb0d   : > { %v1480_v42 = vpop.trf.xlu1 }
 0xb0e   : > { %6964 = vmatprep.mubr.msk.f32.mxu1 %vm1336_vm14, %v1480_v42 }
 0xb11   : > { %v1481_v43 = vpop.trf.xlu1 }
 0xb12   : > { %6965 = vmatmul.mubr.msk.f32.vlgmr.msra.gmra.mrb[2].mxu1 %vm1336_vm14, %v1481_v43 }
 0xb13   : > { %7330 = vmatpush3.bf16.msra.mxu1 %v8969_v32  ;;  %6990 = vmatprep.mubr.msk.f32.mxu1 %vm8474_vm0, %v8473_v1 }
 0xb14   : > { %7331 = vmatprep.subr.bf16.mxu1 %v8472_v0 }
 0xb17   : > { %7333 = vmatpush3.bf16.msra.mxu1 %v8972_v34 }
 0xb18   : > { %7334 = vmatprep.subr.bf16.mxu1 %v8472_v0 }
 0xb43   : > { %v1686_v47 = vpop.permute.xlu0 %1685 }
 0xb44   : > { %v9115_v48 = vadd.f32 %v1686_v47, %v1678_v46 }
 0xb46   : > { %1701 = vrot.lane.b32.xlu0 %v9115_v48, %s8477_s27 }
 0xbb8   : > { %v1702_v49 = vpop.permute.xlu0 %1701 }
 0xbb9   : > { %6991 = vmatmul.mubr.msk.f32.vlgmr.msra.gmra.mrb[4].mxu1 %vm1055_vm6, %v1702_v49 }
 0xbba   : > { %6997 = vmatprep.mubr.msk.f32.mxu1 %vm8474_vm0, %v8473_v1 }
 0xbe5   : > { %v6966_v50 = vpop.f32.mrb[2].mxu1 }
 0xbe6   : > { %v1571_v51 = vpop.f32.mrb[3].mxu1  ;;  %v1581_v44 = vsub.f32 1.0, %v6966_v50 }
 0xbe7   : > { %1586 = vrot.lane.b32.xlu0 %v1571_v51, %s8478_s8  ;;  %v1580_v30 = vsub.f32 1.0, %v1571_v51 }
 0xbe8   : > { %v1583_v55 = vmul.f32 %v1581_v44, %v8996_v45 }
 0xbe9   : > { %v1582_v52 = vmul.f32 %v1580_v30, %v8986_v39 }
 0xbeb   : > { %1588 = vrot.lane.b32.xlu0 %v6966_v50, %s8478_s8 }
 0xc59   : > { %v1587_v53 = vpop.permute.xlu0 %1586 }
 0xc5a   : > { %v9125_v54 = vadd.f32 %v1587_v53, %v1582_v52 }
 0xc5c   : > { %v1825_v56 = vmul.f32 %v9125_v54, %v9125_v54 }
 0xc5d   : > { %v1589_v58 = vpop.permute.xlu0 %1588 }
 0xc5e   : > { %v9130_v61 = vadd.f32 %v1589_v58, %v1583_v55  ;;  %v1827_v62 = vsel %vm1181_vm5, %v1825_v56, 0.0 }
 0xc5f   : > { %1828 = vadd.xlane.f32.xlu1 %v1827_v62 }
 0xc60   : > { %v7339_v63 = vpack.c.bf16 %v9130_v61, %v9125_v54  ;;  %v1826_v39 = vmul.f32 %v9130_v61, %v9130_v61 }
 0xc62   : > { %7340 = vmatpush3.bf16.msra.mxu0 %v7339_v63  ;;  %v1830_v2 = vsel %vm1181_vm5, %v1826_v39, 0.0 }
 0xc63   : > { %1831 = vadd.xlane.f32.xlu0 %v1830_v2 }
 0xc8c   : > { %v1771_v45 = vpop.f32.mrb[4].mxu1 }
 0xc8d   : > { %v9139_v3 = vadd.f32 %v1771_v45, %v9018_v59  ;;  %v6992_v6 = vpop.f32.mrb[5].mxu1 }
 0xc8f   : > { %v1785_v7 = vand.u32 2147483647, %v9139_v3  ;;  %7726 = vtanh.f32 %v9139_v3  ;;  %v1820_v16 = vrot.slane %v9139_v3, 7  ;;  %v1782_v28 = vmax.f32 %v9139_v3, 0.0 }
 0xc90   : > { %vm1783_vm9 = vcmp.ne.f32.partialorder %v9139_v3, %v9139_v3  ;;  %v6649_v56 = vmul.f32 -1.442695, %v9139_v3 }
 0xc91   : > { %v1786_v8 = vsub.f32 0.0, %v1785_v7 }
 0xc93   : > { %v1787_v35 = vmul.f32 1.442695, %v1786_v8 }
 0xc95   : > { %7728 = vpow2.f32 %v1787_v35 }
 0xc99   : > { %v9143_v9 = vpop.eup %7726 }
 0xc9a   : > { %v1801_v12 = vrot.slane %v9143_v9, 7 }
 0xc9c   : > { %1802 = vrot.lane.b32.xlu0 %v1801_v12, %s8478_s8 }
 0xc9f   : > { %v7729_v17 = vpop.eup %7728 }
 0xca0   : > { %1821 = vrot.lane.b32.xlu0 %v1820_v16, %s8481_s17  ;;  %v1789_v18 = vadd.f32 1.0, %v7729_v17  ;;  %v1792_v20 = vmul.f32 -0.5, %v7729_v17  ;;  %v1795_v23 = vand.u32 2147483647, %v7729_v17 }
 0xca2   : > { %7730 = vlog2.f32 %v1789_v18  ;;  %v1793_v22 = vadd.f32 1.0, %v1792_v20  ;;  %vm1796_vm8 = vcmp.lt.f32.partialorder %v1795_v23, 0.0004427343 }
 0xca4   : > { %v1794_v27 = vmul.f32 %v7729_v17, %v1793_v22 }
 0xcac   : > { %v7731_v24 = vpop.eup %7730 }
 0xcad   : > { %v1791_v26 = vmul.f32 0.6931472, %v7731_v24 }
 0xcaf   : > { %v1797_v29 = vsel %vm1796_vm8, %v1794_v27, %v1791_v26 }
 0xcb0   : > { %v1798_v33 = vadd.f32 %v1797_v29, %v1782_v28 }
 0xcb2   : > { %v1799_v37 = vsel %vm1783_vm9, %v9139_v3, %v1798_v33 }
 0xcb3   : > { %v1813_v38 = vrot.slane %v1799_v37, 7 }
 0xcb5   : > { %1814 = vrot.lane.b32.xlu1 %v1813_v38, %s8480_s13 }
 0xcec   : > { %v1829_v41 = vpop.xlane.xlu1 %1828 }
 0xced   : > { %v1833_v40 = vmax.f32 %v1829_v41, 1e-16 }
 0xcef   : > { %7732 = vrsqrt.f32 %v1833_v40 }
 0xcf0   : > { %v1832_v4 = vpop.xlane.xlu0 %1831 }
 0xcf1   : > { %v1834_v42 = vmax.f32 %v1832_v4, 1e-16 }
 0xcf3   : > { %7734 = vrsqrt.f32 %v1834_v42 }
 0xcf4   : > { %7736 = vpow2.f32 %v6649_v56 }
 0xcf9   : > { %v7733_v43 = vpop.eup %7732 }
 0xcfa   : > { %v1837_v47 = vmul.f32 %v7733_v43, %v9125_v54 }
 0xcfd   : > { %v7735_v46 = vpop.eup %7734 }
 0xcfe   : > { %v1838_v49 = vmul.f32 %v7735_v46, %v9130_v61  ;;  %v7737_v62 = vpop.eup %7736 }
 0xcff   : > { %v1779_v39 = vadd.f32 1.0, %v7737_v62 }
 0xd00   : > { %v7335_v50 = vpack.c.bf16 %v1838_v49, %v1837_v47 }
 0xd01   : > { %7738 = vrcp.f32 %v1779_v39 }
 0xd02   : > { %7337 = vmatpush3.bf16.xpose.msk.msra.mxu1 %vm9008_vm7, %v7335_v50 }
 0xd03   : > { %7341 = vmatprep.subr.bf16.mxu1 %v8472_v0 }
 0xd0b   : > { %v9180_v45 = vpop.eup %7738 }
 0xd0c   : > { %v1807_v6 = vrot.slane %v9180_v45, 7 }
 0xd0e   : > { %v1803_v51 = vpop.permute.xlu0 %1802 }
 0xd0f   : > { %v1805_v30 = vsel %vm1158_vm10, %v9143_v9, %v1803_v51 }
 0xd10   : > { %6998 = vmatmul.mubr.msk.f32.vlgmr.msra.gmra.mrb[6].mxu1 %vm1181_vm5, %v1805_v30  ;;  %v1839_v44 = vmul.f32 %v1805_v30, %v1805_v30 }
 0xd11   : > { %7343 = vmatpush3.bf16.msra.mxu1 %v8940_v5  ;;  %7024 = vmatprep.mubr.msk.f32.mxu1 %vm8474_vm0, %v8473_v1 }
 0xd12   : > { %v1840_v52 = vsel %vm1195_vm11, %v1839_v44, 0.0  ;;  %7344 = vmatprep.subr.bf16.mxu1 %v8472_v0  ;;  %v1822_v58 = vpop.permute.xlu0 %1821 }
 0xd13   : > { %1841 = vadd.xlane.f32.xlu0 %v1840_v52  ;;  %v1824_v63 = vsel %vm1158_vm10, %v9139_v3, %v1822_v58 }
 0xd14   : > { %v1956_v2 = vsel %vm1312_vm12, %v1824_v63, -inf }
 0xd15   : > { %7346 = vmatpush3.bf16.msra.mxu1 %v8945_v11 }
 0xd16   : > { %7347 = vmatprep.subr.bf16.mxu1 %v8472_v0 }
 0xd19   : > { %7349 = vmatpush3.bf16.msra.mxu1 %v8956_v15 }
 0xd1a   : > { %7360 = vmatprep.subr.bf16.mxu1 %v8472_v0 }
 0xd27   : > { %v1815_v53 = vpop.permute.xlu1 %1814 }
 0xd28   : > { %v9172_v55 = vsel %vm1158_vm10, %v1799_v37, %v1815_v53 }
 0xd29   : > { %1927 = vperm.xlu1 %7637, %v9172_v55   ;;  %v1818_v58 = vadd.f32 1.0, %v9172_v55 }
 0xd2d   : > { %7638 = vset.pattern.permute.xlu1 %v8483_v60 }
 0xd4d   : > { %1957 = vmax.xlane.f32.xlu1 %v1956_v2 }
 0xd5e   : > { %1808 = vrot.lane.b32.xlu1 %v1807_v6, %s8480_s13 }
 0xda0   : > { %v1842_v7 = vpop.xlane.xlu0 %1841 }
 0xda1   : > { %v1922_v8 = vmax.f32 %v1842_v7, 1e-16 }
 0xda3   : > { %7740 = vrsqrt.f32 %v1922_v8 }
 0xda8   : > { %v1928_v18 = vpop.permute.xlu1 %1927 }
 0xdad   : > { %v7741_v35 = vpop.eup %7740 }
 0xdda   : > { %v1958_v22 = vpop.xlane.xlu1 %1957 }
 0xddb   : > { %v1959_v23 = vsub.f32 %v1824_v63, %v1958_v22 }
 0xddd   : > { %v1960_v24 = vmul.f32 1.442695, %v1959_v23 }
 0xdde   : > { %v1809_v40 = vpop.permute.xlu1 %1808 }
 0xddf   : > { %7742 = vpow2.f32 %v1960_v24  ;;  %v1811_v4 = vsel %vm1158_vm10, %v9180_v45, %v1809_v40 }
 0xde0   : > { %v1948_v42 = vsub.f32 1.0, %v1811_v4 }
 0xde3   : > { %v1918_v12 = vpop.f32.mrb[6].mxu1 }
 0xde4   : > { %v1924_v16 = vmul.f32 %v7741_v35, %v1918_v12  ;;  %v6999_v17 = vpop.f32.mrb[7].mxu1 }
 0xde6   : > { %v1930_v3 = vmul.f32 %v1928_v18, %v1924_v16 }
 0xde8   : > { %v1931_v20 = vsel %vm1195_vm11, %v1930_v3, -inf }
 0xde9   : > { %1932 = vmax.xlane.f32.xlu0 %v1931_v20  ;;  %v7743_v26 = vpop.eup %7742 }
 0xdff   : > { %1963 = vrot.lane.b32.xlu0 %v7743_v26, %s8482_s23 }
 0xe76   : > { %v1933_v27 = vpop.xlane.xlu0 %1932 }
 0xe77   : > { %v1934_v28 = vsub.f32 %v1930_v3, %v1933_v27 }
 0xe79   : > { %v1935_v29 = vmul.f32 1.442695, %v1934_v28 }
 0xe7a   : > { %v1964_v33 = vpop.permute.xlu0 %1963 }
 0xe7b   : > { %7744 = vpow2.f32 %v1935_v29  ;;  %v1966_v37 = vsel %vm1323_vm13, %v1964_v33, 0.0 }
 0xe7c   : > { %1967 = vadd.xlane.f32.xlu0 %v1966_v37 }
 0xe85   : > { %v7745_v38 = vpop.eup %7744 }
 0xe86   : > { %v1937_v41 = vsel %vm1195_vm11, %v7745_v38, 0.0 }
 0xe87   : > { %1938 = vadd.xlane.f32.xlu1 %v1937_v41 }
 0xe92   : > { %1944 = vperm.xlu0 %7631, %v1811_v4  }
 0xe96   : > { %7639 = vset.pattern.permute.xlu0 %v8484_v13 }
 0xe98   : > { %1951 = vperm.xlu1 %7638, %v1948_v42  }
 0xe9c   : > { %7640 = vset.pattern.permute.xlu1 %v8485_v19 }
 0xf09   : > { %v1968_v43 = vpop.xlane.xlu0 %1967 }
 0xf0a   : > { %7746 = vrcp.f32 %v1968_v43 }
 0xf11   : > { %v1945_v44 = vpop.permute.xlu0 %1944 }
 0xf14   : > { %v7747_v46 = vpop.eup %7746  ;;  %v1939_v47 = vpop.xlane.xlu1 %1938 }
 0xf15   : > { %7748 = vrcp.f32 %v1939_v47  ;;  %v1970_v49 = vmul.f32 %v7747_v46, %v7743_v26  ;;  %v2235_v47 = vrot.slane %v8965_v21, 2 }
 0xf16   : > { %7750 = vtanh.f32 %v9115_v48 }
 0xf17   : > { %1993 = vperm.xlu1 %7640, %v1970_v49   ;;  %1988 = vperm.xlu0 %7639, %v1970_v49  }
 0xf18   : > { %v1952_v51 = vpop.permute.xlu1 %1951 }
 0xf19   : > { %v1954_v53 = vmul.f32 %v1952_v51, %v9073_v14 }
 0xf1b   : > { %7641 = vset.pattern.permute.xlu1 %v8486_v25  ;;  %7642 = vset.pattern.permute.xlu0 %v8487_v31 }
 0xf1c   : > { %1999 = vperm.xlu1 %7641, %v1970_v49  }
 0xf1f   : > { %v7749_v50 = vpop.eup %7748 }
 0xf20   : > { %v1941_v30 = vmul.f32 %v7749_v50, %v7745_v38  ;;  %7643 = vset.pattern.permute.xlu1 %v8479_v10  ;;  %v7751_v62 = vpop.eup %7750 }
 0xf22   : > { %v1947_v52 = vmul.f32 %v1945_v44, %v1941_v30 }
 0xf24   : > { %v1955_v56 = vadd.f32 %v1954_v53, %v1947_v52 }
 0xf26   : > { %1975 = vrot.lane.b32.xlu1 %v1955_v56, %s8490_s4  ;;  %1972 = vrot.lane.b32.xlu0 %v1955_v56, %s8489_s11 }
 0xf2a   : > { %1982 = vrot.lane.b32.xlu1 %v1955_v56, %s8488_s20  ;;  %1979 = vrot.lane.b32.xlu0 %v1955_v56, %s8480_s13 }
 0xf2e   : > { %2009 = vperm.xlu0 %7642, %v1818_v58  }
 0xf32   : > { %1691 = vrot.lane.b32.xlu0 %v7751_v62, %s8476_s29 }
 0xf96   : > { %v1994_v63 = vpop.permute.xlu1 %1993  ;;  %v1989_v39 = vpop.permute.xlu0 %1988 }
 0xf97   : > { %v1996_v35 = vmul.f32 %v1994_v63, %v1955_v56 }
 0xf9a   : > { %v1973_v2 = vpop.permute.xlu0 %1972 }
 0xf9b   : > { %v2000_v14 = vpop.permute.xlu1 %1999 }
 0xf9e   : > { %v1980_v12 = vpop.permute.xlu0 %1979 }
 0xf9f   : > { %v1976_v6 = vpop.permute.xlu1 %1975 }
 0xfa0   : > { %v1978_v7 = vsel %vm1336_vm14, %v1973_v2, %v1976_v6 }
 0xfa1   : > { %v1991_v8 = vmul.f32 %v1989_v39, %v1978_v7 }
 0xfa3   : > { %v1983_v16 = vpop.permute.xlu1 %1982  ;;  %v1997_v18 = vadd.f32 %v1996_v35, %v1991_v8 }
 0xfa4   : > { %v1985_v17 = vsel %vm1344_vm15, %v1980_v12, %v1983_v16 }
 0xfa5   : > { %v2002_v3 = vmul.f32 %v2000_v14, %v1985_v17 }
 0xfa7   : > { %v2003_v55 = vadd.f32 %v2002_v3, %v1997_v18 }
 0xfa9   : > { %v2004_v20 = vmax.f32 %v2003_v55, 1e-30 }
 0xfab   : > { %7752 = vlog2.f32 %v2004_v20 }
 0xfad   : > { %v2010_v22 = vpop.permute.xlu0 %2009 }
 0xfb1   : > { %v1692_v23 = vpop.permute.xlu0 %1691 }
 0xfb2   : > { %v1694_v24 = vmul.f32 %v9097_v36, %v1692_v23 }
 0xfb4   : > { %1696 = vrot.lane.b32.xlu0 %v1694_v24, %s8491_s25 }
 0xfb5   : > { %v7753_v26 = vpop.eup %7752 }
 0xfb6   : > { %v2006_v27 = vmul.f32 0.6931472, %v7753_v26 }
 0xfb8   : > { %v2012_v28 = vmul.f32 %v2010_v22, %v2006_v27 }
 0xfba   : > { %v2013_v29 = vmul.f32 1.442695, %v2012_v28 }
 0xfbc   : > { %7754 = vpow2.f32 %v2013_v29 }
 0xfc6   : > { %v7755_v33 = vpop.eup %7754 }
 0xfc7   : > { %v2015_v37 = vsel %vm1195_vm11, %v7755_v33, 0.0 }
 0xfc8   : > { %2016 = vadd.xlane.f32.xlu1 %v2015_v37 }
0x1026   : > { %v1697_v38 = vpop.permute.xlu0 %1696 }
0x1027   : > { %1699 = vst.msk [vmem:[#allocation2 + $0x2] sm:$0x1] %vm934_vm3, %v1697_v38 }
0x1055   : > { %v2017_v41 = vpop.xlane.xlu1 %2016 }
0x1056   : > { %v2018_v40 = vadd.f32 1e-16, %v2017_v41 }
0x1058   : > { %7756 = vrcp.f32 %v2018_v40 }
0x1062   : > { %v7757_v4 = vpop.eup %7756 }
0x1063   : > { %v9209_v42 = vmul.f32 %v7757_v4, %v7755_v33 }
0x1065   : > { %7005 = vmatmul.mubr.msk.f32.vlgmr.msra.gmra.mrb[10].mxu0 %vm1181_vm5, %v9209_v42  ;;  %v2102_v44 = vrot.slane %v9209_v42, 1 }
0x1138   : > { %v2090_v36 = vpop.f32.mrb[10].mxu0 }
0x1139   : > { %2094 = vst.msk [vmem:[#allocation2 + $0x2] sm:$0x1] %vm923_vm1, %v2090_v36  ;;  %v7006_v43 = vpop.f32.mrb[11].mxu0 }
0x1140   : > { %v2234_v46 = vld [vmem:[#allocation2 + $0x2] sm:$0x1] }
0x1141   : > { %7025 = vmatmul.mubr.msk.f32.vlgmr.msra.gmra.mrb[8].mxu1 %vm941_vm4, %v2234_v46 }
0x1142   : > { %7049 = vmatprep.mubr.msk.f32.mxu1 %vm8474_vm0, %v8473_v1 }
0x1214   : > { %v2306_v49 = vpop.f32.mrb[8].mxu1 }
0x1215   : > { %v2307_v50 = vadd.f32 %v2306_v49, %v2235_v47  ;;  %v7026_v51 = vpop.f32.mrb[9].mxu1 }
0x1217   : > { %7758 = vtanh.f32 %v2307_v50  ;;  %v6658_v52 = vmul.f32 -1.442695, %v2307_v50 }
0x1219   : > { %7760 = vpow2.f32 %v6658_v52 }
0x1221   : > { %v7759_v30 = vpop.eup %7758 }
0x1222   : > { %2319 = vrot.lane.b32.xlu0 %v7759_v30, %s8476_s29 }
0x1223   : > { %v7761_v53 = vpop.eup %7760 }
0x1224   : > { %v2313_v56 = vadd.f32 1.0, %v7761_v53 }
0x1226   : > { %2095 = vrot.lane.b32.xlu0 %v9180_v45, %s8492_s19  ;;  %7762 = vrcp.f32 %v2313_v56 }
0x122a   : > { %2098 = vrot.lane.b32.xlu0 %v9143_v9, %s8478_s8 }
0x1230   : > { %v9225_v58 = vpop.eup %7762 }
0x1231   : > { %v2317_v6 = vmul.f32 %v9225_v58, %v9115_v48 }
0x1248   : > { %2104 = vxpose.xlu0.b32.start.end [1/1] (short) (narrow) %v2102_v44, 16 }
0x1271   : > { %7644 = vset.pattern.permute.xlu0 %v8483_v60 }
0x1294   : > { %v2320_v62 = vpop.permute.xlu0 %2319 }
0x1295   : > { %v2322_v63 = vmul.f32 %v9225_v58, %v2320_v62 }
0x1297   : > { %2324 = vrot.lane.b32.xlu1 %v2322_v63, %s8476_s29 }
0x1298   : > { %v2096_v45 = vpop.permute.xlu0 %2095 }
0x129c   : > { %v2099_v39 = vpop.permute.xlu0 %2098 }
0x129d   : > { %v2101_v9 = vsel %vm1181_vm5, %v2096_v45, %v2099_v39 }
0x129e   : > { %7007 = vmatprep.subr.msk.mxu0 %vm1158_vm10, %v2101_v9 }
0x129f   : > { %7008 = vmatpush3.msk.msra.mxu0 %vm1158_vm10, %v2101_v9 }
0x12a0   : > { %7350 = vmatprep.subr.bf16.mxu0 %v8472_v0 }
0x12c8   : > { %v2120_v14 = vpop.trf.xlu0 }
0x12c9   : > { %7009 = vmatprep.mubr.msk.f32.mxu0 %vm1336_vm14, %v2120_v14 }
0x12cc   : > { %v2121_v2 = vpop.trf.xlu0 }
0x12cd   : > { %7010 = vmatmul.mubr.msk.f32.vlgmr.msra.gmra.mrb[12].mxu0 %vm1336_vm14, %v2121_v2 }
0x12ce   : > { %7352 = vmatpush3.bf16.msra.mxu0 %v8969_v32  ;;  %7035 = vmatprep.mubr.msk.f32.mxu0 %vm8474_vm0, %v8473_v1 }
0x12cf   : > { %7353 = vmatprep.subr.bf16.mxu0 %v8472_v0 }
0x12d2   : > { %7355 = vmatpush3.bf16.msra.mxu0 %v8972_v34 }
0x12d3   : > { %7356 = vmatprep.subr.bf16.mxu0 %v8472_v0 }
0x1309   : > { %v2325_v7 = vpop.permute.xlu1 %2324 }
0x130a   : > { %v9243_v8 = vadd.f32 %v2325_v7, %v2317_v6 }
0x130c   : > { %2340 = vrot.lane.b32.xlu1 %v9243_v8, %s8477_s27 }
0x137e   : > { %v2341_v35 = vpop.permute.xlu1 %2340 }
0x137f   : > { %7036 = vmatmul.mubr.msk.f32.vlgmr.msra.gmra.mrb[14].mxu0 %vm1055_vm6, %v2341_v35 }
0x1380   : > { %7042 = vmatprep.mubr.msk.f32.mxu0 %vm8474_vm0, %v8473_v1 }
0x13a0   : > { %v7011_v12 = vpop.f32.mrb[12].mxu0 }
0x13a1   : > { %2228 = vrot.lane.b32.xlu1 %v7011_v12, %s8478_s8  ;;  %v2211_v16 = vpop.f32.mrb[13].mxu0  ;;  %v2221_v17 = vsub.f32 1.0, %v7011_v12 }
0x13a2   : > { %2226 = vrot.lane.b32.xlu0 %v2211_v16, %s8478_s8  ;;  %v2220_v48 = vsub.f32 1.0, %v2211_v16 }
0x13a3   : > { %v2223_v18 = vmul.f32 %v2221_v17, %v9130_v61 }
0x13a4   : > { %v2222_v55 = vmul.f32 %v2220_v48, %v9125_v54 }
0x1413   : > { %v2229_v3 = vpop.permute.xlu1 %2228 }
0x1414   : > { %v9254_v20 = vadd.f32 %v2229_v3, %v2223_v18  ;;  %v2227_v22 = vpop.permute.xlu0 %2226 }
0x1415   : > { %v9256_v23 = vadd.f32 %v2227_v22, %v2222_v55 }
0x1416   : > { %v2465_v61 = vmul.f32 %v9254_v20, %v9254_v20 }
0x1417   : > { %v7361_v24 = vpack.c.bf16 %v9254_v20, %v9256_v23  ;;  %v2464_v26 = vmul.f32 %v9256_v23, %v9256_v23 }
0x1418   : > { %v2469_v54 = vsel %vm1181_vm5, %v2465_v61, 0.0 }
0x1419   : > { %7362 = vmatpush3.bf16.msra.mxu1 %v7361_v24  ;;  %v2466_v27 = vsel %vm1181_vm5, %v2464_v26, 0.0 }
0x141a   : > { %2467 = vadd.xlane.f32.xlu1 %v2466_v27 }
0x141e   : > { %2470 = vadd.xlane.f32.xlu1 %v2469_v54 }
0x1452   : > { %v2410_v28 = vpop.f32.mrb[14].mxu0 }
0x1453   : > { %v9267_v29 = vadd.f32 %v2410_v28, %v9018_v59  ;;  %v7037_v33 = vpop.f32.mrb[15].mxu0 }
0x1455   : > { %v2424_v37 = vand.u32 2147483647, %v9267_v29  ;;  %7764 = vtanh.f32 %v9267_v29  ;;  %v2421_v30 = vmax.f32 %v9267_v29, 0.0  ;;  %vm2422_vm9 = vcmp.ne.f32.partialorder %v9267_v29, %v9267_v29 }
0x1456   : > { %v2459_v62 = vrot.slane %v9267_v29, 7  ;;  %v6660_v55 = vmul.f32 -1.442695, %v9267_v29 }
0x1457   : > { %v2425_v38 = vsub.f32 0.0, %v2424_v37 }
0x1459   : > { %v2426_v41 = vmul.f32 1.442695, %v2425_v38 }
0x145b   : > { %7766 = vpow2.f32 %v2426_v41 }
0x145f   : > { %v9271_v40 = vpop.eup %7764 }
0x1460   : > { %v2440_v4 = vrot.slane %v9271_v40, 7 }
0x1462   : > { %2441 = vrot.lane.b32.xlu1 %v2440_v4, %s8478_s8 }
0x1465   : > { %v7767_v36 = vpop.eup %7766 }
0x1466   : > { %v2428_v43 = vadd.f32 1.0, %v7767_v36  ;;  %v2431_v46 = vmul.f32 -0.5, %v7767_v36  ;;  %v2434_v47 = vand.u32 2147483647, %v7767_v36 }
0x1468   : > { %7768 = vlog2.f32 %v2428_v43  ;;  %v2432_v59 = vadd.f32 1.0, %v2431_v46  ;;  %vm2435_vm8 = vcmp.lt.f32.partialorder %v2434_v47, 0.0004427343 }
0x146a   : > { %v2433_v51 = vmul.f32 %v7767_v36, %v2432_v59 }
0x1472   : > { %v7769_v49 = vpop.eup %7768 }
0x1473   : > { %v2430_v50 = vmul.f32 0.6931472, %v7769_v49 }
0x1475   : > { %v2436_v44 = vsel %vm2435_vm8, %v2433_v51, %v2430_v50 }
0x1476   : > { %v2437_v52 = vadd.f32 %v2436_v44, %v2421_v30 }
0x1478   : > { %v2438_v53 = vsel %vm2422_vm9, %v9267_v29, %v2437_v52 }
0x1479   : > { %v2452_v56 = vrot.slane %v2438_v53, 7 }
0x147b   : > { %2453 = vrot.lane.b32.xlu0 %v2452_v56, %s8480_s13 }
0x147f   : > { %2460 = vrot.lane.b32.xlu0 %v2459_v62, %s8481_s17 }
0x14a7   : > { %v2468_v63 = vpop.xlane.xlu1 %2467 }
0x14a8   : > { %v2472_v45 = vmax.f32 %v2468_v63, 1e-16 }
0x14aa   : > { %7770 = vrsqrt.f32 %v2472_v45 }
0x14ab   : > { %v2471_v39 = vpop.xlane.xlu1 %2470 }
0x14ac   : > { %v2473_v9 = vmax.f32 %v2471_v39, 1e-16 }
0x14ae   : > { %7772 = vrsqrt.f32 %v2473_v9 }
0x14af   : > { %7774 = vpow2.f32 %v6660_v55 }
0x14b4   : > { %v7771_v14 = vpop.eup %7770 }
0x14b5   : > { %v2476_v6 = vmul.f32 %v7771_v14, %v9256_v23 }
0x14b8   : > { %v7773_v2 = vpop.eup %7772 }
0x14b9   : > { %v2477_v7 = vmul.f32 %v7773_v2, %v9254_v20  ;;  %v7775_v24 = vpop.eup %7774 }
0x14ba   : > { %v2418_v27 = vadd.f32 1.0, %v7775_v24 }
0x14bb   : > { %v7357_v35 = vpack.c.bf16 %v2477_v7, %v2476_v6 }
0x14bc   : > { %7776 = vrcp.f32 %v2418_v27 }
0x14bd   : > { %7359 = vmatpush3.bf16.xpose.msk.msra.mxu0 %vm9008_vm7, %v7357_v35 }
0x14be   : > { %7363 = vmatprep.subr.bf16.mxu0 %v8472_v0 }
0x14c6   : > { %v9308_v54 = vpop.eup %7776 }
0x14c7   : > { %v2446_v28 = vrot.slane %v9308_v54, 7 }
0x14d4   : > { %v2442_v12 = vpop.permute.xlu1 %2441 }
0x14d5   : > { %v2444_v16 = vsel %vm1158_vm10, %v9271_v40, %v2442_v12 }
0x14d6   : > { %7043 = vmatmul.mubr.msk.f32.vlgmr.msra.gmra.mrb[16].mxu0 %vm1181_vm5, %v2444_v16  ;;  %v2478_v17 = vmul.f32 %v2444_v16, %v2444_v16 }
0x14d7   : > { %7365 = vmatpush3.bf16.msra.mxu0 %v8940_v5  ;;  %7069 = vmatprep.mubr.msk.f32.mxu0 %vm8474_vm0, %v8473_v1 }
0x14d8   : > { %v2479_v48 = vsel %vm1195_vm11, %v2478_v17, 0.0  ;;  %7366 = vmatprep.subr.bf16.mxu0 %v8472_v0 }
0x14d9   : > { %2480 = vadd.xlane.f32.xlu0 %v2479_v48 }
0x14db   : > { %7368 = vmatpush3.bf16.msra.mxu0 %v8945_v11 }
0x14dc   : > { %7369 = vmatprep.subr.bf16.mxu0 %v8472_v0 }
0x14df   : > { %7371 = vmatpush3.bf16.msra.mxu0 %v8956_v15 }
0x14e0   : > { %7382 = vmatprep.subr.bf16.mxu0 %v8472_v0 }
0x14ed   : > { %v2454_v18 = vpop.permute.xlu0 %2453 }
0x14ee   : > { %v9300_v3 = vsel %vm1158_vm10, %v2438_v53, %v2454_v18 }
0x14ef   : > { %2566 = vperm.xlu1 %7643, %v9300_v3   ;;  %v2457_v55 = vadd.f32 1.0, %v9300_v3 }
0x14f1   : > { %v2461_v22 = vpop.permute.xlu0 %2460 }
0x14f2   : > { %v2463_v26 = vsel %vm1158_vm10, %v9267_v29, %v2461_v22 }
0x14f3   : > { %7645 = vset.pattern.permute.xlu1 %v8483_v60  ;;  %v2595_v61 = vsel %vm1312_vm12, %v2463_v26, -inf }
0x1513   : > { %2596 = vmax.xlane.f32.xlu1 %v2595_v61 }
0x1524   : > { %2447 = vrot.lane.b32.xlu1 %v2446_v28, %s8480_s13 }
0x1566   : > { %v2481_v33 = vpop.xlane.xlu0 %2480 }
0x1567   : > { %v2561_v37 = vmax.f32 %v2481_v33, 1e-16 }
0x1569   : > { %7778 = vrsqrt.f32 %v2561_v37 }
0x156e   : > { %v2567_v43 = vpop.permute.xlu1 %2566 }
0x1573   : > { %v7779_v38 = vpop.eup %7778 }
0x15a0   : > { %v2597_v59 = vpop.xlane.xlu1 %2596 }
0x15a1   : > { %v2598_v47 = vsub.f32 %v2463_v26, %v2597_v59 }
0x15a3   : > { %v2599_v49 = vmul.f32 1.442695, %v2598_v47 }
0x15a4   : > { %v2448_v63 = vpop.permute.xlu1 %2447 }
0x15a5   : > { %7780 = vpow2.f32 %v2599_v49  ;;  %v2450_v45 = vsel %vm1158_vm10, %v9308_v54, %v2448_v63 }
0x15a6   : > { %v2587_v39 = vsub.f32 1.0, %v2450_v45 }
0x15a9   : > { %v2557_v41 = vpop.f32.mrb[16].mxu0 }
0x15aa   : > { %v2563_v4 = vmul.f32 %v7779_v38, %v2557_v41  ;;  %v7044_v36 = vpop.f32.mrb[17].mxu0 }
0x15ac   : > { %v2569_v29 = vmul.f32 %v2567_v43, %v2563_v4 }
0x15ae   : > { %v2570_v46 = vsel %vm1195_vm11, %v2569_v29, -inf }
0x15af   : > { %2571 = vmax.xlane.f32.xlu0 %v2570_v46  ;;  %v7781_v50 = vpop.eup %7780 }
0x15c5   : > { %2602 = vrot.lane.b32.xlu0 %v7781_v50, %s8482_s23 }
0x163c   : > { %v2572_v51 = vpop.xlane.xlu0 %2571 }
0x163d   : > { %v2573_v30 = vsub.f32 %v2569_v29, %v2572_v51 }
0x163f   : > { %v2574_v44 = vmul.f32 1.442695, %v2573_v30 }
0x1640   : > { %v2603_v52 = vpop.permute.xlu0 %2602 }
0x1641   : > { %7782 = vpow2.f32 %v2574_v44  ;;  %v2605_v53 = vsel %vm1323_vm13, %v2603_v52, 0.0 }
0x1642   : > { %2606 = vadd.xlane.f32.xlu0 %v2605_v53 }
0x164b   : > { %v7783_v56 = vpop.eup %7782 }
0x164c   : > { %v2576_v62 = vsel %vm1195_vm11, %v7783_v56, 0.0 }
0x164d   : > { %2577 = vadd.xlane.f32.xlu1 %v2576_v62 }
0x1658   : > { %2583 = vperm.xlu0 %7644, %v2450_v45  }
0x165e   : > { %2590 = vperm.xlu1 %7645, %v2587_v39  }
0x1662   : > { %7646 = vset.pattern.permute.xlu1 %v8484_v13 }
0x16cf   : > { %v2607_v9 = vpop.xlane.xlu0 %2606 }
0x16d0   : > { %7784 = vrcp.f32 %v2607_v9 }
0x16d7   : > { %v2584_v16 = vpop.permute.xlu0 %2583 }
0x16da   : > { %v7785_v14 = vpop.eup %7784  ;;  %v2578_v2 = vpop.xlane.xlu1 %2577 }
0x16db   : > { %7786 = vrcp.f32 %v2578_v2  ;;  %v2609_v6 = vmul.f32 %v7785_v14, %v7781_v50  ;;  %v2874_v14 = vrot.slane %v8965_v21, 3 }
0x16dc   : > { %7788 = vtanh.f32 %v9243_v8 }
0x16dd   : > { %2627 = vperm.xlu1 %7646, %v2609_v6  }
0x16de   : > { %v2591_v35 = vpop.permute.xlu1 %2590 }
0x16df   : > { %v2593_v48 = vmul.f32 %v2591_v35, %v9209_v42 }
0x16e1   : > { %7647 = vset.pattern.permute.xlu1 %v8485_v19 }
0x16e2   : > { %2632 = vperm.xlu1 %7647, %v2609_v6  }
0x16e5   : > { %v7787_v7 = vpop.eup %7786 }
0x16e6   : > { %v2580_v12 = vmul.f32 %v7787_v7, %v7783_v56  ;;  %7648 = vset.pattern.permute.xlu1 %v8486_v25  ;;  %v7789_v22 = vpop.eup %7788 }
0x16e7   : > { %2638 = vperm.xlu1 %7648, %v2609_v6  }
0x16e8   : > { %v2586_v17 = vmul.f32 %v2584_v16, %v2580_v12 }
0x16ea   : > { %v2594_v18 = vadd.f32 %v2593_v48, %v2586_v17 }
0x16eb   : > { %7649 = vset.pattern.permute.xlu1 %v8487_v31 }
0x16ec   : > { %2614 = vrot.lane.b32.xlu0 %v2594_v18, %s8490_s4  ;;  %2611 = vrot.lane.b32.xlu1 %v2594_v18, %s8489_s11 }
0x16f0   : > { %2621 = vrot.lane.b32.xlu0 %v2594_v18, %s8488_s20  ;;  %2618 = vrot.lane.b32.xlu1 %v2594_v18, %s8480_s13 }
0x16f4   : > { %2648 = vperm.xlu1 %7649, %v2457_v55  }
0x16f8   : > { %2330 = vrot.lane.b32.xlu1 %v7789_v22, %s8476_s29 }
0x175c   : > { %v2628_v42 = vpop.permute.xlu1 %2627 }
0x175e   : > { %v2615_v27 = vpop.permute.xlu0 %2614 }
0x1761   : > { %v2633_v24 = vpop.permute.xlu1 %2632 }
0x1762   : > { %v2635_v37 = vmul.f32 %v2633_v24, %v2594_v18  ;;  %v2622_v38 = vpop.permute.xlu0 %2621 }
0x1766   : > { %v2639_v26 = vpop.permute.xlu1 %2638 }
0x176a   : > { %v2612_v61 = vpop.permute.xlu1 %2611 }
0x176b   : > { %v2617_v28 = vsel %vm1336_vm14, %v2612_v61, %v2615_v27 }
0x176c   : > { %v2630_v33 = vmul.f32 %v2628_v42, %v2617_v28 }
0x176e   : > { %v2619_v41 = vpop.permute.xlu1 %2618  ;;  %v2636_v36 = vadd.f32 %v2635_v37, %v2630_v33 }
0x176f   : > { %v2624_v4 = vsel %vm1344_vm15, %v2619_v41, %v2622_v38 }
0x1770   : > { %v2641_v43 = vmul.f32 %v2639_v26, %v2624_v4 }
0x1772   : > { %v2642_v3 = vadd.f32 %v2641_v43, %v2636_v36 }
0x1773   : > { %v2649_v29 = vpop.permute.xlu1 %2648 }
0x1774   : > { %v2643_v46 = vmax.f32 %v2642_v3, 1e-30 }
0x1776   : > { %7790 = vlog2.f32 %v2643_v46 }
0x1777   : > { %v2331_v59 = vpop.permute.xlu1 %2330 }
0x1778   : > { %v2333_v47 = vmul.f32 %v9225_v58, %v2331_v59 }
0x177a   : > { %2335 = vrot.lane.b32.xlu1 %v2333_v47, %s8491_s25 }
0x1780   : > { %v7791_v49 = vpop.eup %7790 }
0x1781   : > { %v2645_v50 = vmul.f32 0.6931472, %v7791_v49 }
0x1783   : > { %v2651_v51 = vmul.f32 %v2649_v29, %v2645_v50 }
0x1785   : > { %v2652_v30 = vmul.f32 1.442695, %v2651_v51  ;;  %v9396_v51 = vld [vmem:[%s10374_s26] sm:$0x1] }
0x1787   : > { %7792 = vpow2.f32 %v2652_v30 }
0x1791   : > { %v7793_v44 = vpop.eup %7792 }
0x1792   : > { %v2654_v52 = vsel %vm1195_vm11, %v7793_v44, 0.0 }
0x1793   : > { %2655 = vadd.xlane.f32.xlu0 %v2654_v52 }
0x17ec   : > { %v2336_v53 = vpop.permute.xlu1 %2335 }
0x17ed   : > { %2338 = vst.msk [vmem:[#allocation2 + $0x3] sm:$0x1] %vm934_vm3, %v2336_v53 }
0x1820   : > { %v2656_v56 = vpop.xlane.xlu0 %2655 }
0x1821   : > { %v2657_v62 = vadd.f32 1e-16, %v2656_v56 }
0x1823   : > { %7794 = vrcp.f32 %v2657_v62 }
0x182d   : > { %v7795_v63 = vpop.eup %7794 }
0x182e   : > { %v9336_v45 = vmul.f32 %v7795_v63, %v7793_v44 }
0x1830   : > { %7050 = vmatmul.mubr.msk.f32.vlgmr.msra.gmra.mrb[10].mxu1 %vm1181_vm5, %v9336_v45  ;;  %v2741_v12 = vrot.slane %v9336_v45, 1 }
0x1903   : > { %v2729_v58 = vpop.f32.mrb[10].mxu1 }
0x1904   : > { %2733 = vst.msk [vmem:[#allocation2 + $0x3] sm:$0x1] %vm923_vm1, %v2729_v58  ;;  %v7051_v39 = vpop.f32.mrb[11].mxu1 }
0x190b   : > { %v2873_v9 = vld [vmem:[#allocation2 + $0x3] sm:$0x1] }
0x190c   : > { %7070 = vmatmul.mubr.msk.f32.vlgmr.msra.gmra.mrb[18].mxu0 %vm941_vm4, %v2873_v9 }
0x190d   : > { %7094 = vmatprep.mubr.msk.f32.mxu0 %vm8474_vm0, %v8473_v1 }
0x19df   : > { %v2945_v2 = vpop.f32.mrb[18].mxu0 }
0x19e0   : > { %v2946_v6 = vadd.f32 %v2945_v2, %v2874_v14  ;;  %v7071_v7 = vpop.f32.mrb[19].mxu0 }
0x19e2   : > { %7796 = vtanh.f32 %v2946_v6  ;;  %v6669_v16 = vmul.f32 -1.442695, %v2946_v6 }
0x19e4   : > { %7798 = vpow2.f32 %v6669_v16 }
0x19ec   : > { %v7797_v35 = vpop.eup %7796 }
0x19ed   : > { %2958 = vrot.lane.b32.xlu1 %v7797_v35, %s8476_s29 }
0x19ee   : > { %v7799_v17 = vpop.eup %7798 }
0x19ef   : > { %v2952_v48 = vadd.f32 1.0, %v7799_v17 }
0x19f1   : > { %2734 = vrot.lane.b32.xlu1 %v9308_v54, %s8492_s19  ;;  %7800 = vrcp.f32 %v2952_v48 }
0x19f5   : > { %2737 = vrot.lane.b32.xlu1 %v9271_v40, %s8478_s8 }
0x19fb   : > { %v9352_v18 = vpop.eup %7800 }
0x19fc   : > { %v2956_v27 = vmul.f32 %v9352_v18, %v9243_v8 }
0x1a1e   : > { %2743 = vxpose.xlu1.b32.start.end [1/1] (short) (narrow) %v2741_v12, 16 }
0x1a3c   : > { %7650 = vset.pattern.permute.xlu1 %v8479_v10 }
0x1a5f   : > { %v2959_v55 = vpop.permute.xlu1 %2958 }
0x1a60   : > { %v2961_v22 = vmul.f32 %v9352_v18, %v2959_v55 }
0x1a62   : > { %2963 = vrot.lane.b32.xlu0 %v2961_v22, %s8476_s29 }
0x1a63   : > { %v2735_v54 = vpop.permute.xlu1 %2734 }
0x1a67   : > { %v2738_v42 = vpop.permute.xlu1 %2737 }
0x1a68   : > { %v2740_v40 = vsel %vm1181_vm5, %v2735_v54, %v2738_v42 }
0x1a69   : > { %7052 = vmatprep.subr.msk.mxu1 %vm1158_vm10, %v2740_v40 }
0x1a6a   : > { %7053 = vmatpush3.msk.msra.mxu1 %vm1158_vm10, %v2740_v40 }
0x1a6b   : > { %7372 = vmatprep.subr.bf16.mxu1 %v8472_v0 }
0x1a9e   : > { %v2759_v24 = vpop.trf.xlu1 }
0x1a9f   : > { %7054 = vmatprep.mubr.msk.f32.mxu1 %vm1336_vm14, %v2759_v24 }
0x1aa2   : > { %v2760_v26 = vpop.trf.xlu1 }
0x1aa3   : > { %7055 = vmatmul.mubr.msk.f32.vlgmr.msra.gmra.mrb[12].mxu1 %vm1336_vm14, %v2760_v26 }
0x1aa4   : > { %7374 = vmatpush3.bf16.msra.mxu1 %v8969_v32  ;;  %7080 = vmatprep.mubr.msk.f32.mxu1 %vm8474_vm0, %v8473_v1 }
0x1aa5   : > { %7375 = vmatprep.subr.bf16.mxu1 %v8472_v0 }
0x1aa8   : > { %7377 = vmatpush3.bf16.msra.mxu1 %v8972_v34 }
0x1aa9   : > { %7378 = vmatprep.subr.bf16.mxu1 %v8472_v0 }
0x1ad4   : > { %v2964_v61 = vpop.permute.xlu0 %2963 }
0x1ad5   : > { %v9370_v28 = vadd.f32 %v2964_v61, %v2956_v27 }
0x1ad7   : > { %2979 = vrot.lane.b32.xlu0 %v9370_v28, %s8477_s27 }
0x1b49   : > { %v2980_v33 = vpop.permute.xlu0 %2979 }
0x1b4a   : > { %7081 = vmatmul.mubr.msk.f32.vlgmr.msra.gmra.mrb[14].mxu1 %vm1055_vm6, %v2980_v33 }
0x1b4b   : > { %7087 = vmatprep.mubr.msk.f32.mxu1 %vm8474_vm0, %v8473_v1 }
0x1b76   : > { %v7056_v37 = vpop.f32.mrb[12].mxu1 }
0x1b77   : > { %v2850_v38 = vpop.f32.mrb[13].mxu1  ;;  %v2860_v8 = vsub.f32 1.0, %v7056_v37 }
0x1b78   : > { %2865 = vrot.lane.b32.xlu0 %v2850_v38, %s8478_s8  ;;  %v2859_v41 = vsub.f32 1.0, %v2850_v38 }
0x1b79   : > { %v2862_v3 = vmul.f32 %v2860_v8, %v9254_v20 }
0x1b7a   : > { %v2861_v4 = vmul.f32 %v2859_v41, %v9256_v23 }
0x1b7c   : > { %2867 = vrot.lane.b32.xlu0 %v7056_v37, %s8478_s8 }
0x1bea   : > { %v2866_v36 = vpop.permute.xlu0 %2865 }
0x1beb   : > { %v9380_v43 = vadd.f32 %v2866_v36, %v2861_v4 }
0x1bed   : > { %v3103_v29 = vmul.f32 %v9380_v43, %v9380_v43 }
0x1bee   : > { %v2868_v46 = vpop.permute.xlu0 %2867 }
0x1bef   : > { %v9385_v59 = vadd.f32 %v2868_v46, %v2862_v3  ;;  %v3105_v47 = vsel %vm1181_vm5, %v3103_v29, 0.0 }
0x1bf0   : > { %3106 = vadd.xlane.f32.xlu1 %v3105_v47 }
0x1bf1   : > { %v7383_v49 = vpack.c.bf16 %v9385_v59, %v9380_v43  ;;  %v3104_v23 = vmul.f32 %v9385_v59, %v9385_v59 }
0x1bf3   : > { %7384 = vmatpush3.bf16.msra.mxu0 %v7383_v49  ;;  %v3108_v50 = vsel %vm1181_vm5, %v3104_v23, 0.0 }
0x1bf4   : > { %3109 = vadd.xlane.f32.xlu0 %v3108_v50 }
0x1c1d   : > { %v3049_v20 = vpop.f32.mrb[14].mxu1 }
0x1c1e   : > { %v9399_v30 = vadd.f32 %v9396_v51, %v3049_v20  ;;  %v7082_v44 = vpop.f32.mrb[15].mxu1 }
0x1c20   : > { %v3063_v52 = vand.u32 2147483647, %v9399_v30  ;;  %7802 = vtanh.f32 %v9399_v30  ;;  %v3098_v58 = vrot.slane %v9399_v30, 7  ;;  %v3060_v16 = vmax.f32 %v9399_v30, 0.0 }
0x1c21   : > { %vm3061_vm9 = vcmp.ne.f32.partialorder %v9399_v30, %v9399_v30  ;;  %v6671_v29 = vmul.f32 -1.442695, %v9399_v30 }
0x1c22   : > { %v3064_v53 = vsub.f32 0.0, %v3063_v52 }
0x1c24   : > { %v3065_v56 = vmul.f32 1.442695, %v3064_v53 }
0x1c26   : > { %7804 = vpow2.f32 %v3065_v56 }
0x1c2a   : > { %v9403_v62 = vpop.eup %7802 }
0x1c2b   : > { %v3079_v63 = vrot.slane %v9403_v62, 7 }
0x1c2d   : > { %3080 = vrot.lane.b32.xlu0 %v3079_v63, %s8478_s8 }
0x1c30   : > { %v7805_v39 = vpop.eup %7804 }
0x1c31   : > { %3099 = vrot.lane.b32.xlu0 %v3098_v58, %s8481_s17  ;;  %v3067_v9 = vadd.f32 1.0, %v7805_v39  ;;  %v3070_v14 = vmul.f32 -0.5, %v7805_v39  ;;  %v3073_v6 = vand.u32 2147483647, %v7805_v39 }
0x1c33   : > { %7806 = vlog2.f32 %v3067_v9  ;;  %v3071_v2 = vadd.f32 1.0, %v3070_v14  ;;  %vm3074_vm8 = vcmp.lt.f32.partialorder %v3073_v6, 0.0004427343 }
0x1c35   : > { %v3072_v12 = vmul.f32 %v7805_v39, %v3071_v2 }
0x1c3d   : > { %v7807_v7 = vpop.eup %7806 }
0x1c3e   : > { %v3069_v35 = vmul.f32 0.6931472, %v7807_v7 }
0x1c40   : > { %v3075_v17 = vsel %vm3074_vm8, %v3072_v12, %v3069_v35 }
0x1c41   : > { %v3076_v48 = vadd.f32 %v3075_v17, %v3060_v16 }
0x1c43   : > { %v3077_v55 = vsel %vm3061_vm9, %v9399_v30, %v3076_v48 }
0x1c44   : > { %v3091_v22 = vrot.slane %v3077_v55, 7 }
0x1c46   : > { %3092 = vrot.lane.b32.xlu1 %v3091_v22, %s8480_s13 }
0x1c7d   : > { %v3107_v54 = vpop.xlane.xlu1 %3106 }
0x1c7e   : > { %v3111_v42 = vmax.f32 %v3107_v54, 1e-16 }
0x1c80   : > { %7808 = vrsqrt.f32 %v3111_v42 }
0x1c81   : > { %v3110_v40 = vpop.xlane.xlu0 %3109 }
0x1c82   : > { %v3112_v24 = vmax.f32 %v3110_v40, 1e-16 }
0x1c84   : > { %7810 = vrsqrt.f32 %v3112_v24 }
0x1c85   : > { %7812 = vpow2.f32 %v6671_v29 }
0x1c8a   : > { %v7809_v26 = vpop.eup %7808 }
0x1c8b   : > { %v3115_v61 = vmul.f32 %v7809_v26, %v9380_v43 }
0x1c8e   : > { %v7811_v27 = vpop.eup %7810 }
0x1c8f   : > { %v3116_v33 = vmul.f32 %v7811_v27, %v9385_v59  ;;  %v7813_v47 = vpop.eup %7812 }
0x1c90   : > { %v3057_v23 = vadd.f32 1.0, %v7813_v47 }
0x1c91   : > { %v7379_v37 = vpack.c.bf16 %v3116_v33, %v3115_v61 }
0x1c92   : > { %7814 = vrcp.f32 %v3057_v23 }
0x1c93   : > { %7381 = vmatpush3.bf16.xpose.msk.msra.mxu1 %vm9008_vm7, %v7379_v37 }
0x1c94   : > { %7385 = vmatprep.subr.bf16.mxu1 %v8472_v0 }
0x1c9c   : > { %v9440_v20 = vpop.eup %7814 }
0x1c9d   : > { %v3085_v44 = vrot.slane %v9440_v20, 7 }
0x1c9f   : > { %v3081_v38 = vpop.permute.xlu0 %3080 }
0x1ca0   : > { %v3083_v41 = vsel %vm1158_vm10, %v9403_v62, %v3081_v38 }
0x1ca1   : > { %v3117_v8 = vmul.f32 %v3083_v41, %v3083_v41  ;;  %7088 = vmatmul.mubr.msk.f32.vlgmr.msra.gmra.mrb[16].mxu1 %vm1181_vm5, %v3083_v41 }
0x1ca2   : > { %7387 = vmatpush3.bf16.msra.mxu1 %v8940_v5  ;;  %7114 = vmatprep.mubr.msk.f32.mxu1 %vm8474_vm0, %v8473_v1 }
0x1ca3   : > { %v3118_v4 = vsel %vm1195_vm11, %v3117_v8, 0.0  ;;  %7388 = vmatprep.subr.bf16.mxu1 %v8472_v0  ;;  %v3100_v46 = vpop.permute.xlu0 %3099 }
0x1ca4   : > { %3119 = vadd.xlane.f32.xlu0 %v3118_v4  ;;  %v3102_v49 = vsel %vm1158_vm10, %v9399_v30, %v3100_v46 }
0x1ca5   : > { %v3234_v50 = vsel %vm1312_vm12, %v3102_v49, -inf }
0x1ca6   : > { %7390 = vmatpush3.bf16.msra.mxu1 %v8945_v11 }
0x1ca7   : > { %7391 = vmatprep.subr.bf16.mxu1 %v8472_v0 }
0x1caa   : > { %7393 = vmatpush3.bf16.msra.mxu1 %v8956_v15 }
0x1cab   : > { %7404 = vmatprep.subr.bf16.mxu1 %v8472_v0 }
0x1cb8   : > { %v3093_v36 = vpop.permute.xlu1 %3092 }
0x1cb9   : > { %v9432_v3 = vsel %vm1158_vm10, %v3077_v55, %v3093_v36 }
0x1cba   : > { %3205 = vperm.xlu1 %7650, %v9432_v3   ;;  %v3096_v46 = vadd.f32 1.0, %v9432_v3 }
0x1cbe   : > { %7651 = vset.pattern.permute.xlu1 %v8483_v60 }
0x1cde   : > { %3235 = vmax.xlane.f32.xlu1 %v3234_v50 }
0x1cef   : > { %3086 = vrot.lane.b32.xlu1 %v3085_v44, %s8480_s13 }
0x1d31   : > { %v3120_v52 = vpop.xlane.xlu0 %3119 }
0x1d32   : > { %v3200_v53 = vmax.f32 %v3120_v52, 1e-16 }
0x1d34   : > { %7816 = vrsqrt.f32 %v3200_v53 }
0x1d39   : > { %v3206_v9 = vpop.permute.xlu1 %3205 }
0x1d3e   : > { %v7817_v56 = vpop.eup %7816 }
0x1d6b   : > { %v3236_v2 = vpop.xlane.xlu1 %3235 }
0x1d6c   : > { %v3237_v6 = vsub.f32 %v3102_v49, %v3236_v2 }
0x1d6e   : > { %v3238_v7 = vmul.f32 1.442695, %v3237_v6 }
0x1d6f   : > { %v3087_v42 = vpop.permute.xlu1 %3086 }
0x1d70   : > { %7818 = vpow2.f32 %v3238_v7  ;;  %v3089_v40 = vsel %vm1158_vm10, %v9440_v20, %v3087_v42 }
0x1d71   : > { %v3226_v24 = vsub.f32 1.0, %v3089_v40 }
0x1d74   : > { %v3196_v63 = vpop.f32.mrb[16].mxu1 }
0x1d75   : > { %v3202_v58 = vmul.f32 %v7817_v56, %v3196_v63  ;;  %v7089_v39 = vpop.f32.mrb[17].mxu1 }
0x1d77   : > { %v3208_v30 = vmul.f32 %v3206_v9, %v3202_v58 }
0x1d79   : > { %v3209_v14 = vsel %vm1195_vm11, %v3208_v30, -inf }
0x1d7a   : > { %3210 = vmax.xlane.f32.xlu0 %v3209_v14  ;;  %v7819_v35 = vpop.eup %7818 }
0x1d90   : > { %3241 = vrot.lane.b32.xlu0 %v7819_v35, %s8482_s23 }
0x1e07   : > { %v3211_v12 = vpop.xlane.xlu0 %3210 }
0x1e08   : > { %v3212_v16 = vsub.f32 %v3208_v30, %v3211_v12 }
0x1e0a   : > { %v3213_v17 = vmul.f32 1.442695, %v3212_v16 }
0x1e0b   : > { %v3242_v48 = vpop.permute.xlu0 %3241 }
0x1e0c   : > { %7820 = vpow2.f32 %v3213_v17  ;;  %v3244_v55 = vsel %vm1323_vm13, %v3242_v48, 0.0 }
0x1e0d   : > { %3245 = vadd.xlane.f32.xlu0 %v3244_v55 }
0x1e16   : > { %v7821_v22 = vpop.eup %7820 }
0x1e17   : > { %v3215_v54 = vsel %vm1195_vm11, %v7821_v22, 0.0 }
0x1e18   : > { %3216 = vadd.xlane.f32.xlu1 %v3215_v54 }
0x1e23   : > { %3222 = vperm.xlu0 %7644, %v3089_v40  }
0x1e27   : > { %7652 = vset.pattern.permute.xlu0 %v8484_v13 }
0x1e29   : > { %3229 = vperm.xlu1 %7651, %v3226_v24  }
0x1e2d   : > { %7653 = vset.pattern.permute.xlu1 %v8485_v19 }
0x1e9a   : > { %v3246_v26 = vpop.xlane.xlu0 %3245 }
0x1e9b   : > { %7822 = vrcp.f32 %v3246_v26 }
0x1ea2   : > { %v3223_v8 = vpop.permute.xlu0 %3222 }
0x1ea5   : > { %v7823_v27 = vpop.eup %7822  ;;  %v3217_v61 = vpop.xlane.xlu1 %3216 }
0x1ea6   : > { %7824 = vrcp.f32 %v3217_v61  ;;  %v3248_v33 = vmul.f32 %v7823_v27, %v7819_v35  ;;  %v3513_v61 = vrot.slane %v8965_v21, 4 }
0x1ea7   : > { %7826 = vtanh.f32 %v9370_v28 }
0x1ea8   : > { %3271 = vperm.xlu1 %7653, %v3248_v33   ;;  %3266 = vperm.xlu0 %7652, %v3248_v33  }
0x1ea9   : > { %v3230_v38 = vpop.permute.xlu1 %3229 }
0x1eaa   : > { %v3232_v36 = vmul.f32 %v3230_v38, %v9336_v45 }
0x1eac   : > { %7654 = vset.pattern.permute.xlu1 %v8486_v25  ;;  %7655 = vset.pattern.permute.xlu0 %v8487_v31 }
0x1ead   : > { %3277 = vperm.xlu1 %7654, %v3248_v33  }
0x1eb0   : > { %v7825_v37 = vpop.eup %7824 }
0x1eb1   : > { %v3219_v41 = vmul.f32 %v7825_v37, %v7821_v22  ;;  %7656 = vset.pattern.permute.xlu1 %v8479_v10  ;;  %v7827_v47 = vpop.eup %7826 }
0x1eb3   : > { %v3225_v4 = vmul.f32 %v3223_v8, %v3219_v41 }
0x1eb5   : > { %v3233_v29 = vadd.f32 %v3232_v36, %v3225_v4 }
0x1eb7   : > { %3253 = vrot.lane.b32.xlu1 %v3233_v29, %s8490_s4  ;;  %3250 = vrot.lane.b32.xlu0 %v3233_v29, %s8489_s11 }
0x1ebb   : > { %3260 = vrot.lane.b32.xlu1 %v3233_v29, %s8488_s20  ;;  %3257 = vrot.lane.b32.xlu0 %v3233_v29, %s8480_s13 }
0x1ebf   : > { %3287 = vperm.xlu0 %7655, %v3096_v46  }
0x1ec3   : > { %2969 = vrot.lane.b32.xlu0 %v7827_v47, %s8476_s29 }
0x1f27   : > { %v3272_v49 = vpop.permute.xlu1 %3271  ;;  %v3267_v23 = vpop.permute.xlu0 %3266 }
0x1f28   : > { %v3274_v56 = vmul.f32 %v3272_v49, %v3233_v29 }
0x1f2b   : > { %v3251_v50 = vpop.permute.xlu0 %3250 }
0x1f2c   : > { %v3278_v45 = vpop.permute.xlu1 %3277 }
0x1f2f   : > { %v3258_v63 = vpop.permute.xlu0 %3257 }
0x1f30   : > { %v3254_v44 = vpop.permute.xlu1 %3253 }
0x1f31   : > { %v3256_v52 = vsel %vm1336_vm14, %v3251_v50, %v3254_v44 }
0x1f32   : > { %v3269_v53 = vmul.f32 %v3267_v23, %v3256_v52 }
0x1f34   : > { %v3261_v58 = vpop.permute.xlu1 %3260  ;;  %v3275_v9 = vadd.f32 %v3274_v56, %v3269_v53 }
0x1f35   : > { %v3263_v39 = vsel %vm1344_vm15, %v3258_v63, %v3261_v58 }
0x1f36   : > { %v3280_v30 = vmul.f32 %v3278_v45, %v3263_v39 }
0x1f38   : > { %v3281_v3 = vadd.f32 %v3280_v30, %v3275_v9 }
0x1f3a   : > { %v3282_v14 = vmax.f32 %v3281_v3, 1e-30 }
0x1f3c   : > { %7828 = vlog2.f32 %v3282_v14 }
0x1f3e   : > { %v3288_v2 = vpop.permute.xlu0 %3287 }
0x1f42   : > { %v2970_v6 = vpop.permute.xlu0 %2969 }
0x1f43   : > { %v2972_v7 = vmul.f32 %v9352_v18, %v2970_v6 }
0x1f45   : > { %2974 = vrot.lane.b32.xlu0 %v2972_v7, %s8491_s25 }
0x1f46   : > { %v7829_v35 = vpop.eup %7828 }
0x1f47   : > { %v3284_v12 = vmul.f32 0.6931472, %v7829_v35 }
0x1f49   : > { %v3290_v16 = vmul.f32 %v3288_v2, %v3284_v12 }
0x1f4b   : > { %v3291_v17 = vmul.f32 1.442695, %v3290_v16 }
0x1f4d   : > { %7830 = vpow2.f32 %v3291_v17 }
0x1f57   : > { %v7831_v48 = vpop.eup %7830 }
0x1f58   : > { %v3293_v55 = vsel %vm1195_vm11, %v7831_v48, 0.0 }
0x1f59   : > { %3294 = vadd.xlane.f32.xlu1 %v3293_v55 }
0x1fb7   : > { %v2975_v22 = vpop.permute.xlu0 %2974 }
0x1fb8   : > { %2977 = vst.msk [vmem:[#allocation2 + $0x4] sm:$0x1] %vm934_vm3, %v2975_v22 }
0x1fe6   : > { %v3295_v54 = vpop.xlane.xlu1 %3294 }
0x1fe7   : > { %v3296_v42 = vadd.f32 1e-16, %v3295_v54 }
0x1fe9   : > { %7832 = vrcp.f32 %v3296_v42 }
0x1ff3   : > { %v7833_v40 = vpop.eup %7832 }
0x1ff4   : > { %v9469_v24 = vmul.f32 %v7833_v40, %v7831_v48 }
0x1ff6   : > { %7095 = vmatmul.mubr.msk.f32.vlgmr.msra.gmra.mrb[20].mxu0 %vm1181_vm5, %v9469_v24  ;;  %v3380_v8 = vrot.slane %v9469_v24, 1 }
0x20c9   : > { %v3368_v18 = vpop.f32.mrb[20].mxu0 }
0x20ca   : > { %3372 = vst.msk [vmem:[#allocation2 + $0x4] sm:$0x1] %vm923_vm1, %v3368_v18  ;;  %v7096_v26 = vpop.f32.mrb[21].mxu0 }
0x20d1   : > { %v3512_v27 = vld [vmem:[#allocation2 + $0x4] sm:$0x1] }
0x20d2   : > { %7115 = vmatmul.mubr.msk.f32.vlgmr.msra.gmra.mrb[18].mxu1 %vm941_vm4, %v3512_v27 }
0x20d3   : > { %7139 = vmatprep.mubr.msk.f32.mxu1 %vm8474_vm0, %v8473_v1 }
0x21a5   : > { %v3584_v33 = vpop.f32.mrb[18].mxu1 }
0x21a6   : > { %v3585_v37 = vadd.f32 %v3584_v33, %v3513_v61  ;;  %v7116_v38 = vpop.f32.mrb[19].mxu1 }
0x21a8   : > { %7834 = vtanh.f32 %v3585_v37  ;;  %v6680_v4 = vmul.f32 -1.442695, %v3585_v37 }
0x21aa   : > { %7836 = vpow2.f32 %v6680_v4 }
0x21b2   : > { %v7835_v41 = vpop.eup %7834 }
0x21b3   : > { %3597 = vrot.lane.b32.xlu0 %v7835_v41, %s8476_s29 }
0x21b4   : > { %v7837_v36 = vpop.eup %7836 }
0x21b5   : > { %v3591_v29 = vadd.f32 1.0, %v7837_v36 }
0x21b7   : > { %3373 = vrot.lane.b32.xlu0 %v9440_v20, %s8492_s19  ;;  %7838 = vrcp.f32 %v3591_v29 }
0x21bb   : > { %3376 = vrot.lane.b32.xlu0 %v9403_v62, %s8478_s8 }
0x21c1   : > { %v9485_v46 = vpop.eup %7838 }
0x21c2   : > { %v3595_v44 = vmul.f32 %v9485_v46, %v9370_v28 }
0x21d9   : > { %3382 = vxpose.xlu0.b32.start.end [1/1] (short) (narrow) %v3380_v8, 16 }
0x2202   : > { %7657 = vset.pattern.permute.xlu0 %v8483_v60 }
0x2225   : > { %v3598_v47 = vpop.permute.xlu0 %3597 }
0x2226   : > { %v3600_v49 = vmul.f32 %v9485_v46, %v3598_v47 }
0x2228   : > { %3602 = vrot.lane.b32.xlu1 %v3600_v49, %s8476_s29 }
0x2229   : > { %v3374_v20 = vpop.permute.xlu0 %3373 }
0x222d   : > { %v3377_v23 = vpop.permute.xlu0 %3376 }
0x222e   : > { %v3379_v62 = vsel %vm1181_vm5, %v3374_v20, %v3377_v23 }
0x222f   : > { %7097 = vmatprep.subr.msk.mxu0 %vm1158_vm10, %v3379_v62 }
0x2230   : > { %7098 = vmatpush3.msk.msra.mxu0 %vm1158_vm10, %v3379_v62 }
0x2231   : > { %7394 = vmatprep.subr.bf16.mxu0 %v8472_v0 }
0x2259   : > { %v3398_v45 = vpop.trf.xlu0 }
0x225a   : > { %7099 = vmatprep.mubr.msk.f32.mxu0 %vm1336_vm14, %v3398_v45 }
0x225d   : > { %v3399_v50 = vpop.trf.xlu0 }
0x225e   : > { %7100 = vmatmul.mubr.msk.f32.vlgmr.msra.gmra.mrb[22].mxu0 %vm1336_vm14, %v3399_v50 }
0x225f   : > { %7396 = vmatpush3.bf16.msra.mxu0 %v8969_v32  ;;  %7125 = vmatprep.mubr.msk.f32.mxu0 %vm8474_vm0, %v8473_v1 }
0x2260   : > { %7397 = vmatprep.subr.bf16.mxu0 %v8472_v0 }
0x2263   : > { %7399 = vmatpush3.bf16.msra.mxu0 %v8972_v34 }
0x2264   : > { %7400 = vmatprep.subr.bf16.mxu0 %v8472_v0 }
0x229a   : > { %v3603_v52 = vpop.permute.xlu1 %3602 }
0x229b   : > { %v9503_v53 = vadd.f32 %v3603_v52, %v3595_v44 }
0x229d   : > { %3618 = vrot.lane.b32.xlu1 %v9503_v53, %s8477_s27 }
0x230f   : > { %v3619_v56 = vpop.permute.xlu1 %3618 }
0x2310   : > { %7126 = vmatmul.mubr.msk.f32.vlgmr.msra.gmra.mrb[24].mxu0 %vm1055_vm6, %v3619_v56 }
0x2311   : > { %7132 = vmatprep.mubr.msk.f32.mxu0 %vm8474_vm0, %v8473_v1 }
0x2331   : > { %v7101_v63 = vpop.f32.mrb[22].mxu0 }
0x2332   : > { %3506 = vrot.lane.b32.xlu1 %v7101_v63, %s8478_s8  ;;  %v3489_v58 = vpop.f32.mrb[23].mxu0  ;;  %v3499_v39 = vsub.f32 1.0, %v7101_v63 }
0x2333   : > { %3504 = vrot.lane.b32.xlu0 %v3489_v58, %s8478_s8  ;;  %v3498_v28 = vsub.f32 1.0, %v3489_v58 }
0x2334   : > { %v3501_v9 = vmul.f32 %v3499_v39, %v9385_v59 }
0x2335   : > { %v3500_v3 = vmul.f32 %v3498_v28, %v9380_v43 }
0x23a4   : > { %v3507_v30 = vpop.permute.xlu1 %3506 }
0x23a5   : > { %v9514_v14 = vadd.f32 %v3507_v30, %v3501_v9  ;;  %v3505_v2 = vpop.permute.xlu0 %3504 }
0x23a6   : > { %v9516_v6 = vadd.f32 %v3505_v2, %v3500_v3 }
0x23a7   : > { %v3743_v59 = vmul.f32 %v9514_v14, %v9514_v14 }
0x23a8   : > { %v7405_v7 = vpack.c.bf16 %v9514_v14, %v9516_v6  ;;  %v3742_v35 = vmul.f32 %v9516_v6, %v9516_v6 }
0x23a9   : > { %v3747_v43 = vsel %vm1181_vm5, %v3743_v59, 0.0 }
0x23aa   : > { %7406 = vmatpush3.bf16.msra.mxu1 %v7405_v7  ;;  %v3744_v12 = vsel %vm1181_vm5, %v3742_v35, 0.0 }
0x23ab   : > { %3745 = vadd.xlane.f32.xlu1 %v3744_v12 }
0x23af   : > { %3748 = vadd.xlane.f32.xlu1 %v3747_v43 }
0x23e3   : > { %v3688_v16 = vpop.f32.mrb[24].mxu0 }
0x23e4   : > { %v9527_v17 = vadd.f32 %v9396_v51, %v3688_v16  ;;  %v7127_v48 = vpop.f32.mrb[25].mxu0 }
0x23e6   : > { %v3702_v55 = vand.u32 2147483647, %v9527_v17  ;;  %7840 = vtanh.f32 %v9527_v17  ;;  %v3699_v8 = vmax.f32 %v9527_v17, 0.0  ;;  %vm3700_vm9 = vcmp.ne.f32.partialorder %v9527_v17, %v9527_v17 }
0x23e7   : > { %v3737_v49 = vrot.slane %v9527_v17, 7  ;;  %v6682_v2 = vmul.f32 -1.442695, %v9527_v17 }
0x23e8   : > { %v3703_v22 = vsub.f32 0.0, %v3702_v55 }
0x23ea   : > { %v3704_v54 = vmul.f32 1.442695, %v3703_v22 }
0x23ec   : > { %7842 = vpow2.f32 %v3704_v54 }
0x23f0   : > { %v9531_v42 = vpop.eup %7840 }
0x23f1   : > { %v3718_v40 = vrot.slane %v9531_v42, 7 }
0x23f3   : > { %3719 = vrot.lane.b32.xlu1 %v3718_v40, %s8478_s8 }
0x23f6   : > { %v7843_v18 = vpop.eup %7842 }
0x23f7   : > { %v3706_v26 = vadd.f32 1.0, %v7843_v18  ;;  %v3709_v27 = vmul.f32 -0.5, %v7843_v18  ;;  %v3712_v33 = vand.u32 2147483647, %v7843_v18 }
0x23f9   : > { %7844 = vlog2.f32 %v3706_v26  ;;  %v3710_v61 = vadd.f32 1.0, %v3709_v27  ;;  %vm3713_vm8 = vcmp.lt.f32.partialorder %v3712_v33, 0.0004427343 }
0x23fb   : > { %v3711_v41 = vmul.f32 %v7843_v18, %v3710_v61 }
0x2403   : > { %v7845_v37 = vpop.eup %7844 }
0x2404   : > { %v3708_v38 = vmul.f32 0.6931472, %v7845_v37 }
0x2406   : > { %v3714_v4 = vsel %vm3713_vm8, %v3711_v41, %v3708_v38 }
0x2407   : > { %v3715_v36 = vadd.f32 %v3714_v4, %v3699_v8 }
0x2409   : > { %v3716_v29 = vsel %vm3700_vm9, %v9527_v17, %v3715_v36 }
0x240a   : > { %v3730_v47 = vrot.slane %v3716_v29, 7 }
0x240c   : > { %3731 = vrot.lane.b32.xlu0 %v3730_v47, %s8480_s13 }
0x2410   : > { %3738 = vrot.lane.b32.xlu0 %v3737_v49, %s8481_s17 }
0x2438   : > { %v3746_v20 = vpop.xlane.xlu1 %3745 }
0x2439   : > { %v3750_v23 = vmax.f32 %v3746_v20, 1e-16 }
0x243b   : > { %7846 = vrsqrt.f32 %v3750_v23 }
0x243c   : > { %v3749_v62 = vpop.xlane.xlu1 %3748 }
0x243d   : > { %v3751_v45 = vmax.f32 %v3749_v62, 1e-16 }
0x243f   : > { %7848 = vrsqrt.f32 %v3751_v45 }
0x2440   : > { %7850 = vpow2.f32 %v6682_v2 }
0x2445   : > { %v7847_v50 = vpop.eup %7846 }
0x2446   : > { %v3754_v52 = vmul.f32 %v7847_v50, %v9516_v6 }
0x2449   : > { %v7849_v44 = vpop.eup %7848 }
0x244a   : > { %v3755_v56 = vmul.f32 %v7849_v44, %v9514_v14  ;;  %v7851_v35 = vpop.eup %7850 }
0x244b   : > { %v3696_v59 = vadd.f32 1.0, %v7851_v35 }
0x244c   : > { %v7401_v63 = vpack.c.bf16 %v3755_v56, %v3754_v52 }
0x244d   : > { %7852 = vrcp.f32 %v3696_v59 }
0x244e   : > { %7403 = vmatpush3.bf16.xpose.msk.msra.mxu0 %vm9008_vm7, %v7401_v63 }
0x244f   : > { %7407 = vmatprep.subr.bf16.mxu0 %v8472_v0 }
0x2457   : > { %v9568_v16 = vpop.eup %7852 }
0x2458   : > { %v3724_v48 = vrot.slane %v9568_v16, 7 }
0x2465   : > { %v3720_v58 = vpop.permute.xlu1 %3719 }
0x2466   : > { %v3722_v39 = vsel %vm1158_vm10, %v9531_v42, %v3720_v58 }
0x2467   : > { %v3756_v28 = vmul.f32 %v3722_v39, %v3722_v39  ;;  %7133 = vmatmul.mubr.msk.f32.vlgmr.msra.gmra.mrb[26].mxu0 %vm1181_vm5, %v3722_v39 }
0x2468   : > { %7409 = vmatpush3.bf16.msra.mxu0 %v8940_v5  ;;  %7159 = vmatprep.mubr.msk.f32.mxu0 %vm8474_vm0, %v8473_v1 }
0x2469   : > { %v3757_v9 = vsel %vm1195_vm11, %v3756_v28, 0.0  ;;  %7410 = vmatprep.subr.bf16.mxu0 %v8472_v0 }
0x246a   : > { %3758 = vadd.xlane.f32.xlu0 %v3757_v9 }
0x246c   : > { %7412 = vmatpush3.bf16.msra.mxu0 %v8945_v11 }
0x246d   : > { %7413 = vmatprep.subr.bf16.mxu0 %v8472_v0 }
0x2470   : > { %7415 = vmatpush3.bf16.msra.mxu0 %v8956_v15 }
0x2471   : > { %7426 = vmatprep.subr.bf16.mxu0 %v8472_v0 }
0x247e   : > { %v3732_v30 = vpop.permute.xlu0 %3731 }
0x247f   : > { %v9560_v3 = vsel %vm1158_vm10, %v3716_v29, %v3732_v30 }
0x2480   : > { %3844 = vperm.xlu1 %7656, %v9560_v3  }
0x2482   : > { %v3739_v7 = vpop.permute.xlu0 %3738 }
0x2483   : > { %v3741_v12 = vsel %vm1158_vm10, %v9527_v17, %v3739_v7  ;;  %v3735_v7 = vadd.f32 1.0, %v9560_v3 }
0x2484   : > { %7658 = vset.pattern.permute.xlu1 %v8483_v60  ;;  %v3873_v43 = vsel %vm1312_vm12, %v3741_v12, -inf }
0x24a4   : > { %3874 = vmax.xlane.f32.xlu1 %v3873_v43 }
0x24b5   : > { %3725 = vrot.lane.b32.xlu1 %v3724_v48, %s8480_s13 }
0x24f7   : > { %v3759_v55 = vpop.xlane.xlu0 %3758 }
0x24f8   : > { %v3839_v22 = vmax.f32 %v3759_v55, 1e-16 }
0x24fa   : > { %7854 = vrsqrt.f32 %v3839_v22 }
0x24ff   : > { %v3845_v27 = vpop.permute.xlu1 %3844 }
0x2504   : > { %v7855_v54 = vpop.eup %7854 }
0x2531   : > { %v3875_v33 = vpop.xlane.xlu1 %3874 }
0x2532   : > { %v3876_v37 = vsub.f32 %v3741_v12, %v3875_v33 }
0x2534   : > { %v3877_v38 = vmul.f32 1.442695, %v3876_v37 }
0x2535   : > { %v3726_v23 = vpop.permute.xlu1 %3725 }
0x2536   : > { %7856 = vpow2.f32 %v3877_v38  ;;  %v3728_v62 = vsel %vm1158_vm10, %v9568_v16, %v3726_v23 }
0x2537   : > { %v3865_v45 = vsub.f32 1.0, %v3728_v62 }
0x253a   : > { %v3835_v40 = vpop.f32.mrb[26].mxu0 }
0x253b   : > { %v3841_v18 = vmul.f32 %v7855_v54, %v3835_v40  ;;  %v7134_v26 = vpop.f32.mrb[27].mxu0 }
0x253d   : > { %v3847_v17 = vmul.f32 %v3845_v27, %v3841_v18 }
0x253f   : > { %v3848_v61 = vsel %vm1195_vm11, %v3847_v17, -inf }
0x2540   : > { %3849 = vmax.xlane.f32.xlu0 %v3848_v61  ;;  %v7857_v41 = vpop.eup %7856 }
0x2556   : > { %3880 = vrot.lane.b32.xlu0 %v7857_v41, %s8482_s23 }
0x25cd   : > { %v3850_v8 = vpop.xlane.xlu0 %3849 }
0x25ce   : > { %v3851_v4 = vsub.f32 %v3847_v17, %v3850_v8 }
0x25d0   : > { %v3852_v36 = vmul.f32 1.442695, %v3851_v4 }
0x25d1   : > { %v3881_v29 = vpop.permute.xlu0 %3880 }
0x25d2   : > { %7858 = vpow2.f32 %v3852_v36  ;;  %v3883_v47 = vsel %vm1323_vm13, %v3881_v29, 0.0 }
0x25d3   : > { %3884 = vadd.xlane.f32.xlu0 %v3883_v47 }
0x25dc   : > { %v7859_v49 = vpop.eup %7858 }
0x25dd   : > { %v3854_v20 = vsel %vm1195_vm11, %v7859_v49, 0.0 }
0x25de   : > { %3855 = vadd.xlane.f32.xlu1 %v3854_v20 }
0x25e9   : > { %3861 = vperm.xlu0 %7657, %v3728_v62  }
0x25ef   : > { %3868 = vperm.xlu1 %7658, %v3865_v45  }
0x25f3   : > { %7659 = vset.pattern.permute.xlu1 %v8484_v13 }
0x2660   : > { %v3885_v50 = vpop.xlane.xlu0 %3884 }
0x2661   : > { %7860 = vrcp.f32 %v3885_v50 }
0x2668   : > { %v3862_v28 = vpop.permute.xlu0 %3861 }
0x266b   : > { %v7861_v44 = vpop.eup %7860  ;;  %v3856_v52 = vpop.xlane.xlu1 %3855 }
0x266c   : > { %7862 = vrcp.f32 %v3856_v52  ;;  %v3887_v56 = vmul.f32 %v7861_v44, %v7857_v41  ;;  %v4152_v52 = vrot.slane %v8965_v21, 5 }
0x266d   : > { %7864 = vtanh.f32 %v9503_v53 }
0x266e   : > { %3905 = vperm.xlu1 %7659, %v3887_v56  }
0x266f   : > { %v3869_v58 = vpop.permute.xlu1 %3868 }
0x2670   : > { %v3871_v30 = vmul.f32 %v3869_v58, %v9469_v24 }
0x2672   : > { %7660 = vset.pattern.permute.xlu1 %v8485_v19 }
0x2673   : > { %3910 = vperm.xlu1 %7660, %v3887_v56  }
0x2676   : > { %v7863_v63 = vpop.eup %7862 }
0x2677   : > { %v3858_v39 = vmul.f32 %v7863_v63, %v7859_v49  ;;  %7661 = vset.pattern.permute.xlu1 %v8486_v25  ;;  %v7865_v35 = vpop.eup %7864 }
0x2678   : > { %3916 = vperm.xlu1 %7661, %v3887_v56  }
0x2679   : > { %v3864_v9 = vmul.f32 %v3862_v28, %v3858_v39 }
0x267b   : > { %v3872_v2 = vadd.f32 %v3871_v30, %v3864_v9 }
0x267c   : > { %7662 = vset.pattern.permute.xlu1 %v8487_v31 }
0x267d   : > { %3892 = vrot.lane.b32.xlu0 %v3872_v2, %s8490_s4  ;;  %3889 = vrot.lane.b32.xlu1 %v3872_v2, %s8489_s11 }
0x2681   : > { %3899 = vrot.lane.b32.xlu0 %v3872_v2, %s8488_s20  ;;  %3896 = vrot.lane.b32.xlu1 %v3872_v2, %s8480_s13 }
0x2685   : > { %3926 = vperm.xlu1 %7662, %v3735_v7  }
0x2689   : > { %3608 = vrot.lane.b32.xlu1 %v7865_v35, %s8476_s29 }
0x26ed   : > { %v3906_v24 = vpop.permute.xlu1 %3905 }
0x26ef   : > { %v3893_v43 = vpop.permute.xlu0 %3892 }
0x26f2   : > { %v3911_v12 = vpop.permute.xlu1 %3910 }
0x26f3   : > { %v3913_v54 = vmul.f32 %v3911_v12, %v3872_v2  ;;  %v3900_v40 = vpop.permute.xlu0 %3899 }
0x26f7   : > { %v3917_v59 = vpop.permute.xlu1 %3916 }
0x26fb   : > { %v3890_v48 = vpop.permute.xlu1 %3889 }
0x26fc   : > { %v3895_v55 = vsel %vm1336_vm14, %v3890_v48, %v3893_v43 }
0x26fd   : > { %v3908_v22 = vmul.f32 %v3906_v24, %v3895_v55 }
0x26ff   : > { %v3897_v18 = vpop.permute.xlu1 %3896  ;;  %v3914_v27 = vadd.f32 %v3913_v54, %v3908_v22 }
0x2700   : > { %v3902_v26 = vsel %vm1344_vm15, %v3897_v18, %v3900_v40 }
0x2701   : > { %v3919_v17 = vmul.f32 %v3917_v59, %v3902_v26 }
0x2703   : > { %v3920_v3 = vadd.f32 %v3919_v17, %v3914_v27 }
0x2704   : > { %v3927_v61 = vpop.permute.xlu1 %3926 }
0x2705   : > { %v3921_v33 = vmax.f32 %v3920_v3, 1e-30 }
0x2707   : > { %7866 = vlog2.f32 %v3921_v33 }
0x2708   : > { %v3609_v37 = vpop.permute.xlu1 %3608 }
0x2709   : > { %v3611_v38 = vmul.f32 %v9485_v46, %v3609_v37 }
0x270b   : > { %3613 = vrot.lane.b32.xlu1 %v3611_v38, %s8491_s25 }
0x2711   : > { %v7867_v41 = vpop.eup %7866 }
0x2712   : > { %v3923_v8 = vmul.f32 0.6931472, %v7867_v41 }
0x2714   : > { %v3929_v4 = vmul.f32 %v3927_v61, %v3923_v8 }
0x2716   : > { %v3930_v36 = vmul.f32 1.442695, %v3929_v4 }
0x2718   : > { %7868 = vpow2.f32 %v3930_v36 }
0x2722   : > { %v7869_v29 = vpop.eup %7868 }
0x2723   : > { %v3932_v47 = vsel %vm1195_vm11, %v7869_v29, 0.0 }
0x2724   : > { %3933 = vadd.xlane.f32.xlu0 %v3932_v47 }
0x277d   : > { %v3614_v49 = vpop.permute.xlu1 %3613 }
0x277e   : > { %3616 = vst.msk [vmem:[#allocation2 + $0x5] sm:$0x1] %vm934_vm3, %v3614_v49 }
0x27b1   : > { %v3934_v20 = vpop.xlane.xlu0 %3933 }
0x27b2   : > { %v3935_v23 = vadd.f32 1e-16, %v3934_v20 }
0x27b4   : > { %7870 = vrcp.f32 %v3935_v23 }
0x27be   : > { %v7871_v62 = vpop.eup %7870 }
0x27bf   : > { %v9596_v45 = vmul.f32 %v7871_v62, %v7869_v29 }
0x27c1   : > { %7140 = vmatmul.mubr.msk.f32.vlgmr.msra.gmra.mrb[20].mxu1 %vm1181_vm5, %v9596_v45  ;;  %v4019_v28 = vrot.slane %v9596_v45, 1 }
0x2894   : > { %v4007_v46 = vpop.f32.mrb[20].mxu1 }
0x2895   : > { %4011 = vst.msk [vmem:[#allocation2 + $0x5] sm:$0x1] %vm923_vm1, %v4007_v46  ;;  %v7141_v50 = vpop.f32.mrb[21].mxu1 }
0x289c   : > { %v4151_v44 = vld [vmem:[#allocation2 + $0x5] sm:$0x1] }
0x289d   : > { %7160 = vmatmul.mubr.msk.f32.vlgmr.msra.gmra.mrb[28].mxu0 %vm941_vm4, %v4151_v44 }
0x289e   : > { %7184 = vmatprep.mubr.msk.f32.mxu0 %vm8474_vm0, %v8473_v1 }
0x2970   : > { %v4223_v56 = vpop.f32.mrb[28].mxu0 }
0x2971   : > { %v4224_v63 = vadd.f32 %v4223_v56, %v4152_v52  ;;  %v7161_v58 = vpop.f32.mrb[29].mxu0 }
0x2973   : > { %7872 = vtanh.f32 %v4224_v63  ;;  %v6691_v9 = vmul.f32 -1.442695, %v4224_v63 }
0x2975   : > { %7874 = vpow2.f32 %v6691_v9 }
0x297d   : > { %v7873_v39 = vpop.eup %7872 }
0x297e   : > { %4236 = vrot.lane.b32.xlu1 %v7873_v39, %s8476_s29 }
0x297f   : > { %v7875_v30 = vpop.eup %7874 }
0x2980   : > { %v4230_v2 = vadd.f32 1.0, %v7875_v30 }
0x2982   : > { %4012 = vrot.lane.b32.xlu1 %v9568_v16, %s8492_s19  ;;  %7876 = vrcp.f32 %v4230_v2 }
0x2986   : > { %4015 = vrot.lane.b32.xlu1 %v9531_v42, %s8478_s8 }
0x298c   : > { %v9612_v7 = vpop.eup %7876 }
0x298d   : > { %v4234_v48 = vmul.f32 %v9612_v7, %v9503_v53 }
0x29af   : > { %4021 = vxpose.xlu1.b32.start.end [1/1] (short) (narrow) %v4019_v28, 16 }
0x29cd   : > { %7663 = vset.pattern.permute.xlu1 %v8479_v10 }
0x29f0   : > { %v4237_v35 = vpop.permute.xlu1 %4236 }
0x29f1   : > { %v4239_v24 = vmul.f32 %v9612_v7, %v4237_v35 }
0x29f3   : > { %4241 = vrot.lane.b32.xlu0 %v4239_v24, %s8476_s29 }
0x29f4   : > { %v4013_v16 = vpop.permute.xlu1 %4012 }
0x29f8   : > { %v4016_v12 = vpop.permute.xlu1 %4015 }
0x29f9   : > { %v4018_v42 = vsel %vm1181_vm5, %v4013_v16, %v4016_v12 }
0x29fa   : > { %7142 = vmatprep.subr.msk.mxu1 %vm1158_vm10, %v4018_v42 }
0x29fb   : > { %7143 = vmatpush3.msk.msra.mxu1 %vm1158_vm10, %v4018_v42 }
0x29fc   : > { %7416 = vmatprep.subr.bf16.mxu1 %v8472_v0 }
0x2a2f   : > { %v4037_v59 = vpop.trf.xlu1 }
0x2a30   : > { %7144 = vmatprep.mubr.msk.f32.mxu1 %vm1336_vm14, %v4037_v59 }
0x2a33   : > { %v4038_v43 = vpop.trf.xlu1 }
0x2a34   : > { %7145 = vmatmul.mubr.msk.f32.vlgmr.msra.gmra.mrb[22].mxu1 %vm1336_vm14, %v4038_v43 }
0x2a35   : > { %7418 = vmatpush3.bf16.msra.mxu1 %v8969_v32  ;;  %7170 = vmatprep.mubr.msk.f32.mxu1 %vm8474_vm0, %v8473_v1 }
0x2a36   : > { %7419 = vmatprep.subr.bf16.mxu1 %v8472_v0 }
0x2a39   : > { %7421 = vmatpush3.bf16.msra.mxu1 %v8972_v34 }
0x2a3a   : > { %7422 = vmatprep.subr.bf16.mxu1 %v8472_v0 }
0x2a65   : > { %v4242_v55 = vpop.permute.xlu0 %4241 }
0x2a66   : > { %v9630_v22 = vadd.f32 %v4242_v55, %v4234_v48 }
0x2a68   : > { %4257 = vrot.lane.b32.xlu0 %v9630_v22, %s8477_s27 }
0x2ada   : > { %v4258_v54 = vpop.permute.xlu0 %4257 }
0x2adb   : > { %7171 = vmatmul.mubr.msk.f32.vlgmr.msra.gmra.mrb[24].mxu1 %vm1055_vm6, %v4258_v54 }
0x2adc   : > { %7177 = vmatprep.mubr.msk.f32.mxu1 %vm8474_vm0, %v8473_v1 }
0x2b07   : > { %v7146_v40 = vpop.f32.mrb[22].mxu1 }
0x2b08   : > { %v4128_v18 = vpop.f32.mrb[23].mxu1  ;;  %v4138_v53 = vsub.f32 1.0, %v7146_v40 }
0x2b09   : > { %4143 = vrot.lane.b32.xlu0 %v4128_v18, %s8478_s8  ;;  %v4137_v26 = vsub.f32 1.0, %v4128_v18 }
0x2b0a   : > { %v4140_v61 = vmul.f32 %v4138_v53, %v9514_v14 }
0x2b0b   : > { %v4139_v27 = vmul.f32 %v4137_v26, %v9516_v6 }
0x2b0d   : > { %4145 = vrot.lane.b32.xlu0 %v7146_v40, %s8478_s8 }
0x2b7b   : > { %v4144_v17 = vpop.permute.xlu0 %4143 }
0x2b7c   : > { %v9640_v3 = vadd.f32 %v4144_v17, %v4139_v27 }
0x2b7e   : > { %v4381_v33 = vmul.f32 %v9640_v3, %v9640_v3 }
0x2b7f   : > { %v4146_v37 = vpop.permute.xlu0 %4145 }
0x2b80   : > { %v9645_v38 = vadd.f32 %v4146_v37, %v4140_v61  ;;  %v4383_v41 = vsel %vm1181_vm5, %v4381_v33, 0.0 }
0x2b81   : > { %4384 = vadd.xlane.f32.xlu1 %v4383_v41 }
0x2b82   : > { %v7427_v8 = vpack.c.bf16 %v9645_v38, %v9640_v3  ;;  %v4382_v6 = vmul.f32 %v9645_v38, %v9645_v38 }
0x2b84   : > { %7428 = vmatpush3.bf16.msra.mxu0 %v7427_v8  ;;  %v4386_v4 = vsel %vm1181_vm5, %v4382_v6, 0.0 }
0x2b85   : > { %4387 = vadd.xlane.f32.xlu0 %v4386_v4 }
0x2bae   : > { %v4327_v14 = vpop.f32.mrb[24].mxu1 }
0x2baf   : > { %v9654_v36 = vadd.f32 %v9396_v51, %v4327_v14  ;;  %v7172_v29 = vpop.f32.mrb[25].mxu1 }
0x2bb1   : > { %v4341_v47 = vand.u32 2147483647, %v9654_v36  ;;  %7878 = vtanh.f32 %v9654_v36  ;;  %v4376_v46 = vrot.slane %v9654_v36, 7  ;;  %v4338_v28 = vmax.f32 %v9654_v36, 0.0 }
0x2bb2   : > { %vm4339_vm9 = vcmp.ne.f32.partialorder %v9654_v36, %v9654_v36  ;;  %v6693_v61 = vmul.f32 -1.442695, %v9654_v36 }
0x2bb3   : > { %v4342_v49 = vsub.f32 0.0, %v4341_v47 }
0x2bb5   : > { %v4343_v20 = vmul.f32 1.442695, %v4342_v49 }
0x2bb7   : > { %7880 = vpow2.f32 %v4343_v20 }
0x2bbb   : > { %v9658_v23 = vpop.eup %7878 }
0x2bbc   : > { %v4357_v62 = vrot.slane %v9658_v23, 7 }
0x2bbe   : > { %4358 = vrot.lane.b32.xlu0 %v4357_v62, %s8478_s8 }
0x2bc1   : > { %v7881_v50 = vpop.eup %7880 }
0x2bc2   : > { %4377 = vrot.lane.b32.xlu0 %v4376_v46, %s8481_s17  ;;  %v4345_v51 = vadd.f32 1.0, %v7881_v50  ;;  %v4348_v44 = vmul.f32 -0.5, %v7881_v50  ;;  %v4351_v56 = vand.u32 2147483647, %v7881_v50 }
0x2bc4   : > { %7882 = vlog2.f32 %v4345_v51  ;;  %v4349_v52 = vadd.f32 1.0, %v4348_v44  ;;  %vm4352_vm8 = vcmp.lt.f32.partialorder %v4351_v56, 0.0004427343 }
0x2bc6   : > { %v4350_v39 = vmul.f32 %v7881_v50, %v4349_v52 }
0x2bce   : > { %v7883_v63 = vpop.eup %7882 }
0x2bcf   : > { %v4347_v58 = vmul.f32 0.6931472, %v7883_v63 }
0x2bd1   : > { %v4353_v9 = vsel %vm4352_vm8, %v4350_v39, %v4347_v58 }
0x2bd2   : > { %v4354_v30 = vadd.f32 %v4353_v9, %v4338_v28 }
0x2bd4   : > { %v4355_v2 = vsel %vm4339_vm9, %v9654_v36, %v4354_v30 }
0x2bd5   : > { %v4369_v35 = vrot.slane %v4355_v2, 7 }
0x2bd7   : > { %4370 = vrot.lane.b32.xlu1 %v4369_v35, %s8480_s13 }
0x2c0e   : > { %v4385_v24 = vpop.xlane.xlu1 %4384 }
0x2c0f   : > { %v4389_v16 = vmax.f32 %v4385_v24, 1e-16 }
0x2c11   : > { %7884 = vrsqrt.f32 %v4389_v16 }
0x2c12   : > { %v4388_v12 = vpop.xlane.xlu0 %4387 }
0x2c13   : > { %v4390_v42 = vmax.f32 %v4388_v12, 1e-16 }
0x2c15   : > { %7886 = vrsqrt.f32 %v4390_v42 }
0x2c16   : > { %7888 = vpow2.f32 %v6693_v61 }
0x2c1b   : > { %v7885_v59 = vpop.eup %7884 }
0x2c1c   : > { %v4393_v48 = vmul.f32 %v7885_v59, %v9640_v3 }
0x2c1f   : > { %v7887_v43 = vpop.eup %7886 }
0x2c20   : > { %v4394_v55 = vmul.f32 %v7887_v43, %v9645_v38  ;;  %v7889_v37 = vpop.eup %7888 }
0x2c21   : > { %v4335_v8 = vadd.f32 1.0, %v7889_v37 }
0x2c22   : > { %v7423_v54 = vpack.c.bf16 %v4394_v55, %v4393_v48 }
0x2c23   : > { %7890 = vrcp.f32 %v4335_v8 }
0x2c24   : > { %7425 = vmatpush3.bf16.xpose.msk.msra.mxu1 %vm9008_vm7, %v7423_v54 }
0x2c25   : > { %7429 = vmatprep.subr.bf16.mxu1 %v8472_v0 }
0x2c2d   : > { %v9695_v4 = vpop.eup %7890 }
0x2c2e   : > { %v4363_v14 = vrot.slane %v9695_v4, 7 }
0x2c30   : > { %v4359_v40 = vpop.permute.xlu0 %4358 }
0x2c31   : > { %v4361_v18 = vsel %vm1158_vm10, %v9658_v23, %v4359_v40 }
0x2c32   : > { %v4395_v26 = vmul.f32 %v4361_v18, %v4361_v18  ;;  %7178 = vmatmul.mubr.msk.f32.vlgmr.msra.gmra.mrb[26].mxu1 %vm1181_vm5, %v4361_v18 }
0x2c33   : > { %7431 = vmatpush3.bf16.msra.mxu1 %v8940_v5  ;;  %7204 = vmatprep.mubr.msk.f32.mxu1 %vm8474_vm0, %v8473_v1 }
0x2c34   : > { %v4396_v53 = vsel %vm1195_vm11, %v4395_v26, 0.0  ;;  %7432 = vmatprep.subr.bf16.mxu1 %v8472_v0  ;;  %v4378_v33 = vpop.permute.xlu0 %4377 }
0x2c35   : > { %4397 = vadd.xlane.f32.xlu0 %v4396_v53  ;;  %v4380_v41 = vsel %vm1158_vm10, %v9654_v36, %v4378_v33 }
0x2c36   : > { %v4512_v6 = vsel %vm1312_vm12, %v4380_v41, -inf }
0x2c37   : > { %7434 = vmatpush3.bf16.msra.mxu1 %v8945_v11 }
0x2c38   : > { %7435 = vmatprep.subr.bf16.mxu1 %v8472_v0 }
0x2c3b   : > { %7437 = vmatpush3.bf16.msra.mxu1 %v8956_v15 }
0x2c3c   : > { %7448 = vmatprep.subr.bf16.mxu1 %v8472_v0 }
0x2c49   : > { %v4371_v27 = vpop.permute.xlu1 %4370 }
0x2c4a   : > { %v9687_v17 = vsel %vm1158_vm10, %v4355_v2, %v4371_v27 }
0x2c4b   : > { %4483 = vperm.xlu1 %7663, %v9687_v17   ;;  %v4374_v61 = vadd.f32 1.0, %v9687_v17 }
0x2c4f   : > { %7664 = vset.pattern.permute.xlu1 %v8483_v60 }
0x2c6f   : > { %4513 = vmax.xlane.f32.xlu1 %v4512_v6 }
0x2c80   : > { %4364 = vrot.lane.b32.xlu1 %v4363_v14, %s8480_s13 }
0x2cc2   : > { %v4398_v29 = vpop.xlane.xlu0 %4397 }
0x2cc3   : > { %v4478_v47 = vmax.f32 %v4398_v29, 1e-16 }
0x2cc5   : > { %7892 = vrsqrt.f32 %v4478_v47 }
0x2cca   : > { %v4484_v50 = vpop.permute.xlu1 %4483 }
0x2ccf   : > { %v7893_v49 = vpop.eup %7892 }
0x2cfc   : > { %v4514_v44 = vpop.xlane.xlu1 %4513 }
0x2cfd   : > { %v4515_v52 = vsub.f32 %v4380_v41, %v4514_v44 }
0x2cff   : > { %v4516_v56 = vmul.f32 1.442695, %v4515_v52 }
0x2d00   : > { %v4365_v24 = vpop.permute.xlu1 %4364 }
0x2d01   : > { %7894 = vpow2.f32 %v4516_v56  ;;  %v4367_v16 = vsel %vm1158_vm10, %v9695_v4, %v4365_v24 }
0x2d02   : > { %v4504_v12 = vsub.f32 1.0, %v4367_v16 }
0x2d05   : > { %v4474_v20 = vpop.f32.mrb[26].mxu1 }
0x2d06   : > { %v4480_v62 = vmul.f32 %v7893_v49, %v4474_v20  ;;  %v7179_v46 = vpop.f32.mrb[27].mxu1 }
0x2d08   : > { %v4486_v36 = vmul.f32 %v4484_v50, %v4480_v62 }
0x2d0a   : > { %v4487_v51 = vsel %vm1195_vm11, %v4486_v36, -inf }
0x2d0b   : > { %4488 = vmax.xlane.f32.xlu0 %v4487_v51  ;;  %v7895_v63 = vpop.eup %7894 }
0x2d21   : > { %4519 = vrot.lane.b32.xlu0 %v7895_v63, %s8482_s23 }
0x2d98   : > { %v4489_v58 = vpop.xlane.xlu0 %4488 }
0x2d99   : > { %v4490_v39 = vsub.f32 %v4486_v36, %v4489_v58 }
0x2d9b   : > { %v4491_v28 = vmul.f32 1.442695, %v4490_v39 }
0x2d9c   : > { %v4520_v9 = vpop.permute.xlu0 %4519 }
0x2d9d   : > { %7896 = vpow2.f32 %v4491_v28  ;;  %v4522_v30 = vsel %vm1323_vm13, %v4520_v9, 0.0 }
0x2d9e   : > { %4523 = vadd.xlane.f32.xlu0 %v4522_v30 }
0x2da7   : > { %v7897_v2 = vpop.eup %7896 }
0x2da8   : > { %v4493_v35 = vsel %vm1195_vm11, %v7897_v2, 0.0 }
0x2da9   : > { %4494 = vadd.xlane.f32.xlu1 %v4493_v35 }
0x2db4   : > { %4500 = vperm.xlu0 %7657, %v4367_v16  }
0x2db8   : > { %7665 = vset.pattern.permute.xlu0 %v8484_v13 }
0x2dba   : > { %4507 = vperm.xlu1 %7664, %v4504_v12  }
0x2dbe   : > { %7666 = vset.pattern.permute.xlu1 %v8485_v19 }
0x2e2b   : > { %v4524_v42 = vpop.xlane.xlu0 %4523 }
0x2e2c   : > { %7898 = vrcp.f32 %v4524_v42 }
0x2e33   : > { %v4501_v18 = vpop.permute.xlu0 %4500 }
0x2e36   : > { %v7899_v59 = vpop.eup %7898  ;;  %v4495_v43 = vpop.xlane.xlu1 %4494 }
0x2e37   : > { %7900 = vrcp.f32 %v4495_v43  ;;  %v4526_v48 = vmul.f32 %v7899_v59, %v7895_v63  ;;  %v4791_v59 = vrot.slane %v8965_v21, 6 }
0x2e38   : > { %7902 = vtanh.f32 %v9630_v22 }
0x2e39   : > { %4549 = vperm.xlu1 %7666, %v4526_v48   ;;  %4544 = vperm.xlu0 %7665, %v4526_v48  }
0x2e3a   : > { %v4508_v54 = vpop.permute.xlu1 %4507 }
0x2e3b   : > { %v4510_v53 = vmul.f32 %v4508_v54, %v9596_v45 }
0x2e3d   : > { %7667 = vset.pattern.permute.xlu1 %v8486_v25  ;;  %7668 = vset.pattern.permute.xlu0 %v8487_v31 }
0x2e3e   : > { %4555 = vperm.xlu1 %7667, %v4526_v48  }
0x2e41   : > { %v7901_v55 = vpop.eup %7900 }
0x2e42   : > { %v4497_v40 = vmul.f32 %v7901_v55, %v7897_v2  ;;  %7669 = vset.pattern.permute.xlu1 %v8479_v10  ;;  %v7903_v33 = vpop.eup %7902 }
0x2e44   : > { %v4503_v26 = vmul.f32 %v4501_v18, %v4497_v40 }
0x2e46   : > { %v4511_v27 = vadd.f32 %v4510_v53, %v4503_v26 }
0x2e48   : > { %4531 = vrot.lane.b32.xlu1 %v4511_v27, %s8490_s4  ;;  %4528 = vrot.lane.b32.xlu0 %v4511_v27, %s8489_s11 }
0x2e4c   : > { %4538 = vrot.lane.b32.xlu1 %v4511_v27, %s8488_s20  ;;  %4535 = vrot.lane.b32.xlu0 %v4511_v27, %s8480_s13 }
0x2e50   : > { %4565 = vperm.xlu0 %7668, %v4374_v61  }
0x2e54   : > { %4247 = vrot.lane.b32.xlu0 %v7903_v33, %s8476_s29 }
0x2eb8   : > { %v4550_v37 = vpop.permute.xlu1 %4549  ;;  %v4545_v41 = vpop.permute.xlu0 %4544 }
0x2eb9   : > { %v4552_v47 = vmul.f32 %v4550_v37, %v4511_v27 }
0x2ebc   : > { %v4529_v8 = vpop.permute.xlu0 %4528 }
0x2ebd   : > { %v4556_v45 = vpop.permute.xlu1 %4555 }
0x2ec0   : > { %v4536_v49 = vpop.permute.xlu0 %4535 }
0x2ec1   : > { %v4532_v6 = vpop.permute.xlu1 %4531 }
0x2ec2   : > { %v4534_v14 = vsel %vm1336_vm14, %v4529_v8, %v4532_v6 }
0x2ec3   : > { %v4547_v29 = vmul.f32 %v4545_v41, %v4534_v14 }
0x2ec5   : > { %v4539_v20 = vpop.permute.xlu1 %4538  ;;  %v4553_v46 = vadd.f32 %v4552_v47, %v4547_v29 }
0x2ec6   : > { %v4541_v62 = vsel %vm1344_vm15, %v4536_v49, %v4539_v20 }
0x2ec7   : > { %v4558_v50 = vmul.f32 %v4556_v45, %v4541_v62 }
0x2ec9   : > { %v4559_v17 = vadd.f32 %v4558_v50, %v4553_v46 }
0x2ecb   : > { %v4560_v36 = vmax.f32 %v4559_v17, 1e-30 }
0x2ecd   : > { %7904 = vlog2.f32 %v4560_v36 }
0x2ecf   : > { %v4566_v51 = vpop.permute.xlu0 %4565 }
0x2ed3   : > { %v4248_v44 = vpop.permute.xlu0 %4247 }
0x2ed4   : > { %v4250_v52 = vmul.f32 %v9612_v7, %v4248_v44 }
0x2ed6   : > { %4252 = vrot.lane.b32.xlu0 %v4250_v52, %s8491_s25 }
0x2ed7   : > { %v7905_v56 = vpop.eup %7904 }
0x2ed8   : > { %v4562_v63 = vmul.f32 0.6931472, %v7905_v56 }
0x2eda   : > { %v4568_v58 = vmul.f32 %v4566_v51, %v4562_v63 }
0x2edc   : > { %v4569_v39 = vmul.f32 1.442695, %v4568_v58  ;;  %v9784_v58 = vld [vmem:[%s10374_s26] sm:$0x1] }
0x2ede   : > { %7906 = vpow2.f32 %v4569_v39 }
0x2ee8   : > { %v7907_v28 = vpop.eup %7906 }
0x2ee9   : > { %v4571_v9 = vsel %vm1195_vm11, %v7907_v28, 0.0 }
0x2eea   : > { %4572 = vadd.xlane.f32.xlu1 %v4571_v9 }
0x2f48   : > { %v4253_v30 = vpop.permute.xlu0 %4252 }
0x2f49   : > { %4255 = vst.msk [vmem:[#allocation2 + $0x6] sm:$0x1] %vm934_vm3, %v4253_v30 }
0x2f77   : > { %v4573_v2 = vpop.xlane.xlu1 %4572 }
0x2f78   : > { %v4574_v35 = vadd.f32 1e-16, %v4573_v2 }
0x2f7a   : > { %7908 = vrcp.f32 %v4574_v35 }
0x2f84   : > { %v7909_v24 = vpop.eup %7908 }
0x2f85   : > { %v9724_v16 = vmul.f32 %v7909_v24, %v7907_v28 }
0x2f87   : > { %7185 = vmatmul.mubr.msk.f32.vlgmr.msra.gmra.mrb[30].mxu0 %vm1181_vm5, %v9724_v16  ;;  %v4658_v40 = vrot.slane %v9724_v16, 1 }
0x305a   : > { %v4646_v7 = vpop.f32.mrb[30].mxu0 }
0x305b   : > { %4650 = vst.msk [vmem:[#allocation2 + $0x6] sm:$0x1] %vm923_vm1, %v4646_v7  ;;  %v7186_v12 = vpop.f32.mrb[31].mxu0 }
0x3062   : > { %v4790_v42 = vld [vmem:[#allocation2 + $0x6] sm:$0x1] }
0x3063   : > { %7205 = vmatmul.mubr.msk.f32.vlgmr.msra.gmra.mrb[28].mxu1 %vm941_vm4, %v4790_v42 }
0x3064   : > { %7229 = vmatprep.mubr.msk.f32.mxu1 %vm8474_vm0, %v8473_v1 }
0x3136   : > { %v4862_v43 = vpop.f32.mrb[28].mxu1 }
0x3137   : > { %v4863_v48 = vadd.f32 %v4862_v43, %v4791_v59  ;;  %v7206_v55 = vpop.f32.mrb[29].mxu1 }
0x3139   : > { %7910 = vtanh.f32 %v4863_v48  ;;  %v6702_v18 = vmul.f32 -1.442695, %v4863_v48 }
0x313b   : > { %7912 = vpow2.f32 %v6702_v18 }
0x3143   : > { %v7911_v54 = vpop.eup %7910 }
0x3144   : > { %4875 = vrot.lane.b32.xlu0 %v7911_v54, %s8476_s29 }
0x3145   : > { %v7913_v26 = vpop.eup %7912 }
0x3146   : > { %v4869_v53 = vadd.f32 1.0, %v7913_v26 }
0x3148   : > { %4651 = vrot.lane.b32.xlu0 %v9695_v4, %s8492_s19  ;;  %7914 = vrcp.f32 %v4869_v53 }
0x314c   : > { %4654 = vrot.lane.b32.xlu0 %v9658_v23, %s8478_s8 }
0x3152   : > { %v9740_v27 = vpop.eup %7914 }
0x3153   : > { %v4873_v8 = vmul.f32 %v9740_v27, %v9630_v22 }
0x316a   : > { %4660 = vxpose.xlu0.b32.start.end [1/1] (short) (narrow) %v4658_v40, 16 }
0x3193   : > { %7670 = vset.pattern.permute.xlu0 %v8483_v60 }
0x31b6   : > { %v4876_v61 = vpop.permute.xlu0 %4875 }
0x31b7   : > { %v4878_v33 = vmul.f32 %v9740_v27, %v4876_v61 }
0x31b9   : > { %4880 = vrot.lane.b32.xlu1 %v4878_v33, %s8476_s29 }
0x31ba   : > { %v4652_v4 = vpop.permute.xlu0 %4651 }
0x31be   : > { %v4655_v37 = vpop.permute.xlu0 %4654 }
0x31bf   : > { %v4657_v23 = vsel %vm1181_vm5, %v4652_v4, %v4655_v37 }
0x31c0   : > { %7187 = vmatprep.subr.msk.mxu0 %vm1158_vm10, %v4657_v23 }
0x31c1   : > { %7188 = vmatpush3.msk.msra.mxu0 %vm1158_vm10, %v4657_v23 }
0x31c2   : > { %7438 = vmatprep.subr.bf16.mxu0 %v8472_v0 }
0x31ea   : > { %v4676_v41 = vpop.trf.xlu0 }
0x31eb   : > { %7189 = vmatprep.mubr.msk.f32.mxu0 %vm1336_vm14, %v4676_v41 }
0x31ee   : > { %v4677_v45 = vpop.trf.xlu0 }
0x31ef   : > { %7190 = vmatmul.mubr.msk.f32.vlgmr.msra.gmra.mrb[32].mxu0 %vm1336_vm14, %v4677_v45 }
0x31f0   : > { %7440 = vmatpush3.bf16.msra.mxu0 %v8969_v32  ;;  %7215 = vmatprep.mubr.msk.f32.mxu0 %vm8474_vm0, %v8473_v1 }
0x31f1   : > { %7441 = vmatprep.subr.bf16.mxu0 %v8472_v0 }
0x31f4   : > { %7443 = vmatpush3.bf16.msra.mxu0 %v8972_v34 }
0x31f5   : > { %7444 = vmatprep.subr.bf16.mxu0 %v8472_v0 }
0x322b   : > { %v4881_v6 = vpop.permute.xlu1 %4880 }
0x322c   : > { %v9758_v14 = vadd.f32 %v4881_v6, %v4873_v8 }
0x322e   : > { %4896 = vrot.lane.b32.xlu1 %v9758_v14, %s8477_s27 }
0x32a0   : > { %v4897_v29 = vpop.permute.xlu1 %4896 }
0x32a1   : > { %7216 = vmatmul.mubr.msk.f32.vlgmr.msra.gmra.mrb[34].mxu0 %vm1055_vm6, %v4897_v29 }
0x32a2   : > { %7222 = vmatprep.mubr.msk.f32.mxu0 %vm8474_vm0, %v8473_v1 }
0x32c2   : > { %v7191_v47 = vpop.f32.mrb[32].mxu0 }
0x32c3   : > { %4784 = vrot.lane.b32.xlu1 %v7191_v47, %s8478_s8  ;;  %v4767_v49 = vpop.f32.mrb[33].mxu0  ;;  %v4777_v20 = vsub.f32 1.0, %v7191_v47 }
0x32c4   : > { %4782 = vrot.lane.b32.xlu0 %v4767_v49, %s8478_s8  ;;  %v4776_v22 = vsub.f32 1.0, %v4767_v49 }
0x32c5   : > { %v4779_v62 = vmul.f32 %v4777_v20, %v9645_v38 }
0x32c6   : > { %v4778_v50 = vmul.f32 %v4776_v22, %v9640_v3 }
0x3335   : > { %v4785_v46 = vpop.permute.xlu1 %4784 }
0x3336   : > { %v9769_v17 = vadd.f32 %v4785_v46, %v4779_v62  ;;  %v4783_v36 = vpop.permute.xlu0 %4782 }
0x3337   : > { %v9771_v51 = vadd.f32 %v4783_v36, %v4778_v50 }
0x3338   : > { %v5021_v38 = vmul.f32 %v9769_v17, %v9769_v17 }
0x3339   : > { %v7449_v44 = vpack.c.bf16 %v9769_v17, %v9771_v51  ;;  %v5020_v52 = vmul.f32 %v9771_v51, %v9771_v51 }
0x333a   : > { %v5025_v3 = vsel %vm1181_vm5, %v5021_v38, 0.0 }
0x333b   : > { %7450 = vmatpush3.bf16.msra.mxu1 %v7449_v44  ;;  %v5022_v56 = vsel %vm1181_vm5, %v5020_v52, 0.0 }
0x333c   : > { %5023 = vadd.xlane.f32.xlu1 %v5022_v56 }
0x3340   : > { %5026 = vadd.xlane.f32.xlu1 %v5025_v3 }
0x3374   : > { %v4966_v63 = vpop.f32.mrb[34].mxu0 }
0x3375   : > { %v9787_v39 = vadd.f32 %v9784_v58, %v4966_v63  ;;  %v7217_v28 = vpop.f32.mrb[35].mxu0 }
0x3377   : > { %v4980_v9 = vand.u32 2147483647, %v9787_v39  ;;  %7916 = vtanh.f32 %v9787_v39  ;;  %v4977_v40 = vmax.f32 %v9787_v39, 0.0  ;;  %vm4978_vm9 = vcmp.ne.f32.partialorder %v9787_v39, %v9787_v39 }
0x3378   : > { %v5015_v33 = vrot.slane %v9787_v39, 7 }
0x3379   : > { %v4981_v30 = vsub.f32 0.0, %v4980_v9 }
0x337b   : > { %v4982_v2 = vmul.f32 1.442695, %v4981_v30 }
0x337d   : > { %7918 = vpow2.f32 %v4982_v2 }
0x3381   : > { %v9791_v35 = vpop.eup %7916 }
0x3382   : > { %v4996_v24 = vrot.slane %v9791_v35, 7 }
0x3384   : > { %4997 = vrot.lane.b32.xlu1 %v4996_v24, %s8478_s8 }
0x3387   : > { %v7919_v7 = vpop.eup %7918 }
0x3388   : > { %v4984_v12 = vadd.f32 1.0, %v7919_v7  ;;  %v4987_v42 = vmul.f32 -0.5, %v7919_v7  ;;  %v4990_v43 = vand.u32 2147483647, %v7919_v7 }
0x338a   : > { %7920 = vlog2.f32 %v4984_v12  ;;  %v4988_v59 = vadd.f32 1.0, %v4987_v42  ;;  %vm4991_vm8 = vcmp.lt.f32.partialorder %v4990_v43, 0.0004427343 }
0x338c   : > { %v4989_v54 = vmul.f32 %v7919_v7, %v4988_v59 }
0x3394   : > { %v7921_v48 = vpop.eup %7920 }
0x3395   : > { %v4986_v55 = vmul.f32 0.6931472, %v7921_v48 }
0x3397   : > { %v4992_v18 = vsel %vm4991_vm8, %v4989_v54, %v4986_v55  ;;  %vm6165_vm8 = vcmask 253952  }
0x3398   : > { %v4993_v26 = vadd.f32 %v4992_v18, %v4977_v40 }
0x339a   : > { %v4994_v53 = vsel %vm4978_vm9, %v9787_v39, %v4993_v26 }
0x339b   : > { %v5008_v61 = vrot.slane %v4994_v53, 7 }
0x339d   : > { %5009 = vrot.lane.b32.xlu0 %v5008_v61, %s8480_s13 }
0x33a1   : > { %5016 = vrot.lane.b32.xlu0 %v5015_v33, %s8481_s17 }
0x33c9   : > { %v5024_v4 = vpop.xlane.xlu1 %5023 }
0x33ca   : > { %v5028_v37 = vmax.f32 %v5024_v4, 1e-16 }
0x33cc   : > { %7922 = vrsqrt.f32 %v5028_v37 }
0x33cd   : > { %v5027_v23 = vpop.xlane.xlu1 %5026 }
0x33ce   : > { %v5029_v41 = vmax.f32 %v5027_v23, 1e-16 }
0x33d0   : > { %7924 = vrsqrt.f32 %v5029_v41 }
0x33d6   : > { %v7923_v45 = vpop.eup %7922 }
0x33d7   : > { %v5032_v6 = vmul.f32 %v7923_v45, %v9771_v51 }
0x33da   : > { %v7925_v8 = vpop.eup %7924 }
0x33db   : > { %v5033_v29 = vmul.f32 %v7925_v8, %v9769_v17 }
0x33dd   : > { %v7445_v47 = vpack.c.bf16 %v5033_v29, %v5032_v6 }
0x33df   : > { %7447 = vmatpush3.bf16.xpose.msk.msra.mxu0 %vm9008_vm7, %v7445_v47 }
0x33e0   : > { %7451 = vmatprep.subr.bf16.mxu0 %v8472_v0 }
0x33f6   : > { %v4998_v49 = vpop.permute.xlu1 %4997 }
0x33f7   : > { %v5000_v20 = vsel %vm1158_vm10, %v9791_v35, %v4998_v49 }
0x33f8   : > { %v5034_v22 = vmul.f32 %v5000_v20, %v5000_v20  ;;  %7223 = vmatmul.mubr.msk.f32.vlgmr.msra.gmra.mrb[36].mxu0 %vm1181_vm5, %v5000_v20 }
0x33f9   : > { %7453 = vmatpush3.bf16.msra.mxu0 %v8940_v5  ;;  %7249 = vmatprep.mubr.msk.f32.mxu0 %vm8474_vm0, %v8473_v1  ;;  %v6704_v5 = vmul.f32 -1.442695, %v9787_v39 }
0x33fa   : > { %v5035_v62 = vsel %vm1195_vm11, %v5034_v22, 0.0  ;;  %7454 = vmatprep.subr.bf16.mxu0 %v8472_v0 }
0x33fb   : > { %5036 = vadd.xlane.f32.xlu0 %v5035_v62  ;;  %7926 = vpow2.f32 %v6704_v5 }
0x33fd   : > { %7456 = vmatpush3.bf16.msra.mxu0 %v8945_v11 }
0x33fe   : > { %7457 = vmatprep.subr.bf16.mxu0 %v8472_v0 }
0x3401   : > { %7459 = vmatpush3.bf16.msra.mxu0 %v8956_v15 }
0x3402   : > { %7470 = vmatprep.subr.bf16.mxu0 %v8472_v0 }
0x3405   : > { %v7927_v44 = vpop.eup %7926 }
0x3406   : > { %v4974_v52 = vadd.f32 1.0, %v7927_v44 }
0x3408   : > { %7928 = vrcp.f32 %v4974_v52 }
0x340f   : > { %v5010_v46 = vpop.permute.xlu0 %5009 }
0x3410   : > { %v9820_v50 = vsel %vm1158_vm10, %v4994_v53, %v5010_v46 }
0x3411   : > { %5122 = vperm.xlu1 %7669, %v9820_v50   ;;  %v5013_v62 = vadd.f32 1.0, %v9820_v50 }
0x3412   : > { %v9828_v56 = vpop.eup %7928 }
0x3413   : > { %v5017_v36 = vpop.permute.xlu0 %5016  ;;  %v5002_v38 = vrot.slane %v9828_v56, 7 }
0x3414   : > { %v5019_v11 = vsel %vm1158_vm10, %v9787_v39, %v5017_v36 }
0x3415   : > { %7671 = vset.pattern.permute.xlu1 %v8483_v60  ;;  %v5151_v15 = vsel %vm1312_vm12, %v5019_v11, -inf }
0x3435   : > { %5152 = vmax.xlane.f32.xlu1 %v5151_v15 }
0x3446   : > { %5003 = vrot.lane.b32.xlu1 %v5002_v38, %s8480_s13 }
0x3488   : > { %v5037_v3 = vpop.xlane.xlu0 %5036 }
0x3489   : > { %v5117_v63 = vmax.f32 %v5037_v3, 1e-16 }
0x348b   : > { %7930 = vrsqrt.f32 %v5117_v63 }
0x3490   : > { %v5123_v24 = vpop.permute.xlu1 %5122 }
0x3495   : > { %v7931_v28 = vpop.eup %7930 }
0x34c2   : > { %v5153_v12 = vpop.xlane.xlu1 %5152 }
0x34c3   : > { %v5154_v42 = vsub.f32 %v5019_v11, %v5153_v12 }
0x34c5   : > { %v5155_v59 = vmul.f32 1.442695, %v5154_v42 }
0x34c6   : > { %v5004_v61 = vpop.permute.xlu1 %5003 }
0x34c7   : > { %7932 = vpow2.f32 %v5155_v59  ;;  %v5006_v33 = vsel %vm1158_vm10, %v9828_v56, %v5004_v61 }
0x34c8   : > { %v5143_v4 = vsub.f32 1.0, %v5006_v33 }
0x34cb   : > { %v5113_v9 = vpop.f32.mrb[36].mxu0 }
0x34cc   : > { %v5119_v30 = vmul.f32 %v7931_v28, %v5113_v9  ;;  %v7224_v2 = vpop.f32.mrb[37].mxu0 }
0x34ce   : > { %v5125_v39 = vmul.f32 %v5123_v24, %v5119_v30 }
0x34d0   : > { %v5126_v7 = vsel %vm1195_vm11, %v5125_v39, -inf }
0x34d1   : > { %5127 = vmax.xlane.f32.xlu0 %v5126_v7  ;;  %v7933_v43 = vpop.eup %7932 }
0x34e7   : > { %5158 = vrot.lane.b32.xlu0 %v7933_v43, %s8482_s23 }
0x355e   : > { %v5128_v48 = vpop.xlane.xlu0 %5127 }
0x355f   : > { %v5129_v55 = vsub.f32 %v5125_v39, %v5128_v48 }
0x3561   : > { %v5130_v54 = vmul.f32 1.442695, %v5129_v55 }
0x3562   : > { %v5159_v40 = vpop.permute.xlu0 %5158 }
0x3563   : > { %7934 = vpow2.f32 %v5130_v54  ;;  %v5161_v18 = vsel %vm1323_vm13, %v5159_v40, 0.0 }
0x3564   : > { %5162 = vadd.xlane.f32.xlu0 %v5161_v18 }
0x356d   : > { %v7935_v26 = vpop.eup %7934 }
0x356e   : > { %v5132_v53 = vsel %vm1195_vm11, %v7935_v26, 0.0 }
0x356f   : > { %5133 = vadd.xlane.f32.xlu1 %v5132_v53 }
0x357a   : > { %5139 = vperm.xlu0 %7670, %v5006_v33  }
0x3580   : > { %5146 = vperm.xlu1 %7671, %v5143_v4   ;;  %v5430_v4 = vrot.slane %v8965_v21, 7 }
0x3584   : > { %7672 = vset.pattern.permute.xlu1 %v8484_v13 }
0x35f1   : > { %v5163_v37 = vpop.xlane.xlu0 %5162 }
0x35f2   : > { %7936 = vrcp.f32 %v5163_v37 }
0x35f9   : > { %v5140_v47 = vpop.permute.xlu0 %5139 }
0x35fc   : > { %v7937_v23 = vpop.eup %7936  ;;  %v5134_v41 = vpop.xlane.xlu1 %5133 }
0x35fd   : > { %7938 = vrcp.f32 %v5134_v41  ;;  %v5165_v45 = vmul.f32 %v7937_v23, %v7933_v43 }
0x35fe   : > { %7940 = vtanh.f32 %v9758_v14 }
0x35ff   : > { %5183 = vperm.xlu1 %7672, %v5165_v45  }
0x3600   : > { %v5147_v6 = vpop.permute.xlu1 %5146 }
0x3601   : > { %v5149_v20 = vmul.f32 %v5147_v6, %v9724_v16 }
0x3603   : > { %7673 = vset.pattern.permute.xlu1 %v8485_v19 }
0x3604   : > { %5188 = vperm.xlu1 %7673, %v5165_v45  }
0x3607   : > { %v7939_v8 = vpop.eup %7938 }
0x3608   : > { %v5136_v29 = vmul.f32 %v7939_v8, %v7935_v26  ;;  %7674 = vset.pattern.permute.xlu1 %v8486_v25  ;;  %v7941_v46 = vpop.eup %7940 }
0x3609   : > { %5194 = vperm.xlu1 %7674, %v5165_v45  }
0x360a   : > { %v5142_v49 = vmul.f32 %v5140_v47, %v5136_v29 }
0x360c   : > { %v5150_v22 = vadd.f32 %v5149_v20, %v5142_v49 }
0x360d   : > { %7675 = vset.pattern.permute.xlu1 %v8487_v31 }
0x360e   : > { %5170 = vrot.lane.b32.xlu0 %v5150_v22, %s8490_s4  ;;  %5167 = vrot.lane.b32.xlu1 %v5150_v22, %s8489_s11 }
0x3612   : > { %5177 = vrot.lane.b32.xlu0 %v5150_v22, %s8488_s20  ;;  %5174 = vrot.lane.b32.xlu1 %v5150_v22, %s8480_s13 }
0x3616   : > { %5204 = vperm.xlu1 %7675, %v5013_v62  }
0x361a   : > { %4886 = vrot.lane.b32.xlu1 %v7941_v46, %s8476_s29 }
0x367e   : > { %v5184_v16 = vpop.permute.xlu1 %5183 }
0x3680   : > { %v5171_v44 = vpop.permute.xlu0 %5170 }
0x3683   : > { %v5189_v5 = vpop.permute.xlu1 %5188 }
0x3684   : > { %v5191_v38 = vmul.f32 %v5189_v5, %v5150_v22  ;;  %v5178_v3 = vpop.permute.xlu0 %5177 }
0x3688   : > { %v5195_v36 = vpop.permute.xlu1 %5194 }
0x368c   : > { %v5168_v11 = vpop.permute.xlu1 %5167 }
0x368d   : > { %v5173_v52 = vsel %vm1336_vm14, %v5168_v11, %v5171_v44 }
0x368e   : > { %v5186_v15 = vmul.f32 %v5184_v16, %v5173_v52 }
0x3690   : > { %v5175_v63 = vpop.permute.xlu1 %5174  ;;  %v5192_v9 = vadd.f32 %v5191_v38, %v5186_v15 }
0x3691   : > { %v5180_v28 = vsel %vm1344_vm15, %v5175_v63, %v5178_v3 }
0x3692   : > { %v5197_v30 = vmul.f32 %v5195_v36, %v5180_v28 }
0x3694   : > { %v5198_v50 = vadd.f32 %v5197_v30, %v5192_v9 }
0x3695   : > { %v5205_v2 = vpop.permute.xlu1 %5204 }
0x3696   : > { %v5199_v24 = vmax.f32 %v5198_v50, 1e-30 }
0x3698   : > { %7942 = vlog2.f32 %v5199_v24 }
0x3699   : > { %v4887_v39 = vpop.permute.xlu1 %4886 }
0x369a   : > { %v4889_v7 = vmul.f32 %v9740_v27, %v4887_v39 }
0x369c   : > { %4891 = vrot.lane.b32.xlu1 %v4889_v7, %s8491_s25 }
0x36a2   : > { %v7943_v12 = vpop.eup %7942 }
0x36a3   : > { %v5201_v42 = vmul.f32 0.6931472, %v7943_v12 }
0x36a5   : > { %v5207_v59 = vmul.f32 %v5205_v2, %v5201_v42 }
0x36a7   : > { %v5208_v43 = vmul.f32 1.442695, %v5207_v59 }
0x36a9   : > { %7944 = vpow2.f32 %v5208_v43 }
0x36b3   : > { %v7945_v48 = vpop.eup %7944 }
0x36b4   : > { %v5210_v55 = vsel %vm1195_vm11, %v7945_v48, 0.0 }
0x36b5   : > { %5211 = vadd.xlane.f32.xlu0 %v5210_v55 }
0x370e   : > { %v4892_v54 = vpop.permute.xlu1 %4891 }
0x370f   : > { %4894 = vst.msk [vmem:[#allocation2 + $0x7] sm:$0x1] %vm934_vm3, %v4892_v54 }
0x3742   : > { %v5212_v40 = vpop.xlane.xlu0 %5211 }
0x3743   : > { %v5213_v18 = vadd.f32 1e-16, %v5212_v40 }
0x3745   : > { %7946 = vrcp.f32 %v5213_v18 }
0x374f   : > { %v7947_v26 = vpop.eup %7946 }
0x3750   : > { %v9856_v53 = vmul.f32 %v7947_v26, %v7945_v48 }
0x3752   : > { %7230 = vmatmul.mubr.msk.f32.vlgmr.msra.gmra.mrb[30].mxu1 %vm1181_vm5, %v9856_v53  ;;  %v5297_v8 = vrot.slane %v9856_v53, 1 }
0x3825   : > { %v5285_v27 = vpop.f32.mrb[30].mxu1 }
0x3826   : > { %5289 = vst.msk [vmem:[#allocation2 + $0x7] sm:$0x1] %vm923_vm1, %v5285_v27  ;;  %v7231_v61 = vpop.f32.mrb[31].mxu1 }
0x382d   : > { %v5429_v33 = vld [vmem:[#allocation2 + $0x7] sm:$0x1] }
0x382e   : > { %7250 = vmatmul.mubr.msk.f32.vlgmr.msra.gmra.mrb[38].mxu0 %vm941_vm4, %v5429_v33 }
0x382f   : > { %7274 = vmatprep.mubr.msk.f32.mxu0 %vm8474_vm0, %v8473_v1 }
0x3901   : > { %v5501_v37 = vpop.f32.mrb[38].mxu0 }
0x3902   : > { %v5502_v23 = vadd.f32 %v5501_v37, %v5430_v4  ;;  %v7251_v41 = vpop.f32.mrb[39].mxu0 }
0x3904   : > { %7948 = vtanh.f32 %v5502_v23  ;;  %v6713_v6 = vmul.f32 -1.442695, %v5502_v23 }
0x3906   : > { %7950 = vpow2.f32 %v6713_v6 }
0x390e   : > { %v7949_v45 = vpop.eup %7948 }
0x390f   : > { %5514 = vrot.lane.b32.xlu1 %v7949_v45, %s8476_s29 }
0x3910   : > { %v7951_v21 = vpop.eup %7950 }
0x3911   : > { %v5508_v29 = vadd.f32 1.0, %v7951_v21 }
0x3913   : > { %5290 = vrot.lane.b32.xlu1 %v9828_v56, %s8492_s19  ;;  %7952 = vrcp.f32 %v5508_v29 }
0x3917   : > { %5293 = vrot.lane.b32.xlu1 %v9791_v35, %s8478_s8 }
0x391d   : > { %v9872_v47 = vpop.eup %7952 }
0x391e   : > { %v5512_v46 = vmul.f32 %v9872_v47, %v9758_v14 }
0x3940   : > { %5299 = vxpose.xlu1.b32.start.end [1/1] (short) (narrow) %v5297_v8, 16 }
0x395e   : > { %7676 = vset.pattern.permute.xlu1 %v8479_v10 }
0x3981   : > { %v5515_v49 = vpop.permute.xlu1 %5514 }
0x3982   : > { %v5517_v20 = vmul.f32 %v9872_v47, %v5515_v49 }
0x3984   : > { %5519 = vrot.lane.b32.xlu0 %v5517_v20, %s8476_s29 }
0x3985   : > { %v5291_v56 = vpop.permute.xlu1 %5290 }
0x3989   : > { %v5294_v22 = vpop.permute.xlu1 %5293 }
0x398a   : > { %v5296_v35 = vsel %vm1181_vm5, %v5291_v56, %v5294_v22 }
0x398b   : > { %7232 = vmatprep.subr.msk.mxu1 %vm1158_vm10, %v5296_v35 }
0x398c   : > { %7233 = vmatpush3.msk.msra.mxu1 %vm1158_vm10, %v5296_v35 }
0x398d   : > { %7460 = vmatprep.subr.bf16.mxu1 %v8472_v0 }
0x39c0   : > { %v5315_v10 = vpop.trf.xlu1 }
0x39c1   : > { %7234 = vmatprep.mubr.msk.f32.mxu1 %vm1336_vm14, %v5315_v10 }
0x39c4   : > { %v5316_v62 = vpop.trf.xlu1 }
0x39c5   : > { %7235 = vmatmul.mubr.msk.f32.vlgmr.msra.gmra.mrb[32].mxu1 %vm1336_vm14, %v5316_v62 }
0x39c6   : > { %7462 = vmatpush3.bf16.msra.mxu1 %v8969_v32  ;;  %7260 = vmatprep.mubr.msk.f32.mxu1 %vm8474_vm0, %v8473_v1 }
0x39c7   : > { %7463 = vmatprep.subr.bf16.mxu1 %v8472_v0 }
0x39ca   : > { %7465 = vmatpush3.bf16.msra.mxu1 %v8972_v34 }
0x39cb   : > { %7466 = vmatprep.subr.bf16.mxu1 %v8472_v0 }
0x39f6   : > { %v5520_v16 = vpop.permute.xlu0 %5519 }
0x39f7   : > { %v9890_v5 = vadd.f32 %v5520_v16, %v5512_v46 }
0x39f9   : > { %5535 = vrot.lane.b32.xlu0 %v9890_v5, %s8477_s27 }
0x3a6b   : > { %v5536_v32 = vpop.permute.xlu0 %5535 }
0x3a6c   : > { %6168 = vst.msk [vmem:[%s802_s12] sm:$0x1] %vm6165_vm8, %v5536_v32  ;;  %7261 = vmatmul.mubr.msk.f32.vlgmr.msra.gmra.mrb[34].mxu1 %vm1055_vm6, %v5536_v32 }
0x3a6d   : > { %7267 = vmatprep.mubr.msk.f32.mxu1 %vm8474_vm0, %v8473_v1 }
0x3a98   : > { %v7236_v34 = vpop.f32.mrb[32].mxu1 }
0x3a99   : > { %v5406_v36 = vpop.f32.mrb[33].mxu1  ;;  %v5416_v44 = vsub.f32 1.0, %v7236_v34 }
0x3a9a   : > { %5421 = vrot.lane.b32.xlu0 %v5406_v36, %s8478_s8  ;;  %v5415_v14 = vsub.f32 1.0, %v5406_v36 }
0x3a9b   : > { %v5418_v38 = vmul.f32 %v5416_v44, %v9769_v17 }
0x3a9c   : > { %v5417_v11 = vmul.f32 %v5415_v14, %v9771_v51 }
0x3a9e   : > { %5423 = vrot.lane.b32.xlu0 %v7236_v34, %s8478_s8 }
0x3b0c   : > { %v5422_v52 = vpop.permute.xlu0 %5421 }
0x3b0d   : > { %v9904_v15 = vadd.f32 %v5422_v52, %v5417_v11 }
0x3b0f   : > { %v5659_v3 = vmul.f32 %v9904_v15, %v9904_v15 }
0x3b10   : > { %v5424_v63 = vpop.permute.xlu0 %5423 }
0x3b11   : > { %v9909_v28 = vadd.f32 %v5424_v63, %v5418_v38  ;;  %v5661_v9 = vsel %vm1181_vm5, %v5659_v3, 0.0 }
0x3b12   : > { %5662 = vadd.xlane.f32.xlu1 %v5661_v9 }
0x3b13   : > { %v7471_v30 = vpack.c.bf16 %v9909_v28, %v9904_v15  ;;  %v5660_v51 = vmul.f32 %v9909_v28, %v9909_v28 }
0x3b15   : > { %7472 = vmatpush3.bf16.msra.mxu0 %v7471_v30  ;;  %v5664_v50 = vsel %vm1181_vm5, %v5660_v51, 0.0 }
0x3b16   : > { %5665 = vadd.xlane.f32.xlu0 %v5664_v50 }
0x3b3f   : > { %v5605_v17 = vpop.f32.mrb[34].mxu1 }
0x3b40   : > { %v5606_v2 = vadd.f32 %v9784_v58, %v5605_v17  ;;  %v7262_v24 = vpop.f32.mrb[35].mxu1 }
0x3b42   : > { %v5619_v39 = vand.u32 2147483647, %v5606_v2  ;;  %7954 = vtanh.f32 %v5606_v2  ;;  %v5654_v43 = vrot.slane %v5606_v2, 7  ;;  %v5616_v61 = vmax.f32 %v5606_v2, 0.0 }
0x3b43   : > { %vm5617_vm9 = vcmp.ne.f32.partialorder %v5606_v2, %v5606_v2  ;;  %v6715_v57 = vmul.f32 -1.442695, %v5606_v2 }
0x3b44   : > { %v5620_v7 = vsub.f32 0.0, %v5619_v39 }
0x3b46   : > { %v5621_v12 = vmul.f32 1.442695, %v5620_v7 }
0x3b48   : > { %7956 = vpow2.f32 %v5621_v12 }
0x3b4c   : > { %v9918_v42 = vpop.eup %7954 }
0x3b4d   : > { %v5635_v59 = vrot.slane %v9918_v42, 7 }
0x3b4f   : > { %5636 = vrot.lane.b32.xlu0 %v5635_v59, %s8478_s8 }
0x3b52   : > { %v7957_v48 = vpop.eup %7956 }
0x3b53   : > { %5655 = vrot.lane.b32.xlu0 %v5654_v43, %s8481_s17  ;;  %v5623_v55 = vadd.f32 1.0, %v7957_v48  ;;  %v5626_v54 = vmul.f32 -0.5, %v7957_v48  ;;  %v5629_v40 = vand.u32 2147483647, %v7957_v48 }
0x3b55   : > { %7958 = vlog2.f32 %v5623_v55  ;;  %v5627_v58 = vadd.f32 1.0, %v5626_v54  ;;  %vm5630_vm6 = vcmp.lt.f32.partialorder %v5629_v40, 0.0004427343 }
0x3b57   : > { %v5628_v27 = vmul.f32 %v7957_v48, %v5627_v58 }
0x3b5f   : > { %v7959_v18 = vpop.eup %7958 }
0x3b60   : > { %v5625_v26 = vmul.f32 0.6931472, %v7959_v18 }
0x3b62   : > { %v5631_v33 = vsel %vm5630_vm6, %v5628_v27, %v5625_v26 }
0x3b63   : > { %v5632_v4 = vadd.f32 %v5631_v33, %v5616_v61 }
0x3b65   : > { %v5633_v37 = vsel %vm5617_vm9, %v5606_v2, %v5632_v4 }
0x3b66   : > { %v5647_v23 = vrot.slane %v5633_v37, 7 }
0x3b68   : > { %5648 = vrot.lane.b32.xlu1 %v5647_v23, %s8480_s13 }
0x3b9f   : > { %v5663_v41 = vpop.xlane.xlu1 %5662 }
0x3ba0   : > { %v5667_v45 = vmax.f32 %v5663_v41, 1e-16 }
0x3ba2   : > { %7960 = vrsqrt.f32 %v5667_v45 }
0x3ba3   : > { %v5666_v8 = vpop.xlane.xlu0 %5665 }
0x3ba4   : > { %v5668_v6 = vmax.f32 %v5666_v8, 1e-16 }
0x3ba6   : > { %7962 = vrsqrt.f32 %v5668_v6 }
0x3ba7   : > { %7964 = vpow2.f32 %v6715_v57 }
0x3bac   : > { %v7961_v21 = vpop.eup %7960 }
0x3bad   : > { %v5671_v49 = vmul.f32 %v7961_v21, %v9904_v15 }
0x3bb0   : > { %v7963_v29 = vpop.eup %7962 }
0x3bb1   : > { %v5672_v20 = vmul.f32 %v7963_v29, %v9909_v28  ;;  %v7965_v34 = vpop.eup %7964 }
0x3bb2   : > { %v5613_v14 = vadd.f32 1.0, %v7965_v34 }
0x3bb3   : > { %v7467_v56 = vpack.c.bf16 %v5672_v20, %v5671_v49 }
0x3bb4   : > { %7966 = vrcp.f32 %v5613_v14 }
0x3bb5   : > { %7469 = vmatpush3.bf16.xpose.msk.msra.mxu1 %vm9008_vm7, %v7467_v56 }
0x3bb6   : > { %7473 = vmatprep.subr.bf16.mxu1 %v8472_v0 }
0x3bbe   : > { %v9942_v44 = vpop.eup %7966 }
0x3bbf   : > { %v5641_v11 = vrot.slane %v9942_v44, 7 }
0x3bc1   : > { %v5637_v22 = vpop.permute.xlu0 %5636 }
0x3bc2   : > { %v5639_v35 = vsel %vm1158_vm10, %v9918_v42, %v5637_v22 }
0x3bc3   : > { %v5673_v10 = vmul.f32 %v5639_v35, %v5639_v35  ;;  %7268 = vmatmul.mubr.msk.f32.vlgmr.msra.gmra.mrb[36].mxu1 %vm1181_vm5, %v5639_v35 }
0x3bc4   : > { %7294 = vmatprep.mubr.msk.f32.mxu1 %vm8474_vm0, %v8473_v1 }
0x3bc5   : > { %v5674_v62 = vsel %vm1195_vm11, %v5673_v10, 0.0  ;;  %v5656_v32 = vpop.permute.xlu0 %5655 }
0x3bc6   : > { %5675 = vadd.xlane.f32.xlu0 %v5674_v62  ;;  %v5658_v36 = vsel %vm1158_vm10, %v5606_v2, %v5656_v32 }
0x3bc7   : > { %v5790_v1 = vsel %vm1312_vm12, %v5658_v36, -inf }
0x3bda   : > { %v5649_v46 = vpop.permute.xlu1 %5648 }
0x3bdb   : > { %v9936_v16 = vsel %vm1158_vm10, %v5633_v37, %v5649_v46 }
0x3bdc   : > { %5761 = vperm.xlu1 %7676, %v9936_v16  }
0x3be0   : > { %7677 = vset.pattern.permute.xlu1 %v8483_v60 }
0x3c00   : > { %5791 = vmax.xlane.f32.xlu1 %v5790_v1 }
0x3c11   : > { %5642 = vrot.lane.b32.xlu1 %v5641_v11, %s8480_s13 }
0x3c53   : > { %v5676_v52 = vpop.xlane.xlu0 %5675 }
0x3c54   : > { %v5756_v38 = vmax.f32 %v5676_v52, 1e-16 }
0x3c56   : > { %7968 = vrsqrt.f32 %v5756_v38 }
0x3c5b   : > { %v5762_v30 = vpop.permute.xlu1 %5761 }
0x3c60   : > { %v7969_v60 = vpop.eup %7968 }
0x3c8d   : > { %v5792_v17 = vpop.xlane.xlu1 %5791 }
0x3c8e   : > { %v5793_v2 = vsub.f32 %v5658_v36, %v5792_v17  ;;  %v6070_v17 = vld [vmem:[%s10375_s24 + $0x8] sm:$0xff] }
0x3c90   : > { %v5794_v24 = vmul.f32 1.442695, %v5793_v2 }
0x3c91   : > { %v5643_v58 = vpop.permute.xlu1 %5642 }
0x3c92   : > { %7970 = vpow2.f32 %v5794_v24  ;;  %v5645_v40 = vsel %vm1158_vm10, %v9942_v44, %v5643_v58  ;;  %v6071_v24 = vld [vmem:[%s10375_s24 + $0x10] sm:$0xff] }
0x3c93   : > { %v5782_v18 = vsub.f32 1.0, %v5645_v40 }
0x3c96   : > { %v5752_v3 = vpop.f32.mrb[36].mxu1 }
0x3c97   : > { %v5758_v63 = vmul.f32 %v7969_v60, %v5752_v3  ;;  %v7269_v9 = vpop.f32.mrb[37].mxu1 }
0x3c99   : > { %v5764_v51 = vmul.f32 %v5762_v30, %v5758_v63 }
0x3c9b   : > { %v5765_v50 = vsel %vm1195_vm11, %v5764_v51, -inf }
0x3c9c   : > { %5766 = vmax.xlane.f32.xlu0 %v5765_v50  ;;  %v7971_v39 = vpop.eup %7970 }
0x3cb2   : > { %5797 = vrot.lane.b32.xlu0 %v7971_v39, %s8482_s23  ;;  %s8493_s23 = smov 64  }
0x3d29   : > { %v5767_v7 = vpop.xlane.xlu0 %5766 }
0x3d2a   : > { %v5768_v12 = vsub.f32 %v5764_v51, %v5767_v7 }
0x3d2c   : > { %v5769_v59 = vmul.f32 1.442695, %v5768_v12  ;;  %v6073_v12 = vld [vmem:[%s10375_s24 + $0x20] sm:$0xff] }
0x3d2d   : > { %v5798_v43 = vpop.permute.xlu0 %5797 }
0x3d2e   : > { %7972 = vpow2.f32 %v5769_v59  ;;  %v5800_v48 = vsel %vm1323_vm13, %v5798_v43, 0.0  ;;  %v6074_v59 = vld [vmem:[%s10375_s24 + $0x28] sm:$0xff] }
0x3d2f   : > { %5801 = vadd.xlane.f32.xlu0 %v5800_v48  ;;  %v7480_v43 = vpack.c.bf16 %v6074_v59, %v6073_v12 }
0x3d38   : > { %v7973_v55 = vpop.eup %7972 }
0x3d39   : > { %v5771_v54 = vsel %vm1195_vm11, %v7973_v55, 0.0 }
0x3d3a   : > { %5772 = vadd.xlane.f32.xlu1 %v5771_v54 }
0x3d45   : > { %5778 = vperm.xlu0 %7670, %v5645_v40  }
0x3d49   : > { %7678 = vset.pattern.permute.xlu0 %v8484_v13 }
0x3d4b   : > { %5785 = vperm.xlu1 %7677, %v5782_v18  }
0x3d4f   : > { %7679 = vset.pattern.permute.xlu1 %v8485_v19 }
0x3dbc   : > { %v5802_v26 = vpop.xlane.xlu0 %5801 }
0x3dbd   : > { %7974 = vrcp.f32 %v5802_v26 }
0x3dc4   : > { %v5779_v13 = vpop.permute.xlu0 %5778 }
0x3dc7   : > { %v7975_v27 = vpop.eup %7974  ;;  %v5773_v61 = vpop.xlane.xlu1 %5772 }
0x3dc8   : > { %7976 = vrcp.f32 %v5773_v61  ;;  %v5804_v33 = vmul.f32 %v7975_v27, %v7971_v39  ;;  %v6072_v39 = vld [vmem:[%s10375_s24 + $0x18] sm:$0xff] }
0x3dc9   : > { %7978 = vtanh.f32 %v9890_v5  ;;  %v7477_v7 = vpack.c.bf16 %v6072_v39, %v6071_v24 }
0x3dca   : > { %5827 = vperm.xlu1 %7679, %v5804_v33   ;;  %5822 = vperm.xlu0 %7678, %v5804_v33  }
0x3dcb   : > { %v5786_v37 = vpop.permute.xlu1 %5785 }
0x3dcc   : > { %v5788_v19 = vmul.f32 %v5786_v37, %v9856_v53 }
0x3dce   : > { %7680 = vset.pattern.permute.xlu1 %v8486_v25  ;;  %7681 = vset.pattern.permute.xlu0 %v8487_v31  ;;  %v5652_v25 = vadd.f32 1.0, %v9936_v16 }
0x3dcf   : > { %5833 = vperm.xlu1 %7680, %v5804_v33  }
0x3dd2   : > { %v7977_v4 = vpop.eup %7976 }
0x3dd3   : > { %v5775_v23 = vmul.f32 %v7977_v4, %v7973_v55  ;;  %v7979_v31 = vpop.eup %7978 }
0x3dd5   : > { %v5781_v41 = vmul.f32 %v5779_v13, %v5775_v23 }
0x3dd7   : > { %v5789_v45 = vadd.f32 %v5788_v19, %v5781_v41 }
0x3dd9   : > { %5809 = vrot.lane.b32.xlu1 %v5789_v45, %s8490_s4  ;;  %5806 = vrot.lane.b32.xlu0 %v5789_v45, %s8489_s11 }
0x3ddd   : > { %5816 = vrot.lane.b32.xlu1 %v5789_v45, %s8488_s20  ;;  %5813 = vrot.lane.b32.xlu0 %v5789_v45, %s8480_s13  ;;  %s10377_s13 = sld [smem:[#allocation59_spill]]  ;;  %s6197_s20 = scalar_lea.sflag [#allocation25], %s8893_s6 }
0x3de1   : > { %5843 = vperm.xlu0 %7681, %v5652_v25  }
0x3de3   : > { %s10025_s17 = scalar_lea.hbm %s10377_s13, %s10013_s15 }
0x3de5   : > { %5525 = vrot.lane.b32.xlu0 %v7979_v31, %s8476_s29  ;;  %s9979_s29 = scalar_lea.vmem [#allocation23], %s6622_s2  ;;  %s6277_s2 = sshll.u32 %s822_s22, 4  ;;  %s10027_s2 = int_to_ptr.vmem [resolvable:$true] %s6277_s2 }
0x3de6   : > { %s8226_s11 = scalar_lea.vmem %s10027_s2, 16 }
0x3de7   : > { %p8227_p6 = scmp.ne.s32.totalorder %s10027_s2, %s8226_s11 }
0x3de9   : > { %5929 = vrot.lane.b32.xlu0 %v9942_v44, %s8492_s19  ;;  %p8228_p3 = pnand %p8227_p6, %p10378_p2 }
0x3deb   : > { %p8229_p4 = pneg %p8228_p3 }
0x3ded   : > { %5932 = vrot.lane.b32.xlu0 %v9918_v42, %s8478_s8 }
0x3e49   : > { %v5828_v53 = vpop.permute.xlu1 %5827  ;;  %v5823_v8 = vpop.permute.xlu0 %5822 }
0x3e4a   : > { %v5830_v20 = vmul.f32 %v5828_v53, %v5789_v45 }
0x3e4d   : > { %v5807_v5 = vpop.permute.xlu0 %5806 }
0x3e4e   : > { %v5834_v6 = vpop.permute.xlu1 %5833 }
0x3e51   : > { %v5814_v56 = vpop.permute.xlu0 %5813 }
0x3e52   : > { %v5810_v21 = vpop.permute.xlu1 %5809 }
0x3e53   : > { %v5812_v29 = vsel %vm1336_vm14, %v5807_v5, %v5810_v21 }
0x3e54   : > { %v5825_v49 = vmul.f32 %v5823_v8, %v5812_v29 }
0x3e56   : > { %v5817_v22 = vpop.permute.xlu1 %5816  ;;  %v5831_v10 = vadd.f32 %v5830_v20, %v5825_v49 }
0x3e57   : > { %v5819_v35 = vsel %vm1344_vm15, %v5814_v56, %v5817_v22 }
0x3e58   : > { %v5836_v62 = vmul.f32 %v5834_v6, %v5819_v35 }
0x3e5a   : > { %v5837_v46 = vadd.f32 %v5836_v62, %v5831_v10 }
0x3e5c   : > { %v5838_v16 = vmax.f32 %v5837_v46, 1e-30 }
0x3e5e   : > { %7980 = vlog2.f32 %v5838_v16 }
0x3e60   : > { %v5844_v57 = vpop.permute.xlu0 %5843 }
0x3e64   : > { %v5526_v42 = vpop.permute.xlu0 %5525 }
0x3e65   : > { %v5528_v60 = vmul.f32 %v9872_v47, %v5526_v42  ;;  %v6069_v47 = vld [vmem:[%s10375_s24] sm:$0xff] }
0x3e66   : > { %v7474_v2 = vpack.c.bf16 %v6070_v17, %v6069_v47 }
0x3e68   : > { %v7981_v32 = vpop.eup %7980  ;;  %v5930_v34 = vpop.permute.xlu0 %5929  ;;  %7475 = vmatpush3.bf16.msra.mxu1 %v7474_v2 }
0x3e69   : > { %v5840_v36 = vmul.f32 0.6931472, %v7981_v32  ;;  %7476 = vmatprep.subr.bf16.mxu1 %v8472_v0 }
0x3e6b   : > { %v5846_v14 = vmul.f32 %v5844_v57, %v5840_v36 }
0x3e6c   : > { %v5933_v1 = vpop.permute.xlu0 %5932  ;;  %7478 = vmatpush3.bf16.msra.mxu1 %v7477_v7 }
0x3e6d   : > { %v5847_v44 = vmul.f32 1.442695, %v5846_v14  ;;  %v5935_v11 = vsel %vm1181_vm5, %v5930_v34, %v5933_v1  ;;  %7479 = vmatprep.subr.bf16.mxu1 %v8472_v0 }
0x3e6e   : > { %7277 = vmatprep.subr.msk.mxu0 %vm1158_vm10, %v5935_v11 }
0x3e6f   : > { %7982 = vpow2.f32 %v5847_v44 }
0x3e70   : > { %7481 = vmatpush3.bf16.msra.mxu1 %v7480_v43 }
0x3e79   : > { %v7983_v52 = vpop.eup %7982 }
0x3e7a   : > { %v5849_v38 = vsel %vm1195_vm11, %v7983_v52, 0.0 }
0x3e7b   : > { %5850 = vadd.xlane.f32.xlu1 %v5849_v38 }
0x3e8c   : > { %5530 = vrot.lane.b32.xlu1 %v5528_v60, %s8491_s25 }
0x3f08   : > { %v5851_v3 = vpop.xlane.xlu1 %5850 }
0x3f09   : > { %v5852_v63 = vadd.f32 1e-16, %v5851_v3 }
0x3f0b   : > { %7984 = vrcp.f32 %v5852_v63 }
0x3f0c   : > { %v5531_v9 = vpop.permute.xlu1 %5530 }
0x3f0d   : > { %5533 = vst.msk [vmem:[#allocation2 + $0x8] sm:$0x1] %vm934_vm3, %v5531_v9 }
0x3f15   : > { %v7985_v30 = vpop.eup %7984 }
0x3f16   : > { %v5854_v51 = vmul.f32 %v7985_v30, %v7983_v52 }
0x3f18   : > { %7275 = vmatmul.mubr.msk.f32.vlgmr.msra.gmra.mrb[40].mxu0 %vm1181_vm5, %v5854_v51  ;;  %v5936_v50 = vrot.slane %v5854_v51, 1  ;;  %6171 = vst.msk [vmem:[%s9979_s29] sm:$0x3] %vm1195_vm11, %v5854_v51 }
0x3f19   : > { %7278 = vmatpush3.msk.msra.mxu0 %vm1158_vm10, %v5935_v11 }
0x3f1a   : > { %5938 = vxpose.xlu0.b32.start.end [1/1] (short) (narrow) %v5936_v50, 16 }
0x3f9a   : > { %v5954_v48 = vpop.trf.xlu0 }
0x3f9b   : > { %7279 = vmatprep.mubr.msk.f32.mxu0 %vm1336_vm14, %v5954_v48 }
0x3f9e   : > { %v5955_v55 = vpop.trf.xlu0 }
0x3f9f   : > { %7280 = vmatmul.mubr.msk.f32.vlgmr.msra.gmra.mrb[42].mxu0 %vm1336_vm14, %v5955_v55 }
0x3feb   : > { %v5924_v54 = vpop.f32.mrb[40].mxu0 }
0x3fec   : > { %5928 = vst.msk [vmem:[#allocation2 + $0x8] sm:$0x1] %vm923_vm1, %v5924_v54  ;;  %6172 = vst.msk [vmem:[%s822_s22] sm:$0x1] %vm923_vm1, %v5924_v54  ;;  %v7276_v58 = vpop.f32.mrb[41].mxu0 }
0x3ff3   : > { %v6068_v40 = vld [vmem:[#allocation2 + $0x1] sm:$0xff] }
0x3ff4   : > { %7295 = vmatmul.mubr.msk.f32.vlgmr.msra.gmra.mrb[38].mxu1 %vm941_vm4, %v6068_v40 }
0x4072   : > { %v10010_v0 = vpop.f32.mrb[42].mxu0 }
0x4073   : > { %6062 = vrot.lane.b32.xlu1 %v10010_v0, %s8478_s8  ;;  %v10017_v18 = vpop.f32.mrb[43].mxu0 }
0x4074   : > { %6060 = vrot.lane.b32.xlu0 %v10017_v18, %s8478_s8  ;;  %s8494_s8 = smov [#allocation24]  }
0x4075   : > { %s8230_s4 = sshll.u32 %s8494_s8, 4  ;;  %s8231_s4 = int_to_ptr.vmem [resolvable:$false] %s8230_s4 }
0x4076   : > { %s8232_s25 = scalar_lea.vmem %s8231_s4, 32  ;;  %p8233_p7 = scmp.lt.s32.totalorder %s10027_s2, %s8231_s4 }
0x4077   : > { %6162 = vrot.lane.b32.xlu1 %v5528_v60, %s8493_s23  ;;  %p8234_p0 = scmp.lt.s32.totalorder %s8232_s25, %s8226_s11 }
0x4079   : > { %p8235_p8 = por %p8234_p0, %p8233_p7 }
0x407b   : > { %p8236_p13 = pnand %p8235_p8, %p8229_p4 }
0x407d   : > { %8239 = shalt.err (!%p8236_p13)
}
0x407e   : > { %s8240_s19 = scalar_lea.hbm %s10025_s17, 16  ;;  %s8244_s27 = scalar_lea.hbm %s10377_s13, 64 }
0x407f   : > { %p8241_p10 = scmp.ne.s32.totalorder %s10025_s17, %s8240_s19  ;;  %p8245_p11 = scmp.lt.u32.totalorder %s10025_s17, %s10377_s13 }
0x4080   : > { %p8246_p9 = scmp.lt.u32.totalorder %s8244_s27, %s8240_s19  ;;  %p8248_p6 = scmp.lt.u32.totalorder %s8240_s19, %s10025_s17 }
0x4081   : > { %p8242_p12 = pnand %p8241_p10, %p10378_p2 }
0x4082   : > { %p8247_p1 = por %p8246_p9, %p8245_p11 }
0x4083   : > { %p8243_p5 = pneg %p8242_p12 }
0x4084   : > { %p8249_p3 = por %p8248_p6, %p8247_p1 }
0x4086   : > { %p8250_p4 = pnand %p8249_p3, %p8243_p5 }
0x4088   : > { %8253 = shalt.err (!%p8250_p4)
}
0x4089   : > { %7509 = dma.vmem_to_hbm [thread:$0]  (%p10378_p2), %s10027_s2, 16, %s10025_s17, %s6197_s20   ;;  %v6055_v13 = vsub.f32 1.0, %v10010_v0  ;;  %v6054_v41 = vsub.f32 1.0, %v10017_v18 }
0x408a   : > { %s10379_s4 = sld [smem:[#allocation53_spill]]  ;;  %s6627_s25 = sshll.u32 %s8893_s6, 4 }
0x408b   : > { %s10055_s19 = scalar_lea.vmem [#allocation21], %s6627_s25  ;;  %s10060_s2 = sshll.u32 %s802_s12, 4  ;;  %v6057_v45 = vmul.f32 %v6055_v13, %v9909_v28  ;;  %v6056_v31 = vmul.f32 %v6054_v41, %v9904_v15  ;;  %s10131_s2 = int_to_ptr.vmem [resolvable:$true] %s10060_s2 }
0x408c   : > { %s6248_s17 = sshll.u32 %s10055_s19, 4  ;;  %s6729_s20 = sshll.u32 %s8618_s0, 7  ;;  %s10062_s17 = int_to_ptr.vmem [resolvable:$true] %s6248_s17 }
0x408d   : > { %s790_s10 = scalar_lea.vmem [#allocation17], %s6621_s14  ;;  %s10309_s27 = scalar_lea.vmem [#allocation18], %s8893_s6 }
0x408e   : > { %s6209_s22 = sshll.u32 %s790_s10, 4  ;;  %s6222_s3 = sshll.u32 %s10309_s27, 4  ;;  %s10083_s22 = int_to_ptr.vmem [resolvable:$true] %s6209_s22  ;;  %s10085_s3 = int_to_ptr.vmem [resolvable:$true] %s6222_s3 }
0x408f   : > { %s10380_s8 = sld [smem:[#allocation55_spill]]  ;;  %s10381_s5 = sld [smem:[#allocation54_spill]] }
0x4090   : > { %v6723_v26 = vld [vmem:[%s10379_s4] ss:$0 sm:$0xff]  ;;  %s6174_s23 = scalar_lea.sflag [#allocation5], %s8893_s6  ;;  %s8254_s11 = scalar_lea.vmem %s10083_s22, 128 }
0x4091   : > { %p8255_p7 = scmp.ne.s32.totalorder %s10083_s22, %s8254_s11 }
0x4093   : > { %p8256_p0 = pnand %p8255_p7, %p10378_p2 }
0x4095   : > { %s10076_s12 = scalar_lea.hbm %s10380_s8, %s10013_s15  ;;  %s10081_s7 = scalar_lea.hbm %s10381_s5, %s6729_s20 }
0x4096   : > { %p8257_p8 = pneg %p8256_p0  ;;  %s8495_s20 = smov [#allocation17]  }
0x4097   : > { %s8258_s4 = sshll.u32 %s8495_s20, 4  ;;  %s8259_s4 = int_to_ptr.vmem [resolvable:$false] %s8258_s4 }
0x4098   : > { %s8260_s25 = scalar_lea.vmem %s8259_s4, 256  ;;  %p8261_p13 = scmp.lt.s32.totalorder %s10083_s22, %s8259_s4 }
0x4099   : > { %p8262_p10 = scmp.lt.s32.totalorder %s8260_s25, %s8254_s11 }
0x409b   : > { %p8263_p12 = por %p8262_p10, %p8261_p13 }
0x409d   : > { %p8264_p5 = pnand %p8263_p12, %p8257_p8 }
0x40c7   : > { %v6151_v27 = vpop.f32.mrb[38].mxu1 }
0x40c8   : > { %v6152_v61 = vadd.f32 %v6723_v26, %v6151_v27  ;;  %v7296_v33 = vpop.f32.mrb[39].mxu1 }
0x40ca   : > { %v6725_v4 = vmul.f32 -1.442695, %v6152_v61 }
0x40cc   : > { %7986 = vpow2.f32 %v6725_v4 }
0x40d6   : > { %v7987_v37 = vpop.eup %7986 }
0x40d7   : > { %v6158_v23 = vadd.f32 1.0, %v7987_v37 }
0x40d9   : > { %7988 = vrcp.f32 %v6158_v23 }
0x40e3   : > { %v7989_v19 = vpop.eup %7988 }
0x40e4   : > { %6161 = vst.msk [vmem:[%s790_s10] sm:$0xff] %vm837_vm2, %v7989_v19 }
0x40e5   : > { %v6063_v25 = vpop.permute.xlu1 %6062 }
0x40e6   : > { %8267 = shalt.err (!%p8264_p5)
}
0x40e7   : > { %s8268_s10 = scalar_lea.hbm %s10081_s7, 128  ;;  %s8272_s20 = scalar_lea.hbm %s10381_s5, 512 }
0x40e8   : > { %p8269_p11 = scmp.ne.s32.totalorder %s10081_s7, %s8268_s10  ;;  %p8273_p6 = scmp.lt.u32.totalorder %s10081_s7, %s10381_s5 }
0x40e9   : > { %p8274_p3 = scmp.lt.u32.totalorder %s8272_s20, %s8268_s10  ;;  %p8276_p7 = scmp.lt.u32.totalorder %s8268_s10, %s10081_s7 }
0x40ea   : > { %p8270_p9 = pnand %p8269_p11, %p10378_p2 }
0x40eb   : > { %p8275_p4 = por %p8274_p3, %p8273_p6 }
0x40ec   : > { %p8271_p1 = pneg %p8270_p9 }
0x40ed   : > { %p8277_p0 = por %p8276_p7, %p8275_p4 }
0x40ef   : > { %p8278_p8 = pnand %p8277_p0, %p8271_p1 }
0x40f1   : > { %8281 = shalt.err (!%p8278_p8)
}
0x40f2   : > { %7504 = dma.vmem_to_hbm [thread:$0]  (%p10378_p2), %s10083_s22, 128, %s10081_s7, %s6174_s23   ;;  %v6067_v15 = vadd.f32 %v6063_v25, %v6057_v45  ;;  %v6061_v28 = vpop.permute.xlu0 %6060  ;;  %v6163_v8 = vpop.permute.xlu1 %6162 }
0x40f3   : > { %s6734_s9 = sshll.u32 %s8618_s0, 5  ;;  %s6264_s27 = sshll.u32 %s9979_s29, 4  ;;  %v6066_v53 = vadd.f32 %v6061_v28, %v6056_v31  ;;  %s10140_s27 = int_to_ptr.vmem [resolvable:$true] %s6264_s27 }
0x40f4   : > { %s10382_s14 = sshll.u32 %s8618_s0, 8  ;;  %s10383_s10 = sld [smem:[#allocation57_spill]]  ;;  %6170 = vst.msk [vmem:[%s10055_s19 + $0x8] sm:$0xff] %vm1181_vm5, %v6067_v15 }
0x40f5   : > { %s10384_s13 = sld [smem:[#allocation56_spill]]  ;;  %6169 = vst.msk [vmem:[%s10055_s19] sm:$0xff] %vm1181_vm5, %v6066_v53  ;;  %s10385_s22 = sld [smem:[#allocation58_spill]] }
0x40f6   : > { %s6187_s11 = scalar_lea.sflag [#allocation22], %s8906_s1  ;;  %s8282_s5 = scalar_lea.vmem %s10062_s17, 256 }
0x40f7   : > { %p8283_p13 = scmp.ne.s32.totalorder %s10062_s17, %s8282_s5 }
0x40f9   : > { %p8284_p10 = pnand %p8283_p13, %p10378_p2 }
0x40fa   : > { %s10120_s20 = scalar_lea.hbm %s10383_s10, %s10382_s14  ;;  %s10386_s14 = scalar_lea.vmem [#allocation18], %s8893_s6 }
0x40fb   : > { %s10128_s7 = scalar_lea.hbm %s10384_s13, %s10013_s15  ;;  %s10138_s23 = scalar_lea.hbm %s10385_s22, %s6734_s9  ;;  %6166 = vst.msk [vmem:[%s10386_s14] sm:$0x1] %vm6165_vm8, %v6163_v8 }
0x40fc   : > { %p8285_p12 = pneg %p8284_p10  ;;  %s8496_s15 = smov [#allocation21]  }
0x40fd   : > { %s8286_s25 = sshll.u32 %s8496_s15, 4  ;;  %s8287_s25 = int_to_ptr.vmem [resolvable:$false] %s8286_s25 }
0x40fe   : > { %s8288_s19 = scalar_lea.vmem %s8287_s25, 512  ;;  %p8289_p5 = scmp.lt.s32.totalorder %s10062_s17, %s8287_s25 }
0x40ff   : > { %p8290_p11 = scmp.lt.s32.totalorder %s8288_s19, %s8282_s5 }
0x4101   : > { %p8291_p9 = por %p8290_p11, %p8289_p5 }
0x4103   : > { %p8292_p1 = pnand %p8291_p9, %p8285_p12 }
0x4105   : > { %8295 = shalt.err (!%p8292_p1)
}
0x4106   : > { %s8296_s6 = scalar_lea.hbm %s10120_s20, 256  ;;  %s8300_s29 = scalar_lea.hbm %s10383_s10, 1024 }
0x4107   : > { %p8297_p6 = scmp.ne.s32.totalorder %s10120_s20, %s8296_s6  ;;  %p8301_p7 = scmp.lt.u32.totalorder %s10120_s20, %s10383_s10 }
0x4108   : > { %p8302_p0 = scmp.lt.u32.totalorder %s8300_s29, %s8296_s6  ;;  %p8304_p13 = scmp.lt.u32.totalorder %s8296_s6, %s10120_s20 }
0x4109   : > { %p8298_p3 = pnand %p8297_p6, %p10378_p2 }
0x410a   : > { %p8303_p8 = por %p8302_p0, %p8301_p7 }
0x410b   : > { %p8299_p4 = pneg %p8298_p3 }
0x410c   : > { %p8305_p10 = por %p8304_p13, %p8303_p8 }
0x410e   : > { %p8306_p12 = pnand %p8305_p10, %p8299_p4 }
0x4110   : > { %8309 = shalt.err (!%p8306_p12)
}
0x4111   : > { %s8497_s5 = smov 128   ;;  %s8498_s15 = smov 8  }
0x4112   : > { %7507 = dma.vmem_to_hbm [thread:$0]  (%p10378_p2), %s10062_s17, 256, %s10120_s20, %s6187_s11, %s8497_s5, %s8497_s5, %s8498_s15  }
0x4113   : > { %s6179_s25 = scalar_lea.sflag [#allocation19], %s8906_s1  ;;  %s8310_s19 = scalar_lea.vmem %s10085_s3, 16 }
0x4114   : > { %p8311_p5 = scmp.ne.s32.totalorder %s10085_s3, %s8310_s19  ;;  %s8499_s6 = smov [#allocation18]  }
0x4115   : > { %s8314_s9 = sshll.u32 %s8499_s6, 4  ;;  %s8315_s9 = int_to_ptr.vmem [resolvable:$false] %s8314_s9 }
0x4116   : > { %p8312_p11 = pnand %p8311_p5, %p10378_p2  ;;  %s8316_s4 = scalar_lea.vmem %s8315_s9, 32 }
0x4117   : > { %p8317_p1 = scmp.lt.s32.totalorder %s10085_s3, %s8315_s9  ;;  %p8318_p6 = scmp.lt.s32.totalorder %s8316_s4, %s8310_s19 }
0x4118   : > { %p8313_p9 = pneg %p8312_p11 }
0x4119   : > { %p8319_p3 = por %p8318_p6, %p8317_p1 }
0x411b   : > { %p8320_p4 = pnand %p8319_p3, %p8313_p9 }
0x411d   : > { %8323 = shalt.err (!%p8320_p4)
}
0x411e   : > { %s8324_s17 = scalar_lea.hbm %s10076_s12, 16  ;;  %s8328_s0 = scalar_lea.hbm %s10380_s8, 64 }
0x411f   : > { %p8325_p7 = scmp.ne.s32.totalorder %s10076_s12, %s8324_s17  ;;  %p8329_p13 = scmp.lt.u32.totalorder %s10076_s12, %s10380_s8 }
0x4120   : > { %p8330_p10 = scmp.lt.u32.totalorder %s8328_s0, %s8324_s17  ;;  %p8332_p5 = scmp.lt.u32.totalorder %s8324_s17, %s10076_s12 }
0x4121   : > { %p8326_p0 = pnand %p8325_p7, %p10378_p2 }
0x4122   : > { %p8331_p12 = por %p8330_p10, %p8329_p13 }
0x4123   : > { %p8327_p8 = pneg %p8326_p0 }
0x4124   : > { %p8333_p11 = por %p8332_p5, %p8331_p12 }
0x4126   : > { %p8334_p9 = pnand %p8333_p11, %p8327_p8 }
0x4128   : > { %8337 = shalt.err (!%p8334_p9)
}
0x4129   : > { %7505 = dma.vmem_to_hbm [thread:$0]  (%p10378_p2), %s10085_s3, 16, %s10076_s12, %s6179_s25  }
0x412a   : > { %s8338_s15 = scalar_lea.vmem %s10131_s2, 16  ;;  %s8500_s19 = smov [#allocation20]  }
0x412b   : > { %p8339_p1 = scmp.ne.s32.totalorder %s10131_s2, %s8338_s15  ;;  %s8342_s6 = sshll.u32 %s8500_s19, 4  ;;  %s8343_s6 = int_to_ptr.vmem [resolvable:$false] %s8342_s6 }
0x412c   : > { %s8344_s9 = scalar_lea.vmem %s8343_s6, 32  ;;  %p8345_p4 = scmp.lt.s32.totalorder %s10131_s2, %s8343_s6 }
0x412d   : > { %p8340_p6 = pnand %p8339_p1, %p10378_p2  ;;  %p8346_p7 = scmp.lt.s32.totalorder %s8344_s9, %s8338_s15 }
0x412f   : > { %p8341_p3 = pneg %p8340_p6  ;;  %p8347_p0 = por %p8346_p7, %p8345_p4 }
0x4131   : > { %p8348_p8 = pnand %p8347_p0, %p8341_p3 }
0x4133   : > { %8351 = shalt.err (!%p8348_p8)
}
0x4134   : > { %s8352_s3 = scalar_lea.hbm %s10128_s7, 16  ;;  %s8356_s17 = scalar_lea.hbm %s10384_s13, 64 }
0x4135   : > { %p8353_p13 = scmp.ne.s32.totalorder %s10128_s7, %s8352_s3  ;;  %p8357_p5 = scmp.lt.u32.totalorder %s10128_s7, %s10384_s13 }
0x4136   : > { %p8358_p11 = scmp.lt.u32.totalorder %s8356_s17, %s8352_s3  ;;  %p8360_p1 = scmp.lt.u32.totalorder %s8352_s3, %s10128_s7 }
0x4137   : > { %p8354_p10 = pnand %p8353_p13, %p10378_p2 }
0x4138   : > { %p8359_p9 = por %p8358_p11, %p8357_p5 }
0x4139   : > { %p8355_p12 = pneg %p8354_p10 }
0x413a   : > { %p8361_p6 = por %p8360_p1, %p8359_p9 }
0x413c   : > { %p8362_p3 = pnand %p8361_p6, %p8355_p12 }
0x413e   : > { %8365 = shalt.err (!%p8362_p3)
}
0x413f   : > { %7506 = dma.vmem_to_hbm [thread:$0]  (%p10378_p2), %s10131_s2, 16, %s10128_s7, %s6179_s25  }
0x4140   : > { %s8366_s0 = scalar_lea.vmem %s10140_s27, 32  ;;  %s8501_s14 = smov [#allocation23]  }
0x4141   : > { %p8367_p4 = scmp.ne.s32.totalorder %s10140_s27, %s8366_s0  ;;  %s8370_s5 = sshll.u32 %s8501_s14, 4  ;;  %s8371_s5 = int_to_ptr.vmem [resolvable:$false] %s8370_s5 }
0x4142   : > { %s8372_s15 = scalar_lea.vmem %s8371_s5, 64  ;;  %p8373_p8 = scmp.lt.s32.totalorder %s10140_s27, %s8371_s5 }
0x4143   : > { %p8368_p7 = pnand %p8367_p4, %p10378_p2  ;;  %p8374_p13 = scmp.lt.s32.totalorder %s8372_s15, %s8366_s0 }
0x4145   : > { %p8369_p0 = pneg %p8368_p7  ;;  %p8375_p10 = por %p8374_p13, %p8373_p8 }
0x4147   : > { %p8376_p12 = pnand %p8375_p10, %p8369_p0 }
0x4149   : > { %8379 = shalt.err (!%p8376_p12)
}
0x414a   : > { %s8380_s2 = scalar_lea.hbm %s10138_s23, 32  ;;  %s8384_s19 = scalar_lea.hbm %s10385_s22, 128 }
0x414b   : > { %p8381_p5 = scmp.ne.s32.totalorder %s10138_s23, %s8380_s2  ;;  %p8385_p1 = scmp.lt.u32.totalorder %s10138_s23, %s10385_s22 }
0x414c   : > { %p8386_p6 = scmp.lt.u32.totalorder %s8384_s19, %s8380_s2  ;;  %p8388_p4 = scmp.lt.u32.totalorder %s8380_s2, %s10138_s23 }
0x414d   : > { %p8382_p11 = pnand %p8381_p5, %p10378_p2 }
0x414e   : > { %p8387_p3 = por %p8386_p6, %p8385_p1 }
0x414f   : > { %p8383_p9 = pneg %p8382_p11 }
0x4150   : > { %p8389_p7 = por %p8388_p4, %p8387_p3 }
0x4152   : > { %p8390_p0 = pnand %p8389_p7, %p8383_p9 }
0x4154   : > { %8393 = shalt.err (!%p8390_p0)
}
0x4155   : > { %7508 = dma.vmem_to_hbm [thread:$0]  (%p10378_p2), %s10140_s27, 32, %s10138_s23, %s6187_s11  }
0x4156 PF: > { %s10387_s3 = sld [smem:[#allocation35_spill]]  ;;  %s10388_s12 = sld [smem:[#allocation40_spill]] }
0x4157   : > { %p7568_p8 = scmp.ge.s32.totalorder %s8460_s30, 2 }
0x415c   : > { %s6289_s4 = sand.u32 1, %s10387_s3   ;;  %p10389_p13 = scmp.ne.s32.totalorder %s10388_s12, 0 }
0x415d   : > { %s6290_s17 = scalar_lea.sflag [#allocation5], %s6289_s4 }
0x415e   : > { %p7543_p10 = pnand %p7568_p8, %p10389_p13 }
0x4160   : > { %8431 = dma.done.wait (!%p7543_p10), %s6290_s17, 128  }
0x4161   : > { %8433 = vsyncadd (!%p7543_p10), %s6290_s17, 4294967168  ;;  %s10390_s20 = sadd.s32 4294967294, %s8460_s30  }
0x4162   : > { %s6298_s29 = sand.u32 1, %s10390_s20  }
0x4163   : > { %s6299_s16 = scalar_lea.sflag [#allocation19], %s6298_s29 }
0x4164   : > { %8435 = dma.done.wait (!%p7543_p10), %s6299_s16, 32  }
0x4165   : > { %8437 = vsyncadd (!%p7543_p10), %s6299_s16, 4294967264  ;;  %s6315_s1 = scalar_lea.sflag [#allocation22], %s6298_s29 }
0x4166   : > { %8439 = dma.done.wait (!%p7543_p10), %s6315_s1, 288  }
0x4167   : > { %8441 = vsyncadd (!%p7543_p10), %s6315_s1, 4294967008  ;;  %s6333_s27 = scalar_lea.sflag [#allocation25], %s6289_s4 }
0x4168   : > { %8443 = dma.done.wait (!%p7543_p10), %s6333_s27, 16  }
0x4169   : > { %8445 = vsyncadd (!%p7543_p10), %s6333_s27, 4294967280  ;;  %s10391_s30 = sld [smem:[#allocation37_spill]]  ;;  %s10392_s23 = sld [smem:[#allocation36_spill]] }
0x416a   : > { %s10393_s29 = sld [smem:[#allocation38_spill]]  ;;  %s10394_s27 = smov %s8452_s28 }
0x416f   : > { %p49_p2 = scmp.ge.s32.totalorder %s10391_s30, 6   ;;  %s10395_s28 = smov %s10392_s23 }
0x4171   :  { %51 = sbr.rel (!%p49_p2) target bundleno = 37 (0x25), region = 261 }
0x4178   :  { %6337 = vsyncpa [#allocation4], 1 }
0x4179   :  { %6339 = vsyncpa [#allocation4 + $0x1], 1 }
0x417a   :  { %6340 = vsyncpa [#allocation7], 1 }
0x417b   :  { %6342 = vsyncpa [#allocation7 + $0x1], 1 }
0x417c   :  { %6343 = vsyncpa [#allocation10], 1 }
0x417d   :  { %6345 = vsyncpa [#allocation10 + $0x1], 1 }
0x417e   :  { %6346 = vsyncpa [#allocation13], 1 }
0x417f   :  { %6347 = vsyncpa [#allocation16], 1 }
0x4180   :  { %6348 = vsyncpa [#allocation5], 1 }
0x4181   :  { %6350 = vsyncpa [#allocation5 + $0x1], 1 }
0x4182   :  { %6351 = vsyncpa [#allocation19], 1 }
0x4183   :  { %6353 = vsyncpa [#allocation19 + $0x1], 1 }
0x4184   :  { %6354 = vsyncpa [#allocation22], 1 }
0x4185   :  { %6356 = vsyncpa [#allocation22 + $0x1], 1 }
0x4186   :  { %6357 = vsyncpa [#allocation25], 1 }
0x4187   :  { %6359 = vsyncpa [#allocation25 + $0x1], 1 }

</bundles_post_ra>
